<compile_context>
chip_gen: v6e
topology: v6e:2x2x1
jax: 0.10.0
libtpu: 0.0.40
codegen_flags: <defaults>
</compile_context>

<pallas_src>
import functools
from typing import NamedTuple

import numpy as np

import jax
import jax.numpy as jnp
from jax.experimental import pallas as pl
from jax.experimental.pallas import tpu as pltpu

BF16 = jnp.bfloat16
F32 = jnp.float32

_VMEM_LIMIT = 32 * 1024 * 1024   # plenty for this config; safe on v5e/v6e/v7x


class Config(NamedTuple):
    n_in: int
    n_embd: int
    n_embd_ks: int
    arch: tuple
    scale_factor: int
    expansion_factor: int


def _full_spec(shape):
    nd = len(shape)
    return pl.BlockSpec(tuple(shape), lambda i, _nd=nd: (0,) * _nd)


# --------------------------------------------------------------------------
# Fused kernel: the whole backbone in one pallas_call.
#
# Activation layout ("slab"): (C, B*(T_l + 2*PW)) with PW zero lanes on each
# side of every batch segment, so convs never leak across batch boundaries.
# The per-level mask slab is zero on pad lanes (and masked time steps), which
# keeps the slab self-repairing layer to layer.
# --------------------------------------------------------------------------
def _make_fused_kernel(*, B, PW, Ke, stride, n_embd, n_embd_layers, n_stem,
                       n_branch, T_levels):
    n_masks = 1 + n_branch
    n_sel = n_branch if stride > 1 else 0
    w_per_branch = 6 if stride > 1 else 4
    n_weights = 2 * n_embd_layers + 4 * n_stem + w_per_branch * n_branch
    n_inputs = 1 + n_masks + n_sel + n_weights
    n_out = 1 + n_branch

    def kernel(*refs):
        x_ref = refs[0]
        m_refs = refs[1:1 + n_masks]
        sel_refs = refs[1 + n_masks:1 + n_masks + n_sel]
        w_refs = refs[1 + n_masks + n_sel:n_inputs]
        out_refs = refs[n_inputs:n_inputs + n_out]
        xpad, stack = refs[n_inputs + n_out:]
        wi = iter(w_refs)

        def conv_matmul(a, w_ref, K):
            """K-tap stride-1 conv on slab value a:(Cin, Ls) -> (Cout, Ls) f32."""
            C, Ls = a.shape
            h = K // 2
            xpad[0:C, h:h + Ls] = a.astype(BF16)
            if h > 0:
                z = jnp.zeros((C, h), BF16)
                xpad[0:C, 0:h] = z                          # left guard
                xpad[0:C, h + Ls:2 * h + Ls] = z            # right guard
            for j in range(K):                              # K shifted copies
                stack[j * C:(j + 1) * C, 0:Ls] = xpad[0:C, j:j + Ls]
            return jnp.dot(w_ref[...], stack[0:K * C, 0:Ls],
                           preferred_element_type=F32)      # one deep matmul

        def block_s1(a, m):
            """ConvBlock, stride 1."""
            w1 = next(wi); b1 = next(wi); w2 = next(wi); b2 = next(wi)
            h1 = jnp.maximum((conv_matmul(a, w1, 3) + b1[...]) * m, 0.0)
            return jnp.maximum((conv_matmul(h1, w2, 3) + b2[...]) * m + a, 0.0)

        def block_strided(a, m_out, sel_ref):
            """ConvBlock: stride-s conv1 + 1x1 stride-s downsample identity."""
            w1 = next(wi); b1 = next(wi); wd = next(wi); bd = next(wi)
            w2 = next(wi); b2 = next(wi)
            C, Ls_in = a.shape
            S = sel_ref[...]
            Lo = S.shape[1]
            # in-kernel strided tap gather: one 0/1 selection matmul per tap
            xpad[0:C, 0:Ls_in] = a.astype(BF16)
            xpad[0:C, Ls_in:Ls_in + 2] = jnp.zeros((C, 2), BF16)
            taps = [jnp.dot(xpad[0:C, j:j + Ls_in], S,
                            preferred_element_type=F32).astype(BF16)
                    for j in range(3)]
            ident = jnp.dot(wd[...], taps[1], preferred_element_type=F32)
            for j in range(3):
                stack[j * C:(j + 1) * C, 0:Lo] = taps[j]
            acc1 = jnp.dot(w1[...], stack[0:3 * C, 0:Lo],
                           preferred_element_type=F32)
            h1 = jnp.maximum((acc1 + b1[...]) * m_out, 0.0)
            acc2 = conv_matmul(h1, w2, 3)
            # fold conv2 + identity + both biases into one masked relu pass
            return jnp.maximum((acc2 + ident + b2[...] + bd[...]) * m_out, 0.0)

        def write_level(o_ref, a, T):
            """Strip per-batch pads -> lane-dense (B*C, T) output block."""
            seg = T + 2 * PW
            for b in range(B):
                o_ref[b * n_embd:(b + 1) * n_embd, :] = (
                    a[:, b * seg + PW:b * seg + PW + T].astype(o_ref.dtype))

        m0 = m_refs[0][...]
        cur = x_ref[...]
        for _ in range(n_embd_layers):
            w = next(wi); b = next(wi)
            cur = jnp.maximum((conv_matmul(cur, w, Ke) + b[...]) * m0, 0.0)
        for _ in range(n_stem):
            cur = block_s1(cur, m0)
        write_level(out_refs[0], cur, T_levels[0])
        for l in range(n_branch):
            m_l = m_refs[l + 1][...]
            if stride > 1:
                cur = block_strided(cur, m_l, sel_refs[l])
            else:
                cur = block_s1(cur, m_l)
            write_level(out_refs[l + 1], cur, T_levels[l + 1])

    return kernel, n_inputs


# --------------------------------------------------------------------------
# Host glue
# --------------------------------------------------------------------------
def _to_slab(x, PW, dtype):
    B, C, T = x.shape
    xp = jnp.pad(x, ((0, 0), (0, 0), (PW, PW)))
    return jnp.transpose(xp, (1, 0, 2)).reshape(C, B * (T + 2 * PW)).astype(dtype)


def _mask_slab(mask, PW):
    B, _, T = mask.shape
    mp = jnp.pad(mask.astype(F32), ((0, 0), (0, 0), (PW, PW)))
    return jnp.transpose(mp, (1, 0, 2)).reshape(1, B * (T + 2 * PW))


def _sel_matrix(B, T_in, T_out, PW, stride):
    """0/1 matrix S so (slab shifted by j lanes) @ S == stride-s conv tap j,
       laid out on the output-resolution slab (pad columns all zero)."""
    seg_in, seg_out = T_in + 2 * PW, T_out + 2 * PW
    S = np.zeros((B * seg_in, B * seg_out), np.float32)
    for b in range(B):
        for to in range(T_out):
            S[b * seg_in + PW + stride * to - 1, b * seg_out + PW + to] = 1.0
    return jnp.asarray(S, BF16)


def _flatten_weights(params, stride):
    ws = []
    for (w, b) in params["embd"]:
        ws += [w, b]
    for blk in params["stem"]:
        ws += [blk["w1"], blk["b1"], blk["w2"], blk["b2"]]
    for blk in params["branch"]:
        if stride > 1:
            ws += [blk["w1"], blk["b1"], blk["wd"], blk["bd"],
                   blk["w2"], blk["b2"]]
        else:
            ws += [blk["w1"], blk["b1"], blk["w2"], blk["b2"]]
    return ws


@functools.partial(jax.jit, static_argnames=("cfg",))
def conv_backbone_forward(params, x, mask, *, cfg):
    """x: (B, n_in, T) f32, mask: (B, 1, T) {0,1} float.
       Returns (tuple of (B, n_embd, T_l) f32, tuple of (B, 1, T_l) f32)."""
    B, n_in, T0 = x.shape
    assert n_in == cfg.n_in
    PW = max(cfg.n_embd_ks // 2, 1)
    stride = cfg.scale_factor
    n_embd = cfg.n_embd
    width = cfg.n_embd * cfg.expansion_factor
    n_embd_layers, n_stem, n_branch = cfg.arch

    T_levels = [T0]
    for _ in range(n_branch):
        t = T_levels[-1]
        if stride > 1:
            assert t % stride == 0, "T must divide by scale_factor at every level"
            t //= stride
        T_levels.append(t)

    x_slab = _to_slab(x, PW, BF16)
    masks = [mask.astype(F32)]
    for _ in range(n_branch):
        masks.append(masks[-1][:, :, ::stride] if stride > 1 else masks[-1])
    m_slabs = [_mask_slab(m, PW) for m in masks]
    sels = ([_sel_matrix(B, T_levels[l], T_levels[l + 1], PW, stride)
             for l in range(n_branch)] if stride > 1 else [])
    inputs = [x_slab] + m_slabs + sels + _flatten_weights(params, stride)

    kernel, n_inputs = _make_fused_kernel(
        B=B, PW=PW, Ke=cfg.n_embd_ks, stride=stride, n_embd=n_embd,
        n_embd_layers=n_embd_layers, n_stem=n_stem, n_branch=n_branch,
        T_levels=tuple(T_levels))
    assert n_inputs == len(inputs)

    L0 = B * (T0 + 2 * PW)
    cmax = max(n_in, n_embd, width)
    stack_rows = max(cfg.n_embd_ks * max(n_in, n_embd), 3 * width)
    out_shapes = tuple(jax.ShapeDtypeStruct((B * n_embd, T_levels[l]), F32)
                       for l in range(n_branch + 1))

    outs = pl.pallas_call(
        kernel,
        out_shape=out_shapes,
        grid_spec=pltpu.PrefetchScalarGridSpec(
            num_scalar_prefetch=0,
            grid=(1,),
            in_specs=[_full_spec(a.shape) for a in inputs],
            out_specs=[_full_spec(s.shape) for s in out_shapes],
            scratch_shapes=[
                pltpu.VMEM((cmax, L0 + 2 * PW), BF16),   # guard-padded conv input
                pltpu.VMEM((stack_rows, L0), BF16),      # K-tap stacked matmul rhs
            ],
        ),
        compiler_params=pltpu.CompilerParams(
            dimension_semantics=("arbitrary",),
            vmem_limit_bytes=_VMEM_LIMIT,
        ),
    )(*inputs)

    out_feats = tuple(o.reshape(B, n_embd, T_levels[l]) for l, o in enumerate(outs))
    return out_feats, tuple(masks)


# --------------------------------------------------------------------------
# Deterministic parameter init (biases zeroed, matching __init_weights__)
# --------------------------------------------------------------------------
def init_params(key, cfg):
    assert cfg.n_embd_ks % 2 == 1, "kernel size must be odd"
    n_in, n_embd, ks = cfg.n_in, cfg.n_embd, cfg.n_embd_ks
    stride = cfg.scale_factor
    width = n_embd * cfg.expansion_factor
    n_embd_layers, n_stem, n_branch = cfg.arch

    def w_flat(k, cout, cin, ksz):
        scale = (2.0 / (cin * ksz)) ** 0.5
        w = scale * jax.random.normal(k, (cout, cin, ksz), F32)
        # (Cout, K, Cin) tap-major flatten; bf16 operand for the MXU
        return jnp.transpose(w, (0, 2, 1)).reshape(cout, ksz * cin).astype(BF16)

    def bias(cout):   # __init_weights__: conv biases -> 0
        return jnp.zeros((cout, 1), F32)

    keys = iter(jax.random.split(key, 256))
    params = {"embd": [], "stem": [], "branch": []}
    for i in range(n_embd_layers):
        cin = n_in if i == 0 else n_embd
        params["embd"].append((w_flat(next(keys), n_embd, cin, ks), bias(n_embd)))
    for _ in range(n_stem):
        params["stem"].append({
            "w1": w_flat(next(keys), width, n_embd, 3), "b1": bias(width),
            "w2": w_flat(next(keys), n_embd, width, 3), "b2": bias(n_embd),
        })
    for _ in range(n_branch):
        blk = {"w1": w_flat(next(keys), width, n_embd, 3), "b1": bias(width),
               "w2": w_flat(next(keys), n_embd, width, 3), "b2": bias(n_embd)}
        if stride > 1:
            blk["wd"] = w_flat(next(keys), n_embd, n_embd, 1)   # (n_embd, n_embd)
            blk["bd"] = bias(n_embd)
        params["branch"].append(blk)
    return params


# --------------------------------------------------------------------------
# Pure-JAX reference (independent layout; bf16 matmul inputs, f32 carries)
# --------------------------------------------------------------------------
def _ref_masked_conv(x, w_flat, b, mask_out, K, stride=1):
    B, cin, T = x.shape
    cout = w_flat.shape[0]
    pad = K // 2
    w = w_flat.astype(F32).reshape(cout, K, cin)
    xq = x.astype(BF16).astype(F32)
    Tout = T // stride
    xp = jnp.pad(xq, ((0, 0), (0, 0), (pad, pad)))
    acc = jnp.zeros((B, cout, Tout), F32)
    for j in range(K):
        sl = xp[:, :, j: j + stride * (Tout - 1) + 1: stride]
        acc = acc + jnp.einsum("oc,bct->bot", w[:, j], sl)
    return (acc + b[None]) * mask_out


def _ref_forward(params, x, mask, cfg):
    stride = cfg.scale_factor
    ks = cfg.n_embd_ks
    m = mask.astype(F32)
    a = x.astype(F32)
    for (w, b) in params["embd"]:
        a = jnp.maximum(_ref_masked_conv(a, w, b, m, ks), 0.0)

    def block(a, m_in, blk, s):
        m_out = m_in if s == 1 else m_in[:, :, ::s]
        h1 = jnp.maximum(_ref_masked_conv(a, blk["w1"], blk["b1"], m_out, 3, s), 0.0)
        h2 = _ref_masked_conv(h1, blk["w2"], blk["b2"], m_out, 3, 1)
        if s == 1:
            ident = a
        else:
            ident = _ref_masked_conv(a, blk["wd"], blk["bd"], m_out, 1, s)
        return jnp.maximum(h2 + ident, 0.0), m_out

    for blk in params["stem"]:
        a, m = block(a, m, blk, 1)
    feats, masks_out = [a], [m]
    for blk in params["branch"]:
        a, m = block(a, m, blk, stride)
        feats.append(a)
        masks_out.append(m)
    return tuple(feats), tuple(masks_out)


# --------------------------------------------------------------------------
if __name__ == "__main__":
    key = jax.random.PRNGKey(0)
    kx, kp = jax.random.split(key)

    B, C_IN, T = 2, 4, 64           # T must divide by scale_factor**arch[2] = 32
    cfg = Config(n_in=C_IN, n_embd=32, n_embd_ks=3, arch=(2, 2, 5),
                 scale_factor=2, expansion_factor=2)

    x = jax.random.normal(kx, (B, C_IN, T), F32)
    # valid-length mask: batch 0 fully valid, batch 1 has its tail masked out
    lengths = jnp.array([T, 40])
    mask = (jnp.arange(T)[None, None, :] < lengths[:, None, None]).astype(F32)

    params = init_params(kp, cfg)

    feats, masks = conv_backbone_forward(params, x, mask, cfg=cfg)
    jax.block_until_ready(feats)
    jax.block_until_ready(masks)

    expect_T = [T // (cfg.scale_factor ** i) for i in range(cfg.arch[2] + 1)]
    assert len(feats) == cfg.arch[2] + 1 and len(masks) == cfg.arch[2] + 1
    for f, m, t in zip(feats, masks, expect_T):
        assert f.shape == (B, cfg.n_embd, t), f.shape
        assert m.shape == (B, 1, t), m.shape
        assert bool(jnp.all(jnp.isfinite(f)))

    ref_feats, ref_masks = _ref_forward(params, x, mask, cfg)
    for lvl, (f, rf) in enumerate(zip(feats, ref_feats)):
        err = float(jnp.max(jnp.abs(f - rf)))
        assert bool(jnp.allclose(f, rf, atol=2e-2, rtol=2e-2)), (lvl, err)
    for m, rm in zip(masks, ref_masks):
        assert bool(jnp.array_equal(m, rm))

    print("KERNEL_OK")
</pallas_src>

<mosaic_0001>
module attributes {stable_mosaic.version = 11 : i64} {
  func.func @kernel(%arg0: i32, %arg1: memref<4x132xbf16, #tpu.memory_space<vmem>>, %arg2: memref<1x132xf32, #tpu.memory_space<vmem>>, %arg3: memref<1x68xf32, #tpu.memory_space<vmem>>, %arg4: memref<1x36xf32, #tpu.memory_space<vmem>>, %arg5: memref<1x20xf32, #tpu.memory_space<vmem>>, %arg6: memref<1x12xf32, #tpu.memory_space<vmem>>, %arg7: memref<1x8xf32, #tpu.memory_space<vmem>>, %arg8: memref<132x68xbf16, #tpu.memory_space<vmem>>, %arg9: memref<68x36xbf16, #tpu.memory_space<vmem>>, %arg10: memref<36x20xbf16, #tpu.memory_space<vmem>>, %arg11: memref<20x12xbf16, #tpu.memory_space<vmem>>, %arg12: memref<12x8xbf16, #tpu.memory_space<vmem>>, %arg13: memref<32x12xbf16, #tpu.memory_space<vmem>>, %arg14: memref<32x1xf32, #tpu.memory_space<vmem>>, %arg15: memref<32x96xbf16, #tpu.memory_space<vmem>>, %arg16: memref<32x1xf32, #tpu.memory_space<vmem>>, %arg17: memref<64x96xbf16, #tpu.memory_space<vmem>>, %arg18: memref<64x1xf32, #tpu.memory_space<vmem>>, %arg19: memref<32x192xbf16, #tpu.memory_space<vmem>>, %arg20: memref<32x1xf32, #tpu.memory_space<vmem>>, %arg21: memref<64x96xbf16, #tpu.memory_space<vmem>>, %arg22: memref<64x1xf32, #tpu.memory_space<vmem>>, %arg23: memref<32x192xbf16, #tpu.memory_space<vmem>>, %arg24: memref<32x1xf32, #tpu.memory_space<vmem>>, %arg25: memref<64x96xbf16, #tpu.memory_space<vmem>>, %arg26: memref<64x1xf32, #tpu.memory_space<vmem>>, %arg27: memref<32x32xbf16, #tpu.memory_space<vmem>>, %arg28: memref<32x1xf32, #tpu.memory_space<vmem>>, %arg29: memref<32x192xbf16, #tpu.memory_space<vmem>>, %arg30: memref<32x1xf32, #tpu.memory_space<vmem>>, %arg31: memref<64x96xbf16, #tpu.memory_space<vmem>>, %arg32: memref<64x1xf32, #tpu.memory_space<vmem>>, %arg33: memref<32x32xbf16, #tpu.memory_space<vmem>>, %arg34: memref<32x1xf32, #tpu.memory_space<vmem>>, %arg35: memref<32x192xbf16, #tpu.memory_space<vmem>>, %arg36: memref<32x1xf32, #tpu.memory_space<vmem>>, %arg37: memref<64x96xbf16, #tpu.memory_space<vmem>>, %arg38: memref<64x1xf32, #tpu.memory_space<vmem>>, %arg39: memref<32x32xbf16, #tpu.memory_space<vmem>>, %arg40: memref<32x1xf32, #tpu.memory_space<vmem>>, %arg41: memref<32x192xbf16, #tpu.memory_space<vmem>>, %arg42: memref<32x1xf32, #tpu.memory_space<vmem>>, %arg43: memref<64x96xbf16, #tpu.memory_space<vmem>>, %arg44: memref<64x1xf32, #tpu.memory_space<vmem>>, %arg45: memref<32x32xbf16, #tpu.memory_space<vmem>>, %arg46: memref<32x1xf32, #tpu.memory_space<vmem>>, %arg47: memref<32x192xbf16, #tpu.memory_space<vmem>>, %arg48: memref<32x1xf32, #tpu.memory_space<vmem>>, %arg49: memref<64x96xbf16, #tpu.memory_space<vmem>>, %arg50: memref<64x1xf32, #tpu.memory_space<vmem>>, %arg51: memref<32x32xbf16, #tpu.memory_space<vmem>>, %arg52: memref<32x1xf32, #tpu.memory_space<vmem>>, %arg53: memref<32x192xbf16, #tpu.memory_space<vmem>>, %arg54: memref<32x1xf32, #tpu.memory_space<vmem>>, %arg55: memref<64x64xf32, #tpu.memory_space<vmem>>, %arg56: memref<64x32xf32, #tpu.memory_space<vmem>>, %arg57: memref<64x16xf32, #tpu.memory_space<vmem>>, %arg58: memref<64x8xf32, #tpu.memory_space<vmem>>, %arg59: memref<64x4xf32, #tpu.memory_space<vmem>>, %arg60: memref<64x2xf32, #tpu.memory_space<vmem>>, %arg61: memref<64x134xbf16, #tpu.memory_space<vmem>>, %arg62: memref<192x132xbf16, #tpu.memory_space<vmem>>) attributes {dimension_semantics = [#tpu.dimension_semantics<arbitrary>], iteration_bounds = array<i64: 1>, scalar_prefetch = 0 : i64, scratch_operands = 2 : i64, tpu.core_type = #tpu.core_type<tc>, window_params = [{pipeline_mode = #tpu.pipeline_mode<synchronous>, transform_indices = @transform_0, window_bounds = array<i64: 4, 132>}, {pipeline_mode = #tpu.pipeline_mode<synchronous>, transform_indices = @transform_1, window_bounds = array<i64: 1, 132>}, {pipeline_mode = #tpu.pipeline_mode<synchronous>, transform_indices = @transform_2, window_bounds = array<i64: 1, 68>}, {pipeline_mode = #tpu.pipeline_mode<synchronous>, transform_indices = @transform_3, window_bounds = array<i64: 1, 36>}, {pipeline_mode = #tpu.pipeline_mode<synchronous>, transform_indices = @transform_4, window_bounds = array<i64: 1, 20>}, {pipeline_mode = #tpu.pipeline_mode<synchronous>, transform_indices = @transform_5, window_bounds = array<i64: 1, 12>}, {pipeline_mode = #tpu.pipeline_mode<synchronous>, transform_indices = @transform_6, window_bounds = array<i64: 1, 8>}, {pipeline_mode = #tpu.pipeline_mode<synchronous>, transform_indices = @transform_7, window_bounds = array<i64: 132, 68>}, {pipeline_mode = #tpu.pipeline_mode<synchronous>, transform_indices = @transform_8, window_bounds = array<i64: 68, 36>}, {pipeline_mode = #tpu.pipeline_mode<synchronous>, transform_indices = @transform_9, window_bounds = array<i64: 36, 20>}, {pipeline_mode = #tpu.pipeline_mode<synchronous>, transform_indices = @transform_10, window_bounds = array<i64: 20, 12>}, {pipeline_mode = #tpu.pipeline_mode<synchronous>, transform_indices = @transform_11, window_bounds = array<i64: 12, 8>}, {pipeline_mode = #tpu.pipeline_mode<synchronous>, transform_indices = @transform_12, window_bounds = array<i64: 32, 12>}, {pipeline_mode = #tpu.pipeline_mode<synchronous>, transform_indices = @transform_13, window_bounds = array<i64: 32, 1>}, {pipeline_mode = #tpu.pipeline_mode<synchronous>, transform_indices = @transform_14, window_bounds = array<i64: 32, 96>}, {pipeline_mode = #tpu.pipeline_mode<synchronous>, transform_indices = @transform_15, window_bounds = array<i64: 32, 1>}, {pipeline_mode = #tpu.pipeline_mode<synchronous>, transform_indices = @transform_16, window_bounds = array<i64: 64, 96>}, {pipeline_mode = #tpu.pipeline_mode<synchronous>, transform_indices = @transform_17, window_bounds = array<i64: 64, 1>}, {pipeline_mode = #tpu.pipeline_mode<synchronous>, transform_indices = @transform_18, window_bounds = array<i64: 32, 192>}, {pipeline_mode = #tpu.pipeline_mode<synchronous>, transform_indices = @transform_19, window_bounds = array<i64: 32, 1>}, {pipeline_mode = #tpu.pipeline_mode<synchronous>, transform_indices = @transform_20, window_bounds = array<i64: 64, 96>}, {pipeline_mode = #tpu.pipeline_mode<synchronous>, transform_indices = @transform_21, window_bounds = array<i64: 64, 1>}, {pipeline_mode = #tpu.pipeline_mode<synchronous>, transform_indices = @transform_22, window_bounds = array<i64: 32, 192>}, {pipeline_mode = #tpu.pipeline_mode<synchronous>, transform_indices = @transform_23, window_bounds = array<i64: 32, 1>}, {pipeline_mode = #tpu.pipeline_mode<synchronous>, transform_indices = @transform_24, window_bounds = array<i64: 64, 96>}, {pipeline_mode = #tpu.pipeline_mode<synchronous>, transform_indices = @transform_25, window_bounds = array<i64: 64, 1>}, {pipeline_mode = #tpu.pipeline_mode<synchronous>, transform_indices = @transform_26, window_bounds = array<i64: 32, 32>}, {pipeline_mode = #tpu.pipeline_mode<synchronous>, transform_indices = @transform_27, window_bounds = array<i64: 32, 1>}, {pipeline_mode = #tpu.pipeline_mode<synchronous>, transform_indices = @transform_28, window_bounds = array<i64: 32, 192>}, {pipeline_mode = #tpu.pipeline_mode<synchronous>, transform_indices = @transform_29, window_bounds = array<i64: 32, 1>}, {pipeline_mode = #tpu.pipeline_mode<synchronous>, transform_indices = @transform_30, window_bounds = array<i64: 64, 96>}, {pipeline_mode = #tpu.pipeline_mode<synchronous>, transform_indices = @transform_31, window_bounds = array<i64: 64, 1>}, {pipeline_mode = #tpu.pipeline_mode<synchronous>, transform_indices = @transform_32, window_bounds = array<i64: 32, 32>}, {pipeline_mode = #tpu.pipeline_mode<synchronous>, transform_indices = @transform_33, window_bounds = array<i64: 32, 1>}, {pipeline_mode = #tpu.pipeline_mode<synchronous>, transform_indices = @transform_34, window_bounds = array<i64: 32, 192>}, {pipeline_mode = #tpu.pipeline_mode<synchronous>, transform_indices = @transform_35, window_bounds = array<i64: 32, 1>}, {pipeline_mode = #tpu.pipeline_mode<synchronous>, transform_indices = @transform_36, window_bounds = array<i64: 64, 96>}, {pipeline_mode = #tpu.pipeline_mode<synchronous>, transform_indices = @transform_37, window_bounds = array<i64: 64, 1>}, {pipeline_mode = #tpu.pipeline_mode<synchronous>, transform_indices = @transform_38, window_bounds = array<i64: 32, 32>}, {pipeline_mode = #tpu.pipeline_mode<synchronous>, transform_indices = @transform_39, window_bounds = array<i64: 32, 1>}, {pipeline_mode = #tpu.pipeline_mode<synchronous>, transform_indices = @transform_40, window_bounds = array<i64: 32, 192>}, {pipeline_mode = #tpu.pipeline_mode<synchronous>, transform_indices = @transform_41, window_bounds = array<i64: 32, 1>}, {pipeline_mode = #tpu.pipeline_mode<synchronous>, transform_indices = @transform_42, window_bounds = array<i64: 64, 96>}, {pipeline_mode = #tpu.pipeline_mode<synchronous>, transform_indices = @transform_43, window_bounds = array<i64: 64, 1>}, {pipeline_mode = #tpu.pipeline_mode<synchronous>, transform_indices = @transform_44, window_bounds = array<i64: 32, 32>}, {pipeline_mode = #tpu.pipeline_mode<synchronous>, transform_indices = @transform_45, window_bounds = array<i64: 32, 1>}, {pipeline_mode = #tpu.pipeline_mode<synchronous>, transform_indices = @transform_46, window_bounds = array<i64: 32, 192>}, {pipeline_mode = #tpu.pipeline_mode<synchronous>, transform_indices = @transform_47, window_bounds = array<i64: 32, 1>}, {pipeline_mode = #tpu.pipeline_mode<synchronous>, transform_indices = @transform_48, window_bounds = array<i64: 64, 96>}, {pipeline_mode = #tpu.pipeline_mode<synchronous>, transform_indices = @transform_49, window_bounds = array<i64: 64, 1>}, {pipeline_mode = #tpu.pipeline_mode<synchronous>, transform_indices = @transform_50, window_bounds = array<i64: 32, 32>}, {pipeline_mode = #tpu.pipeline_mode<synchronous>, transform_indices = @transform_51, window_bounds = array<i64: 32, 1>}, {pipeline_mode = #tpu.pipeline_mode<synchronous>, transform_indices = @transform_52, window_bounds = array<i64: 32, 192>}, {pipeline_mode = #tpu.pipeline_mode<synchronous>, transform_indices = @transform_53, window_bounds = array<i64: 32, 1>}, {pipeline_mode = #tpu.pipeline_mode<synchronous>, transform_indices = @transform_54, window_bounds = array<i64: 64, 64>}, {pipeline_mode = #tpu.pipeline_mode<synchronous>, transform_indices = @transform_55, window_bounds = array<i64: 64, 32>}, {pipeline_mode = #tpu.pipeline_mode<synchronous>, transform_indices = @transform_56, window_bounds = array<i64: 64, 16>}, {pipeline_mode = #tpu.pipeline_mode<synchronous>, transform_indices = @transform_57, window_bounds = array<i64: 64, 8>}, {pipeline_mode = #tpu.pipeline_mode<synchronous>, transform_indices = @transform_58, window_bounds = array<i64: 64, 4>}, {pipeline_mode = #tpu.pipeline_mode<synchronous>, transform_indices = @transform_59, window_bounds = array<i64: 64, 2>}]} {
    %c0 = arith.constant 0 : index
    %c0_0 = arith.constant 0 : index
    %0 = vector.load %arg2[%c0, %c0_0] : memref<1x132xf32, #tpu.memory_space<vmem>>, vector<1x132xf32>
    %c0_1 = arith.constant 0 : index
    %c0_2 = arith.constant 0 : index
    %1 = vector.load %arg1[%c0_1, %c0_2] : memref<4x132xbf16, #tpu.memory_space<vmem>>, vector<4x132xbf16>
    %c0_3 = arith.constant 0 : index
    %c1 = arith.constant 1 : index
    %2 = vector.load %arg61[%c0_3, %c1] : memref<64x134xbf16, #tpu.memory_space<vmem>>, vector<4x132xbf16>
    tpu.vector_store %arg61[%c0_3, %c1], %1 {strides = array<i32>} : memref<64x134xbf16, #tpu.memory_space<vmem>>, vector<4x132xbf16>,
    %cst = arith.constant 0.000000e+00 : bf16
    %3 = vector.broadcast %cst : bf16 to vector<4x1xbf16>
    %c0_4 = arith.constant 0 : index
    %c0_5 = arith.constant 0 : index
    %4 = vector.load %arg61[%c0_4, %c0_5] : memref<64x134xbf16, #tpu.memory_space<vmem>>, vector<4x1xbf16>
    tpu.vector_store %arg61[%c0_4, %c0_5], %3 {strides = array<i32>} : memref<64x134xbf16, #tpu.memory_space<vmem>>, vector<4x1xbf16>,
    %c0_6 = arith.constant 0 : index
    %c133 = arith.constant 133 : index
    %5 = vector.load %arg61[%c0_6, %c133] : memref<64x134xbf16, #tpu.memory_space<vmem>>, vector<4x1xbf16>
    tpu.vector_store %arg61[%c0_6, %c133], %3 {strides = array<i32>} : memref<64x134xbf16, #tpu.memory_space<vmem>>, vector<4x1xbf16>,
    %c0_7 = arith.constant 0 : index
    %c0_8 = arith.constant 0 : index
    %6 = vector.load %arg61[%c0_7, %c0_8] : memref<64x134xbf16, #tpu.memory_space<vmem>>, vector<4x132xbf16>
    %c0_9 = arith.constant 0 : index
    %c0_10 = arith.constant 0 : index
    %7 = vector.load %arg62[%c0_9, %c0_10] : memref<192x132xbf16, #tpu.memory_space<vmem>>, vector<4x132xbf16>
    tpu.vector_store %arg62[%c0_9, %c0_10], %6 {strides = array<i32>} : memref<192x132xbf16, #tpu.memory_space<vmem>>, vector<4x132xbf16>,
    %c0_11 = arith.constant 0 : index
    %c1_12 = arith.constant 1 : index
    %8 = vector.load %arg61[%c0_11, %c1_12] : memref<64x134xbf16, #tpu.memory_space<vmem>>, vector<4x132xbf16>
    %c4 = arith.constant 4 : index
    %c0_13 = arith.constant 0 : index
    %9 = vector.load %arg62[%c4, %c0_13] : memref<192x132xbf16, #tpu.memory_space<vmem>>, vector<4x132xbf16>
    tpu.vector_store %arg62[%c4, %c0_13], %8 {strides = array<i32>} : memref<192x132xbf16, #tpu.memory_space<vmem>>, vector<4x132xbf16>,
    %c0_14 = arith.constant 0 : index
    %c2 = arith.constant 2 : index
    %10 = vector.load %arg61[%c0_14, %c2] : memref<64x134xbf16, #tpu.memory_space<vmem>>, vector<4x132xbf16>
    %c8 = arith.constant 8 : index
    %c0_15 = arith.constant 0 : index
    %11 = vector.load %arg62[%c8, %c0_15] : memref<192x132xbf16, #tpu.memory_space<vmem>>, vector<4x132xbf16>
    tpu.vector_store %arg62[%c8, %c0_15], %10 {strides = array<i32>} : memref<192x132xbf16, #tpu.memory_space<vmem>>, vector<4x132xbf16>,
    %c0_16 = arith.constant 0 : index
    %c0_17 = arith.constant 0 : index
    %12 = vector.load %arg13[%c0_16, %c0_17] : memref<32x12xbf16, #tpu.memory_space<vmem>>, vector<32x12xbf16>
    %c0_18 = arith.constant 0 : index
    %c0_19 = arith.constant 0 : index
    %13 = vector.load %arg62[%c0_18, %c0_19] : memref<192x132xbf16, #tpu.memory_space<vmem>>, vector<12x132xbf16>
    %cst_20 = arith.constant dense<0.000000e+00> : vector<32x132xf32>
    %14 = tpu.matmul %12, %13, %cst_20 {dimension_numbers = #tpu.dot_dimension_numbers<[1], [0], [0], [1], [0, 0, 1, 1], [], []>} : vector<32x12xbf16>, vector<12x132xbf16>, vector<32x132xf32> -> vector<32x132xf32>
    %c0_21 = arith.constant 0 : index
    %c0_22 = arith.constant 0 : index
    %15 = vector.load %arg14[%c0_21, %c0_22] : memref<32x1xf32, #tpu.memory_space<vmem>>, vector<32x1xf32>
    %16 = vector.broadcast %15 : vector<32x1xf32> to vector<32x132xf32>
    %17 = arith.addf %14, %16 : vector<32x132xf32>
    %18 = vector.broadcast %0 : vector<1x132xf32> to vector<32x132xf32>
    %19 = arith.mulf %17, %18 : vector<32x132xf32>
    %cst_23 = arith.constant 0.000000e+00 : f32
    %20 = vector.broadcast %cst_23 : f32 to vector<32x132xf32>
    %21 = arith.maximumf %19, %20 : vector<32x132xf32>
    %22 = arith.truncf %21 : vector<32x132xf32> to vector<32x132xbf16>
    %c0_24 = arith.constant 0 : index
    %c1_25 = arith.constant 1 : index
    %23 = vector.load %arg61[%c0_24, %c1_25] : memref<64x134xbf16, #tpu.memory_space<vmem>>, vector<32x132xbf16>
    tpu.vector_store %arg61[%c0_24, %c1_25], %22 {strides = array<i32>} : memref<64x134xbf16, #tpu.memory_space<vmem>>, vector<32x132xbf16>,
    %cst_26 = arith.constant 0.000000e+00 : bf16
    %24 = vector.broadcast %cst_26 : bf16 to vector<32x1xbf16>
    %c0_27 = arith.constant 0 : index
    %c0_28 = arith.constant 0 : index
    %25 = vector.load %arg61[%c0_27, %c0_28] : memref<64x134xbf16, #tpu.memory_space<vmem>>, vector<32x1xbf16>
    tpu.vector_store %arg61[%c0_27, %c0_28], %24 {strides = array<i32>} : memref<64x134xbf16, #tpu.memory_space<vmem>>, vector<32x1xbf16>,
    %c0_29 = arith.constant 0 : index
    %c133_30 = arith.constant 133 : index
    %26 = vector.load %arg61[%c0_29, %c133_30] : memref<64x134xbf16, #tpu.memory_space<vmem>>, vector<32x1xbf16>
    tpu.vector_store %arg61[%c0_29, %c133_30], %24 {strides = array<i32>} : memref<64x134xbf16, #tpu.memory_space<vmem>>, vector<32x1xbf16>,
    %c0_31 = arith.constant 0 : index
    %c0_32 = arith.constant 0 : index
    %27 = vector.load %arg61[%c0_31, %c0_32] : memref<64x134xbf16, #tpu.memory_space<vmem>>, vector<32x132xbf16>
    %c0_33 = arith.constant 0 : index
    %c0_34 = arith.constant 0 : index
    %28 = vector.load %arg62[%c0_33, %c0_34] : memref<192x132xbf16, #tpu.memory_space<vmem>>, vector<32x132xbf16>
    tpu.vector_store %arg62[%c0_33, %c0_34], %27 {strides = array<i32>} : memref<192x132xbf16, #tpu.memory_space<vmem>>, vector<32x132xbf16>,
    %c0_35 = arith.constant 0 : index
    %c1_36 = arith.constant 1 : index
    %29 = vector.load %arg61[%c0_35, %c1_36] : memref<64x134xbf16, #tpu.memory_space<vmem>>, vector<32x132xbf16>
    %c32 = arith.constant 32 : index
    %c0_37 = arith.constant 0 : index
    %30 = vector.load %arg62[%c32, %c0_37] : memref<192x132xbf16, #tpu.memory_space<vmem>>, vector<32x132xbf16>
    tpu.vector_store %arg62[%c32, %c0_37], %29 {strides = array<i32>} : memref<192x132xbf16, #tpu.memory_space<vmem>>, vector<32x132xbf16>,
    %c0_38 = arith.constant 0 : index
    %c2_39 = arith.constant 2 : index
    %31 = vector.load %arg61[%c0_38, %c2_39] : memref<64x134xbf16, #tpu.memory_space<vmem>>, vector<32x132xbf16>
    %c64 = arith.constant 64 : index
    %c0_40 = arith.constant 0 : index
    %32 = vector.load %arg62[%c64, %c0_40] : memref<192x132xbf16, #tpu.memory_space<vmem>>, vector<32x132xbf16>
    tpu.vector_store %arg62[%c64, %c0_40], %31 {strides = array<i32>} : memref<192x132xbf16, #tpu.memory_space<vmem>>, vector<32x132xbf16>,
    %c0_41 = arith.constant 0 : index
    %c0_42 = arith.constant 0 : index
    %33 = vector.load %arg15[%c0_41, %c0_42] : memref<32x96xbf16, #tpu.memory_space<vmem>>, vector<32x96xbf16>
    %c0_43 = arith.constant 0 : index
    %c0_44 = arith.constant 0 : index
    %34 = vector.load %arg62[%c0_43, %c0_44] : memref<192x132xbf16, #tpu.memory_space<vmem>>, vector<96x132xbf16>
    %cst_45 = arith.constant dense<0.000000e+00> : vector<32x132xf32>
    %35 = tpu.matmul %33, %34, %cst_45 {dimension_numbers = #tpu.dot_dimension_numbers<[1], [0], [0], [1], [0, 0, 1, 1], [], []>} : vector<32x96xbf16>, vector<96x132xbf16>, vector<32x132xf32> -> vector<32x132xf32>
    %c0_46 = arith.constant 0 : index
    %c0_47 = arith.constant 0 : index
    %36 = vector.load %arg16[%c0_46, %c0_47] : memref<32x1xf32, #tpu.memory_space<vmem>>, vector<32x1xf32>
    %37 = vector.broadcast %36 : vector<32x1xf32> to vector<32x132xf32>
    %38 = arith.addf %35, %37 : vector<32x132xf32>
    %39 = vector.broadcast %0 : vector<1x132xf32> to vector<32x132xf32>
    %40 = arith.mulf %38, %39 : vector<32x132xf32>
    %cst_48 = arith.constant 0.000000e+00 : f32
    %41 = vector.broadcast %cst_48 : f32 to vector<32x132xf32>
    %42 = arith.maximumf %40, %41 : vector<32x132xf32>
    %43 = arith.truncf %42 : vector<32x132xf32> to vector<32x132xbf16>
    %c0_49 = arith.constant 0 : index
    %c1_50 = arith.constant 1 : index
    %44 = vector.load %arg61[%c0_49, %c1_50] : memref<64x134xbf16, #tpu.memory_space<vmem>>, vector<32x132xbf16>
    tpu.vector_store %arg61[%c0_49, %c1_50], %43 {strides = array<i32>} : memref<64x134xbf16, #tpu.memory_space<vmem>>, vector<32x132xbf16>,
    %cst_51 = arith.constant 0.000000e+00 : bf16
    %45 = vector.broadcast %cst_51 : bf16 to vector<32x1xbf16>
    %c0_52 = arith.constant 0 : index
    %c0_53 = arith.constant 0 : index
    %46 = vector.load %arg61[%c0_52, %c0_53] : memref<64x134xbf16, #tpu.memory_space<vmem>>, vector<32x1xbf16>
    tpu.vector_store %arg61[%c0_52, %c0_53], %45 {strides = array<i32>} : memref<64x134xbf16, #tpu.memory_space<vmem>>, vector<32x1xbf16>,
    %c0_54 = arith.constant 0 : index
    %c133_55 = arith.constant 133 : index
    %47 = vector.load %arg61[%c0_54, %c133_55] : memref<64x134xbf16, #tpu.memory_space<vmem>>, vector<32x1xbf16>
    tpu.vector_store %arg61[%c0_54, %c133_55], %45 {strides = array<i32>} : memref<64x134xbf16, #tpu.memory_space<vmem>>, vector<32x1xbf16>,
    %c0_56 = arith.constant 0 : index
    %c0_57 = arith.constant 0 : index
    %48 = vector.load %arg61[%c0_56, %c0_57] : memref<64x134xbf16, #tpu.memory_space<vmem>>, vector<32x132xbf16>
    %c0_58 = arith.constant 0 : index
    %c0_59 = arith.constant 0 : index
    %49 = vector.load %arg62[%c0_58, %c0_59] : memref<192x132xbf16, #tpu.memory_space<vmem>>, vector<32x132xbf16>
    tpu.vector_store %arg62[%c0_58, %c0_59], %48 {strides = array<i32>} : memref<192x132xbf16, #tpu.memory_space<vmem>>, vector<32x132xbf16>,
    %c0_60 = arith.constant 0 : index
    %c1_61 = arith.constant 1 : index
    %50 = vector.load %arg61[%c0_60, %c1_61] : memref<64x134xbf16, #tpu.memory_space<vmem>>, vector<32x132xbf16>
    %c32_62 = arith.constant 32 : index
    %c0_63 = arith.constant 0 : index
    %51 = vector.load %arg62[%c32_62, %c0_63] : memref<192x132xbf16, #tpu.memory_space<vmem>>, vector<32x132xbf16>
    tpu.vector_store %arg62[%c32_62, %c0_63], %50 {strides = array<i32>} : memref<192x132xbf16, #tpu.memory_space<vmem>>, vector<32x132xbf16>,
    %c0_64 = arith.constant 0 : index
    %c2_65 = arith.constant 2 : index
    %52 = vector.load %arg61[%c0_64, %c2_65] : memref<64x134xbf16, #tpu.memory_space<vmem>>, vector<32x132xbf16>
    %c64_66 = arith.constant 64 : index
    %c0_67 = arith.constant 0 : index
    %53 = vector.load %arg62[%c64_66, %c0_67] : memref<192x132xbf16, #tpu.memory_space<vmem>>, vector<32x132xbf16>
    tpu.vector_store %arg62[%c64_66, %c0_67], %52 {strides = array<i32>} : memref<192x132xbf16, #tpu.memory_space<vmem>>, vector<32x132xbf16>,
    %c0_68 = arith.constant 0 : index
    %c0_69 = arith.constant 0 : index
    %54 = vector.load %arg17[%c0_68, %c0_69] : memref<64x96xbf16, #tpu.memory_space<vmem>>, vector<64x96xbf16>
    %c0_70 = arith.constant 0 : index
    %c0_71 = arith.constant 0 : index
    %55 = vector.load %arg62[%c0_70, %c0_71] : memref<192x132xbf16, #tpu.memory_space<vmem>>, vector<96x132xbf16>
    %cst_72 = arith.constant dense<0.000000e+00> : vector<64x132xf32>
    %56 = tpu.matmul %54, %55, %cst_72 {dimension_numbers = #tpu.dot_dimension_numbers<[1], [0], [0], [1], [0, 0, 1, 1], [], []>} : vector<64x96xbf16>, vector<96x132xbf16>, vector<64x132xf32> -> vector<64x132xf32>
    %c0_73 = arith.constant 0 : index
    %c0_74 = arith.constant 0 : index
    %57 = vector.load %arg18[%c0_73, %c0_74] : memref<64x1xf32, #tpu.memory_space<vmem>>, vector<64x1xf32>
    %58 = vector.broadcast %57 : vector<64x1xf32> to vector<64x132xf32>
    %59 = arith.addf %56, %58 : vector<64x132xf32>
    %60 = vector.broadcast %0 : vector<1x132xf32> to vector<64x132xf32>
    %61 = arith.mulf %59, %60 : vector<64x132xf32>
    %cst_75 = arith.constant 0.000000e+00 : f32
    %62 = vector.broadcast %cst_75 : f32 to vector<64x132xf32>
    %63 = arith.maximumf %61, %62 : vector<64x132xf32>
    %64 = arith.truncf %63 : vector<64x132xf32> to vector<64x132xbf16>
    %c0_76 = arith.constant 0 : index
    %c1_77 = arith.constant 1 : index
    %65 = vector.load %arg61[%c0_76, %c1_77] : memref<64x134xbf16, #tpu.memory_space<vmem>>, vector<64x132xbf16>
    tpu.vector_store %arg61[%c0_76, %c1_77], %64 {strides = array<i32>} : memref<64x134xbf16, #tpu.memory_space<vmem>>, vector<64x132xbf16>,
    %cst_78 = arith.constant 0.000000e+00 : bf16
    %66 = vector.broadcast %cst_78 : bf16 to vector<64x1xbf16>
    %c0_79 = arith.constant 0 : index
    %c0_80 = arith.constant 0 : index
    %67 = vector.load %arg61[%c0_79, %c0_80] : memref<64x134xbf16, #tpu.memory_space<vmem>>, vector<64x1xbf16>
    tpu.vector_store %arg61[%c0_79, %c0_80], %66 {strides = array<i32>} : memref<64x134xbf16, #tpu.memory_space<vmem>>, vector<64x1xbf16>,
    %c0_81 = arith.constant 0 : index
    %c133_82 = arith.constant 133 : index
    %68 = vector.load %arg61[%c0_81, %c133_82] : memref<64x134xbf16, #tpu.memory_space<vmem>>, vector<64x1xbf16>
    tpu.vector_store %arg61[%c0_81, %c133_82], %66 {strides = array<i32>} : memref<64x134xbf16, #tpu.memory_space<vmem>>, vector<64x1xbf16>,
    %c0_83 = arith.constant 0 : index
    %c0_84 = arith.constant 0 : index
    %69 = vector.load %arg61[%c0_83, %c0_84] : memref<64x134xbf16, #tpu.memory_space<vmem>>, vector<64x132xbf16>
    %c0_85 = arith.constant 0 : index
    %c0_86 = arith.constant 0 : index
    %70 = vector.load %arg62[%c0_85, %c0_86] : memref<192x132xbf16, #tpu.memory_space<vmem>>, vector<64x132xbf16>
    tpu.vector_store %arg62[%c0_85, %c0_86], %69 {strides = array<i32>} : memref<192x132xbf16, #tpu.memory_space<vmem>>, vector<64x132xbf16>,
    %c0_87 = arith.constant 0 : index
    %c1_88 = arith.constant 1 : index
    %71 = vector.load %arg61[%c0_87, %c1_88] : memref<64x134xbf16, #tpu.memory_space<vmem>>, vector<64x132xbf16>
    %c64_89 = arith.constant 64 : index
    %c0_90 = arith.constant 0 : index
    %72 = vector.load %arg62[%c64_89, %c0_90] : memref<192x132xbf16, #tpu.memory_space<vmem>>, vector<64x132xbf16>
    tpu.vector_store %arg62[%c64_89, %c0_90], %71 {strides = array<i32>} : memref<192x132xbf16, #tpu.memory_space<vmem>>, vector<64x132xbf16>,
    %c0_91 = arith.constant 0 : index
    %c2_92 = arith.constant 2 : index
    %73 = vector.load %arg61[%c0_91, %c2_92] : memref<64x134xbf16, #tpu.memory_space<vmem>>, vector<64x132xbf16>
    %c128 = arith.constant 128 : index
    %c0_93 = arith.constant 0 : index
    %74 = vector.load %arg62[%c128, %c0_93] : memref<192x132xbf16, #tpu.memory_space<vmem>>, vector<64x132xbf16>
    tpu.vector_store %arg62[%c128, %c0_93], %73 {strides = array<i32>} : memref<192x132xbf16, #tpu.memory_space<vmem>>, vector<64x132xbf16>,
    %c0_94 = arith.constant 0 : index
    %c0_95 = arith.constant 0 : index
    %75 = vector.load %arg19[%c0_94, %c0_95] : memref<32x192xbf16, #tpu.memory_space<vmem>>, vector<32x192xbf16>
    %c0_96 = arith.constant 0 : index
    %c0_97 = arith.constant 0 : index
    %76 = vector.load %arg62[%c0_96, %c0_97] : memref<192x132xbf16, #tpu.memory_space<vmem>>, vector<192x132xbf16>
    %cst_98 = arith.constant dense<0.000000e+00> : vector<32x132xf32>
    %77 = tpu.matmul %75, %76, %cst_98 {dimension_numbers = #tpu.dot_dimension_numbers<[1], [0], [0], [1], [0, 0, 1, 1], [], []>} : vector<32x192xbf16>, vector<192x132xbf16>, vector<32x132xf32> -> vector<32x132xf32>
    %c0_99 = arith.constant 0 : index
    %c0_100 = arith.constant 0 : index
    %78 = vector.load %arg20[%c0_99, %c0_100] : memref<32x1xf32, #tpu.memory_space<vmem>>, vector<32x1xf32>
    %79 = vector.broadcast %78 : vector<32x1xf32> to vector<32x132xf32>
    %80 = arith.addf %77, %79 : vector<32x132xf32>
    %81 = vector.broadcast %0 : vector<1x132xf32> to vector<32x132xf32>
    %82 = arith.mulf %80, %81 : vector<32x132xf32>
    %83 = arith.addf %82, %42 : vector<32x132xf32>
    %cst_101 = arith.constant 0.000000e+00 : f32
    %84 = vector.broadcast %cst_101 : f32 to vector<32x132xf32>
    %85 = arith.maximumf %83, %84 : vector<32x132xf32>
    %86 = arith.truncf %85 : vector<32x132xf32> to vector<32x132xbf16>
    %c0_102 = arith.constant 0 : index
    %c1_103 = arith.constant 1 : index
    %87 = vector.load %arg61[%c0_102, %c1_103] : memref<64x134xbf16, #tpu.memory_space<vmem>>, vector<32x132xbf16>
    tpu.vector_store %arg61[%c0_102, %c1_103], %86 {strides = array<i32>} : memref<64x134xbf16, #tpu.memory_space<vmem>>, vector<32x132xbf16>,
    %cst_104 = arith.constant 0.000000e+00 : bf16
    %88 = vector.broadcast %cst_104 : bf16 to vector<32x1xbf16>
    %c0_105 = arith.constant 0 : index
    %c0_106 = arith.constant 0 : index
    %89 = vector.load %arg61[%c0_105, %c0_106] : memref<64x134xbf16, #tpu.memory_space<vmem>>, vector<32x1xbf16>
    tpu.vector_store %arg61[%c0_105, %c0_106], %88 {strides = array<i32>} : memref<64x134xbf16, #tpu.memory_space<vmem>>, vector<32x1xbf16>,
    %c0_107 = arith.constant 0 : index
    %c133_108 = arith.constant 133 : index
    %90 = vector.load %arg61[%c0_107, %c133_108] : memref<64x134xbf16, #tpu.memory_space<vmem>>, vector<32x1xbf16>
    tpu.vector_store %arg61[%c0_107, %c133_108], %88 {strides = array<i32>} : memref<64x134xbf16, #tpu.memory_space<vmem>>, vector<32x1xbf16>,
    %c0_109 = arith.constant 0 : index
    %c0_110 = arith.constant 0 : index
    %91 = vector.load %arg61[%c0_109, %c0_110] : memref<64x134xbf16, #tpu.memory_space<vmem>>, vector<32x132xbf16>
    %c0_111 = arith.constant 0 : index
    %c0_112 = arith.constant 0 : index
    %92 = vector.load %arg62[%c0_111, %c0_112] : memref<192x132xbf16, #tpu.memory_space<vmem>>, vector<32x132xbf16>
    tpu.vector_store %arg62[%c0_111, %c0_112], %91 {strides = array<i32>} : memref<192x132xbf16, #tpu.memory_space<vmem>>, vector<32x132xbf16>,
    %c0_113 = arith.constant 0 : index
    %c1_114 = arith.constant 1 : index
    %93 = vector.load %arg61[%c0_113, %c1_114] : memref<64x134xbf16, #tpu.memory_space<vmem>>, vector<32x132xbf16>
    %c32_115 = arith.constant 32 : index
    %c0_116 = arith.constant 0 : index
    %94 = vector.load %arg62[%c32_115, %c0_116] : memref<192x132xbf16, #tpu.memory_space<vmem>>, vector<32x132xbf16>
    tpu.vector_store %arg62[%c32_115, %c0_116], %93 {strides = array<i32>} : memref<192x132xbf16, #tpu.memory_space<vmem>>, vector<32x132xbf16>,
    %c0_117 = arith.constant 0 : index
    %c2_118 = arith.constant 2 : index
    %95 = vector.load %arg61[%c0_117, %c2_118] : memref<64x134xbf16, #tpu.memory_space<vmem>>, vector<32x132xbf16>
    %c64_119 = arith.constant 64 : index
    %c0_120 = arith.constant 0 : index
    %96 = vector.load %arg62[%c64_119, %c0_120] : memref<192x132xbf16, #tpu.memory_space<vmem>>, vector<32x132xbf16>
    tpu.vector_store %arg62[%c64_119, %c0_120], %95 {strides = array<i32>} : memref<192x132xbf16, #tpu.memory_space<vmem>>, vector<32x132xbf16>,
    %c0_121 = arith.constant 0 : index
    %c0_122 = arith.constant 0 : index
    %97 = vector.load %arg21[%c0_121, %c0_122] : memref<64x96xbf16, #tpu.memory_space<vmem>>, vector<64x96xbf16>
    %c0_123 = arith.constant 0 : index
    %c0_124 = arith.constant 0 : index
    %98 = vector.load %arg62[%c0_123, %c0_124] : memref<192x132xbf16, #tpu.memory_space<vmem>>, vector<96x132xbf16>
    %cst_125 = arith.constant dense<0.000000e+00> : vector<64x132xf32>
    %99 = tpu.matmul %97, %98, %cst_125 {dimension_numbers = #tpu.dot_dimension_numbers<[1], [0], [0], [1], [0, 0, 1, 1], [], []>} : vector<64x96xbf16>, vector<96x132xbf16>, vector<64x132xf32> -> vector<64x132xf32>
    %c0_126 = arith.constant 0 : index
    %c0_127 = arith.constant 0 : index
    %100 = vector.load %arg22[%c0_126, %c0_127] : memref<64x1xf32, #tpu.memory_space<vmem>>, vector<64x1xf32>
    %101 = vector.broadcast %100 : vector<64x1xf32> to vector<64x132xf32>
    %102 = arith.addf %99, %101 : vector<64x132xf32>
    %103 = vector.broadcast %0 : vector<1x132xf32> to vector<64x132xf32>
    %104 = arith.mulf %102, %103 : vector<64x132xf32>
    %cst_128 = arith.constant 0.000000e+00 : f32
    %105 = vector.broadcast %cst_128 : f32 to vector<64x132xf32>
    %106 = arith.maximumf %104, %105 : vector<64x132xf32>
    %107 = arith.truncf %106 : vector<64x132xf32> to vector<64x132xbf16>
    %c0_129 = arith.constant 0 : index
    %c1_130 = arith.constant 1 : index
    %108 = vector.load %arg61[%c0_129, %c1_130] : memref<64x134xbf16, #tpu.memory_space<vmem>>, vector<64x132xbf16>
    tpu.vector_store %arg61[%c0_129, %c1_130], %107 {strides = array<i32>} : memref<64x134xbf16, #tpu.memory_space<vmem>>, vector<64x132xbf16>,
    %cst_131 = arith.constant 0.000000e+00 : bf16
    %109 = vector.broadcast %cst_131 : bf16 to vector<64x1xbf16>
    %c0_132 = arith.constant 0 : index
    %c0_133 = arith.constant 0 : index
    %110 = vector.load %arg61[%c0_132, %c0_133] : memref<64x134xbf16, #tpu.memory_space<vmem>>, vector<64x1xbf16>
    tpu.vector_store %arg61[%c0_132, %c0_133], %109 {strides = array<i32>} : memref<64x134xbf16, #tpu.memory_space<vmem>>, vector<64x1xbf16>,
    %c0_134 = arith.constant 0 : index
    %c133_135 = arith.constant 133 : index
    %111 = vector.load %arg61[%c0_134, %c133_135] : memref<64x134xbf16, #tpu.memory_space<vmem>>, vector<64x1xbf16>
    tpu.vector_store %arg61[%c0_134, %c133_135], %109 {strides = array<i32>} : memref<64x134xbf16, #tpu.memory_space<vmem>>, vector<64x1xbf16>,
    %c0_136 = arith.constant 0 : index
    %c0_137 = arith.constant 0 : index
    %112 = vector.load %arg61[%c0_136, %c0_137] : memref<64x134xbf16, #tpu.memory_space<vmem>>, vector<64x132xbf16>
    %c0_138 = arith.constant 0 : index
    %c0_139 = arith.constant 0 : index
    %113 = vector.load %arg62[%c0_138, %c0_139] : memref<192x132xbf16, #tpu.memory_space<vmem>>, vector<64x132xbf16>
    tpu.vector_store %arg62[%c0_138, %c0_139], %112 {strides = array<i32>} : memref<192x132xbf16, #tpu.memory_space<vmem>>, vector<64x132xbf16>,
    %c0_140 = arith.constant 0 : index
    %c1_141 = arith.constant 1 : index
    %114 = vector.load %arg61[%c0_140, %c1_141] : memref<64x134xbf16, #tpu.memory_space<vmem>>, vector<64x132xbf16>
    %c64_142 = arith.constant 64 : index
    %c0_143 = arith.constant 0 : index
    %115 = vector.load %arg62[%c64_142, %c0_143] : memref<192x132xbf16, #tpu.memory_space<vmem>>, vector<64x132xbf16>
    tpu.vector_store %arg62[%c64_142, %c0_143], %114 {strides = array<i32>} : memref<192x132xbf16, #tpu.memory_space<vmem>>, vector<64x132xbf16>,
    %c0_144 = arith.constant 0 : index
    %c2_145 = arith.constant 2 : index
    %116 = vector.load %arg61[%c0_144, %c2_145] : memref<64x134xbf16, #tpu.memory_space<vmem>>, vector<64x132xbf16>
    %c128_146 = arith.constant 128 : index
    %c0_147 = arith.constant 0 : index
    %117 = vector.load %arg62[%c128_146, %c0_147] : memref<192x132xbf16, #tpu.memory_space<vmem>>, vector<64x132xbf16>
    tpu.vector_store %arg62[%c128_146, %c0_147], %116 {strides = array<i32>} : memref<192x132xbf16, #tpu.memory_space<vmem>>, vector<64x132xbf16>,
    %c0_148 = arith.constant 0 : index
    %c0_149 = arith.constant 0 : index
    %118 = vector.load %arg23[%c0_148, %c0_149] : memref<32x192xbf16, #tpu.memory_space<vmem>>, vector<32x192xbf16>
    %c0_150 = arith.constant 0 : index
    %c0_151 = arith.constant 0 : index
    %119 = vector.load %arg62[%c0_150, %c0_151] : memref<192x132xbf16, #tpu.memory_space<vmem>>, vector<192x132xbf16>
    %cst_152 = arith.constant dense<0.000000e+00> : vector<32x132xf32>
    %120 = tpu.matmul %118, %119, %cst_152 {dimension_numbers = #tpu.dot_dimension_numbers<[1], [0], [0], [1], [0, 0, 1, 1], [], []>} : vector<32x192xbf16>, vector<192x132xbf16>, vector<32x132xf32> -> vector<32x132xf32>
    %c0_153 = arith.constant 0 : index
    %c0_154 = arith.constant 0 : index
    %121 = vector.load %arg24[%c0_153, %c0_154] : memref<32x1xf32, #tpu.memory_space<vmem>>, vector<32x1xf32>
    %122 = vector.broadcast %121 : vector<32x1xf32> to vector<32x132xf32>
    %123 = arith.addf %120, %122 : vector<32x132xf32>
    %124 = vector.broadcast %0 : vector<1x132xf32> to vector<32x132xf32>
    %125 = arith.mulf %123, %124 : vector<32x132xf32>
    %126 = arith.addf %125, %85 : vector<32x132xf32>
    %cst_155 = arith.constant 0.000000e+00 : f32
    %127 = vector.broadcast %cst_155 : f32 to vector<32x132xf32>
    %128 = arith.maximumf %126, %127 : vector<32x132xf32>
    %129 = vector.extract_strided_slice %128 {offsets = [0, 1], sizes = [32, 64], strides = [1, 1]} : vector<32x132xf32> to vector<32x64xf32>
    %c0_156 = arith.constant 0 : index
    %c0_157 = arith.constant 0 : index
    %130 = vector.load %arg55[%c0_156, %c0_157] : memref<64x64xf32, #tpu.memory_space<vmem>>, vector<32x64xf32>
    tpu.vector_store %arg55[%c0_156, %c0_157], %129 {strides = array<i32>} : memref<64x64xf32, #tpu.memory_space<vmem>>, vector<32x64xf32>,
    %131 = vector.extract_strided_slice %128 {offsets = [0, 67], sizes = [32, 64], strides = [1, 1]} : vector<32x132xf32> to vector<32x64xf32>
    %c32_158 = arith.constant 32 : index
    %c0_159 = arith.constant 0 : index
    %132 = vector.load %arg55[%c32_158, %c0_159] : memref<64x64xf32, #tpu.memory_space<vmem>>, vector<32x64xf32>
    tpu.vector_store %arg55[%c32_158, %c0_159], %131 {strides = array<i32>} : memref<64x64xf32, #tpu.memory_space<vmem>>, vector<32x64xf32>,
    %c0_160 = arith.constant 0 : index
    %c0_161 = arith.constant 0 : index
    %133 = vector.load %arg3[%c0_160, %c0_161] : memref<1x68xf32, #tpu.memory_space<vmem>>, vector<1x68xf32>
    %c0_162 = arith.constant 0 : index
    %c0_163 = arith.constant 0 : index
    %134 = vector.load %arg8[%c0_162, %c0_163] : memref<132x68xbf16, #tpu.memory_space<vmem>>, vector<132x68xbf16>
    %135 = arith.truncf %128 : vector<32x132xf32> to vector<32x132xbf16>
    %c0_164 = arith.constant 0 : index
    %c0_165 = arith.constant 0 : index
    %136 = vector.load %arg61[%c0_164, %c0_165] : memref<64x134xbf16, #tpu.memory_space<vmem>>, vector<32x132xbf16>
    tpu.vector_store %arg61[%c0_164, %c0_165], %135 {strides = array<i32>} : memref<64x134xbf16, #tpu.memory_space<vmem>>, vector<32x132xbf16>,
    %cst_166 = arith.constant 0.000000e+00 : bf16
    %137 = vector.broadcast %cst_166 : bf16 to vector<32x2xbf16>
    %c0_167 = arith.constant 0 : index
    %c132 = arith.constant 132 : index
    %138 = vector.load %arg61[%c0_167, %c132] : memref<64x134xbf16, #tpu.memory_space<vmem>>, vector<32x2xbf16>
    tpu.vector_store %arg61[%c0_167, %c132], %137 {strides = array<i32>} : memref<64x134xbf16, #tpu.memory_space<vmem>>, vector<32x2xbf16>,
    %c0_168 = arith.constant 0 : index
    %c0_169 = arith.constant 0 : index
    %139 = vector.load %arg61[%c0_168, %c0_169] : memref<64x134xbf16, #tpu.memory_space<vmem>>, vector<32x132xbf16>
    %cst_170 = arith.constant dense<0.000000e+00> : vector<32x68xf32>
    %140 = tpu.matmul %139, %134, %cst_170 {dimension_numbers = #tpu.dot_dimension_numbers<[1], [0], [0], [1], [0, 0, 1, 1], [], []>} : vector<32x132xbf16>, vector<132x68xbf16>, vector<32x68xf32> -> vector<32x68xf32>
    %141 = arith.truncf %140 : vector<32x68xf32> to vector<32x68xbf16>
    %c0_171 = arith.constant 0 : index
    %c1_172 = arith.constant 1 : index
    %142 = vector.load %arg61[%c0_171, %c1_172] : memref<64x134xbf16, #tpu.memory_space<vmem>>, vector<32x132xbf16>
    %cst_173 = arith.constant dense<0.000000e+00> : vector<32x68xf32>
    %143 = tpu.matmul %142, %134, %cst_173 {dimension_numbers = #tpu.dot_dimension_numbers<[1], [0], [0], [1], [0, 0, 1, 1], [], []>} : vector<32x132xbf16>, vector<132x68xbf16>, vector<32x68xf32> -> vector<32x68xf32>
    %144 = arith.truncf %143 : vector<32x68xf32> to vector<32x68xbf16>
    %c0_174 = arith.constant 0 : index
    %c2_175 = arith.constant 2 : index
    %145 = vector.load %arg61[%c0_174, %c2_175] : memref<64x134xbf16, #tpu.memory_space<vmem>>, vector<32x132xbf16>
    %cst_176 = arith.constant dense<0.000000e+00> : vector<32x68xf32>
    %146 = tpu.matmul %145, %134, %cst_176 {dimension_numbers = #tpu.dot_dimension_numbers<[1], [0], [0], [1], [0, 0, 1, 1], [], []>} : vector<32x132xbf16>, vector<132x68xbf16>, vector<32x68xf32> -> vector<32x68xf32>
    %147 = arith.truncf %146 : vector<32x68xf32> to vector<32x68xbf16>
    %c0_177 = arith.constant 0 : index
    %c0_178 = arith.constant 0 : index
    %148 = vector.load %arg27[%c0_177, %c0_178] : memref<32x32xbf16, #tpu.memory_space<vmem>>, vector<32x32xbf16>
    %cst_179 = arith.constant dense<0.000000e+00> : vector<32x68xf32>
    %149 = tpu.matmul %148, %144, %cst_179 {dimension_numbers = #tpu.dot_dimension_numbers<[1], [0], [0], [1], [0, 0, 1, 1], [], []>} : vector<32x32xbf16>, vector<32x68xbf16>, vector<32x68xf32> -> vector<32x68xf32>
    %c0_180 = arith.constant 0 : index
    %c0_181 = arith.constant 0 : index
    %150 = vector.load %arg62[%c0_180, %c0_181] : memref<192x132xbf16, #tpu.memory_space<vmem>>, vector<32x68xbf16>
    tpu.vector_store %arg62[%c0_180, %c0_181], %141 {strides = array<i32>} : memref<192x132xbf16, #tpu.memory_space<vmem>>, vector<32x68xbf16>,
    %c32_182 = arith.constant 32 : index
    %c0_183 = arith.constant 0 : index
    %151 = vector.load %arg62[%c32_182, %c0_183] : memref<192x132xbf16, #tpu.memory_space<vmem>>, vector<32x68xbf16>
    tpu.vector_store %arg62[%c32_182, %c0_183], %144 {strides = array<i32>} : memref<192x132xbf16, #tpu.memory_space<vmem>>, vector<32x68xbf16>,
    %c64_184 = arith.constant 64 : index
    %c0_185 = arith.constant 0 : index
    %152 = vector.load %arg62[%c64_184, %c0_185] : memref<192x132xbf16, #tpu.memory_space<vmem>>, vector<32x68xbf16>
    tpu.vector_store %arg62[%c64_184, %c0_185], %147 {strides = array<i32>} : memref<192x132xbf16, #tpu.memory_space<vmem>>, vector<32x68xbf16>,
    %c0_186 = arith.constant 0 : index
    %c0_187 = arith.constant 0 : index
    %153 = vector.load %arg25[%c0_186, %c0_187] : memref<64x96xbf16, #tpu.memory_space<vmem>>, vector<64x96xbf16>
    %c0_188 = arith.constant 0 : index
    %c0_189 = arith.constant 0 : index
    %154 = vector.load %arg62[%c0_188, %c0_189] : memref<192x132xbf16, #tpu.memory_space<vmem>>, vector<96x68xbf16>
    %cst_190 = arith.constant dense<0.000000e+00> : vector<64x68xf32>
    %155 = tpu.matmul %153, %154, %cst_190 {dimension_numbers = #tpu.dot_dimension_numbers<[1], [0], [0], [1], [0, 0, 1, 1], [], []>} : vector<64x96xbf16>, vector<96x68xbf16>, vector<64x68xf32> -> vector<64x68xf32>
    %c0_191 = arith.constant 0 : index
    %c0_192 = arith.constant 0 : index
    %156 = vector.load %arg26[%c0_191, %c0_192] : memref<64x1xf32, #tpu.memory_space<vmem>>, vector<64x1xf32>
    %157 = vector.broadcast %156 : vector<64x1xf32> to vector<64x68xf32>
    %158 = arith.addf %155, %157 : vector<64x68xf32>
    %159 = vector.broadcast %133 : vector<1x68xf32> to vector<64x68xf32>
    %160 = arith.mulf %158, %159 : vector<64x68xf32>
    %cst_193 = arith.constant 0.000000e+00 : f32
    %161 = vector.broadcast %cst_193 : f32 to vector<64x68xf32>
    %162 = arith.maximumf %160, %161 : vector<64x68xf32>
    %163 = arith.truncf %162 : vector<64x68xf32> to vector<64x68xbf16>
    %c0_194 = arith.constant 0 : index
    %c1_195 = arith.constant 1 : index
    %164 = vector.load %arg61[%c0_194, %c1_195] : memref<64x134xbf16, #tpu.memory_space<vmem>>, vector<64x68xbf16>
    tpu.vector_store %arg61[%c0_194, %c1_195], %163 {strides = array<i32>} : memref<64x134xbf16, #tpu.memory_space<vmem>>, vector<64x68xbf16>,
    %cst_196 = arith.constant 0.000000e+00 : bf16
    %165 = vector.broadcast %cst_196 : bf16 to vector<64x1xbf16>
    %c0_197 = arith.constant 0 : index
    %c0_198 = arith.constant 0 : index
    %166 = vector.load %arg61[%c0_197, %c0_198] : memref<64x134xbf16, #tpu.memory_space<vmem>>, vector<64x1xbf16>
    tpu.vector_store %arg61[%c0_197, %c0_198], %165 {strides = array<i32>} : memref<64x134xbf16, #tpu.memory_space<vmem>>, vector<64x1xbf16>,
    %c0_199 = arith.constant 0 : index
    %c69 = arith.constant 69 : index
    %167 = vector.load %arg61[%c0_199, %c69] : memref<64x134xbf16, #tpu.memory_space<vmem>>, vector<64x1xbf16>
    tpu.vector_store %arg61[%c0_199, %c69], %165 {strides = array<i32>} : memref<64x134xbf16, #tpu.memory_space<vmem>>, vector<64x1xbf16>,
    %c0_200 = arith.constant 0 : index
    %c0_201 = arith.constant 0 : index
    %168 = vector.load %arg61[%c0_200, %c0_201] : memref<64x134xbf16, #tpu.memory_space<vmem>>, vector<64x68xbf16>
    %c0_202 = arith.constant 0 : index
    %c0_203 = arith.constant 0 : index
    %169 = vector.load %arg62[%c0_202, %c0_203] : memref<192x132xbf16, #tpu.memory_space<vmem>>, vector<64x68xbf16>
    tpu.vector_store %arg62[%c0_202, %c0_203], %168 {strides = array<i32>} : memref<192x132xbf16, #tpu.memory_space<vmem>>, vector<64x68xbf16>,
    %c0_204 = arith.constant 0 : index
    %c1_205 = arith.constant 1 : index
    %170 = vector.load %arg61[%c0_204, %c1_205] : memref<64x134xbf16, #tpu.memory_space<vmem>>, vector<64x68xbf16>
    %c64_206 = arith.constant 64 : index
    %c0_207 = arith.constant 0 : index
    %171 = vector.load %arg62[%c64_206, %c0_207] : memref<192x132xbf16, #tpu.memory_space<vmem>>, vector<64x68xbf16>
    tpu.vector_store %arg62[%c64_206, %c0_207], %170 {strides = array<i32>} : memref<192x132xbf16, #tpu.memory_space<vmem>>, vector<64x68xbf16>,
    %c0_208 = arith.constant 0 : index
    %c2_209 = arith.constant 2 : index
    %172 = vector.load %arg61[%c0_208, %c2_209] : memref<64x134xbf16, #tpu.memory_space<vmem>>, vector<64x68xbf16>
    %c128_210 = arith.constant 128 : index
    %c0_211 = arith.constant 0 : index
    %173 = vector.load %arg62[%c128_210, %c0_211] : memref<192x132xbf16, #tpu.memory_space<vmem>>, vector<64x68xbf16>
    tpu.vector_store %arg62[%c128_210, %c0_211], %172 {strides = array<i32>} : memref<192x132xbf16, #tpu.memory_space<vmem>>, vector<64x68xbf16>,
    %c0_212 = arith.constant 0 : index
    %c0_213 = arith.constant 0 : index
    %174 = vector.load %arg29[%c0_212, %c0_213] : memref<32x192xbf16, #tpu.memory_space<vmem>>, vector<32x192xbf16>
    %c0_214 = arith.constant 0 : index
    %c0_215 = arith.constant 0 : index
    %175 = vector.load %arg62[%c0_214, %c0_215] : memref<192x132xbf16, #tpu.memory_space<vmem>>, vector<192x68xbf16>
    %cst_216 = arith.constant dense<0.000000e+00> : vector<32x68xf32>
    %176 = tpu.matmul %174, %175, %cst_216 {dimension_numbers = #tpu.dot_dimension_numbers<[1], [0], [0], [1], [0, 0, 1, 1], [], []>} : vector<32x192xbf16>, vector<192x68xbf16>, vector<32x68xf32> -> vector<32x68xf32>
    %177 = arith.addf %176, %149 : vector<32x68xf32>
    %c0_217 = arith.constant 0 : index
    %c0_218 = arith.constant 0 : index
    %178 = vector.load %arg30[%c0_217, %c0_218] : memref<32x1xf32, #tpu.memory_space<vmem>>, vector<32x1xf32>
    %179 = vector.broadcast %178 : vector<32x1xf32> to vector<32x68xf32>
    %180 = arith.addf %177, %179 : vector<32x68xf32>
    %c0_219 = arith.constant 0 : index
    %c0_220 = arith.constant 0 : index
    %181 = vector.load %arg28[%c0_219, %c0_220] : memref<32x1xf32, #tpu.memory_space<vmem>>, vector<32x1xf32>
    %182 = vector.broadcast %181 : vector<32x1xf32> to vector<32x68xf32>
    %183 = arith.addf %180, %182 : vector<32x68xf32>
    %184 = vector.broadcast %133 : vector<1x68xf32> to vector<32x68xf32>
    %185 = arith.mulf %183, %184 : vector<32x68xf32>
    %cst_221 = arith.constant 0.000000e+00 : f32
    %186 = vector.broadcast %cst_221 : f32 to vector<32x68xf32>
    %187 = arith.maximumf %185, %186 : vector<32x68xf32>
    %188 = vector.extract_strided_slice %187 {offsets = [0, 1], sizes = [32, 32], strides = [1, 1]} : vector<32x68xf32> to vector<32x32xf32>
    %c0_222 = arith.constant 0 : index
    %c0_223 = arith.constant 0 : index
    %189 = vector.load %arg56[%c0_222, %c0_223] : memref<64x32xf32, #tpu.memory_space<vmem>>, vector<32x32xf32>
    tpu.vector_store %arg56[%c0_222, %c0_223], %188 {strides = array<i32>} : memref<64x32xf32, #tpu.memory_space<vmem>>, vector<32x32xf32>,
    %190 = vector.extract_strided_slice %187 {offsets = [0, 35], sizes = [32, 32], strides = [1, 1]} : vector<32x68xf32> to vector<32x32xf32>
    %c32_224 = arith.constant 32 : index
    %c0_225 = arith.constant 0 : index
    %191 = vector.load %arg56[%c32_224, %c0_225] : memref<64x32xf32, #tpu.memory_space<vmem>>, vector<32x32xf32>
    tpu.vector_store %arg56[%c32_224, %c0_225], %190 {strides = array<i32>} : memref<64x32xf32, #tpu.memory_space<vmem>>, vector<32x32xf32>,
    %c0_226 = arith.constant 0 : index
    %c0_227 = arith.constant 0 : index
    %192 = vector.load %arg4[%c0_226, %c0_227] : memref<1x36xf32, #tpu.memory_space<vmem>>, vector<1x36xf32>
    %c0_228 = arith.constant 0 : index
    %c0_229 = arith.constant 0 : index
    %193 = vector.load %arg9[%c0_228, %c0_229] : memref<68x36xbf16, #tpu.memory_space<vmem>>, vector<68x36xbf16>
    %194 = arith.truncf %187 : vector<32x68xf32> to vector<32x68xbf16>
    %c0_230 = arith.constant 0 : index
    %c0_231 = arith.constant 0 : index
    %195 = vector.load %arg61[%c0_230, %c0_231] : memref<64x134xbf16, #tpu.memory_space<vmem>>, vector<32x68xbf16>
    tpu.vector_store %arg61[%c0_230, %c0_231], %194 {strides = array<i32>} : memref<64x134xbf16, #tpu.memory_space<vmem>>, vector<32x68xbf16>,
    %cst_232 = arith.constant 0.000000e+00 : bf16
    %196 = vector.broadcast %cst_232 : bf16 to vector<32x2xbf16>
    %c0_233 = arith.constant 0 : index
    %c68 = arith.constant 68 : index
    %197 = vector.load %arg61[%c0_233, %c68] : memref<64x134xbf16, #tpu.memory_space<vmem>>, vector<32x2xbf16>
    tpu.vector_store %arg61[%c0_233, %c68], %196 {strides = array<i32>} : memref<64x134xbf16, #tpu.memory_space<vmem>>, vector<32x2xbf16>,
    %c0_234 = arith.constant 0 : index
    %c0_235 = arith.constant 0 : index
    %198 = vector.load %arg61[%c0_234, %c0_235] : memref<64x134xbf16, #tpu.memory_space<vmem>>, vector<32x68xbf16>
    %cst_236 = arith.constant dense<0.000000e+00> : vector<32x36xf32>
    %199 = tpu.matmul %198, %193, %cst_236 {dimension_numbers = #tpu.dot_dimension_numbers<[1], [0], [0], [1], [0, 0, 1, 1], [], []>} : vector<32x68xbf16>, vector<68x36xbf16>, vector<32x36xf32> -> vector<32x36xf32>
    %200 = arith.truncf %199 : vector<32x36xf32> to vector<32x36xbf16>
    %c0_237 = arith.constant 0 : index
    %c1_238 = arith.constant 1 : index
    %201 = vector.load %arg61[%c0_237, %c1_238] : memref<64x134xbf16, #tpu.memory_space<vmem>>, vector<32x68xbf16>
    %cst_239 = arith.constant dense<0.000000e+00> : vector<32x36xf32>
    %202 = tpu.matmul %201, %193, %cst_239 {dimension_numbers = #tpu.dot_dimension_numbers<[1], [0], [0], [1], [0, 0, 1, 1], [], []>} : vector<32x68xbf16>, vector<68x36xbf16>, vector<32x36xf32> -> vector<32x36xf32>
    %203 = arith.truncf %202 : vector<32x36xf32> to vector<32x36xbf16>
    %c0_240 = arith.constant 0 : index
    %c2_241 = arith.constant 2 : index
    %204 = vector.load %arg61[%c0_240, %c2_241] : memref<64x134xbf16, #tpu.memory_space<vmem>>, vector<32x68xbf16>
    %cst_242 = arith.constant dense<0.000000e+00> : vector<32x36xf32>
    %205 = tpu.matmul %204, %193, %cst_242 {dimension_numbers = #tpu.dot_dimension_numbers<[1], [0], [0], [1], [0, 0, 1, 1], [], []>} : vector<32x68xbf16>, vector<68x36xbf16>, vector<32x36xf32> -> vector<32x36xf32>
    %206 = arith.truncf %205 : vector<32x36xf32> to vector<32x36xbf16>
    %c0_243 = arith.constant 0 : index
    %c0_244 = arith.constant 0 : index
    %207 = vector.load %arg33[%c0_243, %c0_244] : memref<32x32xbf16, #tpu.memory_space<vmem>>, vector<32x32xbf16>
    %cst_245 = arith.constant dense<0.000000e+00> : vector<32x36xf32>
    %208 = tpu.matmul %207, %203, %cst_245 {dimension_numbers = #tpu.dot_dimension_numbers<[1], [0], [0], [1], [0, 0, 1, 1], [], []>} : vector<32x32xbf16>, vector<32x36xbf16>, vector<32x36xf32> -> vector<32x36xf32>
    %c0_246 = arith.constant 0 : index
    %c0_247 = arith.constant 0 : index
    %209 = vector.load %arg62[%c0_246, %c0_247] : memref<192x132xbf16, #tpu.memory_space<vmem>>, vector<32x36xbf16>
    tpu.vector_store %arg62[%c0_246, %c0_247], %200 {strides = array<i32>} : memref<192x132xbf16, #tpu.memory_space<vmem>>, vector<32x36xbf16>,
    %c32_248 = arith.constant 32 : index
    %c0_249 = arith.constant 0 : index
    %210 = vector.load %arg62[%c32_248, %c0_249] : memref<192x132xbf16, #tpu.memory_space<vmem>>, vector<32x36xbf16>
    tpu.vector_store %arg62[%c32_248, %c0_249], %203 {strides = array<i32>} : memref<192x132xbf16, #tpu.memory_space<vmem>>, vector<32x36xbf16>,
    %c64_250 = arith.constant 64 : index
    %c0_251 = arith.constant 0 : index
    %211 = vector.load %arg62[%c64_250, %c0_251] : memref<192x132xbf16, #tpu.memory_space<vmem>>, vector<32x36xbf16>
    tpu.vector_store %arg62[%c64_250, %c0_251], %206 {strides = array<i32>} : memref<192x132xbf16, #tpu.memory_space<vmem>>, vector<32x36xbf16>,
    %c0_252 = arith.constant 0 : index
    %c0_253 = arith.constant 0 : index
    %212 = vector.load %arg31[%c0_252, %c0_253] : memref<64x96xbf16, #tpu.memory_space<vmem>>, vector<64x96xbf16>
    %c0_254 = arith.constant 0 : index
    %c0_255 = arith.constant 0 : index
    %213 = vector.load %arg62[%c0_254, %c0_255] : memref<192x132xbf16, #tpu.memory_space<vmem>>, vector<96x36xbf16>
    %cst_256 = arith.constant dense<0.000000e+00> : vector<64x36xf32>
    %214 = tpu.matmul %212, %213, %cst_256 {dimension_numbers = #tpu.dot_dimension_numbers<[1], [0], [0], [1], [0, 0, 1, 1], [], []>} : vector<64x96xbf16>, vector<96x36xbf16>, vector<64x36xf32> -> vector<64x36xf32>
    %c0_257 = arith.constant 0 : index
    %c0_258 = arith.constant 0 : index
    %215 = vector.load %arg32[%c0_257, %c0_258] : memref<64x1xf32, #tpu.memory_space<vmem>>, vector<64x1xf32>
    %216 = vector.broadcast %215 : vector<64x1xf32> to vector<64x36xf32>
    %217 = arith.addf %214, %216 : vector<64x36xf32>
    %218 = vector.broadcast %192 : vector<1x36xf32> to vector<64x36xf32>
    %219 = arith.mulf %217, %218 : vector<64x36xf32>
    %cst_259 = arith.constant 0.000000e+00 : f32
    %220 = vector.broadcast %cst_259 : f32 to vector<64x36xf32>
    %221 = arith.maximumf %219, %220 : vector<64x36xf32>
    %222 = arith.truncf %221 : vector<64x36xf32> to vector<64x36xbf16>
    %c0_260 = arith.constant 0 : index
    %c1_261 = arith.constant 1 : index
    %223 = vector.load %arg61[%c0_260, %c1_261] : memref<64x134xbf16, #tpu.memory_space<vmem>>, vector<64x36xbf16>
    tpu.vector_store %arg61[%c0_260, %c1_261], %222 {strides = array<i32>} : memref<64x134xbf16, #tpu.memory_space<vmem>>, vector<64x36xbf16>,
    %cst_262 = arith.constant 0.000000e+00 : bf16
    %224 = vector.broadcast %cst_262 : bf16 to vector<64x1xbf16>
    %c0_263 = arith.constant 0 : index
    %c0_264 = arith.constant 0 : index
    %225 = vector.load %arg61[%c0_263, %c0_264] : memref<64x134xbf16, #tpu.memory_space<vmem>>, vector<64x1xbf16>
    tpu.vector_store %arg61[%c0_263, %c0_264], %224 {strides = array<i32>} : memref<64x134xbf16, #tpu.memory_space<vmem>>, vector<64x1xbf16>,
    %c0_265 = arith.constant 0 : index
    %c37 = arith.constant 37 : index
    %226 = vector.load %arg61[%c0_265, %c37] : memref<64x134xbf16, #tpu.memory_space<vmem>>, vector<64x1xbf16>
    tpu.vector_store %arg61[%c0_265, %c37], %224 {strides = array<i32>} : memref<64x134xbf16, #tpu.memory_space<vmem>>, vector<64x1xbf16>,
    %c0_266 = arith.constant 0 : index
    %c0_267 = arith.constant 0 : index
    %227 = vector.load %arg61[%c0_266, %c0_267] : memref<64x134xbf16, #tpu.memory_space<vmem>>, vector<64x36xbf16>
    %c0_268 = arith.constant 0 : index
    %c0_269 = arith.constant 0 : index
    %228 = vector.load %arg62[%c0_268, %c0_269] : memref<192x132xbf16, #tpu.memory_space<vmem>>, vector<64x36xbf16>
    tpu.vector_store %arg62[%c0_268, %c0_269], %227 {strides = array<i32>} : memref<192x132xbf16, #tpu.memory_space<vmem>>, vector<64x36xbf16>,
    %c0_270 = arith.constant 0 : index
    %c1_271 = arith.constant 1 : index
    %229 = vector.load %arg61[%c0_270, %c1_271] : memref<64x134xbf16, #tpu.memory_space<vmem>>, vector<64x36xbf16>
    %c64_272 = arith.constant 64 : index
    %c0_273 = arith.constant 0 : index
    %230 = vector.load %arg62[%c64_272, %c0_273] : memref<192x132xbf16, #tpu.memory_space<vmem>>, vector<64x36xbf16>
    tpu.vector_store %arg62[%c64_272, %c0_273], %229 {strides = array<i32>} : memref<192x132xbf16, #tpu.memory_space<vmem>>, vector<64x36xbf16>,
    %c0_274 = arith.constant 0 : index
    %c2_275 = arith.constant 2 : index
    %231 = vector.load %arg61[%c0_274, %c2_275] : memref<64x134xbf16, #tpu.memory_space<vmem>>, vector<64x36xbf16>
    %c128_276 = arith.constant 128 : index
    %c0_277 = arith.constant 0 : index
    %232 = vector.load %arg62[%c128_276, %c0_277] : memref<192x132xbf16, #tpu.memory_space<vmem>>, vector<64x36xbf16>
    tpu.vector_store %arg62[%c128_276, %c0_277], %231 {strides = array<i32>} : memref<192x132xbf16, #tpu.memory_space<vmem>>, vector<64x36xbf16>,
    %c0_278 = arith.constant 0 : index
    %c0_279 = arith.constant 0 : index
    %233 = vector.load %arg35[%c0_278, %c0_279] : memref<32x192xbf16, #tpu.memory_space<vmem>>, vector<32x192xbf16>
    %c0_280 = arith.constant 0 : index
    %c0_281 = arith.constant 0 : index
    %234 = vector.load %arg62[%c0_280, %c0_281] : memref<192x132xbf16, #tpu.memory_space<vmem>>, vector<192x36xbf16>
    %cst_282 = arith.constant dense<0.000000e+00> : vector<32x36xf32>
    %235 = tpu.matmul %233, %234, %cst_282 {dimension_numbers = #tpu.dot_dimension_numbers<[1], [0], [0], [1], [0, 0, 1, 1], [], []>} : vector<32x192xbf16>, vector<192x36xbf16>, vector<32x36xf32> -> vector<32x36xf32>
    %236 = arith.addf %235, %208 : vector<32x36xf32>
    %c0_283 = arith.constant 0 : index
    %c0_284 = arith.constant 0 : index
    %237 = vector.load %arg36[%c0_283, %c0_284] : memref<32x1xf32, #tpu.memory_space<vmem>>, vector<32x1xf32>
    %238 = vector.broadcast %237 : vector<32x1xf32> to vector<32x36xf32>
    %239 = arith.addf %236, %238 : vector<32x36xf32>
    %c0_285 = arith.constant 0 : index
    %c0_286 = arith.constant 0 : index
    %240 = vector.load %arg34[%c0_285, %c0_286] : memref<32x1xf32, #tpu.memory_space<vmem>>, vector<32x1xf32>
    %241 = vector.broadcast %240 : vector<32x1xf32> to vector<32x36xf32>
    %242 = arith.addf %239, %241 : vector<32x36xf32>
    %243 = vector.broadcast %192 : vector<1x36xf32> to vector<32x36xf32>
    %244 = arith.mulf %242, %243 : vector<32x36xf32>
    %cst_287 = arith.constant 0.000000e+00 : f32
    %245 = vector.broadcast %cst_287 : f32 to vector<32x36xf32>
    %246 = arith.maximumf %244, %245 : vector<32x36xf32>
    %247 = vector.extract_strided_slice %246 {offsets = [0, 1], sizes = [32, 16], strides = [1, 1]} : vector<32x36xf32> to vector<32x16xf32>
    %c0_288 = arith.constant 0 : index
    %c0_289 = arith.constant 0 : index
    %248 = vector.load %arg57[%c0_288, %c0_289] : memref<64x16xf32, #tpu.memory_space<vmem>>, vector<32x16xf32>
    tpu.vector_store %arg57[%c0_288, %c0_289], %247 {strides = array<i32>} : memref<64x16xf32, #tpu.memory_space<vmem>>, vector<32x16xf32>,
    %249 = vector.extract_strided_slice %246 {offsets = [0, 19], sizes = [32, 16], strides = [1, 1]} : vector<32x36xf32> to vector<32x16xf32>
    %c32_290 = arith.constant 32 : index
    %c0_291 = arith.constant 0 : index
    %250 = vector.load %arg57[%c32_290, %c0_291] : memref<64x16xf32, #tpu.memory_space<vmem>>, vector<32x16xf32>
    tpu.vector_store %arg57[%c32_290, %c0_291], %249 {strides = array<i32>} : memref<64x16xf32, #tpu.memory_space<vmem>>, vector<32x16xf32>,
    %c0_292 = arith.constant 0 : index
    %c0_293 = arith.constant 0 : index
    %251 = vector.load %arg5[%c0_292, %c0_293] : memref<1x20xf32, #tpu.memory_space<vmem>>, vector<1x20xf32>
    %c0_294 = arith.constant 0 : index
    %c0_295 = arith.constant 0 : index
    %252 = vector.load %arg10[%c0_294, %c0_295] : memref<36x20xbf16, #tpu.memory_space<vmem>>, vector<36x20xbf16>
    %253 = arith.truncf %246 : vector<32x36xf32> to vector<32x36xbf16>
    %c0_296 = arith.constant 0 : index
    %c0_297 = arith.constant 0 : index
    %254 = vector.load %arg61[%c0_296, %c0_297] : memref<64x134xbf16, #tpu.memory_space<vmem>>, vector<32x36xbf16>
    tpu.vector_store %arg61[%c0_296, %c0_297], %253 {strides = array<i32>} : memref<64x134xbf16, #tpu.memory_space<vmem>>, vector<32x36xbf16>,
    %cst_298 = arith.constant 0.000000e+00 : bf16
    %255 = vector.broadcast %cst_298 : bf16 to vector<32x2xbf16>
    %c0_299 = arith.constant 0 : index
    %c36 = arith.constant 36 : index
    %256 = vector.load %arg61[%c0_299, %c36] : memref<64x134xbf16, #tpu.memory_space<vmem>>, vector<32x2xbf16>
    tpu.vector_store %arg61[%c0_299, %c36], %255 {strides = array<i32>} : memref<64x134xbf16, #tpu.memory_space<vmem>>, vector<32x2xbf16>,
    %c0_300 = arith.constant 0 : index
    %c0_301 = arith.constant 0 : index
    %257 = vector.load %arg61[%c0_300, %c0_301] : memref<64x134xbf16, #tpu.memory_space<vmem>>, vector<32x36xbf16>
    %cst_302 = arith.constant dense<0.000000e+00> : vector<32x20xf32>
    %258 = tpu.matmul %257, %252, %cst_302 {dimension_numbers = #tpu.dot_dimension_numbers<[1], [0], [0], [1], [0, 0, 1, 1], [], []>} : vector<32x36xbf16>, vector<36x20xbf16>, vector<32x20xf32> -> vector<32x20xf32>
    %259 = arith.truncf %258 : vector<32x20xf32> to vector<32x20xbf16>
    %c0_303 = arith.constant 0 : index
    %c1_304 = arith.constant 1 : index
    %260 = vector.load %arg61[%c0_303, %c1_304] : memref<64x134xbf16, #tpu.memory_space<vmem>>, vector<32x36xbf16>
    %cst_305 = arith.constant dense<0.000000e+00> : vector<32x20xf32>
    %261 = tpu.matmul %260, %252, %cst_305 {dimension_numbers = #tpu.dot_dimension_numbers<[1], [0], [0], [1], [0, 0, 1, 1], [], []>} : vector<32x36xbf16>, vector<36x20xbf16>, vector<32x20xf32> -> vector<32x20xf32>
    %262 = arith.truncf %261 : vector<32x20xf32> to vector<32x20xbf16>
    %c0_306 = arith.constant 0 : index
    %c2_307 = arith.constant 2 : index
    %263 = vector.load %arg61[%c0_306, %c2_307] : memref<64x134xbf16, #tpu.memory_space<vmem>>, vector<32x36xbf16>
    %cst_308 = arith.constant dense<0.000000e+00> : vector<32x20xf32>
    %264 = tpu.matmul %263, %252, %cst_308 {dimension_numbers = #tpu.dot_dimension_numbers<[1], [0], [0], [1], [0, 0, 1, 1], [], []>} : vector<32x36xbf16>, vector<36x20xbf16>, vector<32x20xf32> -> vector<32x20xf32>
    %265 = arith.truncf %264 : vector<32x20xf32> to vector<32x20xbf16>
    %c0_309 = arith.constant 0 : index
    %c0_310 = arith.constant 0 : index
    %266 = vector.load %arg39[%c0_309, %c0_310] : memref<32x32xbf16, #tpu.memory_space<vmem>>, vector<32x32xbf16>
    %cst_311 = arith.constant dense<0.000000e+00> : vector<32x20xf32>
    %267 = tpu.matmul %266, %262, %cst_311 {dimension_numbers = #tpu.dot_dimension_numbers<[1], [0], [0], [1], [0, 0, 1, 1], [], []>} : vector<32x32xbf16>, vector<32x20xbf16>, vector<32x20xf32> -> vector<32x20xf32>
    %c0_312 = arith.constant 0 : index
    %c0_313 = arith.constant 0 : index
    %268 = vector.load %arg62[%c0_312, %c0_313] : memref<192x132xbf16, #tpu.memory_space<vmem>>, vector<32x20xbf16>
    tpu.vector_store %arg62[%c0_312, %c0_313], %259 {strides = array<i32>} : memref<192x132xbf16, #tpu.memory_space<vmem>>, vector<32x20xbf16>,
    %c32_314 = arith.constant 32 : index
    %c0_315 = arith.constant 0 : index
    %269 = vector.load %arg62[%c32_314, %c0_315] : memref<192x132xbf16, #tpu.memory_space<vmem>>, vector<32x20xbf16>
    tpu.vector_store %arg62[%c32_314, %c0_315], %262 {strides = array<i32>} : memref<192x132xbf16, #tpu.memory_space<vmem>>, vector<32x20xbf16>,
    %c64_316 = arith.constant 64 : index
    %c0_317 = arith.constant 0 : index
    %270 = vector.load %arg62[%c64_316, %c0_317] : memref<192x132xbf16, #tpu.memory_space<vmem>>, vector<32x20xbf16>
    tpu.vector_store %arg62[%c64_316, %c0_317], %265 {strides = array<i32>} : memref<192x132xbf16, #tpu.memory_space<vmem>>, vector<32x20xbf16>,
    %c0_318 = arith.constant 0 : index
    %c0_319 = arith.constant 0 : index
    %271 = vector.load %arg37[%c0_318, %c0_319] : memref<64x96xbf16, #tpu.memory_space<vmem>>, vector<64x96xbf16>
    %c0_320 = arith.constant 0 : index
    %c0_321 = arith.constant 0 : index
    %272 = vector.load %arg62[%c0_320, %c0_321] : memref<192x132xbf16, #tpu.memory_space<vmem>>, vector<96x20xbf16>
    %cst_322 = arith.constant dense<0.000000e+00> : vector<64x20xf32>
    %273 = tpu.matmul %271, %272, %cst_322 {dimension_numbers = #tpu.dot_dimension_numbers<[1], [0], [0], [1], [0, 0, 1, 1], [], []>} : vector<64x96xbf16>, vector<96x20xbf16>, vector<64x20xf32> -> vector<64x20xf32>
    %c0_323 = arith.constant 0 : index
    %c0_324 = arith.constant 0 : index
    %274 = vector.load %arg38[%c0_323, %c0_324] : memref<64x1xf32, #tpu.memory_space<vmem>>, vector<64x1xf32>
    %275 = vector.broadcast %274 : vector<64x1xf32> to vector<64x20xf32>
    %276 = arith.addf %273, %275 : vector<64x20xf32>
    %277 = vector.broadcast %251 : vector<1x20xf32> to vector<64x20xf32>
    %278 = arith.mulf %276, %277 : vector<64x20xf32>
    %cst_325 = arith.constant 0.000000e+00 : f32
    %279 = vector.broadcast %cst_325 : f32 to vector<64x20xf32>
    %280 = arith.maximumf %278, %279 : vector<64x20xf32>
    %281 = arith.truncf %280 : vector<64x20xf32> to vector<64x20xbf16>
    %c0_326 = arith.constant 0 : index
    %c1_327 = arith.constant 1 : index
    %282 = vector.load %arg61[%c0_326, %c1_327] : memref<64x134xbf16, #tpu.memory_space<vmem>>, vector<64x20xbf16>
    tpu.vector_store %arg61[%c0_326, %c1_327], %281 {strides = array<i32>} : memref<64x134xbf16, #tpu.memory_space<vmem>>, vector<64x20xbf16>,
    %cst_328 = arith.constant 0.000000e+00 : bf16
    %283 = vector.broadcast %cst_328 : bf16 to vector<64x1xbf16>
    %c0_329 = arith.constant 0 : index
    %c0_330 = arith.constant 0 : index
    %284 = vector.load %arg61[%c0_329, %c0_330] : memref<64x134xbf16, #tpu.memory_space<vmem>>, vector<64x1xbf16>
    tpu.vector_store %arg61[%c0_329, %c0_330], %283 {strides = array<i32>} : memref<64x134xbf16, #tpu.memory_space<vmem>>, vector<64x1xbf16>,
    %c0_331 = arith.constant 0 : index
    %c21 = arith.constant 21 : index
    %285 = vector.load %arg61[%c0_331, %c21] : memref<64x134xbf16, #tpu.memory_space<vmem>>, vector<64x1xbf16>
    tpu.vector_store %arg61[%c0_331, %c21], %283 {strides = array<i32>} : memref<64x134xbf16, #tpu.memory_space<vmem>>, vector<64x1xbf16>,
    %c0_332 = arith.constant 0 : index
    %c0_333 = arith.constant 0 : index
    %286 = vector.load %arg61[%c0_332, %c0_333] : memref<64x134xbf16, #tpu.memory_space<vmem>>, vector<64x20xbf16>
    %c0_334 = arith.constant 0 : index
    %c0_335 = arith.constant 0 : index
    %287 = vector.load %arg62[%c0_334, %c0_335] : memref<192x132xbf16, #tpu.memory_space<vmem>>, vector<64x20xbf16>
    tpu.vector_store %arg62[%c0_334, %c0_335], %286 {strides = array<i32>} : memref<192x132xbf16, #tpu.memory_space<vmem>>, vector<64x20xbf16>,
    %c0_336 = arith.constant 0 : index
    %c1_337 = arith.constant 1 : index
    %288 = vector.load %arg61[%c0_336, %c1_337] : memref<64x134xbf16, #tpu.memory_space<vmem>>, vector<64x20xbf16>
    %c64_338 = arith.constant 64 : index
    %c0_339 = arith.constant 0 : index
    %289 = vector.load %arg62[%c64_338, %c0_339] : memref<192x132xbf16, #tpu.memory_space<vmem>>, vector<64x20xbf16>
    tpu.vector_store %arg62[%c64_338, %c0_339], %288 {strides = array<i32>} : memref<192x132xbf16, #tpu.memory_space<vmem>>, vector<64x20xbf16>,
    %c0_340 = arith.constant 0 : index
    %c2_341 = arith.constant 2 : index
    %290 = vector.load %arg61[%c0_340, %c2_341] : memref<64x134xbf16, #tpu.memory_space<vmem>>, vector<64x20xbf16>
    %c128_342 = arith.constant 128 : index
    %c0_343 = arith.constant 0 : index
    %291 = vector.load %arg62[%c128_342, %c0_343] : memref<192x132xbf16, #tpu.memory_space<vmem>>, vector<64x20xbf16>
    tpu.vector_store %arg62[%c128_342, %c0_343], %290 {strides = array<i32>} : memref<192x132xbf16, #tpu.memory_space<vmem>>, vector<64x20xbf16>,
    %c0_344 = arith.constant 0 : index
    %c0_345 = arith.constant 0 : index
    %292 = vector.load %arg41[%c0_344, %c0_345] : memref<32x192xbf16, #tpu.memory_space<vmem>>, vector<32x192xbf16>
    %c0_346 = arith.constant 0 : index
    %c0_347 = arith.constant 0 : index
    %293 = vector.load %arg62[%c0_346, %c0_347] : memref<192x132xbf16, #tpu.memory_space<vmem>>, vector<192x20xbf16>
    %cst_348 = arith.constant dense<0.000000e+00> : vector<32x20xf32>
    %294 = tpu.matmul %292, %293, %cst_348 {dimension_numbers = #tpu.dot_dimension_numbers<[1], [0], [0], [1], [0, 0, 1, 1], [], []>} : vector<32x192xbf16>, vector<192x20xbf16>, vector<32x20xf32> -> vector<32x20xf32>
    %295 = arith.addf %294, %267 : vector<32x20xf32>
    %c0_349 = arith.constant 0 : index
    %c0_350 = arith.constant 0 : index
    %296 = vector.load %arg42[%c0_349, %c0_350] : memref<32x1xf32, #tpu.memory_space<vmem>>, vector<32x1xf32>
    %297 = vector.broadcast %296 : vector<32x1xf32> to vector<32x20xf32>
    %298 = arith.addf %295, %297 : vector<32x20xf32>
    %c0_351 = arith.constant 0 : index
    %c0_352 = arith.constant 0 : index
    %299 = vector.load %arg40[%c0_351, %c0_352] : memref<32x1xf32, #tpu.memory_space<vmem>>, vector<32x1xf32>
    %300 = vector.broadcast %299 : vector<32x1xf32> to vector<32x20xf32>
    %301 = arith.addf %298, %300 : vector<32x20xf32>
    %302 = vector.broadcast %251 : vector<1x20xf32> to vector<32x20xf32>
    %303 = arith.mulf %301, %302 : vector<32x20xf32>
    %cst_353 = arith.constant 0.000000e+00 : f32
    %304 = vector.broadcast %cst_353 : f32 to vector<32x20xf32>
    %305 = arith.maximumf %303, %304 : vector<32x20xf32>
    %306 = vector.extract_strided_slice %305 {offsets = [0, 1], sizes = [32, 8], strides = [1, 1]} : vector<32x20xf32> to vector<32x8xf32>
    %c0_354 = arith.constant 0 : index
    %c0_355 = arith.constant 0 : index
    %307 = vector.load %arg58[%c0_354, %c0_355] : memref<64x8xf32, #tpu.memory_space<vmem>>, vector<32x8xf32>
    tpu.vector_store %arg58[%c0_354, %c0_355], %306 {strides = array<i32>} : memref<64x8xf32, #tpu.memory_space<vmem>>, vector<32x8xf32>,
    %308 = vector.extract_strided_slice %305 {offsets = [0, 11], sizes = [32, 8], strides = [1, 1]} : vector<32x20xf32> to vector<32x8xf32>
    %c32_356 = arith.constant 32 : index
    %c0_357 = arith.constant 0 : index
    %309 = vector.load %arg58[%c32_356, %c0_357] : memref<64x8xf32, #tpu.memory_space<vmem>>, vector<32x8xf32>
    tpu.vector_store %arg58[%c32_356, %c0_357], %308 {strides = array<i32>} : memref<64x8xf32, #tpu.memory_space<vmem>>, vector<32x8xf32>,
    %c0_358 = arith.constant 0 : index
    %c0_359 = arith.constant 0 : index
    %310 = vector.load %arg6[%c0_358, %c0_359] : memref<1x12xf32, #tpu.memory_space<vmem>>, vector<1x12xf32>
    %c0_360 = arith.constant 0 : index
    %c0_361 = arith.constant 0 : index
    %311 = vector.load %arg11[%c0_360, %c0_361] : memref<20x12xbf16, #tpu.memory_space<vmem>>, vector<20x12xbf16>
    %312 = arith.truncf %305 : vector<32x20xf32> to vector<32x20xbf16>
    %c0_362 = arith.constant 0 : index
    %c0_363 = arith.constant 0 : index
    %313 = vector.load %arg61[%c0_362, %c0_363] : memref<64x134xbf16, #tpu.memory_space<vmem>>, vector<32x20xbf16>
    tpu.vector_store %arg61[%c0_362, %c0_363], %312 {strides = array<i32>} : memref<64x134xbf16, #tpu.memory_space<vmem>>, vector<32x20xbf16>,
    %cst_364 = arith.constant 0.000000e+00 : bf16
    %314 = vector.broadcast %cst_364 : bf16 to vector<32x2xbf16>
    %c0_365 = arith.constant 0 : index
    %c20 = arith.constant 20 : index
    %315 = vector.load %arg61[%c0_365, %c20] : memref<64x134xbf16, #tpu.memory_space<vmem>>, vector<32x2xbf16>
    tpu.vector_store %arg61[%c0_365, %c20], %314 {strides = array<i32>} : memref<64x134xbf16, #tpu.memory_space<vmem>>, vector<32x2xbf16>,
    %c0_366 = arith.constant 0 : index
    %c0_367 = arith.constant 0 : index
    %316 = vector.load %arg61[%c0_366, %c0_367] : memref<64x134xbf16, #tpu.memory_space<vmem>>, vector<32x20xbf16>
    %cst_368 = arith.constant dense<0.000000e+00> : vector<32x12xf32>
    %317 = tpu.matmul %316, %311, %cst_368 {dimension_numbers = #tpu.dot_dimension_numbers<[1], [0], [0], [1], [0, 0, 1, 1], [], []>} : vector<32x20xbf16>, vector<20x12xbf16>, vector<32x12xf32> -> vector<32x12xf32>
    %318 = arith.truncf %317 : vector<32x12xf32> to vector<32x12xbf16>
    %c0_369 = arith.constant 0 : index
    %c1_370 = arith.constant 1 : index
    %319 = vector.load %arg61[%c0_369, %c1_370] : memref<64x134xbf16, #tpu.memory_space<vmem>>, vector<32x20xbf16>
    %cst_371 = arith.constant dense<0.000000e+00> : vector<32x12xf32>
    %320 = tpu.matmul %319, %311, %cst_371 {dimension_numbers = #tpu.dot_dimension_numbers<[1], [0], [0], [1], [0, 0, 1, 1], [], []>} : vector<32x20xbf16>, vector<20x12xbf16>, vector<32x12xf32> -> vector<32x12xf32>
    %321 = arith.truncf %320 : vector<32x12xf32> to vector<32x12xbf16>
    %c0_372 = arith.constant 0 : index
    %c2_373 = arith.constant 2 : index
    %322 = vector.load %arg61[%c0_372, %c2_373] : memref<64x134xbf16, #tpu.memory_space<vmem>>, vector<32x20xbf16>
    %cst_374 = arith.constant dense<0.000000e+00> : vector<32x12xf32>
    %323 = tpu.matmul %322, %311, %cst_374 {dimension_numbers = #tpu.dot_dimension_numbers<[1], [0], [0], [1], [0, 0, 1, 1], [], []>} : vector<32x20xbf16>, vector<20x12xbf16>, vector<32x12xf32> -> vector<32x12xf32>
    %324 = arith.truncf %323 : vector<32x12xf32> to vector<32x12xbf16>
    %c0_375 = arith.constant 0 : index
    %c0_376 = arith.constant 0 : index
    %325 = vector.load %arg45[%c0_375, %c0_376] : memref<32x32xbf16, #tpu.memory_space<vmem>>, vector<32x32xbf16>
    %cst_377 = arith.constant dense<0.000000e+00> : vector<32x12xf32>
    %326 = tpu.matmul %325, %321, %cst_377 {dimension_numbers = #tpu.dot_dimension_numbers<[1], [0], [0], [1], [0, 0, 1, 1], [], []>} : vector<32x32xbf16>, vector<32x12xbf16>, vector<32x12xf32> -> vector<32x12xf32>
    %c0_378 = arith.constant 0 : index
    %c0_379 = arith.constant 0 : index
    %327 = vector.load %arg62[%c0_378, %c0_379] : memref<192x132xbf16, #tpu.memory_space<vmem>>, vector<32x12xbf16>
    tpu.vector_store %arg62[%c0_378, %c0_379], %318 {strides = array<i32>} : memref<192x132xbf16, #tpu.memory_space<vmem>>, vector<32x12xbf16>,
    %c32_380 = arith.constant 32 : index
    %c0_381 = arith.constant 0 : index
    %328 = vector.load %arg62[%c32_380, %c0_381] : memref<192x132xbf16, #tpu.memory_space<vmem>>, vector<32x12xbf16>
    tpu.vector_store %arg62[%c32_380, %c0_381], %321 {strides = array<i32>} : memref<192x132xbf16, #tpu.memory_space<vmem>>, vector<32x12xbf16>,
    %c64_382 = arith.constant 64 : index
    %c0_383 = arith.constant 0 : index
    %329 = vector.load %arg62[%c64_382, %c0_383] : memref<192x132xbf16, #tpu.memory_space<vmem>>, vector<32x12xbf16>
    tpu.vector_store %arg62[%c64_382, %c0_383], %324 {strides = array<i32>} : memref<192x132xbf16, #tpu.memory_space<vmem>>, vector<32x12xbf16>,
    %c0_384 = arith.constant 0 : index
    %c0_385 = arith.constant 0 : index
    %330 = vector.load %arg43[%c0_384, %c0_385] : memref<64x96xbf16, #tpu.memory_space<vmem>>, vector<64x96xbf16>
    %c0_386 = arith.constant 0 : index
    %c0_387 = arith.constant 0 : index
    %331 = vector.load %arg62[%c0_386, %c0_387] : memref<192x132xbf16, #tpu.memory_space<vmem>>, vector<96x12xbf16>
    %cst_388 = arith.constant dense<0.000000e+00> : vector<64x12xf32>
    %332 = tpu.matmul %330, %331, %cst_388 {dimension_numbers = #tpu.dot_dimension_numbers<[1], [0], [0], [1], [0, 0, 1, 1], [], []>} : vector<64x96xbf16>, vector<96x12xbf16>, vector<64x12xf32> -> vector<64x12xf32>
    %c0_389 = arith.constant 0 : index
    %c0_390 = arith.constant 0 : index
    %333 = vector.load %arg44[%c0_389, %c0_390] : memref<64x1xf32, #tpu.memory_space<vmem>>, vector<64x1xf32>
    %334 = vector.broadcast %333 : vector<64x1xf32> to vector<64x12xf32>
    %335 = arith.addf %332, %334 : vector<64x12xf32>
    %336 = vector.broadcast %310 : vector<1x12xf32> to vector<64x12xf32>
    %337 = arith.mulf %335, %336 : vector<64x12xf32>
    %cst_391 = arith.constant 0.000000e+00 : f32
    %338 = vector.broadcast %cst_391 : f32 to vector<64x12xf32>
    %339 = arith.maximumf %337, %338 : vector<64x12xf32>
    %340 = arith.truncf %339 : vector<64x12xf32> to vector<64x12xbf16>
    %c0_392 = arith.constant 0 : index
    %c1_393 = arith.constant 1 : index
    %341 = vector.load %arg61[%c0_392, %c1_393] : memref<64x134xbf16, #tpu.memory_space<vmem>>, vector<64x12xbf16>
    tpu.vector_store %arg61[%c0_392, %c1_393], %340 {strides = array<i32>} : memref<64x134xbf16, #tpu.memory_space<vmem>>, vector<64x12xbf16>,
    %cst_394 = arith.constant 0.000000e+00 : bf16
    %342 = vector.broadcast %cst_394 : bf16 to vector<64x1xbf16>
    %c0_395 = arith.constant 0 : index
    %c0_396 = arith.constant 0 : index
    %343 = vector.load %arg61[%c0_395, %c0_396] : memref<64x134xbf16, #tpu.memory_space<vmem>>, vector<64x1xbf16>
    tpu.vector_store %arg61[%c0_395, %c0_396], %342 {strides = array<i32>} : memref<64x134xbf16, #tpu.memory_space<vmem>>, vector<64x1xbf16>,
    %c0_397 = arith.constant 0 : index
    %c13 = arith.constant 13 : index
    %344 = vector.load %arg61[%c0_397, %c13] : memref<64x134xbf16, #tpu.memory_space<vmem>>, vector<64x1xbf16>
    tpu.vector_store %arg61[%c0_397, %c13], %342 {strides = array<i32>} : memref<64x134xbf16, #tpu.memory_space<vmem>>, vector<64x1xbf16>,
    %c0_398 = arith.constant 0 : index
    %c0_399 = arith.constant 0 : index
    %345 = vector.load %arg61[%c0_398, %c0_399] : memref<64x134xbf16, #tpu.memory_space<vmem>>, vector<64x12xbf16>
    %c0_400 = arith.constant 0 : index
    %c0_401 = arith.constant 0 : index
    %346 = vector.load %arg62[%c0_400, %c0_401] : memref<192x132xbf16, #tpu.memory_space<vmem>>, vector<64x12xbf16>
    tpu.vector_store %arg62[%c0_400, %c0_401], %345 {strides = array<i32>} : memref<192x132xbf16, #tpu.memory_space<vmem>>, vector<64x12xbf16>,
    %c0_402 = arith.constant 0 : index
    %c1_403 = arith.constant 1 : index
    %347 = vector.load %arg61[%c0_402, %c1_403] : memref<64x134xbf16, #tpu.memory_space<vmem>>, vector<64x12xbf16>
    %c64_404 = arith.constant 64 : index
    %c0_405 = arith.constant 0 : index
    %348 = vector.load %arg62[%c64_404, %c0_405] : memref<192x132xbf16, #tpu.memory_space<vmem>>, vector<64x12xbf16>
    tpu.vector_store %arg62[%c64_404, %c0_405], %347 {strides = array<i32>} : memref<192x132xbf16, #tpu.memory_space<vmem>>, vector<64x12xbf16>,
    %c0_406 = arith.constant 0 : index
    %c2_407 = arith.constant 2 : index
    %349 = vector.load %arg61[%c0_406, %c2_407] : memref<64x134xbf16, #tpu.memory_space<vmem>>, vector<64x12xbf16>
    %c128_408 = arith.constant 128 : index
    %c0_409 = arith.constant 0 : index
    %350 = vector.load %arg62[%c128_408, %c0_409] : memref<192x132xbf16, #tpu.memory_space<vmem>>, vector<64x12xbf16>
    tpu.vector_store %arg62[%c128_408, %c0_409], %349 {strides = array<i32>} : memref<192x132xbf16, #tpu.memory_space<vmem>>, vector<64x12xbf16>,
    %c0_410 = arith.constant 0 : index
    %c0_411 = arith.constant 0 : index
    %351 = vector.load %arg47[%c0_410, %c0_411] : memref<32x192xbf16, #tpu.memory_space<vmem>>, vector<32x192xbf16>
    %c0_412 = arith.constant 0 : index
    %c0_413 = arith.constant 0 : index
    %352 = vector.load %arg62[%c0_412, %c0_413] : memref<192x132xbf16, #tpu.memory_space<vmem>>, vector<192x12xbf16>
    %cst_414 = arith.constant dense<0.000000e+00> : vector<32x12xf32>
    %353 = tpu.matmul %351, %352, %cst_414 {dimension_numbers = #tpu.dot_dimension_numbers<[1], [0], [0], [1], [0, 0, 1, 1], [], []>} : vector<32x192xbf16>, vector<192x12xbf16>, vector<32x12xf32> -> vector<32x12xf32>
    %354 = arith.addf %353, %326 : vector<32x12xf32>
    %c0_415 = arith.constant 0 : index
    %c0_416 = arith.constant 0 : index
    %355 = vector.load %arg48[%c0_415, %c0_416] : memref<32x1xf32, #tpu.memory_space<vmem>>, vector<32x1xf32>
    %356 = vector.broadcast %355 : vector<32x1xf32> to vector<32x12xf32>
    %357 = arith.addf %354, %356 : vector<32x12xf32>
    %c0_417 = arith.constant 0 : index
    %c0_418 = arith.constant 0 : index
    %358 = vector.load %arg46[%c0_417, %c0_418] : memref<32x1xf32, #tpu.memory_space<vmem>>, vector<32x1xf32>
    %359 = vector.broadcast %358 : vector<32x1xf32> to vector<32x12xf32>
    %360 = arith.addf %357, %359 : vector<32x12xf32>
    %361 = vector.broadcast %310 : vector<1x12xf32> to vector<32x12xf32>
    %362 = arith.mulf %360, %361 : vector<32x12xf32>
    %cst_419 = arith.constant 0.000000e+00 : f32
    %363 = vector.broadcast %cst_419 : f32 to vector<32x12xf32>
    %364 = arith.maximumf %362, %363 : vector<32x12xf32>
    %365 = vector.extract_strided_slice %364 {offsets = [0, 1], sizes = [32, 4], strides = [1, 1]} : vector<32x12xf32> to vector<32x4xf32>
    %c0_420 = arith.constant 0 : index
    %c0_421 = arith.constant 0 : index
    %366 = vector.load %arg59[%c0_420, %c0_421] : memref<64x4xf32, #tpu.memory_space<vmem>>, vector<32x4xf32>
    tpu.vector_store %arg59[%c0_420, %c0_421], %365 {strides = array<i32>} : memref<64x4xf32, #tpu.memory_space<vmem>>, vector<32x4xf32>,
    %367 = vector.extract_strided_slice %364 {offsets = [0, 7], sizes = [32, 4], strides = [1, 1]} : vector<32x12xf32> to vector<32x4xf32>
    %c32_422 = arith.constant 32 : index
    %c0_423 = arith.constant 0 : index
    %368 = vector.load %arg59[%c32_422, %c0_423] : memref<64x4xf32, #tpu.memory_space<vmem>>, vector<32x4xf32>
    tpu.vector_store %arg59[%c32_422, %c0_423], %367 {strides = array<i32>} : memref<64x4xf32, #tpu.memory_space<vmem>>, vector<32x4xf32>,
    %c0_424 = arith.constant 0 : index
    %c0_425 = arith.constant 0 : index
    %369 = vector.load %arg7[%c0_424, %c0_425] : memref<1x8xf32, #tpu.memory_space<vmem>>, vector<1x8xf32>
    %c0_426 = arith.constant 0 : index
    %c0_427 = arith.constant 0 : index
    %370 = vector.load %arg12[%c0_426, %c0_427] : memref<12x8xbf16, #tpu.memory_space<vmem>>, vector<12x8xbf16>
    %371 = arith.truncf %364 : vector<32x12xf32> to vector<32x12xbf16>
    %c0_428 = arith.constant 0 : index
    %c0_429 = arith.constant 0 : index
    %372 = vector.load %arg61[%c0_428, %c0_429] : memref<64x134xbf16, #tpu.memory_space<vmem>>, vector<32x12xbf16>
    tpu.vector_store %arg61[%c0_428, %c0_429], %371 {strides = array<i32>} : memref<64x134xbf16, #tpu.memory_space<vmem>>, vector<32x12xbf16>,
    %cst_430 = arith.constant 0.000000e+00 : bf16
    %373 = vector.broadcast %cst_430 : bf16 to vector<32x2xbf16>
    %c0_431 = arith.constant 0 : index
    %c12 = arith.constant 12 : index
    %374 = vector.load %arg61[%c0_431, %c12] : memref<64x134xbf16, #tpu.memory_space<vmem>>, vector<32x2xbf16>
    tpu.vector_store %arg61[%c0_431, %c12], %373 {strides = array<i32>} : memref<64x134xbf16, #tpu.memory_space<vmem>>, vector<32x2xbf16>,
    %c0_432 = arith.constant 0 : index
    %c0_433 = arith.constant 0 : index
    %375 = vector.load %arg61[%c0_432, %c0_433] : memref<64x134xbf16, #tpu.memory_space<vmem>>, vector<32x12xbf16>
    %cst_434 = arith.constant dense<0.000000e+00> : vector<32x8xf32>
    %376 = tpu.matmul %375, %370, %cst_434 {dimension_numbers = #tpu.dot_dimension_numbers<[1], [0], [0], [1], [0, 0, 1, 1], [], []>} : vector<32x12xbf16>, vector<12x8xbf16>, vector<32x8xf32> -> vector<32x8xf32>
    %377 = arith.truncf %376 : vector<32x8xf32> to vector<32x8xbf16>
    %c0_435 = arith.constant 0 : index
    %c1_436 = arith.constant 1 : index
    %378 = vector.load %arg61[%c0_435, %c1_436] : memref<64x134xbf16, #tpu.memory_space<vmem>>, vector<32x12xbf16>
    %cst_437 = arith.constant dense<0.000000e+00> : vector<32x8xf32>
    %379 = tpu.matmul %378, %370, %cst_437 {dimension_numbers = #tpu.dot_dimension_numbers<[1], [0], [0], [1], [0, 0, 1, 1], [], []>} : vector<32x12xbf16>, vector<12x8xbf16>, vector<32x8xf32> -> vector<32x8xf32>
    %380 = arith.truncf %379 : vector<32x8xf32> to vector<32x8xbf16>
    %c0_438 = arith.constant 0 : index
    %c2_439 = arith.constant 2 : index
    %381 = vector.load %arg61[%c0_438, %c2_439] : memref<64x134xbf16, #tpu.memory_space<vmem>>, vector<32x12xbf16>
    %cst_440 = arith.constant dense<0.000000e+00> : vector<32x8xf32>
    %382 = tpu.matmul %381, %370, %cst_440 {dimension_numbers = #tpu.dot_dimension_numbers<[1], [0], [0], [1], [0, 0, 1, 1], [], []>} : vector<32x12xbf16>, vector<12x8xbf16>, vector<32x8xf32> -> vector<32x8xf32>
    %383 = arith.truncf %382 : vector<32x8xf32> to vector<32x8xbf16>
    %c0_441 = arith.constant 0 : index
    %c0_442 = arith.constant 0 : index
    %384 = vector.load %arg51[%c0_441, %c0_442] : memref<32x32xbf16, #tpu.memory_space<vmem>>, vector<32x32xbf16>
    %cst_443 = arith.constant dense<0.000000e+00> : vector<32x8xf32>
    %385 = tpu.matmul %384, %380, %cst_443 {dimension_numbers = #tpu.dot_dimension_numbers<[1], [0], [0], [1], [0, 0, 1, 1], [], []>} : vector<32x32xbf16>, vector<32x8xbf16>, vector<32x8xf32> -> vector<32x8xf32>
    %c0_444 = arith.constant 0 : index
    %c0_445 = arith.constant 0 : index
    %386 = vector.load %arg62[%c0_444, %c0_445] : memref<192x132xbf16, #tpu.memory_space<vmem>>, vector<32x8xbf16>
    tpu.vector_store %arg62[%c0_444, %c0_445], %377 {strides = array<i32>} : memref<192x132xbf16, #tpu.memory_space<vmem>>, vector<32x8xbf16>,
    %c32_446 = arith.constant 32 : index
    %c0_447 = arith.constant 0 : index
    %387 = vector.load %arg62[%c32_446, %c0_447] : memref<192x132xbf16, #tpu.memory_space<vmem>>, vector<32x8xbf16>
    tpu.vector_store %arg62[%c32_446, %c0_447], %380 {strides = array<i32>} : memref<192x132xbf16, #tpu.memory_space<vmem>>, vector<32x8xbf16>,
    %c64_448 = arith.constant 64 : index
    %c0_449 = arith.constant 0 : index
    %388 = vector.load %arg62[%c64_448, %c0_449] : memref<192x132xbf16, #tpu.memory_space<vmem>>, vector<32x8xbf16>
    tpu.vector_store %arg62[%c64_448, %c0_449], %383 {strides = array<i32>} : memref<192x132xbf16, #tpu.memory_space<vmem>>, vector<32x8xbf16>,
    %c0_450 = arith.constant 0 : index
    %c0_451 = arith.constant 0 : index
    %389 = vector.load %arg49[%c0_450, %c0_451] : memref<64x96xbf16, #tpu.memory_space<vmem>>, vector<64x96xbf16>
    %c0_452 = arith.constant 0 : index
    %c0_453 = arith.constant 0 : index
    %390 = vector.load %arg62[%c0_452, %c0_453] : memref<192x132xbf16, #tpu.memory_space<vmem>>, vector<96x8xbf16>
    %cst_454 = arith.constant dense<0.000000e+00> : vector<64x8xf32>
    %391 = tpu.matmul %389, %390, %cst_454 {dimension_numbers = #tpu.dot_dimension_numbers<[1], [0], [0], [1], [0, 0, 1, 1], [], []>} : vector<64x96xbf16>, vector<96x8xbf16>, vector<64x8xf32> -> vector<64x8xf32>
    %c0_455 = arith.constant 0 : index
    %c0_456 = arith.constant 0 : index
    %392 = vector.load %arg50[%c0_455, %c0_456] : memref<64x1xf32, #tpu.memory_space<vmem>>, vector<64x1xf32>
    %393 = vector.broadcast %392 : vector<64x1xf32> to vector<64x8xf32>
    %394 = arith.addf %391, %393 : vector<64x8xf32>
    %395 = vector.broadcast %369 : vector<1x8xf32> to vector<64x8xf32>
    %396 = arith.mulf %394, %395 : vector<64x8xf32>
    %cst_457 = arith.constant 0.000000e+00 : f32
    %397 = vector.broadcast %cst_457 : f32 to vector<64x8xf32>
    %398 = arith.maximumf %396, %397 : vector<64x8xf32>
    %399 = arith.truncf %398 : vector<64x8xf32> to vector<64x8xbf16>
    %c0_458 = arith.constant 0 : index
    %c1_459 = arith.constant 1 : index
    %400 = vector.load %arg61[%c0_458, %c1_459] : memref<64x134xbf16, #tpu.memory_space<vmem>>, vector<64x8xbf16>
    tpu.vector_store %arg61[%c0_458, %c1_459], %399 {strides = array<i32>} : memref<64x134xbf16, #tpu.memory_space<vmem>>, vector<64x8xbf16>,
    %cst_460 = arith.constant 0.000000e+00 : bf16
    %401 = vector.broadcast %cst_460 : bf16 to vector<64x1xbf16>
    %c0_461 = arith.constant 0 : index
    %c0_462 = arith.constant 0 : index
    %402 = vector.load %arg61[%c0_461, %c0_462] : memref<64x134xbf16, #tpu.memory_space<vmem>>, vector<64x1xbf16>
    tpu.vector_store %arg61[%c0_461, %c0_462], %401 {strides = array<i32>} : memref<64x134xbf16, #tpu.memory_space<vmem>>, vector<64x1xbf16>,
    %c0_463 = arith.constant 0 : index
    %c9 = arith.constant 9 : index
    %403 = vector.load %arg61[%c0_463, %c9] : memref<64x134xbf16, #tpu.memory_space<vmem>>, vector<64x1xbf16>
    tpu.vector_store %arg61[%c0_463, %c9], %401 {strides = array<i32>} : memref<64x134xbf16, #tpu.memory_space<vmem>>, vector<64x1xbf16>,
    %c0_464 = arith.constant 0 : index
    %c0_465 = arith.constant 0 : index
    %404 = vector.load %arg61[%c0_464, %c0_465] : memref<64x134xbf16, #tpu.memory_space<vmem>>, vector<64x8xbf16>
    %c0_466 = arith.constant 0 : index
    %c0_467 = arith.constant 0 : index
    %405 = vector.load %arg62[%c0_466, %c0_467] : memref<192x132xbf16, #tpu.memory_space<vmem>>, vector<64x8xbf16>
    tpu.vector_store %arg62[%c0_466, %c0_467], %404 {strides = array<i32>} : memref<192x132xbf16, #tpu.memory_space<vmem>>, vector<64x8xbf16>,
    %c0_468 = arith.constant 0 : index
    %c1_469 = arith.constant 1 : index
    %406 = vector.load %arg61[%c0_468, %c1_469] : memref<64x134xbf16, #tpu.memory_space<vmem>>, vector<64x8xbf16>
    %c64_470 = arith.constant 64 : index
    %c0_471 = arith.constant 0 : index
    %407 = vector.load %arg62[%c64_470, %c0_471] : memref<192x132xbf16, #tpu.memory_space<vmem>>, vector<64x8xbf16>
    tpu.vector_store %arg62[%c64_470, %c0_471], %406 {strides = array<i32>} : memref<192x132xbf16, #tpu.memory_space<vmem>>, vector<64x8xbf16>,
    %c0_472 = arith.constant 0 : index
    %c2_473 = arith.constant 2 : index
    %408 = vector.load %arg61[%c0_472, %c2_473] : memref<64x134xbf16, #tpu.memory_space<vmem>>, vector<64x8xbf16>
    %c128_474 = arith.constant 128 : index
    %c0_475 = arith.constant 0 : index
    %409 = vector.load %arg62[%c128_474, %c0_475] : memref<192x132xbf16, #tpu.memory_space<vmem>>, vector<64x8xbf16>
    tpu.vector_store %arg62[%c128_474, %c0_475], %408 {strides = array<i32>} : memref<192x132xbf16, #tpu.memory_space<vmem>>, vector<64x8xbf16>,
    %c0_476 = arith.constant 0 : index
    %c0_477 = arith.constant 0 : index
    %410 = vector.load %arg53[%c0_476, %c0_477] : memref<32x192xbf16, #tpu.memory_space<vmem>>, vector<32x192xbf16>
    %c0_478 = arith.constant 0 : index
    %c0_479 = arith.constant 0 : index
    %411 = vector.load %arg62[%c0_478, %c0_479] : memref<192x132xbf16, #tpu.memory_space<vmem>>, vector<192x8xbf16>
    %cst_480 = arith.constant dense<0.000000e+00> : vector<32x8xf32>
    %412 = tpu.matmul %410, %411, %cst_480 {dimension_numbers = #tpu.dot_dimension_numbers<[1], [0], [0], [1], [0, 0, 1, 1], [], []>} : vector<32x192xbf16>, vector<192x8xbf16>, vector<32x8xf32> -> vector<32x8xf32>
    %413 = arith.addf %412, %385 : vector<32x8xf32>
    %c0_481 = arith.constant 0 : index
    %c0_482 = arith.constant 0 : index
    %414 = vector.load %arg54[%c0_481, %c0_482] : memref<32x1xf32, #tpu.memory_space<vmem>>, vector<32x1xf32>
    %415 = vector.broadcast %414 : vector<32x1xf32> to vector<32x8xf32>
    %416 = arith.addf %413, %415 : vector<32x8xf32>
    %c0_483 = arith.constant 0 : index
    %c0_484 = arith.constant 0 : index
    %417 = vector.load %arg52[%c0_483, %c0_484] : memref<32x1xf32, #tpu.memory_space<vmem>>, vector<32x1xf32>
    %418 = vector.broadcast %417 : vector<32x1xf32> to vector<32x8xf32>
    %419 = arith.addf %416, %418 : vector<32x8xf32>
    %420 = vector.broadcast %369 : vector<1x8xf32> to vector<32x8xf32>
    %421 = arith.mulf %419, %420 : vector<32x8xf32>
    %cst_485 = arith.constant 0.000000e+00 : f32
    %422 = vector.broadcast %cst_485 : f32 to vector<32x8xf32>
    %423 = arith.maximumf %421, %422 : vector<32x8xf32>
    %424 = vector.extract_strided_slice %423 {offsets = [0, 1], sizes = [32, 2], strides = [1, 1]} : vector<32x8xf32> to vector<32x2xf32>
    %c0_486 = arith.constant 0 : index
    %c0_487 = arith.constant 0 : index
    %425 = vector.load %arg60[%c0_486, %c0_487] : memref<64x2xf32, #tpu.memory_space<vmem>>, vector<32x2xf32>
    tpu.vector_store %arg60[%c0_486, %c0_487], %424 {strides = array<i32>} : memref<64x2xf32, #tpu.memory_space<vmem>>, vector<32x2xf32>,
    %426 = vector.extract_strided_slice %423 {offsets = [0, 5], sizes = [32, 2], strides = [1, 1]} : vector<32x8xf32> to vector<32x2xf32>
    %c32_488 = arith.constant 32 : index
    %c0_489 = arith.constant 0 : index
    %427 = vector.load %arg60[%c32_488, %c0_489] : memref<64x2xf32, #tpu.memory_space<vmem>>, vector<32x2xf32>
    tpu.vector_store %arg60[%c32_488, %c0_489], %426 {strides = array<i32>} : memref<64x2xf32, #tpu.memory_space<vmem>>, vector<32x2xf32>,
    return
  }
  func.func @transform_0(%arg0: i32) -> (i32, i32) {
    %c0_i32 = arith.constant 0 : i32
    %c0_i32_0 = arith.constant 0 : i32
    %c0_i32_1 = arith.constant 0 : i32
    return %c0_i32, %c0_i32_0 : i32, i32
  }
  func.func @transform_1(%arg0: i32) -> (i32, i32) {
    %c0_i32 = arith.constant 0 : i32
    %c0_i32_0 = arith.constant 0 : i32
    %c0_i32_1 = arith.constant 0 : i32
    return %c0_i32, %c0_i32_0 : i32, i32
  }
  func.func @transform_2(%arg0: i32) -> (i32, i32) {
    %c0_i32 = arith.constant 0 : i32
    %c0_i32_0 = arith.constant 0 : i32
    %c0_i32_1 = arith.constant 0 : i32
    return %c0_i32, %c0_i32_0 : i32, i32
  }
  func.func @transform_3(%arg0: i32) -> (i32, i32) {
    %c0_i32 = arith.constant 0 : i32
    %c0_i32_0 = arith.constant 0 : i32
    %c0_i32_1 = arith.constant 0 : i32
    return %c0_i32, %c0_i32_0 : i32, i32
  }
  func.func @transform_4(%arg0: i32) -> (i32, i32) {
    %c0_i32 = arith.constant 0 : i32
    %c0_i32_0 = arith.constant 0 : i32
    %c0_i32_1 = arith.constant 0 : i32
    return %c0_i32, %c0_i32_0 : i32, i32
  }
  func.func @transform_5(%arg0: i32) -> (i32, i32) {
    %c0_i32 = arith.constant 0 : i32
    %c0_i32_0 = arith.constant 0 : i32
    %c0_i32_1 = arith.constant 0 : i32
    return %c0_i32, %c0_i32_0 : i32, i32
  }
  func.func @transform_6(%arg0: i32) -> (i32, i32) {
    %c0_i32 = arith.constant 0 : i32
    %c0_i32_0 = arith.constant 0 : i32
    %c0_i32_1 = arith.constant 0 : i32
    return %c0_i32, %c0_i32_0 : i32, i32
  }
  func.func @transform_7(%arg0: i32) -> (i32, i32) {
    %c0_i32 = arith.constant 0 : i32
    %c0_i32_0 = arith.constant 0 : i32
    %c0_i32_1 = arith.constant 0 : i32
    return %c0_i32, %c0_i32_0 : i32, i32
  }
  func.func @transform_8(%arg0: i32) -> (i32, i32) {
    %c0_i32 = arith.constant 0 : i32
    %c0_i32_0 = arith.constant 0 : i32
    %c0_i32_1 = arith.constant 0 : i32
    return %c0_i32, %c0_i32_0 : i32, i32
  }
  func.func @transform_9(%arg0: i32) -> (i32, i32) {
    %c0_i32 = arith.constant 0 : i32
    %c0_i32_0 = arith.constant 0 : i32
    %c0_i32_1 = arith.constant 0 : i32
    return %c0_i32, %c0_i32_0 : i32, i32
  }
  func.func @transform_10(%arg0: i32) -> (i32, i32) {
    %c0_i32 = arith.constant 0 : i32
    %c0_i32_0 = arith.constant 0 : i32
    %c0_i32_1 = arith.constant 0 : i32
    return %c0_i32, %c0_i32_0 : i32, i32
  }
  func.func @transform_11(%arg0: i32) -> (i32, i32) {
    %c0_i32 = arith.constant 0 : i32
    %c0_i32_0 = arith.constant 0 : i32
    %c0_i32_1 = arith.constant 0 : i32
    return %c0_i32, %c0_i32_0 : i32, i32
  }
  func.func @transform_12(%arg0: i32) -> (i32, i32) {
    %c0_i32 = arith.constant 0 : i32
    %c0_i32_0 = arith.constant 0 : i32
    %c0_i32_1 = arith.constant 0 : i32
    return %c0_i32, %c0_i32_0 : i32, i32
  }
  func.func @transform_13(%arg0: i32) -> (i32, i32) {
    %c0_i32 = arith.constant 0 : i32
    %c0_i32_0 = arith.constant 0 : i32
    %c0_i32_1 = arith.constant 0 : i32
    return %c0_i32, %c0_i32_0 : i32, i32
  }
  func.func @transform_14(%arg0: i32) -> (i32, i32) {
    %c0_i32 = arith.constant 0 : i32
    %c0_i32_0 = arith.constant 0 : i32
    %c0_i32_1 = arith.constant 0 : i32
    return %c0_i32, %c0_i32_0 : i32, i32
  }
  func.func @transform_15(%arg0: i32) -> (i32, i32) {
    %c0_i32 = arith.constant 0 : i32
    %c0_i32_0 = arith.constant 0 : i32
    %c0_i32_1 = arith.constant 0 : i32
    return %c0_i32, %c0_i32_0 : i32, i32
  }
  func.func @transform_16(%arg0: i32) -> (i32, i32) {
    %c0_i32 = arith.constant 0 : i32
    %c0_i32_0 = arith.constant 0 : i32
    %c0_i32_1 = arith.constant 0 : i32
    return %c0_i32, %c0_i32_0 : i32, i32
  }
  func.func @transform_17(%arg0: i32) -> (i32, i32) {
    %c0_i32 = arith.constant 0 : i32
    %c0_i32_0 = arith.constant 0 : i32
    %c0_i32_1 = arith.constant 0 : i32
    return %c0_i32, %c0_i32_0 : i32, i32
  }
  func.func @transform_18(%arg0: i32) -> (i32, i32) {
    %c0_i32 = arith.constant 0 : i32
    %c0_i32_0 = arith.constant 0 : i32
    %c0_i32_1 = arith.constant 0 : i32
    return %c0_i32, %c0_i32_0 : i32, i32
  }
  func.func @transform_19(%arg0: i32) -> (i32, i32) {
    %c0_i32 = arith.constant 0 : i32
    %c0_i32_0 = arith.constant 0 : i32
    %c0_i32_1 = arith.constant 0 : i32
    return %c0_i32, %c0_i32_0 : i32, i32
  }
  func.func @transform_20(%arg0: i32) -> (i32, i32) {
    %c0_i32 = arith.constant 0 : i32
    %c0_i32_0 = arith.constant 0 : i32
    %c0_i32_1 = arith.constant 0 : i32
    return %c0_i32, %c0_i32_0 : i32, i32
  }
  func.func @transform_21(%arg0: i32) -> (i32, i32) {
    %c0_i32 = arith.constant 0 : i32
    %c0_i32_0 = arith.constant 0 : i32
    %c0_i32_1 = arith.constant 0 : i32
    return %c0_i32, %c0_i32_0 : i32, i32
  }
  func.func @transform_22(%arg0: i32) -> (i32, i32) {
    %c0_i32 = arith.constant 0 : i32
    %c0_i32_0 = arith.constant 0 : i32
    %c0_i32_1 = arith.constant 0 : i32
    return %c0_i32, %c0_i32_0 : i32, i32
  }
  func.func @transform_23(%arg0: i32) -> (i32, i32) {
    %c0_i32 = arith.constant 0 : i32
    %c0_i32_0 = arith.constant 0 : i32
    %c0_i32_1 = arith.constant 0 : i32
    return %c0_i32, %c0_i32_0 : i32, i32
  }
  func.func @transform_24(%arg0: i32) -> (i32, i32) {
    %c0_i32 = arith.constant 0 : i32
    %c0_i32_0 = arith.constant 0 : i32
    %c0_i32_1 = arith.constant 0 : i32
    return %c0_i32, %c0_i32_0 : i32, i32
  }
  func.func @transform_25(%arg0: i32) -> (i32, i32) {
    %c0_i32 = arith.constant 0 : i32
    %c0_i32_0 = arith.constant 0 : i32
    %c0_i32_1 = arith.constant 0 : i32
    return %c0_i32, %c0_i32_0 : i32, i32
  }
  func.func @transform_26(%arg0: i32) -> (i32, i32) {
    %c0_i32 = arith.constant 0 : i32
    %c0_i32_0 = arith.constant 0 : i32
    %c0_i32_1 = arith.constant 0 : i32
    return %c0_i32, %c0_i32_0 : i32, i32
  }
  func.func @transform_27(%arg0: i32) -> (i32, i32) {
    %c0_i32 = arith.constant 0 : i32
    %c0_i32_0 = arith.constant 0 : i32
    %c0_i32_1 = arith.constant 0 : i32
    return %c0_i32, %c0_i32_0 : i32, i32
  }
  func.func @transform_28(%arg0: i32) -> (i32, i32) {
    %c0_i32 = arith.constant 0 : i32
    %c0_i32_0 = arith.constant 0 : i32
    %c0_i32_1 = arith.constant 0 : i32
    return %c0_i32, %c0_i32_0 : i32, i32
  }
  func.func @transform_29(%arg0: i32) -> (i32, i32) {
    %c0_i32 = arith.constant 0 : i32
    %c0_i32_0 = arith.constant 0 : i32
    %c0_i32_1 = arith.constant 0 : i32
    return %c0_i32, %c0_i32_0 : i32, i32
  }
  func.func @transform_30(%arg0: i32) -> (i32, i32) {
    %c0_i32 = arith.constant 0 : i32
    %c0_i32_0 = arith.constant 0 : i32
    %c0_i32_1 = arith.constant 0 : i32
    return %c0_i32, %c0_i32_0 : i32, i32
  }
  func.func @transform_31(%arg0: i32) -> (i32, i32) {
    %c0_i32 = arith.constant 0 : i32
    %c0_i32_0 = arith.constant 0 : i32
    %c0_i32_1 = arith.constant 0 : i32
    return %c0_i32, %c0_i32_0 : i32, i32
  }
  func.func @transform_32(%arg0: i32) -> (i32, i32) {
    %c0_i32 = arith.constant 0 : i32
    %c0_i32_0 = arith.constant 0 : i32
    %c0_i32_1 = arith.constant 0 : i32
    return %c0_i32, %c0_i32_0 : i32, i32
  }
  func.func @transform_33(%arg0: i32) -> (i32, i32) {
    %c0_i32 = arith.constant 0 : i32
    %c0_i32_0 = arith.constant 0 : i32
    %c0_i32_1 = arith.constant 0 : i32
    return %c0_i32, %c0_i32_0 : i32, i32
  }
  func.func @transform_34(%arg0: i32) -> (i32, i32) {
    %c0_i32 = arith.constant 0 : i32
    %c0_i32_0 = arith.constant 0 : i32
    %c0_i32_1 = arith.constant 0 : i32
    return %c0_i32, %c0_i32_0 : i32, i32
  }
  func.func @transform_35(%arg0: i32) -> (i32, i32) {
    %c0_i32 = arith.constant 0 : i32
    %c0_i32_0 = arith.constant 0 : i32
    %c0_i32_1 = arith.constant 0 : i32
    return %c0_i32, %c0_i32_0 : i32, i32
  }
  func.func @transform_36(%arg0: i32) -> (i32, i32) {
    %c0_i32 = arith.constant 0 : i32
    %c0_i32_0 = arith.constant 0 : i32
    %c0_i32_1 = arith.constant 0 : i32
    return %c0_i32, %c0_i32_0 : i32, i32
  }
  func.func @transform_37(%arg0: i32) -> (i32, i32) {
    %c0_i32 = arith.constant 0 : i32
    %c0_i32_0 = arith.constant 0 : i32
    %c0_i32_1 = arith.constant 0 : i32
    return %c0_i32, %c0_i32_0 : i32, i32
  }
  func.func @transform_38(%arg0: i32) -> (i32, i32) {
    %c0_i32 = arith.constant 0 : i32
    %c0_i32_0 = arith.constant 0 : i32
    %c0_i32_1 = arith.constant 0 : i32
    return %c0_i32, %c0_i32_0 : i32, i32
  }
  func.func @transform_39(%arg0: i32) -> (i32, i32) {
    %c0_i32 = arith.constant 0 : i32
    %c0_i32_0 = arith.constant 0 : i32
    %c0_i32_1 = arith.constant 0 : i32
    return %c0_i32, %c0_i32_0 : i32, i32
  }
  func.func @transform_40(%arg0: i32) -> (i32, i32) {
    %c0_i32 = arith.constant 0 : i32
    %c0_i32_0 = arith.constant 0 : i32
    %c0_i32_1 = arith.constant 0 : i32
    return %c0_i32, %c0_i32_0 : i32, i32
  }
  func.func @transform_41(%arg0: i32) -> (i32, i32) {
    %c0_i32 = arith.constant 0 : i32
    %c0_i32_0 = arith.constant 0 : i32
    %c0_i32_1 = arith.constant 0 : i32
    return %c0_i32, %c0_i32_0 : i32, i32
  }
  func.func @transform_42(%arg0: i32) -> (i32, i32) {
    %c0_i32 = arith.constant 0 : i32
    %c0_i32_0 = arith.constant 0 : i32
    %c0_i32_1 = arith.constant 0 : i32
    return %c0_i32, %c0_i32_0 : i32, i32
  }
  func.func @transform_43(%arg0: i32) -> (i32, i32) {
    %c0_i32 = arith.constant 0 : i32
    %c0_i32_0 = arith.constant 0 : i32
    %c0_i32_1 = arith.constant 0 : i32
    return %c0_i32, %c0_i32_0 : i32, i32
  }
  func.func @transform_44(%arg0: i32) -> (i32, i32) {
    %c0_i32 = arith.constant 0 : i32
    %c0_i32_0 = arith.constant 0 : i32
    %c0_i32_1 = arith.constant 0 : i32
    return %c0_i32, %c0_i32_0 : i32, i32
  }
  func.func @transform_45(%arg0: i32) -> (i32, i32) {
    %c0_i32 = arith.constant 0 : i32
    %c0_i32_0 = arith.constant 0 : i32
    %c0_i32_1 = arith.constant 0 : i32
    return %c0_i32, %c0_i32_0 : i32, i32
  }
  func.func @transform_46(%arg0: i32) -> (i32, i32) {
    %c0_i32 = arith.constant 0 : i32
    %c0_i32_0 = arith.constant 0 : i32
    %c0_i32_1 = arith.constant 0 : i32
    return %c0_i32, %c0_i32_0 : i32, i32
  }
  func.func @transform_47(%arg0: i32) -> (i32, i32) {
    %c0_i32 = arith.constant 0 : i32
    %c0_i32_0 = arith.constant 0 : i32
    %c0_i32_1 = arith.constant 0 : i32
    return %c0_i32, %c0_i32_0 : i32, i32
  }
  func.func @transform_48(%arg0: i32) -> (i32, i32) {
    %c0_i32 = arith.constant 0 : i32
    %c0_i32_0 = arith.constant 0 : i32
    %c0_i32_1 = arith.constant 0 : i32
    return %c0_i32, %c0_i32_0 : i32, i32
  }
  func.func @transform_49(%arg0: i32) -> (i32, i32) {
    %c0_i32 = arith.constant 0 : i32
    %c0_i32_0 = arith.constant 0 : i32
    %c0_i32_1 = arith.constant 0 : i32
    return %c0_i32, %c0_i32_0 : i32, i32
  }
  func.func @transform_50(%arg0: i32) -> (i32, i32) {
    %c0_i32 = arith.constant 0 : i32
    %c0_i32_0 = arith.constant 0 : i32
    %c0_i32_1 = arith.constant 0 : i32
    return %c0_i32, %c0_i32_0 : i32, i32
  }
  func.func @transform_51(%arg0: i32) -> (i32, i32) {
    %c0_i32 = arith.constant 0 : i32
    %c0_i32_0 = arith.constant 0 : i32
    %c0_i32_1 = arith.constant 0 : i32
    return %c0_i32, %c0_i32_0 : i32, i32
  }
  func.func @transform_52(%arg0: i32) -> (i32, i32) {
    %c0_i32 = arith.constant 0 : i32
    %c0_i32_0 = arith.constant 0 : i32
    %c0_i32_1 = arith.constant 0 : i32
    return %c0_i32, %c0_i32_0 : i32, i32
  }
  func.func @transform_53(%arg0: i32) -> (i32, i32) {
    %c0_i32 = arith.constant 0 : i32
    %c0_i32_0 = arith.constant 0 : i32
    %c0_i32_1 = arith.constant 0 : i32
    return %c0_i32, %c0_i32_0 : i32, i32
  }
  func.func @transform_54(%arg0: i32) -> (i32, i32) {
    %c0_i32 = arith.constant 0 : i32
    %c0_i32_0 = arith.constant 0 : i32
    %c0_i32_1 = arith.constant 0 : i32
    return %c0_i32, %c0_i32_0 : i32, i32
  }
  func.func @transform_55(%arg0: i32) -> (i32, i32) {
    %c0_i32 = arith.constant 0 : i32
    %c0_i32_0 = arith.constant 0 : i32
    %c0_i32_1 = arith.constant 0 : i32
    return %c0_i32, %c0_i32_0 : i32, i32
  }
  func.func @transform_56(%arg0: i32) -> (i32, i32) {
    %c0_i32 = arith.constant 0 : i32
    %c0_i32_0 = arith.constant 0 : i32
    %c0_i32_1 = arith.constant 0 : i32
    return %c0_i32, %c0_i32_0 : i32, i32
  }
  func.func @transform_57(%arg0: i32) -> (i32, i32) {
    %c0_i32 = arith.constant 0 : i32
    %c0_i32_0 = arith.constant 0 : i32
    %c0_i32_1 = arith.constant 0 : i32
    return %c0_i32, %c0_i32_0 : i32, i32
  }
  func.func @transform_58(%arg0: i32) -> (i32, i32) {
    %c0_i32 = arith.constant 0 : i32
    %c0_i32_0 = arith.constant 0 : i32
    %c0_i32_1 = arith.constant 0 : i32
    return %c0_i32, %c0_i32_0 : i32, i32
  }
  func.func @transform_59(%arg0: i32) -> (i32, i32) {
    %c0_i32 = arith.constant 0 : i32
    %c0_i32_0 = arith.constant 0 : i32
    %c0_i32_1 = arith.constant 0 : i32
    return %c0_i32, %c0_i32_0 : i32, i32
  }
}

</mosaic_0001>

<bundles_post_ra>
// kernel: conv_backbone_forward.1
= control target key start
LH: loop header
LB: loop body
LE: loop exit
PB: predicated region body
PF: predicated region fallthrough
CT: control target
= control target key end

     0   :  { %s9550_s6 = smov 1   ;;  %s9551_s10 = smov 2   ;;  %s12143_s0 = inlined_call_operand.smem [shape: u32[60], index: -1, kind: input, shape index: {}] }
   0x1   :  { %s9631_s5 = sld [smem:[%s12143_s0]]   ;;  %s9552_s14 = smov 3  }
   0x2   :  { %s9636_s9 = sld [smem:[%s12143_s0 + %s9550_s6]]   ;;  %s9553_s18 = smov 4  }
   0x3   :  { %s9641_s13 = sld [smem:[%s12143_s0 + %s9551_s10]]   ;;  %s9554_s22 = smov 5  }
   0x4   :  { %s9646_s17 = sld [smem:[%s12143_s0 + %s9552_s14]]   ;;  %s9555_s26 = smov 6  }
   0x5   :  { %s9651_s21 = sld [smem:[%s12143_s0 + %s9553_s18]]   ;;  %s9556_s30 = smov 7  }
   0x6   :  { %s9656_s25 = sld [smem:[%s12143_s0 + %s9554_s22]]   ;;  %s9557_s4 = smov 8  }
   0x7   :  { %s9661_s29 = sld [smem:[%s12143_s0 + %s9555_s26]]   ;;  %s9558_s10 = smov 9  }
   0x8   :  { %s9666_s3 = sld [smem:[%s12143_s0 + %s9556_s30]]   ;;  %s9559_s15 = smov 10  }
   0x9   :  { %12178 = sst [smem:[#allocation10_spill]] %s9641_s13  ;;  %s9560_s20 = smov 11  }
   0xa   :  { %12179 = sst [smem:[#allocation11_spill]] %s9646_s17  ;;  %s9561_s26 = smov 12  }
   0xb   :  { %12180 = sst [smem:[#allocation12_spill]] %s9651_s21  ;;  %s9562_s1 = smov 13  }
   0xc   :  { %12181 = sst [smem:[#allocation13_spill]] %s9656_s25  ;;  %s9563_s7 = smov 14  }
   0xd   :  { %12182 = sst [smem:[#allocation14_spill]] %s9661_s29  ;;  %s9565_s22 = smov 16  }
   0xe   :  { %12183 = sst [smem:[#allocation15_spill]] %s9666_s3  ;;  %s9566_s28 = smov 17  }
   0xf   :  { %s9671_s8 = sld [smem:[%s12143_s0 + %s9557_s4]]  }
  0x10   :  { %s9676_s14 = sld [smem:[%s12143_s0 + %s9558_s10]]  }
  0x11   :  { %s9681_s19 = sld [smem:[%s12143_s0 + %s9559_s15]]   ;;  %s9564_s15 = smov 15  }
  0x12   :  { %s9686_s24 = sld [smem:[%s12143_s0 + %s9560_s20]]  }
  0x13   :  { %s9691_s30 = sld [smem:[%s12143_s0 + %s9561_s26]]  }
  0x14   :  { %s9696_s6 = sld [smem:[%s12143_s0 + %s9562_s1]]  }
  0x15   :  { %12184 = sst [smem:[#allocation16_spill]] %s9671_s8 }
  0x16   :  { %12185 = sst [smem:[#allocation17_spill]] %s9676_s14 }
  0x17   :  { %12186 = sst [smem:[#allocation18_spill]] %s9681_s19 }
  0x18   :  { %12187 = sst [smem:[#allocation19_spill]] %s9686_s24 }
  0x19   :  { %s9701_s12 = sld [smem:[%s12143_s0 + %s9563_s7]]   ;;  %s9567_s7 = smov 18  }
  0x1a   :  { %s9706_s20 = sld [smem:[%s12143_s0 + %s9564_s15]]   ;;  %s9568_s15 = smov 19  }
  0x1b   :  { %s9711_s27 = sld [smem:[%s12143_s0 + %s9565_s22]]   ;;  %s9569_s22 = smov 20  }
  0x1c   :  { %s9716_s4 = sld [smem:[%s12143_s0 + %s9566_s28]]   ;;  %s9570_s28 = smov 21  }
  0x1d   :  { %s9721_s29 = sld [smem:[%s12143_s0 + %s9567_s7]]   ;;  %s9571_s7 = smov 22  }
  0x1e   :  { %s9726_s24 = sld [smem:[%s12143_s0 + %s9568_s15]]   ;;  %s9572_s15 = smov 23  }
  0x1f   :  { %s9731_s25 = sld [smem:[%s12143_s0 + %s9569_s22]]   ;;  %s9573_s22 = smov 24  }
  0x20   :  { %s9736_s19 = sld [smem:[%s12143_s0 + %s9570_s28]]   ;;  %s9574_s28 = smov 25  }
  0x21   :  { %s9741_s21 = sld [smem:[%s12143_s0 + %s9571_s7]]   ;;  %s9575_s7 = smov 26  }
  0x22   :  { %s9746_s14 = sld [smem:[%s12143_s0 + %s9572_s15]]   ;;  %s9576_s15 = smov 27  }
  0x23   :  { %s9751_s17 = sld [smem:[%s12143_s0 + %s9573_s22]]   ;;  %s9577_s22 = smov 28  }
  0x24   :  { %s9756_s8 = sld [smem:[%s12143_s0 + %s9574_s28]]   ;;  %s9578_s28 = smov 29  }
  0x25   :  { %s9761_s13 = sld [smem:[%s12143_s0 + %s9575_s7]]   ;;  %s9579_s7 = smov 30  }
  0x26   :  { %s9766_s3 = sld [smem:[%s12143_s0 + %s9576_s15]]   ;;  %s9580_s15 = smov 31  }
  0x29   :  { %12188 = sst [smem:[#allocation20_spill]] %s9751_s17 }
  0x2a   :  { %12189 = sst [smem:[#allocation21_spill]] %s9756_s8 }
  0x2b   :  { %12190 = sst [smem:[#allocation22_spill]] %s9761_s13 }
  0x2c   :  { %12191 = sst [smem:[#allocation23_spill]] %s9766_s3 }
  0x2d   :  { %s9771_s17 = sld [smem:[%s12143_s0 + %s9577_s22]]   ;;  %s9581_s22 = smov 32  }
  0x2e   :  { %s9776_s8 = sld [smem:[%s12143_s0 + %s9578_s28]]   ;;  %s9582_s28 = smov 33  }
  0x2f   :  { %s9781_s13 = sld [smem:[%s12143_s0 + %s9579_s7]]   ;;  %s9583_s7 = smov 34  }
  0x30   :  { %s9786_s3 = sld [smem:[%s12143_s0 + %s9580_s15]]   ;;  %s9584_s15 = smov 35  }
  0x33   :  { %12192 = sst [smem:[#allocation24_spill]] %s9771_s17 }
  0x34   :  { %12193 = sst [smem:[#allocation25_spill]] %s9776_s8 }
  0x35   :  { %12194 = sst [smem:[#allocation26_spill]] %s9781_s13 }
  0x36   :  { %12195 = sst [smem:[#allocation27_spill]] %s9786_s3 }
  0x37   :  { %s9791_s17 = sld [smem:[%s12143_s0 + %s9581_s22]]   ;;  %s9585_s22 = smov 36  }
  0x38   :  { %s9796_s8 = sld [smem:[%s12143_s0 + %s9582_s28]]   ;;  %s9586_s28 = smov 37  }
  0x39   :  { %s9801_s13 = sld [smem:[%s12143_s0 + %s9583_s7]]   ;;  %s9587_s7 = smov 38  }
  0x3a   :  { %s9806_s3 = sld [smem:[%s12143_s0 + %s9584_s15]]   ;;  %s9588_s15 = smov 39  }
  0x3d   :  { %12196 = sst [smem:[#allocation28_spill]] %s9791_s17 }
  0x3e   :  { %12197 = sst [smem:[#allocation29_spill]] %s9796_s8 }
  0x3f   :  { %12198 = sst [smem:[#allocation30_spill]] %s9801_s13 }
  0x40   :  { %12199 = sst [smem:[#allocation31_spill]] %s9806_s3 }
  0x41   :  { %s9811_s17 = sld [smem:[%s12143_s0 + %s9585_s22]]   ;;  %s9589_s22 = smov 40  }
  0x42   :  { %s9816_s8 = sld [smem:[%s12143_s0 + %s9586_s28]]   ;;  %s9590_s28 = smov 41  }
  0x43   :  { %s9821_s13 = sld [smem:[%s12143_s0 + %s9587_s7]]   ;;  %s9591_s7 = smov 42  }
  0x44   :  { %s9826_s3 = sld [smem:[%s12143_s0 + %s9588_s15]]   ;;  %s9592_s15 = smov 43  }
  0x47   :  { %12200 = sst [smem:[#allocation32_spill]] %s9811_s17 }
  0x48   :  { %12201 = sst [smem:[#allocation33_spill]] %s9816_s8 }
  0x49   :  { %12202 = sst [smem:[#allocation34_spill]] %s9821_s13 }
  0x4a   :  { %12203 = sst [smem:[#allocation35_spill]] %s9826_s3 }
  0x4b   :  { %s9831_s17 = sld [smem:[%s12143_s0 + %s9589_s22]]   ;;  %s9593_s22 = smov 44  }
  0x4c   :  { %s9836_s8 = sld [smem:[%s12143_s0 + %s9590_s28]]   ;;  %s9594_s28 = smov 45  }
  0x4d   :  { %s9841_s13 = sld [smem:[%s12143_s0 + %s9591_s7]]   ;;  %s9595_s7 = smov 46  }
  0x4e   :  { %s9846_s3 = sld [smem:[%s12143_s0 + %s9592_s15]]   ;;  %s9596_s15 = smov 47  }
  0x51   :  { %12204 = sst [smem:[#allocation36_spill]] %s9831_s17 }
  0x52   :  { %12205 = sst [smem:[#allocation37_spill]] %s9836_s8 }
  0x53   :  { %12206 = sst [smem:[#allocation38_spill]] %s9841_s13 }
  0x54   :  { %12207 = sst [smem:[#allocation39_spill]] %s9846_s3 }
  0x55   :  { %s9851_s17 = sld [smem:[%s12143_s0 + %s9593_s22]]   ;;  %s9597_s22 = smov 48  }
  0x56   :  { %s9856_s8 = sld [smem:[%s12143_s0 + %s9594_s28]]   ;;  %s9598_s28 = smov 49  }
  0x57   :  { %s9861_s13 = sld [smem:[%s12143_s0 + %s9595_s7]]   ;;  %s9599_s7 = smov 50  }
  0x58   :  { %s9866_s3 = sld [smem:[%s12143_s0 + %s9596_s15]]   ;;  %s9600_s15 = smov 51  }
  0x5b   :  { %12208 = sst [smem:[#allocation40_spill]] %s9851_s17 }
  0x5c   :  { %12209 = sst [smem:[#allocation41_spill]] %s9856_s8 }
  0x5d   :  { %12210 = sst [smem:[#allocation42_spill]] %s9861_s13 }
  0x5e   :  { %12211 = sst [smem:[#allocation43_spill]] %s9866_s3 }
  0x5f   :  { %s9871_s17 = sld [smem:[%s12143_s0 + %s9597_s22]]   ;;  %s9601_s22 = smov 52  }
  0x60   :  { %s9876_s8 = sld [smem:[%s12143_s0 + %s9598_s28]]   ;;  %s9602_s28 = smov 53  }
  0x61   :  { %s9881_s13 = sld [smem:[%s12143_s0 + %s9599_s7]]   ;;  %s9603_s7 = smov 54  }
  0x62   :  { %s9886_s3 = sld [smem:[%s12143_s0 + %s9600_s15]]   ;;  %s9604_s15 = smov 55  }
  0x65   :  { %12212 = sst [smem:[#allocation44_spill]] %s9871_s17 }
  0x66   :  { %12213 = sst [smem:[#allocation45_spill]] %s9876_s8 }
  0x67   :  { %12214 = sst [smem:[#allocation46_spill]] %s9881_s13 }
  0x68   :  { %12215 = sst [smem:[#allocation47_spill]] %s9886_s3 }
  0x69   :  { %s9891_s17 = sld [smem:[%s12143_s0 + %s9601_s22]]   ;;  %s9605_s22 = smov 56  }
  0x6a   :  { %s9896_s8 = sld [smem:[%s12143_s0 + %s9602_s28]]   ;;  %s9606_s28 = smov 57  }
  0x6b   :  { %s9901_s13 = sld [smem:[%s12143_s0 + %s9603_s7]]   ;;  %s9607_s7 = smov 58  }
  0x6c   :  { %s9906_s3 = sld [smem:[%s12143_s0 + %s9604_s15]]   ;;  %s9608_s15 = smov 59  }
  0x6f   :  { %12216 = sst [smem:[#allocation48_spill]] %s9891_s17 }
  0x70   :  { %12217 = sst [smem:[#allocation49_spill]] %s9896_s8 }
  0x71   :  { %12218 = sst [smem:[#allocation50_spill]] %s9901_s13 }
  0x72   :  { %12219 = sst [smem:[#allocation51_spill]] %s9906_s3 }
  0x73   :  { %s9911_s17 = sld [smem:[%s12143_s0 + %s9605_s22]]  }
  0x74   :  { %s9916_s8 = sld [smem:[%s12143_s0 + %s9606_s28]]  }
  0x75   :  { %s9921_s13 = sld [smem:[%s12143_s0 + %s9607_s7]]  }
  0x76   :  { %s9926_s3 = sld [smem:[%s12143_s0 + %s9608_s15]]  }
  0x77   :  { %125 = vsyncpa [#allocation5], 0  ;;  %v8051_v0 = vld.sshfl [vmem:[%s9631_s5] sm:$0x33 pattern:$0x76325410] }
  0x78   :  { %s9609_s22 = smov 1   ;;  %v9610_v1 = vmov 0  }
  0x79   :  { %246 = vrot.lane.b32.xlu0 %v8051_v0, %s9609_s22  ;;  %381 = vmatprep.mubr.bf16.mxu0 %v9610_v1 }
  0x7a   :  { %9184 = vset.pattern.permute.xlu1 %v9610_v1  ;;  %9185 = vset.pattern.permute.xlu0 %v9610_v1 }
  0x7b   :  { %710 = vmatprep.mubr.bf16.mxu1 %v9610_v1 }
  0x7c   :  { %126 = vsyncpa [#allocation7], 0  ;;  %vm252_vm0 = vcmask 1041416   ;;  %vm253_vm1 = vcmask 37892   ;;  %vm249_vm2 = vcmask 7168   ;;  %vm256_vm4 = vcmask 1024  }
  0x7d   :  { %vm254_vm3 = vmor %vm253_vm1, %vm252_vm0  ;;  %vm258_vm5 = vcmask 42024   ;;  %vm261_vm6 = vcmask 1041408   ;;  %vm262_vm7 = vcmask 29700   ;;  %s9611_s0 = smov 126   ;;  %s9612_s5 = smov 127   ;;  %v295_v10 = vld [vmem:[%s9696_s6 + $0x10] sm:$0xff]  ;;  %v403_v27 = vlaneseq }
  0x7e   :  { %vm9938_vm8 = vmor %vm262_vm7, %vm261_vm6  ;;  %v296_v11 = vld [vmem:[%s9696_s6 + $0x18] sm:$0xff]  ;;  %v293_v12 = vld [vmem:[%s9696_s6] sm:$0xff]  ;;  %vm283_vm9 = vcmask 1031168   ;;  %vm274_vm10 = vcmask 1043458   ;;  %vm275_vm11 = vcmask 31750   ;;  %vm271_vm12 = vcmask 1039360  }
  0x7f   :  { %v294_v13 = vld [vmem:[%s9696_s6 + $0x8] sm:$0xff]  ;;  %vm276_vm13 = vmor %vm275_vm11, %vm274_vm10  ;;  %vm342_vm14 = vcmask 1045504   ;;  %v9186_v25 = vld [vmem:[%s9691_s30] sm:$0xff]   ;;  %vm335_vm15 = vcmask 97280   ;;  %v404_v30 = vshrl.u32 %v403_v27, 7  ;;  %vm469_vm0 = vcmask 1043464  }
  0x80   :  { %v9187_v26 = vld [vmem:[%s9691_s30 + $0x8] sm:$0xff]   ;;  %v236_v36 = vld [vmem:[%s9636_s9] sm:$0x3]  ;;  %vm470_vm1 = vcmask 39940   ;;  %vm490_vm7 = vcmask 1043456   ;;  %vm671_vm11 = vcmask 785408  }
  0x81   :  { %v405_v34 = vsub.s32 0, %v404_v30  ;;  %v409_v35 = vsub.s32 1, %v404_v30  ;;  %v580_v30 = vld [vmem:[%s9706_s20 + $0x18] sm:$0xff]  ;;  %s12226_s9 = sld [smem:[#allocation15_spill]] }
  0x82   :  { %s12233_s30 = sld [smem:[#allocation24_spill]] }
  0x83   :  { %v9963_v39 = vrot.slane %v236_v36, %v405_v34  ;;  %v9965_v41 = vrot.slane %v236_v36, %v409_v35  ;;  %s12234_s6 = sld [smem:[#allocation16_spill]] }
  0x84   :  { %s12239_s23 = sld [smem:[#allocation31_spill]] }
  0x85   :  { %s12240_s26 = sld [smem:[#allocation29_spill]] }
  0x86   :  { %s12241_s28 = sld [smem:[#allocation30_spill]] }
  0x87   :  { %s12242_s1 = sld [smem:[#allocation17_spill]] }
  0x88   :  { %s12243_s2 = sld [smem:[#allocation33_spill]] }
  0x89   :  { %s12244_s7 = sld [smem:[#allocation32_spill]] }
  0x8a   :  { %s12245_s10 = sld [smem:[#allocation12_spill]] }
  0x8b   :  { %s12246_s11 = sld [smem:[#allocation34_spill]] }
  0x8c   :  { %s12247_s15 = sld [smem:[#allocation37_spill]] }
  0x8d   :  { %s12248_s16 = sld [smem:[#allocation35_spill]] }
  0x8e   :  { %s12249_s18 = sld [smem:[#allocation36_spill]] }
  0xeb   :  { %v247_v2 = vpop.permute.xlu0 %246 }
  0xec   :  { %v248_v3 = vrot.slane %v247_v2, 4 }
  0xee   :  { %v250_v4 = vsel %vm249_vm2, %v248_v3, %v247_v2 }
  0xef   :  { %255 = vst.msk [vmem:[#allocation2] sm:$0x33] %vm254_vm3, %v250_v4  ;;  %vm9979_vm3 = vmor %vm470_vm1, %vm469_vm0  ;;  %vm2745_vm0 = vcmask 31744   ;;  %vm3028_vm1 = vcmask 551936  }
  0xf0   :  { %257 = vst.msk [vmem:[#allocation2] sm:$0x3] %vm256_vm4, %v9610_v1  ;;  %vm476_vm4 = vcmask 3072  }
  0xf1   :  { %259 = vst.msk [vmem:[#allocation2 + $0x4] sm:$0x3] %vm258_vm5, %v9610_v1  ;;  %vm481_vm5 = vcmask 44072  }
  0xf8   :  { %v260_v6 = vld [vmem:[#allocation2] sm:$0x33] }
  0xf9   :  { %v265_v7 = vld [vmem:[#allocation2] sm:$0x33]  ;;  %264 = vst.msk [vmem:[#allocation3] sm:$0x33] %vm9938_vm8, %v260_v6 }
  0xfa   :  { %v278_v8 = vld [vmem:[#allocation2] sm:$0x33]  ;;  %v267_v9 = vrot.slane %v265_v7, 6 }
  0xfb   :  { %280 = vrot.lane.b32.xlu1 %v278_v8, %s9611_s0 }
  0xfc   :  { %268 = vrot.lane.b32.xlu0 %v267_v9, %s9612_s5 }
  0xff   :  { %309 = vperm.xlu1 %9184, %v295_v10  }
 0x100   :  { %314 = vperm.xlu0 %9185, %v296_v11  }
 0x103   :  { %299 = vperm.xlu1 %9184, %v293_v12  }
 0x107   :  { %304 = vperm.xlu1 %9184, %v294_v13  }
 0x16d   :  { %v281_v14 = vpop.permute.xlu1 %280 }
 0x16e   :  { %v282_v15 = vrot.slane %v281_v14, 4  ;;  %v269_v16 = vpop.permute.xlu0 %268 }
 0x16f   :  { %v270_v18 = vrot.slane %v269_v16, 4 }
 0x170   :  { %v284_v17 = vsel %vm283_vm9, %v281_v14, %v282_v15 }
 0x171   :  { %286 = vst.msk [vmem:[#allocation3 + $0x8] sm:$0x33] %vm9938_vm8, %v284_v17  ;;  %v272_v19 = vsel %vm271_vm12, %v269_v16, %v270_v18  ;;  %vm491_vm8 = vcmask 31748  }
 0x172   :  { %277 = vst.msk [vmem:[#allocation3] sm:$0xcc] %vm276_vm13, %v272_v19  ;;  %vm10007_vm10 = vmor %vm491_vm8, %vm490_vm7  ;;  %vm1574_vm13 = vcmask 523264   ;;  %vm3827_vm7 = vcmask 556032   ;;  %vm4093_vm8 = vcmask 289792  }
 0x178   :  { %v292_v20 = vld [vmem:[#allocation3 + $0x8] sm:$0x33] }
 0x179   :  { %v291_v21 = vld [vmem:[#allocation3] sm:$0xff] }
 0x17a   :  { %v8055_v22 = vcombine.high %v291_v21, %v292_v20  ;;  %v8054_v23 = vcombine.low %v291_v21, %v292_v20  ;;  %v310_v28 = vpop.permute.xlu1 %309 }
 0x17b   :  { %v315_v45 = vpop.permute.xlu0 %314 }
 0x17c   :  { %8056 = vmatprep.subr.msk.bf16.mxu0 %vm342_vm14, %v8055_v22  ;;  %v344_v24 = vsel %vm342_vm14, %v8054_v23, 0 }
 0x17d   :  { %364 = vmatpush1.bf16.msra.mxu0 %v344_v24 }
 0x17e   :  { %v300_v33 = vpop.permute.xlu1 %299 }
 0x180   :  { %8057 = vmatmul.mubr.msk.bf16.vlgmr.msra.gmra.mxu0 %vm335_vm15, %v9186_v25 }
 0x181   :  { %391 = vmatprep.mubr.bf16.mxu0 %v9610_v1 }
 0x182   :  { %v305_v46 = vpop.permute.xlu1 %304 }
 0x188   :  { %8058 = vmatmul.mubr.msk.bf16.gmra.mxu0 %vm335_vm15, %v9187_v26 }
 0x189   :  { %1063 = vmatprep.mubr.bf16.mxu0 %v9610_v1 }
 0x240   :  { %v383_v29 = vpop.f32.mrf.mxu0 }
 0x241   :  { %v384_v43 = vadd.f32 %v383_v29, %v300_v33  ;;  %v579_v29 = vld [vmem:[%s9706_s20 + $0x10] sm:$0xff] }
 0x242   :  { %v385_v31 = vpop.f32.mrf.mxu0 }
 0x243   :  { %v386_v40 = vadd.f32 %v385_v31, %v300_v33  ;;  %v413_v54 = vmul.f32 %v9963_v39, %v384_v43  ;;  %v577_v31 = vld [vmem:[%s9706_s20] sm:$0xff] }
 0x244   :  { %v387_v32 = vpop.f32.mrf.mxu0 }
 0x245   :  { %v414_v50 = vmul.f32 %v9965_v41, %v386_v40  ;;  %v388_v55 = vadd.f32 %v387_v32, %v305_v46  ;;  %v421_v2 = vmax.f32 %v413_v54, 0.0  ;;  %v578_v32 = vld [vmem:[%s9706_s20 + $0x8] sm:$0xff]  ;;  %s12236_s20 = sld [smem:[#allocation28_spill]] }
 0x246   :  { %v389_v37 = vpop.f32.mrf.mxu0 }
 0x247   :  { %v390_v51 = vadd.f32 %v389_v37, %v305_v46  ;;  %v422_v61 = vmax.f32 %v414_v50, 0.0  ;;  %v415_v3 = vmul.f32 %v9963_v39, %v388_v55 }
 0x248   :  { %v393_v38 = vpop.f32.mrf.mxu0 }
 0x249   :  { %v394_v42 = vadd.f32 %v393_v38, %v310_v28  ;;  %v416_v62 = vmul.f32 %v9965_v41, %v390_v51  ;;  %v8570_v8 = vpack.c.bf16 %v422_v61, %v421_v2  ;;  %v423_v9 = vmax.f32 %v415_v3, 0.0 }
 0x24a   :  { %v395_v44 = vpop.f32.mrf.mxu0 }
 0x24b   :  { %v417_v47 = vmul.f32 %v9963_v39, %v394_v42  ;;  %v396_v48 = vadd.f32 %v395_v44, %v310_v28  ;;  %v424_v6 = vmax.f32 %v416_v62, 0.0 }
 0x24c   :  { %v397_v49 = vpop.f32.mrf.mxu0 }
 0x24d   :  { %v418_v52 = vmul.f32 %v9965_v41, %v396_v48  ;;  %v398_v53 = vadd.f32 %v397_v49, %v315_v45  ;;  %v425_v57 = vmax.f32 %v417_v47, 0.0  ;;  %v8571_v10 = vpack.c.bf16 %v424_v6, %v423_v9  ;;  %v9207_v9 = vld [vmem:[%s9701_s12 + $0x8] sm:$0xff]  }
 0x24e   :  { %v399_v56 = vpop.f32.mrf.mxu0 }
 0x24f   :  { %v426_v58 = vmax.f32 %v418_v52, 0.0  ;;  %v419_v59 = vmul.f32 %v9963_v39, %v398_v53  ;;  %v400_v60 = vadd.f32 %v399_v56, %v315_v45 }
 0x251   :  { %v420_v63 = vmul.f32 %v9965_v41, %v400_v60  ;;  %v8572_v0 = vpack.c.bf16 %v426_v58, %v425_v57  ;;  %v427_v4 = vmax.f32 %v419_v59, 0.0 }
 0x253   :  { %v428_v5 = vmax.f32 %v420_v63, 0.0  ;;  %453 = vrot.lane.b32.xlu0 %v8572_v0, %s9609_s22 }
 0x255   :  { %v8573_v7 = vpack.c.bf16 %v428_v5, %v427_v4 }
 0x257   :  { %455 = vrot.lane.b32.xlu1 %v8573_v7, %s9609_s22  ;;  %449 = vrot.lane.b32.xlu0 %v8570_v8, %s9609_s22  ;;  %v9206_v8 = vld [vmem:[%s9701_s12] sm:$0xff]   ;;  %s12235_s12 = sld [smem:[#allocation27_spill]] }
 0x25b   :  { %451 = vrot.lane.b32.xlu1 %v8571_v10, %s9609_s22 }
 0x2c5   :  { %v454_v11 = vpop.permute.xlu0 %453 }
 0x2c6   :  { %v459_v13 = vrot.slane %v454_v11, 4 }
 0x2c8   :  { %v463_v14 = vsel %vm249_vm2, %v459_v13, %v454_v11 }
 0x2c9   :  { %474 = vst.msk [vmem:[#allocation2 + $0x10] sm:$0xff] %vm9979_vm3, %v463_v14  ;;  %v456_v15 = vpop.permute.xlu1 %455  ;;  %v450_v16 = vpop.permute.xlu0 %449 }
 0x2ca   :  { %479 = vst.msk [vmem:[#allocation2 + $0x10] sm:$0xf] %vm476_vm4, %v9610_v1  ;;  %v460_v17 = vrot.slane %v456_v15, 4  ;;  %v457_v18 = vrot.slane %v450_v16, 4 }
 0x2cb   :  { %484 = vst.msk [vmem:[#allocation2 + $0x14] sm:$0xf] %vm481_vm5, %v9610_v1 }
 0x2cc   :  { %v464_v19 = vsel %vm249_vm2, %v460_v17, %v456_v15  ;;  %v461_v20 = vsel %vm249_vm2, %v457_v18, %v450_v16 }
 0x2cd   :  { %475 = vst.msk [vmem:[#allocation2 + $0x18] sm:$0xff] %vm9979_vm3, %v464_v19  ;;  %472 = vst.msk [vmem:[#allocation2] sm:$0xff] %vm9979_vm3, %v461_v20  ;;  %v452_v21 = vpop.permute.xlu1 %451 }
 0x2ce   :  { %480 = vst.msk [vmem:[#allocation2 + $0x18] sm:$0xf] %vm476_vm4, %v9610_v1  ;;  %477 = vst.msk [vmem:[#allocation2] sm:$0xf] %vm476_vm4, %v9610_v1  ;;  %v458_v22 = vrot.slane %v452_v21, 4 }
 0x2cf   :  { %485 = vst.msk [vmem:[#allocation2 + $0x1c] sm:$0xf] %vm481_vm5, %v9610_v1  ;;  %482 = vst.msk [vmem:[#allocation2 + $0x4] sm:$0xf] %vm481_vm5, %v9610_v1 }
 0x2d0   :  { %v462_v23 = vsel %vm249_vm2, %v458_v22, %v452_v21 }
 0x2d1   :  { %473 = vst.msk [vmem:[#allocation2 + $0x8] sm:$0xff] %vm9979_vm3, %v462_v23 }
 0x2d2   :  { %v488_v24 = vld [vmem:[#allocation2 + $0x10] sm:$0xff]  ;;  %478 = vst.msk [vmem:[#allocation2 + $0x8] sm:$0xf] %vm476_vm4, %v9610_v1 }
 0x2d3   :  { %483 = vst.msk [vmem:[#allocation2 + $0xc] sm:$0xf] %vm481_vm5, %v9610_v1  ;;  %541 = vrot.lane.b32.xlu0 %v488_v24, %s9611_s0 }
 0x2d4   :  { %495 = vst.msk [vmem:[#allocation3 + $0x10] sm:$0xff] %vm10007_vm10, %v488_v24 }
 0x2d6   :  { %v489_v26 = vld [vmem:[#allocation2 + $0x18] sm:$0xff]  ;;  %v529_v27 = vld [vmem:[#allocation2] sm:$0xff] }
 0x2d7   :  { %543 = vrot.lane.b32.xlu1 %v489_v26, %s9611_s0  ;;  %537 = vrot.lane.b32.xlu0 %v529_v27, %s9611_s0  ;;  %496 = vst.msk [vmem:[#allocation3 + $0x18] sm:$0xff] %vm10007_vm10, %v489_v26  ;;  %493 = vst.msk [vmem:[#allocation3] sm:$0xff] %vm10007_vm10, %v529_v27 }
 0x2da   :  { %v487_v28 = vld [vmem:[#allocation2 + $0x8] sm:$0xff] }
 0x2db   :  { %539 = vrot.lane.b32.xlu1 %v487_v28, %s9611_s0  ;;  %509 = vrot.lane.b32.xlu0 %v488_v24, %s9612_s5  ;;  %494 = vst.msk [vmem:[#allocation3 + $0x8] sm:$0xff] %vm10007_vm10, %v487_v28 }
 0x2de   :  { %v9200_v2 = vld [vmem:[#allocation3 + $0x14] ss:$8 sps:$4 sm:$0xff]   ;;  %v9202_v5 = vld [vmem:[#allocation3 + $0x10] ss:$8 sps:$4 sm:$0xff]  }
 0x2df   :  { %511 = vrot.lane.b32.xlu1 %v489_v26, %s9612_s5  ;;  %505 = vrot.lane.b32.xlu0 %v529_v27, %s9612_s5 }
 0x2e2   :  { %v9203_v6 = vld [vmem:[#allocation3 + $0x4] ss:$8 sps:$4 sm:$0xff]   ;;  %v9205_v7 = vld [vmem:[#allocation3] ss:$8 sps:$4 sm:$0xff]  }
 0x2e3   :  { %507 = vrot.lane.b32.xlu1 %v487_v28, %s9612_s5  ;;  %593 = vperm.xlu0 %9185, %v579_v29  }
 0x2e7   :  { %598 = vperm.xlu1 %9184, %v580_v30   ;;  %583 = vperm.xlu0 %9185, %v577_v31  }
 0x2eb   :  { %588 = vperm.xlu1 %9184, %v578_v32  }
 0x345   :  { %v542_v33 = vpop.permute.xlu0 %541 }
 0x346   :  { %v547_v34 = vrot.slane %v542_v33, 4 }
 0x348   :  { %v551_v35 = vsel %vm283_vm9, %v542_v33, %v547_v34 }
 0x349   :  { %559 = vst.msk [vmem:[#allocation3 + $0x50] sm:$0xff] %vm10007_vm10, %v551_v35  ;;  %v544_v36 = vpop.permute.xlu1 %543  ;;  %v538_v37 = vpop.permute.xlu0 %537 }
 0x34a   :  { %v548_v38 = vrot.slane %v544_v36, 4  ;;  %v545_v40 = vrot.slane %v538_v37, 4 }
 0x34c   :  { %v552_v42 = vsel %vm283_vm9, %v544_v36, %v548_v38  ;;  %v549_v43 = vsel %vm283_vm9, %v538_v37, %v545_v40 }
 0x34d   :  { %560 = vst.msk [vmem:[#allocation3 + $0x58] sm:$0xff] %vm10007_vm10, %v552_v42  ;;  %557 = vst.msk [vmem:[#allocation3 + $0x40] sm:$0xff] %vm10007_vm10, %v549_v43  ;;  %v540_v44 = vpop.permute.xlu1 %539  ;;  %v510_v45 = vpop.permute.xlu0 %509 }
 0x34e   :  { %v546_v46 = vrot.slane %v540_v44, 4  ;;  %v515_v47 = vrot.slane %v510_v45, 4 }
 0x350   :  { %v550_v48 = vsel %vm283_vm9, %v540_v44, %v546_v46  ;;  %v519_v49 = vsel %vm271_vm12, %v510_v45, %v515_v47 }
 0x351   :  { %558 = vst.msk [vmem:[#allocation3 + $0x48] sm:$0xff] %vm10007_vm10, %v550_v48  ;;  %527 = vst.msk [vmem:[#allocation3 + $0x30] sm:$0xff] %vm10007_vm10, %v519_v49  ;;  %v512_v50 = vpop.permute.xlu1 %511  ;;  %v506_v51 = vpop.permute.xlu0 %505 }
 0x352   :  { %v516_v52 = vrot.slane %v512_v50, 4  ;;  %v513_v53 = vrot.slane %v506_v51, 4 }
 0x354   :  { %v520_v54 = vsel %vm271_vm12, %v512_v50, %v516_v52  ;;  %v517_v55 = vsel %vm271_vm12, %v506_v51, %v513_v53  ;;  %v9188_v56 = vld [vmem:[#allocation3 + $0x54] ss:$8 sps:$4 sm:$0xff]   ;;  %v9190_v57 = vld [vmem:[#allocation3 + $0x50] ss:$8 sps:$4 sm:$0xff]  }
 0x355   :  { %528 = vst.msk [vmem:[#allocation3 + $0x38] sm:$0xff] %vm10007_vm10, %v520_v54  ;;  %525 = vst.msk [vmem:[#allocation3 + $0x20] sm:$0xff] %vm10007_vm10, %v517_v55  ;;  %v508_v58 = vpop.permute.xlu1 %507  ;;  %682 = vmatprep.subr.bf16.mxu1 %v9188_v56 }
 0x356   :  { %v514_v59 = vrot.slane %v508_v58, 4  ;;  %683 = vmatpush1.bf16.msra.mxu1 %v9190_v57 }
 0x358   :  { %v518_v60 = vsel %vm271_vm12, %v508_v58, %v514_v59  ;;  %v9191_v61 = vld [vmem:[#allocation3 + $0x44] ss:$8 sps:$4 sm:$0xff]   ;;  %v9193_v62 = vld [vmem:[#allocation3 + $0x40] ss:$8 sps:$4 sm:$0xff]  }
 0x359   :  { %526 = vst.msk [vmem:[#allocation3 + $0x28] sm:$0xff] %vm10007_vm10, %v518_v60  ;;  %684 = vmatprep.subr.bf16.mxu1 %v9191_v61 }
 0x35a   :  { %685 = vmatpush1.bf16.msra.mxu1 %v9193_v62 }
 0x35c   :  { %v9194_v63 = vld [vmem:[#allocation3 + $0x34] ss:$8 sps:$4 sm:$0xff]   ;;  %v9196_v0 = vld [vmem:[#allocation3 + $0x30] ss:$8 sps:$4 sm:$0xff]  }
 0x35d   :  { %686 = vmatprep.subr.bf16.mxu1 %v9194_v63 }
 0x35e   :  { %687 = vmatpush1.bf16.msra.mxu1 %v9196_v0  ;;  %v594_v11 = vpop.permute.xlu0 %593 }
 0x360   :  { %v9197_v3 = vld [vmem:[#allocation3 + $0x24] ss:$8 sps:$4 sm:$0xff]   ;;  %v9199_v4 = vld [vmem:[#allocation3 + $0x20] ss:$8 sps:$4 sm:$0xff]  }
 0x361   :  { %688 = vmatprep.subr.bf16.mxu1 %v9197_v3 }
 0x362   :  { %689 = vmatpush1.bf16.msra.mxu1 %v9199_v4  ;;  %v599_v15 = vpop.permute.xlu1 %598  ;;  %v584_v17 = vpop.permute.xlu0 %583 }
 0x363   :  { %690 = vmatprep.subr.bf16.mxu1 %v9200_v2 }
 0x366   :  { %691 = vmatpush1.bf16.msra.mxu1 %v9202_v5  ;;  %v589_v26 = vpop.permute.xlu1 %588 }
 0x367   :  { %692 = vmatprep.subr.bf16.mxu1 %v9203_v6 }
 0x36a   :  { %693 = vmatpush1.bf16.msra.mxu1 %v9205_v7  ;;  %v897_v7 = vld [vmem:[%s9716_s4 + $0x30] sm:$0xff] }
 0x36d   :  { %8077 = vmatmul.mubr.msk.bf16.vlgmr.msra.gmra.mxu1 %vm671_vm11, %v9206_v8  ;;  %v898_v8 = vld [vmem:[%s9716_s4 + $0x38] sm:$0xff] }
 0x36e   :  { %720 = vmatprep.mubr.bf16.mxu1 %v9610_v1 }
 0x375   :  { %8078 = vmatmul.mubr.msk.bf16.gmra.mxu1 %vm671_vm11, %v9207_v9  ;;  %v895_v9 = vld [vmem:[%s9716_s4 + $0x20] sm:$0xff] }
 0x42d   :  { %v712_v10 = vpop.f32.mrf.mxu1 }
 0x42e   :  { %v713_v21 = vadd.f32 %v712_v10, %v584_v17  ;;  %v896_v10 = vld [vmem:[%s9716_s4 + $0x28] sm:$0xff] }
 0x42f   :  { %v714_v13 = vpop.f32.mrf.mxu1 }
 0x430   :  { %v715_v19 = vadd.f32 %v714_v13, %v584_v17  ;;  %v10074_v32 = vmul.f32 %v713_v21, %v9963_v39  ;;  %v894_v13 = vld [vmem:[%s9716_s4 + $0x18] sm:$0xff] }
 0x431   :  { %v716_v14 = vpop.f32.mrf.mxu1 }
 0x432   :  { %v10068_v28 = vmul.f32 %v715_v19, %v9965_v41  ;;  %v717_v33 = vadd.f32 %v716_v14, %v589_v26  ;;  %v739_v45 = vmax.f32 %v10074_v32, 0.0  ;;  %v891_v14 = vld [vmem:[%s9716_s4] sm:$0xff] }
 0x433   :  { %v718_v16 = vpop.f32.mrf.mxu1 }
 0x434   :  { %v719_v29 = vadd.f32 %v718_v16, %v589_v26  ;;  %v740_v40 = vmax.f32 %v10068_v28, 0.0  ;;  %v10094_v46 = vmul.f32 %v717_v33, %v9963_v39 }
 0x435   :  { %v722_v18 = vpop.f32.mrf.mxu1 }
 0x436   :  { %v723_v20 = vadd.f32 %v722_v18, %v594_v11  ;;  %v10083_v42 = vmul.f32 %v719_v29, %v9965_v41  ;;  %v8574_v51 = vpack.c.bf16 %v740_v40, %v739_v45  ;;  %v741_v52 = vmax.f32 %v10094_v46, 0.0 }
 0x437   :  { %v724_v22 = vpop.f32.mrf.mxu1 }
 0x438   :  { %v10065_v23 = vmul.f32 %v723_v20, %v9963_v39  ;;  %v725_v24 = vadd.f32 %v724_v22, %v594_v11  ;;  %v742_v49 = vmax.f32 %v10083_v42, 0.0  ;;  %v893_v11 = vld [vmem:[%s9716_s4 + $0x10] sm:$0xff] }
 0x439   :  { %v726_v27 = vpop.f32.mrf.mxu1 }
 0x43a   :  { %v10071_v30 = vmul.f32 %v725_v24, %v9965_v41  ;;  %v727_v31 = vadd.f32 %v726_v27, %v599_v15  ;;  %v743_v35 = vmax.f32 %v10065_v23, 0.0  ;;  %v8575_v53 = vpack.c.bf16 %v742_v49, %v741_v52 }
 0x43b   :  { %v728_v34 = vpop.f32.mrf.mxu1 }
 0x43c   :  { %v744_v36 = vmax.f32 %v10071_v30, 0.0  ;;  %v10079_v37 = vmul.f32 %v727_v31, %v9963_v39  ;;  %v729_v38 = vadd.f32 %v728_v34, %v599_v15  ;;  %v892_v15 = vld [vmem:[%s9716_s4 + $0x8] sm:$0xff]  ;;  %s12238_s4 = sld [smem:[#allocation11_spill]] }
 0x43e   :  { %v10086_v43 = vmul.f32 %v729_v38, %v9965_v41  ;;  %v8576_v44 = vpack.c.bf16 %v744_v36, %v743_v35  ;;  %v745_v47 = vmax.f32 %v10079_v37, 0.0 }
 0x440   :  { %v746_v48 = vmax.f32 %v10086_v43, 0.0  ;;  %771 = vrot.lane.b32.xlu0 %v8576_v44, %s9609_s22 }
 0x442   :  { %v8577_v50 = vpack.c.bf16 %v746_v48, %v745_v47 }
 0x444   :  { %773 = vrot.lane.b32.xlu1 %v8577_v50, %s9609_s22  ;;  %767 = vrot.lane.b32.xlu0 %v8574_v51, %s9609_s22 }
 0x448   :  { %769 = vrot.lane.b32.xlu1 %v8575_v53, %s9609_s22 }
 0x4b2   :  { %v772_v54 = vpop.permute.xlu0 %771 }
 0x4b3   :  { %v777_v55 = vrot.slane %v772_v54, 4 }
 0x4b5   :  { %v781_v56 = vsel %vm249_vm2, %v777_v55, %v772_v54 }
 0x4b6   :  { %789 = vst.msk [vmem:[#allocation2 + $0x10] sm:$0xff] %vm9979_vm3, %v781_v56  ;;  %v774_v57 = vpop.permute.xlu1 %773  ;;  %v768_v58 = vpop.permute.xlu0 %767 }
 0x4b7   :  { %793 = vst.msk [vmem:[#allocation2 + $0x10] sm:$0xf] %vm476_vm4, %v9610_v1  ;;  %v778_v59 = vrot.slane %v774_v57, 4  ;;  %v775_v60 = vrot.slane %v768_v58, 4 }
 0x4b8   :  { %797 = vst.msk [vmem:[#allocation2 + $0x14] sm:$0xf] %vm481_vm5, %v9610_v1 }
 0x4b9   :  { %v782_v61 = vsel %vm249_vm2, %v778_v59, %v774_v57  ;;  %v779_v62 = vsel %vm249_vm2, %v775_v60, %v768_v58 }
 0x4ba   :  { %790 = vst.msk [vmem:[#allocation2 + $0x18] sm:$0xff] %vm9979_vm3, %v782_v61  ;;  %787 = vst.msk [vmem:[#allocation2] sm:$0xff] %vm9979_vm3, %v779_v62  ;;  %v770_v63 = vpop.permute.xlu1 %769 }
 0x4bb   :  { %794 = vst.msk [vmem:[#allocation2 + $0x18] sm:$0xf] %vm476_vm4, %v9610_v1  ;;  %791 = vst.msk [vmem:[#allocation2] sm:$0xf] %vm476_vm4, %v9610_v1  ;;  %v776_v0 = vrot.slane %v770_v63, 4 }
 0x4bc   :  { %798 = vst.msk [vmem:[#allocation2 + $0x1c] sm:$0xf] %vm481_vm5, %v9610_v1  ;;  %795 = vst.msk [vmem:[#allocation2 + $0x4] sm:$0xf] %vm481_vm5, %v9610_v1 }
 0x4bd   :  { %v780_v2 = vsel %vm249_vm2, %v776_v0, %v770_v63 }
 0x4be   :  { %788 = vst.msk [vmem:[#allocation2 + $0x8] sm:$0xff] %vm9979_vm3, %v780_v2 }
 0x4bf   :  { %v841_v3 = vld [vmem:[#allocation2 + $0x10] sm:$0xff]  ;;  %792 = vst.msk [vmem:[#allocation2 + $0x8] sm:$0xf] %vm476_vm4, %v9610_v1 }
 0x4c0   :  { %796 = vst.msk [vmem:[#allocation2 + $0xc] sm:$0xf] %vm481_vm5, %v9610_v1  ;;  %851 = vrot.lane.b32.xlu0 %v841_v3, %s9611_s0 }
 0x4c1   :  { %805 = vst.msk [vmem:[#allocation3 + $0x10] sm:$0xff] %vm10007_vm10, %v841_v3 }
 0x4c3   :  { %v842_v4 = vld [vmem:[#allocation2 + $0x18] sm:$0xff]  ;;  %v839_v5 = vld [vmem:[#allocation2] sm:$0xff] }
 0x4c4   :  { %853 = vrot.lane.b32.xlu1 %v842_v4, %s9611_s0  ;;  %847 = vrot.lane.b32.xlu0 %v839_v5, %s9611_s0  ;;  %806 = vst.msk [vmem:[#allocation3 + $0x18] sm:$0xff] %vm10007_vm10, %v842_v4  ;;  %803 = vst.msk [vmem:[#allocation3] sm:$0xff] %vm10007_vm10, %v839_v5 }
 0x4c7   :  { %v840_v6 = vld [vmem:[#allocation2 + $0x8] sm:$0xff] }
 0x4c8   :  { %849 = vrot.lane.b32.xlu1 %v840_v6, %s9611_s0  ;;  %819 = vrot.lane.b32.xlu0 %v841_v3, %s9612_s5  ;;  %804 = vst.msk [vmem:[#allocation3 + $0x8] sm:$0xff] %vm10007_vm10, %v840_v6 }
 0x4cb   :  { %v9220_v2 = vld [vmem:[#allocation3 + $0x14] ss:$8 sps:$4 sm:$0xff]  }
 0x4cc   :  { %821 = vrot.lane.b32.xlu1 %v842_v4, %s9612_s5  ;;  %815 = vrot.lane.b32.xlu0 %v839_v5, %s9612_s5  ;;  %v9222_v5 = vld [vmem:[#allocation3 + $0x10] ss:$8 sps:$4 sm:$0xff]  }
 0x4d0   :  { %817 = vrot.lane.b32.xlu1 %v840_v6, %s9612_s5  ;;  %931 = vperm.xlu0 %9185, %v897_v7   ;;  %v9223_v6 = vld [vmem:[#allocation3 + $0x4] ss:$8 sps:$4 sm:$0xff]   ;;  %v9225_v7 = vld [vmem:[#allocation3] ss:$8 sps:$4 sm:$0xff]  }
 0x4d4   :  { %936 = vperm.xlu1 %9184, %v898_v8   ;;  %921 = vperm.xlu0 %9185, %v895_v9   ;;  %v9226_v8 = vld [vmem:[%s9711_s27] sm:$0xff]   ;;  %v9227_v9 = vld [vmem:[%s9711_s27 + $0x8] sm:$0xff]  }
 0x4d8   :  { %926 = vperm.xlu1 %9184, %v896_v10   ;;  %911 = vperm.xlu0 %9185, %v893_v11   ;;  %v9228_v10 = vld [vmem:[%s9711_s27 + $0x10] sm:$0xff]   ;;  %v9229_v11 = vld [vmem:[%s9711_s27 + $0x18] sm:$0xff]   ;;  %s12237_s27 = sld [smem:[#allocation26_spill]] }
 0x4dc   :  { %916 = vperm.xlu1 %9184, %v894_v13   ;;  %901 = vperm.xlu0 %9185, %v891_v14  }
 0x4e0   :  { %906 = vperm.xlu1 %9184, %v892_v15  }
 0x532   :  { %v852_v16 = vpop.permute.xlu0 %851 }
 0x533   :  { %v857_v17 = vrot.slane %v852_v16, 4 }
 0x535   :  { %v861_v18 = vsel %vm283_vm9, %v852_v16, %v857_v17 }
 0x536   :  { %869 = vst.msk [vmem:[#allocation3 + $0x50] sm:$0xff] %vm10007_vm10, %v861_v18  ;;  %v854_v19 = vpop.permute.xlu1 %853  ;;  %v848_v20 = vpop.permute.xlu0 %847 }
 0x537   :  { %v858_v21 = vrot.slane %v854_v19, 4  ;;  %v855_v22 = vrot.slane %v848_v20, 4 }
 0x539   :  { %v862_v24 = vsel %vm283_vm9, %v854_v19, %v858_v21  ;;  %v859_v26 = vsel %vm283_vm9, %v848_v20, %v855_v22 }
 0x53a   :  { %870 = vst.msk [vmem:[#allocation3 + $0x58] sm:$0xff] %vm10007_vm10, %v862_v24  ;;  %867 = vst.msk [vmem:[#allocation3 + $0x40] sm:$0xff] %vm10007_vm10, %v859_v26  ;;  %v850_v27 = vpop.permute.xlu1 %849  ;;  %v820_v29 = vpop.permute.xlu0 %819 }
 0x53b   :  { %v856_v31 = vrot.slane %v850_v27, 4  ;;  %v825_v33 = vrot.slane %v820_v29, 4 }
 0x53d   :  { %v860_v34 = vsel %vm283_vm9, %v850_v27, %v856_v31  ;;  %v829_v38 = vsel %vm271_vm12, %v820_v29, %v825_v33 }
 0x53e   :  { %868 = vst.msk [vmem:[#allocation3 + $0x48] sm:$0xff] %vm10007_vm10, %v860_v34  ;;  %837 = vst.msk [vmem:[#allocation3 + $0x30] sm:$0xff] %vm10007_vm10, %v829_v38  ;;  %v822_v44 = vpop.permute.xlu1 %821  ;;  %v816_v50 = vpop.permute.xlu0 %815 }
 0x53f   :  { %v826_v51 = vrot.slane %v822_v44, 4  ;;  %v823_v53 = vrot.slane %v816_v50, 4 }
 0x541   :  { %v830_v54 = vsel %vm271_vm12, %v822_v44, %v826_v51  ;;  %v827_v55 = vsel %vm271_vm12, %v816_v50, %v823_v53  ;;  %v9208_v56 = vld [vmem:[#allocation3 + $0x54] ss:$8 sps:$4 sm:$0xff]   ;;  %v9210_v57 = vld [vmem:[#allocation3 + $0x50] ss:$8 sps:$4 sm:$0xff]  }
 0x542   :  { %838 = vst.msk [vmem:[#allocation3 + $0x38] sm:$0xff] %vm10007_vm10, %v830_v54  ;;  %835 = vst.msk [vmem:[#allocation3 + $0x20] sm:$0xff] %vm10007_vm10, %v827_v55  ;;  %v818_v58 = vpop.permute.xlu1 %817  ;;  %1035 = vmatprep.subr.bf16.mxu0 %v9208_v56 }
 0x543   :  { %v824_v59 = vrot.slane %v818_v58, 4  ;;  %1036 = vmatpush1.bf16.msra.mxu0 %v9210_v57 }
 0x545   :  { %v828_v60 = vsel %vm271_vm12, %v818_v58, %v824_v59  ;;  %v9211_v61 = vld [vmem:[#allocation3 + $0x44] ss:$8 sps:$4 sm:$0xff]   ;;  %v9213_v62 = vld [vmem:[#allocation3 + $0x40] ss:$8 sps:$4 sm:$0xff]  }
 0x546   :  { %836 = vst.msk [vmem:[#allocation3 + $0x28] sm:$0xff] %vm10007_vm10, %v828_v60  ;;  %1037 = vmatprep.subr.bf16.mxu0 %v9211_v61 }
 0x547   :  { %1038 = vmatpush1.bf16.msra.mxu0 %v9213_v62 }
 0x549   :  { %v9214_v63 = vld [vmem:[#allocation3 + $0x34] ss:$8 sps:$4 sm:$0xff]   ;;  %v9216_v0 = vld [vmem:[#allocation3 + $0x30] ss:$8 sps:$4 sm:$0xff]  }
 0x54a   :  { %1039 = vmatprep.subr.bf16.mxu0 %v9214_v63 }
 0x54b   :  { %1040 = vmatpush1.bf16.msra.mxu0 %v9216_v0  ;;  %v932_v20 = vpop.permute.xlu0 %931 }
 0x54d   :  { %v9217_v3 = vld [vmem:[#allocation3 + $0x24] ss:$8 sps:$4 sm:$0xff]   ;;  %v9219_v4 = vld [vmem:[#allocation3 + $0x20] ss:$8 sps:$4 sm:$0xff]  }
 0x54e   :  { %1041 = vmatprep.subr.bf16.mxu0 %v9217_v3 }
 0x54f   :  { %1042 = vmatpush1.bf16.msra.mxu0 %v9219_v4  ;;  %v937_v24 = vpop.permute.xlu1 %936  ;;  %v922_v27 = vpop.permute.xlu0 %921 }
 0x550   :  { %1043 = vmatprep.subr.bf16.mxu0 %v9220_v2 }
 0x553   :  { %1044 = vmatpush1.bf16.msra.mxu0 %v9222_v5  ;;  %v927_v33 = vpop.permute.xlu1 %926  ;;  %v912_v38 = vpop.permute.xlu0 %911 }
 0x554   :  { %1045 = vmatprep.subr.bf16.mxu0 %v9223_v6 }
 0x557   :  { %1046 = vmatpush1.bf16.msra.mxu0 %v9225_v7  ;;  %v917_v58 = vpop.permute.xlu1 %916  ;;  %v902_v4 = vpop.permute.xlu0 %901 }
 0x55a   :  { %8099 = vmatmul.mubr.msk.bf16.vlgmr.msra.gmra.mxu0 %vm671_vm11, %v9226_v8 }
 0x55b   :  { %1073 = vmatprep.mubr.bf16.mxu0 %v9610_v1 }
 0x562   :  { %8100 = vmatmul.mubr.msk.bf16.gmra.mxu0 %vm671_vm11, %v9227_v9 }
 0x563   :  { %1083 = vmatprep.mubr.bf16.mxu0 %v9610_v1 }
 0x56a   :  { %8101 = vmatmul.mubr.msk.bf16.gmra.mxu0 %vm671_vm11, %v9228_v10 }
 0x56b   :  { %1093 = vmatprep.mubr.bf16.mxu0 %v9610_v1 }
 0x572   :  { %8102 = vmatmul.mubr.msk.bf16.gmra.mxu0 %vm671_vm11, %v9229_v11 }
 0x573   :  { %1974 = vmatprep.mubr.bf16.mxu0 %v9610_v1 }
 0x61a   :  { %v1065_v13 = vpop.f32.mrf.mxu0 }
 0x61c   :  { %v1067_v14 = vpop.f32.mrf.mxu0 }
 0x61d   :  { %v1068_v9 = vadd.f32 %v1067_v14, %v902_v4 }
 0x61e   :  { %v1069_v15 = vpop.f32.mrf.mxu0 }
 0x61f   :  { %v1105_v14 = vmul.f32 %v1068_v9, %v9965_v41 }
 0x620   :  { %v1071_v16 = vpop.f32.mrf.mxu0 }
 0x622   :  { %v1075_v17 = vpop.f32.mrf.mxu0 }
 0x623   :  { %v1076_v63 = vadd.f32 %v1075_v17, %v912_v38 }
 0x624   :  { %v1077_v18 = vpop.f32.mrf.mxu0 }
 0x625   :  { %v1078_v56 = vadd.f32 %v1077_v18, %v912_v38 }
 0x626   :  { %v1079_v19 = vpop.f32.mrf.mxu0 }
 0x627   :  { %v1109_v10 = vmul.f32 %v1078_v56, %v9965_v41 }
 0x628   :  { %v1081_v21 = vpop.f32.mrf.mxu0 }
 0x629   :  { %v1082_v11 = vadd.f32 %v1081_v21, %v917_v58 }
 0x62a   :  { %v1085_v22 = vpop.f32.mrf.mxu0 }
 0x62b   :  { %v1086_v51 = vadd.f32 %v1085_v22, %v922_v27 }
 0x62c   :  { %v1087_v26 = vpop.f32.mrf.mxu0 }
 0x62d   :  { %v1088_v44 = vadd.f32 %v1087_v26, %v922_v27  ;;  %v1112_v0 = vmul.f32 %v1086_v51, %v9963_v39  ;;  %v1066_v26 = vadd.f32 %v1065_v13, %v902_v4  ;;  %v1108_v27 = vmul.f32 %v1076_v63, %v9963_v39 }
 0x62e   :  { %v1089_v29 = vpop.f32.mrf.mxu0 }
 0x62f   :  { %v1113_v59 = vmul.f32 %v1088_v44, %v9965_v41  ;;  %v1090_v2 = vadd.f32 %v1089_v29, %v927_v33  ;;  %v1080_v29 = vadd.f32 %v1079_v19, %v917_v58  ;;  %v1125_v44 = vmax.f32 %v1109_v10, 0.0 }
 0x630   :  { %v1091_v31 = vpop.f32.mrf.mxu0  ;;  %v1121_v58 = vmax.f32 %v1105_v14, 0.0 }
 0x631   :  { %v1092_v60 = vadd.f32 %v1091_v31, %v927_v33  ;;  %v1129_v18 = vmax.f32 %v1113_v59, 0.0  ;;  %v907_v31 = vpop.permute.xlu1 %906  ;;  %v1128_v33 = vmax.f32 %v1112_v0, 0.0  ;;  %v1110_v56 = vmul.f32 %v1080_v29, %v9963_v39 }
 0x632   :  { %v1095_v34 = vpop.f32.mrf.mxu0  ;;  %v1072_v21 = vadd.f32 %v1071_v16, %v907_v31  ;;  %v1070_v19 = vadd.f32 %v1069_v15, %v907_v31 }
 0x633   :  { %v1096_v50 = vadd.f32 %v1095_v34, %v932_v20  ;;  %v1114_v34 = vmul.f32 %v1090_v2, %v9963_v39  ;;  %v8582_v13 = vpack.c.bf16 %v1129_v18, %v1128_v33  ;;  %v1126_v0 = vmax.f32 %v1110_v56, 0.0 }
 0x634   :  { %v1097_v53 = vpop.f32.mrf.mxu0  ;;  %v1107_v16 = vmul.f32 %v1072_v21, %v9965_v41  ;;  %v1106_v63 = vmul.f32 %v1070_v19, %v9963_v39 }
 0x635   :  { %v1116_v54 = vmul.f32 %v1096_v50, %v9963_v39  ;;  %v1098_v55 = vadd.f32 %v1097_v53, %v932_v20  ;;  %v1115_v20 = vmul.f32 %v1092_v60, %v9965_v41  ;;  %v1111_v50 = vmul.f32 %v1082_v11, %v9965_v41 }
 0x636   :  { %v1099_v57 = vpop.f32.mrf.mxu0  ;;  %v1123_v15 = vmax.f32 %v1107_v16, 0.0  ;;  %v1122_v4 = vmax.f32 %v1106_v63, 0.0  ;;  %v9268_v63 = vld [vmem:[%s9721_s29 + $0x4] ss:$8 sps:$4 sm:$0xff]  }
 0x637   :  { %v1117_v61 = vmul.f32 %v1098_v55, %v9965_v41  ;;  %v1100_v62 = vadd.f32 %v1099_v57, %v937_v24  ;;  %v1132_v5 = vmax.f32 %v1116_v54, 0.0  ;;  %v1131_v51 = vmax.f32 %v1115_v20, 0.0  ;;  %8139 = vmatprep.mubr.msk.bf16.mxu1 %vm1574_vm13, %v9268_v63 }
 0x638   :  { %v1101_v3 = vpop.f32.mrf.mxu0  ;;  %v1104_v54 = vmul.f32 %v1066_v26, %v9963_v39  ;;  %v1124_v55 = vmax.f32 %v1108_v27, 0.0  ;;  %v1130_v57 = vmax.f32 %v1114_v34, 0.0  ;;  %v1127_v59 = vmax.f32 %v1111_v50, 0.0 }
 0x639   :  { %v1133_v6 = vmax.f32 %v1117_v61, 0.0  ;;  %v1118_v7 = vmul.f32 %v1100_v62, %v9963_v39  ;;  %v1102_v8 = vadd.f32 %v1101_v3, %v937_v24 }
 0x63a   :  { %v8583_v60 = vpack.c.bf16 %v1131_v51, %v1130_v57  ;;  %v8580_v61 = vpack.c.bf16 %v1125_v44, %v1124_v55  ;;  %v1120_v62 = vmax.f32 %v1104_v54, 0.0  ;;  %v8581_v2 = vpack.c.bf16 %v1127_v59, %v1126_v0  ;;  %v1414_v59 = vld [vmem:[%s9726_s24 + $0x10] sm:$0xff] }
 0x63b   :  { %v1119_v22 = vmul.f32 %v1102_v8, %v9965_v41  ;;  %v8584_v17 = vpack.c.bf16 %v1133_v6, %v1132_v5  ;;  %v1134_v38 = vmax.f32 %v1118_v7, 0.0  ;;  %v8579_v5 = vpack.c.bf16 %v1123_v15, %v1122_v4 }
 0x63c   :  { %v8578_v3 = vpack.c.bf16 %v1121_v58, %v1120_v62  ;;  %v1413_v62 = vld [vmem:[%s9726_s24 + $0x8] sm:$0xff] }
 0x63d   :  { %v1135_v24 = vmax.f32 %v1119_v22, 0.0  ;;  %1188 = vrot.lane.b32.xlu0 %v8584_v17, %s9609_s22 }
 0x63f   :  { %v8585_v53 = vpack.c.bf16 %v1135_v24, %v1134_v38 }
 0x641   :  { %1190 = vrot.lane.b32.xlu1 %v8585_v53, %s9609_s22  ;;  %1184 = vrot.lane.b32.xlu0 %v8582_v13, %s9609_s22 }
 0x645   :  { %1186 = vrot.lane.b32.xlu1 %v8583_v60, %s9609_s22  ;;  %1180 = vrot.lane.b32.xlu0 %v8580_v61, %s9609_s22  ;;  %v1415_v60 = vld [vmem:[%s9726_s24 + $0x18] sm:$0xff]  ;;  %v1412_v61 = vld [vmem:[%s9726_s24] sm:$0xff]  ;;  %s12232_s24 = sld [smem:[#allocation23_spill]] }
 0x649   :  { %1182 = vrot.lane.b32.xlu1 %v8581_v2, %s9609_s22  ;;  %1176 = vrot.lane.b32.xlu0 %v8578_v3, %s9609_s22 }
 0x64d   :  { %1178 = vrot.lane.b32.xlu1 %v8579_v5, %s9609_s22 }
 0x6af   :  { %v1189_v6 = vpop.permute.xlu0 %1188 }
 0x6b0   :  { %v1198_v7 = vrot.slane %v1189_v6, 4 }
 0x6b2   :  { %v1206_v8 = vsel %vm249_vm2, %v1198_v7, %v1189_v6 }
 0x6b3   :  { %1222 = vst.msk [vmem:[#allocation2 + $0x30] sm:$0xff] %vm9979_vm3, %v1206_v8  ;;  %v1191_v9 = vpop.permute.xlu1 %1190  ;;  %v1185_v10 = vpop.permute.xlu0 %1184 }
 0x6b4   :  { %1230 = vst.msk [vmem:[#allocation2 + $0x30] sm:$0xf] %vm476_vm4, %v9610_v1  ;;  %v1199_v11 = vrot.slane %v1191_v9, 4  ;;  %v1196_v18 = vrot.slane %v1185_v10, 4 }
 0x6b5   :  { %1238 = vst.msk [vmem:[#allocation2 + $0x34] sm:$0xf] %vm481_vm5, %v9610_v1 }
 0x6b6   :  { %v1207_v20 = vsel %vm249_vm2, %v1199_v11, %v1191_v9  ;;  %v1204_v22 = vsel %vm249_vm2, %v1196_v18, %v1185_v10 }
 0x6b7   :  { %1223 = vst.msk [vmem:[#allocation2 + $0x38] sm:$0xff] %vm9979_vm3, %v1207_v20  ;;  %1220 = vst.msk [vmem:[#allocation2 + $0x20] sm:$0xff] %vm9979_vm3, %v1204_v22  ;;  %v1187_v17 = vpop.permute.xlu1 %1186  ;;  %v1181_v26 = vpop.permute.xlu0 %1180 }
 0x6b8   :  { %1231 = vst.msk [vmem:[#allocation2 + $0x38] sm:$0xf] %vm476_vm4, %v9610_v1  ;;  %1228 = vst.msk [vmem:[#allocation2 + $0x20] sm:$0xf] %vm476_vm4, %v9610_v1  ;;  %v1197_v27 = vrot.slane %v1187_v17, 4  ;;  %v1194_v29 = vrot.slane %v1181_v26, 4 }
 0x6b9   :  { %1239 = vst.msk [vmem:[#allocation2 + $0x3c] sm:$0xf] %vm481_vm5, %v9610_v1  ;;  %1236 = vst.msk [vmem:[#allocation2 + $0x24] sm:$0xf] %vm481_vm5, %v9610_v1 }
 0x6ba   :  { %v1205_v31 = vsel %vm249_vm2, %v1197_v27, %v1187_v17  ;;  %v1202_v33 = vsel %vm249_vm2, %v1194_v29, %v1181_v26 }
 0x6bb   :  { %1221 = vst.msk [vmem:[#allocation2 + $0x28] sm:$0xff] %vm9979_vm3, %v1205_v31  ;;  %1218 = vst.msk [vmem:[#allocation2 + $0x10] sm:$0xff] %vm9979_vm3, %v1202_v33  ;;  %v1183_v38 = vpop.permute.xlu1 %1182  ;;  %v1177_v24 = vpop.permute.xlu0 %1176 }
 0x6bc   :  { %v1246_v34 = vld [vmem:[#allocation2 + $0x30] sm:$0xff]  ;;  %1229 = vst.msk [vmem:[#allocation2 + $0x28] sm:$0xf] %vm476_vm4, %v9610_v1  ;;  %1226 = vst.msk [vmem:[#allocation2 + $0x10] sm:$0xf] %vm476_vm4, %v9610_v1  ;;  %v1195_v14 = vrot.slane %v1183_v38, 4 }
 0x6bd   :  { %1254 = vst.msk [vmem:[#allocation3 + $0x30] sm:$0xff] %vm10007_vm10, %v1246_v34  ;;  %v1192_v21 = vrot.slane %v1177_v24, 4  ;;  %1284 = vrot.lane.b32.xlu0 %v1246_v34, %s9612_s5 }
 0x6be   :  { %1237 = vst.msk [vmem:[#allocation2 + $0x2c] sm:$0xf] %vm481_vm5, %v9610_v1  ;;  %1234 = vst.msk [vmem:[#allocation2 + $0x14] sm:$0xf] %vm481_vm5, %v9610_v1  ;;  %v1203_v44 = vsel %vm249_vm2, %v1195_v14, %v1183_v38 }
 0x6bf   :  { %v1200_v50 = vsel %vm249_vm2, %v1192_v21, %v1177_v24  ;;  %1219 = vst.msk [vmem:[#allocation2 + $0x18] sm:$0xff] %vm9979_vm3, %v1203_v44  ;;  %v1179_v13 = vpop.permute.xlu1 %1178 }
 0x6c0   :  { %v1247_v51 = vld [vmem:[#allocation2 + $0x38] sm:$0xff]  ;;  %v1244_v53 = vld [vmem:[#allocation2 + $0x20] sm:$0xff]  ;;  %1216 = vst.msk [vmem:[#allocation2] sm:$0xff] %vm9979_vm3, %v1200_v50  ;;  %v1193_v54 = vrot.slane %v1179_v13, 4 }
 0x6c1   :  { %1255 = vst.msk [vmem:[#allocation3 + $0x38] sm:$0xff] %vm10007_vm10, %v1247_v51  ;;  %1252 = vst.msk [vmem:[#allocation3 + $0x20] sm:$0xff] %vm10007_vm10, %v1244_v53  ;;  %1286 = vrot.lane.b32.xlu1 %v1247_v51, %s9612_s5  ;;  %1280 = vrot.lane.b32.xlu0 %v1244_v53, %s9612_s5 }
 0x6c2   :  { %1227 = vst.msk [vmem:[#allocation2 + $0x18] sm:$0xf] %vm476_vm4, %v9610_v1  ;;  %1224 = vst.msk [vmem:[#allocation2] sm:$0xf] %vm476_vm4, %v9610_v1  ;;  %v1201_v19 = vsel %vm249_vm2, %v1193_v54, %v1179_v13 }
 0x6c3   :  { %1235 = vst.msk [vmem:[#allocation2 + $0x1c] sm:$0xf] %vm481_vm5, %v9610_v1  ;;  %1232 = vst.msk [vmem:[#allocation2 + $0x4] sm:$0xf] %vm481_vm5, %v9610_v1 }
 0x6c4   :  { %1217 = vst.msk [vmem:[#allocation2 + $0x8] sm:$0xff] %vm9979_vm3, %v1201_v19 }
 0x6c5   :  { %v1245_v55 = vld [vmem:[#allocation2 + $0x28] sm:$0xff]  ;;  %v1258_v56 = vld [vmem:[#allocation2 + $0x10] sm:$0xff]  ;;  %1225 = vst.msk [vmem:[#allocation2 + $0x8] sm:$0xf] %vm476_vm4, %v9610_v1 }
 0x6c6   :  { %1253 = vst.msk [vmem:[#allocation3 + $0x28] sm:$0xff] %vm10007_vm10, %v1245_v55  ;;  %1282 = vrot.lane.b32.xlu1 %v1245_v55, %s9612_s5  ;;  %1276 = vrot.lane.b32.xlu0 %v1258_v56, %s9612_s5  ;;  %1250 = vst.msk [vmem:[#allocation3 + $0x10] sm:$0xff] %vm10007_vm10, %v1258_v56 }
 0x6c7   :  { %1233 = vst.msk [vmem:[#allocation2 + $0xc] sm:$0xf] %vm481_vm5, %v9610_v1 }
 0x6ca   :  { %v1259_v57 = vld [vmem:[#allocation2 + $0x18] sm:$0xff]  ;;  %v1256_v58 = vld [vmem:[#allocation2] sm:$0xff] }
 0x6cb   :  { %1278 = vrot.lane.b32.xlu1 %v1259_v57, %s9612_s5  ;;  %1272 = vrot.lane.b32.xlu0 %v1256_v58, %s9612_s5  ;;  %1251 = vst.msk [vmem:[#allocation3 + $0x18] sm:$0xff] %vm10007_vm10, %v1259_v57  ;;  %1248 = vst.msk [vmem:[#allocation3] sm:$0xff] %vm10007_vm10, %v1256_v58 }
 0x6ce   :  { %v1257_v16 = vld [vmem:[#allocation2 + $0x8] sm:$0xff] }
 0x6cf   :  { %1274 = vrot.lane.b32.xlu1 %v1257_v16, %s9612_s5  ;;  %1348 = vrot.lane.b32.xlu0 %v1246_v34, %s9611_s0  ;;  %1249 = vst.msk [vmem:[#allocation3 + $0x8] sm:$0xff] %vm10007_vm10, %v1257_v16 }
 0x6d3   :  { %1350 = vrot.lane.b32.xlu1 %v1247_v51, %s9611_s0  ;;  %1344 = vrot.lane.b32.xlu0 %v1244_v53, %s9611_s0 }
 0x6d7   :  { %1346 = vrot.lane.b32.xlu1 %v1245_v55, %s9611_s0  ;;  %1340 = vrot.lane.b32.xlu0 %v1258_v56, %s9611_s0 }
 0x6db   :  { %1342 = vrot.lane.b32.xlu1 %v1259_v57, %s9611_s0  ;;  %1336 = vrot.lane.b32.xlu0 %v1256_v58, %s9611_s0 }
 0x6df   :  { %1338 = vrot.lane.b32.xlu1 %v1257_v16, %s9611_s0  ;;  %1428 = vperm.xlu0 %9185, %v1414_v59  }
 0x6e3   :  { %1433 = vperm.xlu1 %9184, %v1415_v60   ;;  %1418 = vperm.xlu0 %9185, %v1412_v61  }
 0x6e7   :  { %1423 = vperm.xlu1 %9184, %v1413_v62  }
 0x72f   :  { %v1285_v0 = vpop.permute.xlu0 %1284 }
 0x730   :  { %v1294_v15 = vrot.slane %v1285_v0, 4 }
 0x732   :  { %v1302_v2 = vsel %vm271_vm12, %v1285_v0, %v1294_v15  ;;  %v9242_v0 = vld [vmem:[#allocation3 + $0x34] ss:$8 sps:$4 sm:$0xff]  }
 0x733   :  { %1318 = vst.msk [vmem:[#allocation3 + $0x70] sm:$0xff] %vm10007_vm10, %v1302_v2  ;;  %v1287_v3 = vpop.permute.xlu1 %1286  ;;  %v1281_v4 = vpop.permute.xlu0 %1280 }
 0x734   :  { %v1295_v5 = vrot.slane %v1287_v3, 4  ;;  %v1292_v6 = vrot.slane %v1281_v4, 4 }
 0x736   :  { %v1303_v7 = vsel %vm271_vm12, %v1287_v3, %v1295_v5  ;;  %v1300_v8 = vsel %vm271_vm12, %v1281_v4, %v1292_v6 }
 0x737   :  { %1319 = vst.msk [vmem:[#allocation3 + $0x78] sm:$0xff] %vm10007_vm10, %v1303_v7  ;;  %1316 = vst.msk [vmem:[#allocation3 + $0x60] sm:$0xff] %vm10007_vm10, %v1300_v8 }
 0x738   :  { %v1283_v9 = vpop.permute.xlu1 %1282  ;;  %v1277_v10 = vpop.permute.xlu0 %1276 }
 0x739   :  { %v1293_v11 = vrot.slane %v1283_v9, 4  ;;  %v1290_v18 = vrot.slane %v1277_v10, 4 }
 0x73b   :  { %v1301_v20 = vsel %vm271_vm12, %v1283_v9, %v1293_v11  ;;  %v1298_v22 = vsel %vm271_vm12, %v1277_v10, %v1290_v18  ;;  %v9244_v9 = vld [vmem:[#allocation3 + $0x30] ss:$8 sps:$4 sm:$0xff]   ;;  %v9245_v18 = vld [vmem:[#allocation3 + $0x24] ss:$8 sps:$4 sm:$0xff]  }
 0x73c   :  { %1317 = vst.msk [vmem:[#allocation3 + $0x68] sm:$0xff] %vm10007_vm10, %v1301_v20  ;;  %1314 = vst.msk [vmem:[#allocation3 + $0x50] sm:$0xff] %vm10007_vm10, %v1298_v22 }
 0x73d   :  { %v1279_v17 = vpop.permute.xlu1 %1278  ;;  %v1273_v26 = vpop.permute.xlu0 %1272 }
 0x73e   :  { %v1291_v27 = vrot.slane %v1279_v17, 4  ;;  %v1288_v29 = vrot.slane %v1273_v26, 4  ;;  %v9230_v34 = vld [vmem:[#allocation3 + $0x74] ss:$8 sps:$4 sm:$0xff]   ;;  %v9232_v38 = vld [vmem:[#allocation3 + $0x70] ss:$8 sps:$4 sm:$0xff]  }
 0x73f   :  { %1581 = vmatprep.subr.bf16.mxu1 %v9230_v34 }
 0x740   :  { %v1299_v31 = vsel %vm271_vm12, %v1279_v17, %v1291_v27  ;;  %v1296_v33 = vsel %vm271_vm12, %v1273_v26, %v1288_v29  ;;  %1582 = vmatpush1.bf16.msra.mxu1 %v9232_v38  ;;  %v9247_v17 = vld [vmem:[#allocation3 + $0x20] ss:$8 sps:$4 sm:$0xff]   ;;  %v9248_v27 = vld [vmem:[#allocation3 + $0x14] ss:$8 sps:$4 sm:$0xff]   ;;  %v9250_v29 = vld [vmem:[#allocation3 + $0x10] ss:$8 sps:$4 sm:$0xff]  }
 0x741   :  { %1315 = vst.msk [vmem:[#allocation3 + $0x58] sm:$0xff] %vm10007_vm10, %v1299_v31  ;;  %1312 = vst.msk [vmem:[#allocation3 + $0x40] sm:$0xff] %vm10007_vm10, %v1296_v33  ;;  %v1275_v24 = vpop.permute.xlu1 %1274  ;;  %v1349_v14 = vpop.permute.xlu0 %1348  ;;  %v9251_v31 = vld [vmem:[#allocation3 + $0x4] ss:$8 sps:$4 sm:$0xff]   ;;  %v9253_v33 = vld [vmem:[#allocation3] ss:$8 sps:$4 sm:$0xff]  }
 0x742   :  { %v1289_v21 = vrot.slane %v1275_v24, 4  ;;  %v1358_v44 = vrot.slane %v1349_v14, 4 }
 0x743   :  { %v9233_v51 = vld [vmem:[#allocation3 + $0x64] ss:$8 sps:$4 sm:$0xff]   ;;  %v9235_v53 = vld [vmem:[#allocation3 + $0x60] ss:$8 sps:$4 sm:$0xff]  }
 0x744   :  { %v1297_v50 = vsel %vm271_vm12, %v1275_v24, %v1289_v21  ;;  %v1366_v13 = vsel %vm283_vm9, %v1349_v14, %v1358_v44  ;;  %1583 = vmatprep.subr.bf16.mxu1 %v9233_v51 }
 0x745   :  { %1313 = vst.msk [vmem:[#allocation3 + $0x48] sm:$0xff] %vm10007_vm10, %v1297_v50  ;;  %1382 = vst.msk [vmem:[#allocation3 + $0xb0] sm:$0xff] %vm10007_vm10, %v1366_v13  ;;  %v1351_v54 = vpop.permute.xlu1 %1350  ;;  %v1345_v19 = vpop.permute.xlu0 %1344  ;;  %1584 = vmatpush1.bf16.msra.mxu1 %v9235_v53  ;;  %v9266_v53 = vld [vmem:[%s9721_s29] ss:$8 sps:$4 sm:$0xff]   ;;  %v9269_v13 = vld [vmem:[%s9721_s29 + $0x14] ss:$8 sps:$4 sm:$0xff]  }
 0x746   :  { %v1359_v55 = vrot.slane %v1351_v54, 4  ;;  %v1356_v56 = vrot.slane %v1345_v19, 4 }
 0x748   :  { %v9236_v57 = vld [vmem:[#allocation3 + $0x54] ss:$8 sps:$4 sm:$0xff]   ;;  %v9238_v58 = vld [vmem:[#allocation3 + $0x50] ss:$8 sps:$4 sm:$0xff]   ;;  %v1367_v16 = vsel %vm283_vm9, %v1351_v54, %v1359_v55  ;;  %v1364_v59 = vsel %vm283_vm9, %v1345_v19, %v1356_v56 }
 0x749   :  { %1383 = vst.msk [vmem:[#allocation3 + $0xb8] sm:$0xff] %vm10007_vm10, %v1367_v16  ;;  %1380 = vst.msk [vmem:[#allocation3 + $0xa0] sm:$0xff] %vm10007_vm10, %v1364_v59  ;;  %v1347_v60 = vpop.permute.xlu1 %1346  ;;  %v1341_v61 = vpop.permute.xlu0 %1340  ;;  %1585 = vmatprep.subr.bf16.mxu1 %v9236_v57  ;;  %v9271_v54 = vld [vmem:[%s9721_s29 + $0x10] ss:$8 sps:$4 sm:$0xff]   ;;  %s12229_s29 = sld [smem:[#allocation10_spill]] }
 0x74a   :  { %v1357_v62 = vrot.slane %v1347_v60, 4  ;;  %v1354_v63 = vrot.slane %v1341_v61, 4  ;;  %1586 = vmatpush1.bf16.msra.mxu1 %v9238_v58 }
 0x74c   :  { %v9239_v15 = vld [vmem:[#allocation3 + $0x44] ss:$8 sps:$4 sm:$0xff]   ;;  %v9241_v2 = vld [vmem:[#allocation3 + $0x40] ss:$8 sps:$4 sm:$0xff]   ;;  %v1365_v3 = vsel %vm283_vm9, %v1347_v60, %v1357_v62  ;;  %v1362_v4 = vsel %vm283_vm9, %v1341_v61, %v1354_v63 }
 0x74d   :  { %1381 = vst.msk [vmem:[#allocation3 + $0xa8] sm:$0xff] %vm10007_vm10, %v1365_v3  ;;  %1378 = vst.msk [vmem:[#allocation3 + $0x90] sm:$0xff] %vm10007_vm10, %v1362_v4  ;;  %v1343_v5 = vpop.permute.xlu1 %1342  ;;  %v1337_v6 = vpop.permute.xlu0 %1336  ;;  %1587 = vmatprep.subr.bf16.mxu1 %v9239_v15 }
 0x74e   :  { %v1355_v7 = vrot.slane %v1343_v5, 4  ;;  %v1352_v8 = vrot.slane %v1337_v6, 4  ;;  %1588 = vmatpush1.bf16.msra.mxu1 %v9241_v2 }
 0x74f   :  { %1589 = vmatprep.subr.bf16.mxu1 %v9242_v0 }
 0x750   :  { %v1363_v10 = vsel %vm283_vm9, %v1343_v5, %v1355_v7  ;;  %v1360_v11 = vsel %vm283_vm9, %v1337_v6, %v1352_v8  ;;  %v9254_v34 = vld [vmem:[#allocation3 + $0xb4] ss:$8 sps:$4 sm:$0xff]   ;;  %v9256_v24 = vld [vmem:[#allocation3 + $0xb0] ss:$8 sps:$4 sm:$0xff]  }
 0x751   :  { %1379 = vst.msk [vmem:[#allocation3 + $0x98] sm:$0xff] %vm10007_vm10, %v1363_v10  ;;  %1376 = vst.msk [vmem:[#allocation3 + $0x80] sm:$0xff] %vm10007_vm10, %v1360_v11  ;;  %v1339_v20 = vpop.permute.xlu1 %1338 }
 0x752   :  { %v1353_v22 = vrot.slane %v1339_v20, 4  ;;  %1590 = vmatpush1.bf16.msra.mxu1 %v9244_v9 }
 0x753   :  { %1591 = vmatprep.subr.bf16.mxu1 %v9245_v18 }
 0x754   :  { %v1361_v26 = vsel %vm283_vm9, %v1339_v20, %v1353_v22  ;;  %v9257_v38 = vld [vmem:[#allocation3 + $0xa4] ss:$8 sps:$4 sm:$0xff]   ;;  %v9259_v21 = vld [vmem:[#allocation3 + $0xa0] ss:$8 sps:$4 sm:$0xff]  }
 0x755   :  { %1377 = vst.msk [vmem:[#allocation3 + $0x88] sm:$0xff] %vm10007_vm10, %v1361_v26 }
 0x756   :  { %1592 = vmatpush1.bf16.msra.mxu1 %v9247_v17 }
 0x757   :  { %1593 = vmatprep.subr.bf16.mxu1 %v9248_v27 }
 0x758   :  { %v9260_v14 = vld [vmem:[#allocation3 + $0x94] ss:$8 sps:$4 sm:$0xff]   ;;  %v9262_v50 = vld [vmem:[#allocation3 + $0x90] ss:$8 sps:$4 sm:$0xff]  }
 0x75a   :  { %1594 = vmatpush1.bf16.msra.mxu1 %v9250_v29  ;;  %v1429_v19 = vpop.permute.xlu0 %1428 }
 0x75b   :  { %1595 = vmatprep.subr.bf16.mxu1 %v9251_v31 }
 0x75c   :  { %v9263_v44 = vld [vmem:[#allocation3 + $0x84] ss:$8 sps:$4 sm:$0xff]   ;;  %v9265_v51 = vld [vmem:[#allocation3 + $0x80] ss:$8 sps:$4 sm:$0xff]  }
 0x75e   :  { %1596 = vmatpush1.bf16.msra.mxu1 %v9253_v33  ;;  %v1434_v57 = vpop.permute.xlu1 %1433  ;;  %v1419_v16 = vpop.permute.xlu0 %1418 }
 0x75f   :  { %1605 = vmatprep.subr.bf16.mxu1 %v9254_v34 }
 0x762   :  { %1606 = vmatpush2.bf16.msra.mxu1 %v9256_v24  ;;  %v1424_v0 = vpop.permute.xlu1 %1423 }
 0x763   :  { %1607 = vmatprep.subr.bf16.mxu1 %v9257_v38 }
 0x766   :  { %1608 = vmatpush2.bf16.msra.mxu1 %v9259_v21 }
 0x767   :  { %1609 = vmatprep.subr.bf16.mxu1 %v9260_v14 }
 0x76a   :  { %1610 = vmatpush2.bf16.msra.mxu1 %v9262_v50 }
 0x76b   :  { %1611 = vmatprep.subr.bf16.mxu1 %v9263_v44 }
 0x76e   :  { %1612 = vmatpush2.bf16.msra.mxu1 %v9265_v51 }
 0x76f   :  { %2755 = vmatprep.subr.bf16.mxu1 %v9610_v1 }
 0x771   :  { %1614 = vmatmul.mubr.bf16.vlgmr.msra.gmra.mxu1 %v9266_v53 }
 0x772   :  { %8140 = vmatprep.mubr.msk.bf16.mxu1 %vm1574_vm13, %v9269_v13 }
 0x779   :  { %1624 = vmatmul.mubr.bf16.gmra.mxu1 %v9271_v54 }
 0x831   :  { %v1615_v55 = vpop.f32.mrf.mxu1 }
 0x832   :  { %v1616_v61 = vadd.f32 %v1615_v55, %v1419_v16 }
 0x833   :  { %v1617_v56 = vpop.f32.mrf.mxu1 }
 0x834   :  { %v1618_v59 = vadd.f32 %v1617_v56, %v1419_v16  ;;  %v1634_v6 = vmul.f32 %v1616_v61, %v9963_v39  ;;  %v1808_v16 = vld [vmem:[%s9736_s19 + $0x30] sm:$0xff]  ;;  %v1807_v61 = vld [vmem:[%s9736_s19 + $0x28] sm:$0xff] }
 0x835   :  { %v1619_v58 = vpop.f32.mrf.mxu1 }
 0x836   :  { %v1635_v15 = vmul.f32 %v1618_v59, %v9965_v41  ;;  %v1620_v7 = vadd.f32 %v1619_v58, %v1424_v0  ;;  %v10395_v23 = vadd.f32 %v1634_v6, %v739_v45  ;;  %v1809_v59 = vld [vmem:[%s9736_s19 + $0x38] sm:$0xff] }
 0x837   :  { %v1621_v60 = vpop.f32.mrf.mxu1 }
 0x838   :  { %v1622_v3 = vadd.f32 %v1621_v60, %v1424_v0  ;;  %v10385_v18 = vadd.f32 %v1635_v15, %v740_v40  ;;  %v1650_v37 = vmax.f32 %v10395_v23, 0.0  ;;  %v1806_v60 = vld [vmem:[%s9736_s19 + $0x20] sm:$0xff]  ;;  %v1803_v15 = vld [vmem:[%s9736_s19 + $0x8] sm:$0xff] }
 0x839   :  { %v1625_v62 = vpop.f32.mrf.mxu1  ;;  %v1802_v0 = vld [vmem:[%s9736_s19] sm:$0xff] }
 0x83a   :  { %v1626_v63 = vadd.f32 %v1625_v62, %v1429_v19  ;;  %v1637_v22 = vmul.f32 %v1622_v3, %v9965_v41  ;;  %v1804_v62 = vld [vmem:[%s9736_s19 + $0x10] sm:$0xff] }
 0x83b   :  { %v1627_v2 = vpop.f32.mrf.mxu1 }
 0x83c   :  { %v1638_v4 = vmul.f32 %v1626_v63, %v9963_v39  ;;  %v1628_v5 = vadd.f32 %v1627_v2, %v1429_v19  ;;  %v10408_v31 = vadd.f32 %v1637_v22, %v742_v49  ;;  %v1805_v63 = vld [vmem:[%s9736_s19 + $0x18] sm:$0xff]  ;;  %s12231_s19 = sld [smem:[#allocation25_spill]] }
 0x83d   :  { %v1629_v8 = vpop.f32.mrf.mxu1 }
 0x83e   :  { %v10380_v9 = vadd.f32 %v1638_v4, %v743_v35  ;;  %v1639_v10 = vmul.f32 %v1628_v5, %v9965_v41  ;;  %v1630_v11 = vadd.f32 %v1629_v8, %v1434_v57  ;;  %v1636_v35 = vmul.f32 %v1620_v7, %v9963_v39 }
 0x83f   :  { %v1631_v20 = vpop.f32.mrf.mxu1  ;;  %v1653_v43 = vmax.f32 %v10408_v31, 0.0 }
 0x840   :  { %v10390_v17 = vadd.f32 %v1639_v10, %v744_v36  ;;  %v1640_v26 = vmul.f32 %v1630_v11, %v9963_v39  ;;  %v1632_v27 = vadd.f32 %v1631_v20, %v1434_v57  ;;  %v1654_v28 = vmax.f32 %v10380_v9, 0.0 }
 0x841   :  { %v1651_v36 = vmax.f32 %v10385_v18, 0.0 }
 0x842   :  { %v1655_v40 = vmax.f32 %v10390_v17, 0.0  ;;  %v10402_v29 = vadd.f32 %v1640_v26, %v745_v47  ;;  %v1641_v30 = vmul.f32 %v1632_v27, %v9965_v41  ;;  %v10421_v47 = vadd.f32 %v1636_v35, %v741_v52 }
 0x843   :  { %v8586_v46 = vpack.c.bf16 %v1651_v36, %v1650_v37 }
 0x844   :  { %v10412_v32 = vadd.f32 %v1641_v30, %v746_v48  ;;  %v8588_v45 = vpack.c.bf16 %v1655_v40, %v1654_v28  ;;  %v1656_v33 = vmax.f32 %v10402_v29, 0.0  ;;  %v1652_v49 = vmax.f32 %v10421_v47, 0.0 }
 0x846   :  { %v1657_v42 = vmax.f32 %v10412_v32, 0.0  ;;  %1682 = vrot.lane.b32.xlu0 %v8588_v45, %s9609_s22  ;;  %v8587_v52 = vpack.c.bf16 %v1653_v43, %v1652_v49 }
 0x848   :  { %v8589_v48 = vpack.c.bf16 %v1657_v42, %v1656_v33 }
 0x84a   :  { %1684 = vrot.lane.b32.xlu1 %v8589_v48, %s9609_s22  ;;  %1678 = vrot.lane.b32.xlu0 %v8586_v46, %s9609_s22 }
 0x84e   :  { %1680 = vrot.lane.b32.xlu1 %v8587_v52, %s9609_s22 }
 0x8b8   :  { %v1683_v34 = vpop.permute.xlu0 %1682 }
 0x8b9   :  { %v1688_v38 = vrot.slane %v1683_v34, 4 }
 0x8bb   :  { %v1692_v24 = vsel %vm249_vm2, %v1688_v38, %v1683_v34 }
 0x8bc   :  { %1700 = vst.msk [vmem:[#allocation2 + $0x10] sm:$0xff] %vm9979_vm3, %v1692_v24  ;;  %v1685_v14 = vpop.permute.xlu1 %1684  ;;  %v1679_v21 = vpop.permute.xlu0 %1678 }
 0x8bd   :  { %1704 = vst.msk [vmem:[#allocation2 + $0x10] sm:$0xf] %vm476_vm4, %v9610_v1  ;;  %v1689_v44 = vrot.slane %v1685_v14, 4  ;;  %v1686_v50 = vrot.slane %v1679_v21, 4 }
 0x8be   :  { %1708 = vst.msk [vmem:[#allocation2 + $0x14] sm:$0xf] %vm481_vm5, %v9610_v1 }
 0x8bf   :  { %v1693_v51 = vsel %vm249_vm2, %v1689_v44, %v1685_v14  ;;  %v1690_v53 = vsel %vm249_vm2, %v1686_v50, %v1679_v21 }
 0x8c0   :  { %1701 = vst.msk [vmem:[#allocation2 + $0x18] sm:$0xff] %vm9979_vm3, %v1693_v51  ;;  %1698 = vst.msk [vmem:[#allocation2] sm:$0xff] %vm9979_vm3, %v1690_v53  ;;  %v1681_v13 = vpop.permute.xlu1 %1680 }
 0x8c1   :  { %1705 = vst.msk [vmem:[#allocation2 + $0x18] sm:$0xf] %vm476_vm4, %v9610_v1  ;;  %1702 = vst.msk [vmem:[#allocation2] sm:$0xf] %vm476_vm4, %v9610_v1  ;;  %v1687_v54 = vrot.slane %v1681_v13, 4 }
 0x8c2   :  { %1709 = vst.msk [vmem:[#allocation2 + $0x1c] sm:$0xf] %vm481_vm5, %v9610_v1  ;;  %1706 = vst.msk [vmem:[#allocation2 + $0x4] sm:$0xf] %vm481_vm5, %v9610_v1 }
 0x8c3   :  { %v1691_v19 = vsel %vm249_vm2, %v1687_v54, %v1681_v13 }
 0x8c4   :  { %1699 = vst.msk [vmem:[#allocation2 + $0x8] sm:$0xff] %vm9979_vm3, %v1691_v19 }
 0x8c5   :  { %v1752_v55 = vld [vmem:[#allocation2 + $0x10] sm:$0xff]  ;;  %1703 = vst.msk [vmem:[#allocation2 + $0x8] sm:$0xf] %vm476_vm4, %v9610_v1 }
 0x8c6   :  { %1707 = vst.msk [vmem:[#allocation2 + $0xc] sm:$0xf] %vm481_vm5, %v9610_v1  ;;  %1762 = vrot.lane.b32.xlu0 %v1752_v55, %s9611_s0 }
 0x8c7   :  { %1716 = vst.msk [vmem:[#allocation3 + $0x10] sm:$0xff] %vm10007_vm10, %v1752_v55 }
 0x8c9   :  { %v1753_v56 = vld [vmem:[#allocation2 + $0x18] sm:$0xff]  ;;  %v1750_v57 = vld [vmem:[#allocation2] sm:$0xff] }
 0x8ca   :  { %1764 = vrot.lane.b32.xlu1 %v1753_v56, %s9611_s0  ;;  %1758 = vrot.lane.b32.xlu0 %v1750_v57, %s9611_s0  ;;  %1717 = vst.msk [vmem:[#allocation3 + $0x18] sm:$0xff] %vm10007_vm10, %v1753_v56  ;;  %1714 = vst.msk [vmem:[#allocation3] sm:$0xff] %vm10007_vm10, %v1750_v57 }
 0x8cd   :  { %v1751_v58 = vld [vmem:[#allocation2 + $0x8] sm:$0xff] }
 0x8ce   :  { %1760 = vrot.lane.b32.xlu1 %v1751_v58, %s9611_s0  ;;  %1730 = vrot.lane.b32.xlu0 %v1752_v55, %s9612_s5  ;;  %1715 = vst.msk [vmem:[#allocation3 + $0x8] sm:$0xff] %vm10007_vm10, %v1751_v58 }
 0x8d1   :  { %v9284_v19 = vld [vmem:[#allocation3 + $0x14] ss:$8 sps:$4 sm:$0xff]  }
 0x8d2   :  { %1732 = vrot.lane.b32.xlu1 %v1753_v56, %s9612_s5  ;;  %1726 = vrot.lane.b32.xlu0 %v1750_v57, %s9612_s5  ;;  %v9286_v57 = vld [vmem:[#allocation3 + $0x10] ss:$8 sps:$4 sm:$0xff]  }
 0x8d6   :  { %1728 = vrot.lane.b32.xlu1 %v1751_v58, %s9612_s5  ;;  %1842 = vperm.xlu0 %9185, %v1808_v16   ;;  %v9287_v58 = vld [vmem:[#allocation3 + $0x4] ss:$8 sps:$4 sm:$0xff]   ;;  %v9289_v16 = vld [vmem:[#allocation3] ss:$8 sps:$4 sm:$0xff]  }
 0x8da   :  { %1847 = vperm.xlu1 %9184, %v1809_v59   ;;  %1832 = vperm.xlu0 %9185, %v1806_v60   ;;  %v9290_v59 = vld [vmem:[%s9731_s25] sm:$0xff]   ;;  %v9291_v60 = vld [vmem:[%s9731_s25 + $0x8] sm:$0xff]  }
 0x8de   :  { %1837 = vperm.xlu1 %9184, %v1807_v61   ;;  %1822 = vperm.xlu0 %9185, %v1804_v62   ;;  %v9292_v61 = vld [vmem:[%s9731_s25 + $0x10] sm:$0xff]   ;;  %v9293_v62 = vld [vmem:[%s9731_s25 + $0x18] sm:$0xff]   ;;  %s12228_s25 = sld [smem:[#allocation20_spill]] }
 0x8e2   :  { %1827 = vperm.xlu1 %9184, %v1805_v63   ;;  %1812 = vperm.xlu0 %9185, %v1802_v0  }
 0x8e6   :  { %1817 = vperm.xlu1 %9184, %v1803_v15  }
 0x938   :  { %v1763_v2 = vpop.permute.xlu0 %1762 }
 0x939   :  { %v1768_v3 = vrot.slane %v1763_v2, 4 }
 0x93b   :  { %v1772_v4 = vsel %vm283_vm9, %v1763_v2, %v1768_v3 }
 0x93c   :  { %1780 = vst.msk [vmem:[#allocation3 + $0x50] sm:$0xff] %vm10007_vm10, %v1772_v4  ;;  %v1765_v5 = vpop.permute.xlu1 %1764  ;;  %v1759_v6 = vpop.permute.xlu0 %1758 }
 0x93d   :  { %v1769_v7 = vrot.slane %v1765_v5, 4  ;;  %v1766_v8 = vrot.slane %v1759_v6, 4 }
 0x93f   :  { %v1773_v10 = vsel %vm283_vm9, %v1765_v5, %v1769_v7  ;;  %v1770_v11 = vsel %vm283_vm9, %v1759_v6, %v1766_v8 }
 0x940   :  { %1781 = vst.msk [vmem:[#allocation3 + $0x58] sm:$0xff] %vm10007_vm10, %v1773_v10  ;;  %v1761_v20 = vpop.permute.xlu1 %1760  ;;  %1778 = vst.msk [vmem:[#allocation3 + $0x40] sm:$0xff] %vm10007_vm10, %v1770_v11  ;;  %v1731_v22 = vpop.permute.xlu0 %1730 }
 0x941   :  { %v1767_v26 = vrot.slane %v1761_v20, 4  ;;  %v1736_v27 = vrot.slane %v1731_v22, 4 }
 0x943   :  { %v1771_v35 = vsel %vm283_vm9, %v1761_v20, %v1767_v26  ;;  %v1740_v30 = vsel %vm271_vm12, %v1731_v22, %v1736_v27 }
 0x944   :  { %1779 = vst.msk [vmem:[#allocation3 + $0x48] sm:$0xff] %vm10007_vm10, %v1771_v35  ;;  %v1733_v45 = vpop.permute.xlu1 %1732  ;;  %1748 = vst.msk [vmem:[#allocation3 + $0x30] sm:$0xff] %vm10007_vm10, %v1740_v30  ;;  %v1727_v48 = vpop.permute.xlu0 %1726 }
 0x945   :  { %v1737_v46 = vrot.slane %v1733_v45, 4  ;;  %v1734_v52 = vrot.slane %v1727_v48, 4 }
 0x947   :  { %v1741_v34 = vsel %vm271_vm12, %v1733_v45, %v1737_v46  ;;  %v1738_v38 = vsel %vm271_vm12, %v1727_v48, %v1734_v52  ;;  %v9272_v24 = vld [vmem:[#allocation3 + $0x54] ss:$8 sps:$4 sm:$0xff]   ;;  %v9274_v14 = vld [vmem:[#allocation3 + $0x50] ss:$8 sps:$4 sm:$0xff]  }
 0x948   :  { %1749 = vst.msk [vmem:[#allocation3 + $0x38] sm:$0xff] %vm10007_vm10, %v1741_v34  ;;  %v1729_v21 = vpop.permute.xlu1 %1728  ;;  %1746 = vst.msk [vmem:[#allocation3 + $0x20] sm:$0xff] %vm10007_vm10, %v1738_v38  ;;  %1946 = vmatprep.subr.bf16.mxu0 %v9272_v24 }
 0x949   :  { %v1735_v44 = vrot.slane %v1729_v21, 4  ;;  %1947 = vmatpush1.bf16.msra.mxu0 %v9274_v14 }
 0x94b   :  { %v1739_v50 = vsel %vm271_vm12, %v1729_v21, %v1735_v44  ;;  %v9275_v51 = vld [vmem:[#allocation3 + $0x44] ss:$8 sps:$4 sm:$0xff]   ;;  %v9277_v53 = vld [vmem:[#allocation3 + $0x40] ss:$8 sps:$4 sm:$0xff]  }
 0x94c   :  { %1747 = vst.msk [vmem:[#allocation3 + $0x28] sm:$0xff] %vm10007_vm10, %v1739_v50  ;;  %1948 = vmatprep.subr.bf16.mxu0 %v9275_v51 }
 0x94d   :  { %1949 = vmatpush1.bf16.msra.mxu0 %v9277_v53 }
 0x94f   :  { %v9278_v13 = vld [vmem:[#allocation3 + $0x34] ss:$8 sps:$4 sm:$0xff]   ;;  %v9280_v54 = vld [vmem:[#allocation3 + $0x30] ss:$8 sps:$4 sm:$0xff]  }
 0x950   :  { %1950 = vmatprep.subr.bf16.mxu0 %v9278_v13 }
 0x951   :  { %1951 = vmatpush1.bf16.msra.mxu0 %v9280_v54  ;;  %v1843_v6 = vpop.permute.xlu0 %1842 }
 0x953   :  { %v9281_v55 = vld [vmem:[#allocation3 + $0x24] ss:$8 sps:$4 sm:$0xff]   ;;  %v9283_v56 = vld [vmem:[#allocation3 + $0x20] ss:$8 sps:$4 sm:$0xff]  }
 0x954   :  { %1952 = vmatprep.subr.bf16.mxu0 %v9281_v55 }
 0x955   :  { %1953 = vmatpush1.bf16.msra.mxu0 %v9283_v56  ;;  %v1848_v10 = vpop.permute.xlu1 %1847  ;;  %v1833_v20 = vpop.permute.xlu0 %1832 }
 0x956   :  { %1954 = vmatprep.subr.bf16.mxu0 %v9284_v19 }
 0x959   :  { %1955 = vmatpush1.bf16.msra.mxu0 %v9286_v57  ;;  %v1838_v27 = vpop.permute.xlu1 %1837  ;;  %v1823_v30 = vpop.permute.xlu0 %1822 }
 0x95a   :  { %1956 = vmatprep.subr.bf16.mxu0 %v9287_v58 }
 0x95d   :  { %1957 = vmatpush1.bf16.msra.mxu0 %v9289_v16  ;;  %v1828_v21 = vpop.permute.xlu1 %1827  ;;  %v1813_v56 = vpop.permute.xlu0 %1812 }
 0x960   :  { %8161 = vmatmul.mubr.msk.bf16.vlgmr.msra.gmra.mxu0 %vm671_vm11, %v9290_v59 }
 0x961   :  { %1984 = vmatprep.mubr.bf16.mxu0 %v9610_v1 }
 0x968   :  { %8162 = vmatmul.mubr.msk.bf16.gmra.mxu0 %vm671_vm11, %v9291_v60 }
 0x969   :  { %1994 = vmatprep.mubr.bf16.mxu0 %v9610_v1 }
 0x970   :  { %8163 = vmatmul.mubr.msk.bf16.gmra.mxu0 %vm671_vm11, %v9292_v61 }
 0x971   :  { %2004 = vmatprep.mubr.bf16.mxu0 %v9610_v1 }
 0x978   :  { %8164 = vmatmul.mubr.msk.bf16.gmra.mxu0 %vm671_vm11, %v9293_v62 }
 0xa20   :  { %v1976_v63 = vpop.f32.mrf.mxu0 }
 0xa22   :  { %v1978_v0 = vpop.f32.mrf.mxu0 }
 0xa23   :  { %v1979_v60 = vadd.f32 %v1978_v0, %v1813_v56 }
 0xa24   :  { %v1980_v15 = vpop.f32.mrf.mxu0 }
 0xa25   :  { %v2016_v0 = vmul.f32 %v1979_v60, %v9965_v41 }
 0xa26   :  { %v1982_v2 = vpop.f32.mrf.mxu0 }
 0xa28   :  { %v1986_v3 = vpop.f32.mrf.mxu0 }
 0xa29   :  { %v1987_v13 = vadd.f32 %v1986_v3, %v1823_v30 }
 0xa2a   :  { %v1988_v4 = vpop.f32.mrf.mxu0 }
 0xa2b   :  { %v1989_v24 = vadd.f32 %v1988_v4, %v1823_v30 }
 0xa2c   :  { %v1990_v5 = vpop.f32.mrf.mxu0 }
 0xa2d   :  { %v2020_v61 = vmul.f32 %v1989_v24, %v9965_v41 }
 0xa2e   :  { %v1992_v7 = vpop.f32.mrf.mxu0 }
 0xa2f   :  { %v1993_v62 = vadd.f32 %v1992_v7, %v1828_v21 }
 0xa30   :  { %v1996_v8 = vpop.f32.mrf.mxu0 }
 0xa31   :  { %v1997_v46 = vadd.f32 %v1996_v8, %v1833_v20 }
 0xa32   :  { %v1998_v11 = vpop.f32.mrf.mxu0 }
 0xa33   :  { %v1999_v45 = vadd.f32 %v1998_v11, %v1833_v20  ;;  %v2023_v54 = vmul.f32 %v1997_v46, %v9963_v39  ;;  %v1977_v11 = vadd.f32 %v1976_v63, %v1813_v56  ;;  %v2019_v20 = vmul.f32 %v1987_v13, %v9963_v39 }
 0xa34   :  { %v2000_v22 = vpop.f32.mrf.mxu0 }
 0xa35   :  { %v2024_v44 = vmul.f32 %v1999_v45, %v9965_v41  ;;  %v2001_v19 = vadd.f32 %v2000_v22, %v1838_v27  ;;  %v1991_v22 = vadd.f32 %v1990_v5, %v1828_v21  ;;  %v2036_v45 = vmax.f32 %v2020_v61, 0.0 }
 0xa36   :  { %v2002_v26 = vpop.f32.mrf.mxu0  ;;  %v2032_v21 = vmax.f32 %v2016_v0, 0.0 }
 0xa37   :  { %v2003_v50 = vadd.f32 %v2002_v26, %v1838_v27  ;;  %v2040_v4 = vmax.f32 %v2024_v44, 0.0  ;;  %v1818_v26 = vpop.permute.xlu1 %1817  ;;  %v2039_v27 = vmax.f32 %v2023_v54, 0.0  ;;  %v2021_v24 = vmul.f32 %v1991_v22, %v9963_v39 }
 0xa38   :  { %v2006_v35 = vpop.f32.mrf.mxu0  ;;  %v1983_v7 = vadd.f32 %v1982_v2, %v1818_v26  ;;  %v1981_v5 = vadd.f32 %v1980_v15, %v1818_v26 }
 0xa39   :  { %v2007_v48 = vadd.f32 %v2006_v35, %v1843_v6  ;;  %v2025_v35 = vmul.f32 %v2001_v19, %v9963_v39  ;;  %v8594_v63 = vpack.c.bf16 %v2040_v4, %v2039_v27  ;;  %v2037_v54 = vmax.f32 %v2021_v24, 0.0 }
 0xa3a   :  { %v2008_v52 = vpop.f32.mrf.mxu0  ;;  %v2018_v2 = vmul.f32 %v1983_v7, %v9965_v41  ;;  %v2017_v13 = vmul.f32 %v1981_v5, %v9963_v39 }
 0xa3b   :  { %v2027_v34 = vmul.f32 %v2007_v48, %v9963_v39  ;;  %v2009_v38 = vadd.f32 %v2008_v52, %v1843_v6  ;;  %v2026_v6 = vmul.f32 %v2003_v50, %v9965_v41  ;;  %v2022_v48 = vmul.f32 %v1993_v62, %v9965_v41 }
 0xa3c   :  { %v2010_v14 = vpop.f32.mrf.mxu0  ;;  %v2034_v15 = vmax.f32 %v2018_v2, 0.0  ;;  %v2033_v56 = vmax.f32 %v2017_v13, 0.0  ;;  %v2323_v2 = vld [vmem:[%s9746_s14] sm:$0xff]  ;;  %v10649_v13 = vld [vmem:[%s12226_s9 + $0x38] sm:$0xff]  }
 0xa3d   :  { %v2028_v51 = vmul.f32 %v2009_v38, %v9965_v41  ;;  %v2011_v53 = vadd.f32 %v2010_v14, %v1848_v10  ;;  %v2043_v57 = vmax.f32 %v2027_v34, 0.0  ;;  %v2042_v46 = vmax.f32 %v2026_v6, 0.0  ;;  %2756 = vmatpush1.bf16.msra.mxu1 %v10649_v13 }
 0xa3e   :  { %v2012_v55 = vpop.f32.mrf.mxu0  ;;  %v2015_v34 = vmul.f32 %v1977_v11, %v9963_v39  ;;  %v2035_v38 = vmax.f32 %v2019_v20, 0.0  ;;  %v2041_v14 = vmax.f32 %v2025_v35, 0.0  ;;  %v2038_v44 = vmax.f32 %v2022_v48, 0.0  ;;  %2757 = vmatprep.subr.bf16.mxu1 %v9610_v1 }
 0xa3f   :  { %v2044_v58 = vmax.f32 %v2028_v51, 0.0  ;;  %v2029_v16 = vmul.f32 %v2011_v53, %v9963_v39  ;;  %v2013_v59 = vadd.f32 %v2012_v55, %v1848_v10 }
 0xa40   :  { %v8595_v50 = vpack.c.bf16 %v2042_v46, %v2041_v14  ;;  %v8592_v51 = vpack.c.bf16 %v2036_v45, %v2035_v38  ;;  %v2031_v53 = vmax.f32 %v2015_v34, 0.0  ;;  %v8593_v19 = vpack.c.bf16 %v2038_v44, %v2037_v54  ;;  %v2324_v44 = vld [vmem:[%s9746_s14 + $0x8] sm:$0xff]  ;;  %v10653_v54 = vld [vmem:[%s12226_s9 + $0x30] sm:$0xff]  }
 0xa41   :  { %v2030_v8 = vmul.f32 %v2013_v59, %v9965_v41  ;;  %v8596_v3 = vpack.c.bf16 %v2044_v58, %v2043_v57  ;;  %v2045_v30 = vmax.f32 %v2029_v16, 0.0  ;;  %v8591_v57 = vpack.c.bf16 %v2034_v15, %v2033_v56  ;;  %2758 = vmatpush1.bf16.msra.mxu1 %v10653_v54 }
 0xa42   :  { %v8590_v55 = vpack.c.bf16 %v2032_v21, %v2031_v53  ;;  %v9326_v53 = vld [vmem:[%s9741_s21 + $0x4] ss:$8 sps:$4 sm:$0xff]   ;;  %2759 = vmatprep.subr.bf16.mxu1 %v9610_v1 }
 0xa43   :  { %v2046_v10 = vmax.f32 %v2030_v8, 0.0  ;;  %2099 = vrot.lane.b32.xlu0 %v8596_v3, %s9609_s22  ;;  %8201 = vmatprep.mubr.msk.bf16.mxu0 %vm1574_vm13, %v9326_v53 }
 0xa45   :  { %v8597_v52 = vpack.c.bf16 %v2046_v10, %v2045_v30 }
 0xa47   :  { %2101 = vrot.lane.b32.xlu1 %v8597_v52, %s9609_s22  ;;  %2095 = vrot.lane.b32.xlu0 %v8594_v63, %s9609_s22 }
 0xa4b   :  { %2097 = vrot.lane.b32.xlu1 %v8595_v50, %s9609_s22  ;;  %2091 = vrot.lane.b32.xlu0 %v8592_v51, %s9609_s22  ;;  %v2325_v50 = vld [vmem:[%s9746_s14 + $0x10] sm:$0xff]  ;;  %v2326_v51 = vld [vmem:[%s9746_s14 + $0x18] sm:$0xff]  ;;  %s12230_s14 = sld [smem:[#allocation22_spill]] }
 0xa4f   :  { %2093 = vrot.lane.b32.xlu1 %v8593_v19, %s9609_s22  ;;  %2087 = vrot.lane.b32.xlu0 %v8590_v55, %s9609_s22 }
 0xa53   :  { %2089 = vrot.lane.b32.xlu1 %v8591_v57, %s9609_s22 }
 0xab5   :  { %v2100_v58 = vpop.permute.xlu0 %2099 }
 0xab6   :  { %v2109_v16 = vrot.slane %v2100_v58, 4 }
 0xab8   :  { %v2117_v59 = vsel %vm249_vm2, %v2109_v16, %v2100_v58 }
 0xab9   :  { %2133 = vst.msk [vmem:[#allocation2 + $0x30] sm:$0xff] %vm9979_vm3, %v2117_v59  ;;  %v2102_v60 = vpop.permute.xlu1 %2101  ;;  %v2096_v61 = vpop.permute.xlu0 %2095 }
 0xaba   :  { %2141 = vst.msk [vmem:[#allocation2 + $0x30] sm:$0xf] %vm476_vm4, %v9610_v1  ;;  %v2110_v62 = vrot.slane %v2102_v60, 4  ;;  %v2107_v4 = vrot.slane %v2096_v61, 4 }
 0xabb   :  { %2149 = vst.msk [vmem:[#allocation2 + $0x34] sm:$0xf] %vm481_vm5, %v9610_v1 }
 0xabc   :  { %v2118_v6 = vsel %vm249_vm2, %v2110_v62, %v2102_v60  ;;  %v2115_v8 = vsel %vm249_vm2, %v2107_v4, %v2096_v61 }
 0xabd   :  { %2134 = vst.msk [vmem:[#allocation2 + $0x38] sm:$0xff] %vm9979_vm3, %v2118_v6  ;;  %2131 = vst.msk [vmem:[#allocation2 + $0x20] sm:$0xff] %vm9979_vm3, %v2115_v8  ;;  %v2098_v3 = vpop.permute.xlu1 %2097  ;;  %v2092_v11 = vpop.permute.xlu0 %2091 }
 0xabe   :  { %2142 = vst.msk [vmem:[#allocation2 + $0x38] sm:$0xf] %vm476_vm4, %v9610_v1  ;;  %2139 = vst.msk [vmem:[#allocation2 + $0x20] sm:$0xf] %vm476_vm4, %v9610_v1  ;;  %v2108_v20 = vrot.slane %v2098_v3, 4  ;;  %v2105_v22 = vrot.slane %v2092_v11, 4 }
 0xabf   :  { %2150 = vst.msk [vmem:[#allocation2 + $0x3c] sm:$0xf] %vm481_vm5, %v9610_v1  ;;  %2147 = vst.msk [vmem:[#allocation2 + $0x24] sm:$0xf] %vm481_vm5, %v9610_v1 }
 0xac0   :  { %v2116_v26 = vsel %vm249_vm2, %v2108_v20, %v2098_v3  ;;  %v2113_v27 = vsel %vm249_vm2, %v2105_v22, %v2092_v11 }
 0xac1   :  { %2132 = vst.msk [vmem:[#allocation2 + $0x28] sm:$0xff] %vm9979_vm3, %v2116_v26  ;;  %2129 = vst.msk [vmem:[#allocation2 + $0x10] sm:$0xff] %vm9979_vm3, %v2113_v27  ;;  %v2094_v30 = vpop.permute.xlu1 %2093  ;;  %v2088_v10 = vpop.permute.xlu0 %2087 }
 0xac2   :  { %v2157_v35 = vld [vmem:[#allocation2 + $0x30] sm:$0xff]  ;;  %2140 = vst.msk [vmem:[#allocation2 + $0x28] sm:$0xf] %vm476_vm4, %v9610_v1  ;;  %2137 = vst.msk [vmem:[#allocation2 + $0x10] sm:$0xf] %vm476_vm4, %v9610_v1  ;;  %v2106_v0 = vrot.slane %v2094_v30, 4 }
 0xac3   :  { %2165 = vst.msk [vmem:[#allocation3 + $0x30] sm:$0xff] %vm10007_vm10, %v2157_v35  ;;  %v2103_v7 = vrot.slane %v2088_v10, 4  ;;  %2195 = vrot.lane.b32.xlu0 %v2157_v35, %s9612_s5 }
 0xac4   :  { %2148 = vst.msk [vmem:[#allocation2 + $0x2c] sm:$0xf] %vm481_vm5, %v9610_v1  ;;  %2145 = vst.msk [vmem:[#allocation2 + $0x14] sm:$0xf] %vm481_vm5, %v9610_v1  ;;  %v2114_v45 = vsel %vm249_vm2, %v2106_v0, %v2094_v30 }
 0xac5   :  { %v2111_v48 = vsel %vm249_vm2, %v2103_v7, %v2088_v10  ;;  %2130 = vst.msk [vmem:[#allocation2 + $0x18] sm:$0xff] %vm9979_vm3, %v2114_v45  ;;  %v2090_v63 = vpop.permute.xlu1 %2089 }
 0xac6   :  { %v2158_v46 = vld [vmem:[#allocation2 + $0x38] sm:$0xff]  ;;  %v2155_v52 = vld [vmem:[#allocation2 + $0x20] sm:$0xff]  ;;  %2127 = vst.msk [vmem:[#allocation2] sm:$0xff] %vm9979_vm3, %v2111_v48  ;;  %v2104_v34 = vrot.slane %v2090_v63, 4 }
 0xac7   :  { %2166 = vst.msk [vmem:[#allocation3 + $0x38] sm:$0xff] %vm10007_vm10, %v2158_v46  ;;  %2163 = vst.msk [vmem:[#allocation3 + $0x20] sm:$0xff] %vm10007_vm10, %v2155_v52  ;;  %2197 = vrot.lane.b32.xlu1 %v2158_v46, %s9612_s5  ;;  %2191 = vrot.lane.b32.xlu0 %v2155_v52, %s9612_s5 }
 0xac8   :  { %2138 = vst.msk [vmem:[#allocation2 + $0x18] sm:$0xf] %vm476_vm4, %v9610_v1  ;;  %2135 = vst.msk [vmem:[#allocation2] sm:$0xf] %vm476_vm4, %v9610_v1  ;;  %v2112_v5 = vsel %vm249_vm2, %v2104_v34, %v2090_v63  ;;  %vm2667_vm2 = vcmask 44064  }
 0xac9   :  { %2146 = vst.msk [vmem:[#allocation2 + $0x1c] sm:$0xf] %vm481_vm5, %v9610_v1  ;;  %2143 = vst.msk [vmem:[#allocation2 + $0x4] sm:$0xf] %vm481_vm5, %v9610_v1 }
 0xaca   :  { %2128 = vst.msk [vmem:[#allocation2 + $0x8] sm:$0xff] %vm9979_vm3, %v2112_v5  ;;  %vm2958_vm3 = vcmask 261120  }
 0xacb   :  { %v2156_v38 = vld [vmem:[#allocation2 + $0x28] sm:$0xff]  ;;  %v2153_v24 = vld [vmem:[#allocation2 + $0x10] sm:$0xff]  ;;  %2136 = vst.msk [vmem:[#allocation2 + $0x8] sm:$0xf] %vm476_vm4, %v9610_v1 }
 0xacc   :  { %2164 = vst.msk [vmem:[#allocation3 + $0x28] sm:$0xff] %vm10007_vm10, %v2156_v38  ;;  %2161 = vst.msk [vmem:[#allocation3 + $0x10] sm:$0xff] %vm10007_vm10, %v2153_v24  ;;  %2193 = vrot.lane.b32.xlu1 %v2156_v38, %s9612_s5  ;;  %2187 = vrot.lane.b32.xlu0 %v2153_v24, %s9612_s5 }
 0xacd   :  { %2144 = vst.msk [vmem:[#allocation2 + $0xc] sm:$0xf] %vm481_vm5, %v9610_v1  ;;  %vm3781_vm5 = vcmask 568864  }
 0xad0   :  { %v2154_v14 = vld [vmem:[#allocation2 + $0x18] sm:$0xff]  ;;  %v2167_v12 = vld [vmem:[#allocation2] sm:$0xff] }
 0xad1   :  { %2162 = vst.msk [vmem:[#allocation3 + $0x18] sm:$0xff] %vm10007_vm10, %v2154_v14  ;;  %2189 = vrot.lane.b32.xlu1 %v2154_v14, %s9612_s5  ;;  %2183 = vrot.lane.b32.xlu0 %v2167_v12, %s9612_s5  ;;  %2159 = vst.msk [vmem:[#allocation3] sm:$0xff] %vm10007_vm10, %v2167_v12 }
 0xad4   :  { %v2152_v21 = vld [vmem:[#allocation2 + $0x8] sm:$0xff] }
 0xad5   :  { %2160 = vst.msk [vmem:[#allocation3 + $0x8] sm:$0xff] %vm10007_vm10, %v2152_v21  ;;  %2185 = vrot.lane.b32.xlu1 %v2152_v21, %s9612_s5  ;;  %2259 = vrot.lane.b32.xlu0 %v2157_v35, %s9611_s0 }
 0xad9   :  { %2261 = vrot.lane.b32.xlu1 %v2158_v46, %s9611_s0  ;;  %2255 = vrot.lane.b32.xlu0 %v2155_v52, %s9611_s0 }
 0xadd   :  { %2257 = vrot.lane.b32.xlu1 %v2156_v38, %s9611_s0  ;;  %2251 = vrot.lane.b32.xlu0 %v2153_v24, %s9611_s0 }
 0xae1   :  { %2253 = vrot.lane.b32.xlu1 %v2154_v14, %s9611_s0  ;;  %2247 = vrot.lane.b32.xlu0 %v2167_v12, %s9611_s0 }
 0xae5   :  { %2249 = vrot.lane.b32.xlu1 %v2152_v21, %s9611_s0  ;;  %2329 = vperm.xlu0 %9185, %v2323_v2  }
 0xae9   :  { %2334 = vperm.xlu1 %9184, %v2324_v44   ;;  %2339 = vperm.xlu0 %9185, %v2325_v50  }
 0xaed   :  { %2344 = vperm.xlu1 %9184, %v2326_v51  }
 0xb35   :  { %v2196_v15 = vpop.permute.xlu0 %2195 }
 0xb36   :  { %v2205_v19 = vrot.slane %v2196_v15, 4 }
 0xb38   :  { %v2213_v55 = vsel %vm271_vm12, %v2196_v15, %v2205_v19 }
 0xb39   :  { %v2198_v56 = vpop.permute.xlu1 %2197  ;;  %2229 = vst.msk [vmem:[#allocation3 + $0x70] sm:$0xff] %vm10007_vm10, %v2213_v55  ;;  %v2192_v57 = vpop.permute.xlu0 %2191 }
 0xb3a   :  { %v2206_v58 = vrot.slane %v2198_v56, 4  ;;  %v2203_v16 = vrot.slane %v2192_v57, 4 }
 0xb3c   :  { %v2214_v59 = vsel %vm271_vm12, %v2198_v56, %v2206_v58  ;;  %v2211_v60 = vsel %vm271_vm12, %v2192_v57, %v2203_v16 }
 0xb3d   :  { %2230 = vst.msk [vmem:[#allocation3 + $0x78] sm:$0xff] %vm10007_vm10, %v2214_v59  ;;  %2227 = vst.msk [vmem:[#allocation3 + $0x60] sm:$0xff] %vm10007_vm10, %v2211_v60 }
 0xb3e   :  { %v2194_v61 = vpop.permute.xlu1 %2193  ;;  %v2188_v62 = vpop.permute.xlu0 %2187 }
 0xb3f   :  { %v2204_v4 = vrot.slane %v2194_v61, 4  ;;  %v2201_v6 = vrot.slane %v2188_v62, 4 }
 0xb41   :  { %v2212_v8 = vsel %vm271_vm12, %v2194_v61, %v2204_v4  ;;  %v2209_v3 = vsel %vm271_vm12, %v2188_v62, %v2201_v6  ;;  %v9300_v61 = vld [vmem:[#allocation3 + $0x34] ss:$8 sps:$4 sm:$0xff]  }
 0xb42   :  { %2228 = vst.msk [vmem:[#allocation3 + $0x68] sm:$0xff] %vm10007_vm10, %v2212_v8  ;;  %2225 = vst.msk [vmem:[#allocation3 + $0x50] sm:$0xff] %vm10007_vm10, %v2209_v3  ;;  %v9302_v3 = vld [vmem:[#allocation3 + $0x30] ss:$8 sps:$4 sm:$0xff]  }
 0xb43   :  { %v2190_v11 = vpop.permute.xlu1 %2189  ;;  %v2184_v20 = vpop.permute.xlu0 %2183 }
 0xb44   :  { %v2202_v22 = vrot.slane %v2190_v11, 4  ;;  %v2199_v26 = vrot.slane %v2184_v20, 4  ;;  %v9294_v30 = vld [vmem:[#allocation3 + $0x74] ss:$8 sps:$4 sm:$0xff]   ;;  %v9296_v10 = vld [vmem:[#allocation3 + $0x70] ss:$8 sps:$4 sm:$0xff]  }
 0xb45   :  { %2491 = vmatprep.subr.bf16.mxu0 %v9294_v30 }
 0xb46   :  { %v2210_v27 = vsel %vm271_vm12, %v2190_v11, %v2202_v22  ;;  %v2207_v35 = vsel %vm271_vm12, %v2184_v20, %v2199_v26  ;;  %2492 = vmatpush1.bf16.msra.mxu0 %v9296_v10  ;;  %v9303_v22 = vld [vmem:[#allocation3 + $0x24] ss:$8 sps:$4 sm:$0xff]   ;;  %v9306_v10 = vld [vmem:[#allocation3 + $0x14] ss:$8 sps:$4 sm:$0xff]  }
 0xb47   :  { %2226 = vst.msk [vmem:[#allocation3 + $0x58] sm:$0xff] %vm10007_vm10, %v2210_v27  ;;  %v2186_v0 = vpop.permute.xlu1 %2185  ;;  %2223 = vst.msk [vmem:[#allocation3 + $0x40] sm:$0xff] %vm10007_vm10, %v2207_v35  ;;  %v2260_v7 = vpop.permute.xlu0 %2259  ;;  %v9305_v35 = vld [vmem:[#allocation3 + $0x20] ss:$8 sps:$4 sm:$0xff]  }
 0xb48   :  { %v2200_v45 = vrot.slane %v2186_v0, 4  ;;  %v2269_v48 = vrot.slane %v2260_v7, 4 }
 0xb49   :  { %v9297_v52 = vld [vmem:[#allocation3 + $0x64] ss:$8 sps:$4 sm:$0xff]   ;;  %v9299_v34 = vld [vmem:[#allocation3 + $0x60] ss:$8 sps:$4 sm:$0xff]   ;;  %v2309_v21 = vld [vmem:[#allocation3 + $0x50] sm:$0xff] }
 0xb4a   :  { %v2208_v46 = vsel %vm271_vm12, %v2186_v0, %v2200_v45  ;;  %v2277_v63 = vsel %vm283_vm9, %v2260_v7, %v2269_v48  ;;  %2493 = vmatprep.subr.bf16.mxu0 %v9297_v52  ;;  %v9308_v0 = vld [vmem:[#allocation3 + $0x10] ss:$8 sps:$4 sm:$0xff]   ;;  %v9309_v7 = vld [vmem:[#allocation3 + $0x4] ss:$8 sps:$4 sm:$0xff]   ;;  %v9311_v45 = vld [vmem:[#allocation3] ss:$8 sps:$4 sm:$0xff]  }
 0xb4b   :  { %2224 = vst.msk [vmem:[#allocation3 + $0x48] sm:$0xff] %vm10007_vm10, %v2208_v46  ;;  %2293 = vst.msk [vmem:[#allocation3 + $0xb0] sm:$0xff] %vm10007_vm10, %v2277_v63  ;;  %v2262_v5 = vpop.permute.xlu1 %2261  ;;  %v2256_v38 = vpop.permute.xlu0 %2255  ;;  %2494 = vmatpush1.bf16.msra.mxu0 %v9299_v34 }
 0xb4c   :  { %v2270_v24 = vrot.slane %v2262_v5, 4  ;;  %v2267_v14 = vrot.slane %v2256_v38, 4 }
 0xb4e   :  { %v2310_v12 = vld [vmem:[#allocation3 + $0x58] sm:$0xff]  ;;  %v2278_v2 = vsel %vm283_vm9, %v2262_v5, %v2270_v24  ;;  %v2275_v44 = vsel %vm283_vm9, %v2256_v38, %v2267_v14  ;;  %v2307_v57 = vld [vmem:[#allocation3 + $0x40] sm:$0xff] }
 0xb4f   :  { %v8188_v50 = vcombine.high %v2309_v21, %v2310_v12  ;;  %v8187_v51 = vcombine.low %v2309_v21, %v2310_v12  ;;  %2294 = vst.msk [vmem:[#allocation3 + $0xb8] sm:$0xff] %vm10007_vm10, %v2278_v2  ;;  %2291 = vst.msk [vmem:[#allocation3 + $0xa0] sm:$0xff] %vm10007_vm10, %v2275_v44  ;;  %v2258_v53 = vpop.permute.xlu1 %2257  ;;  %v2252_v15 = vpop.permute.xlu0 %2251  ;;  %v9324_v14 = vld [vmem:[%s9741_s21] ss:$8 sps:$4 sm:$0xff]   ;;  %v9327_v12 = vld [vmem:[%s9741_s21 + $0x14] ss:$8 sps:$4 sm:$0xff]  }
 0xb50   :  { %v2268_v19 = vrot.slane %v2258_v53, 4  ;;  %v2265_v55 = vrot.slane %v2252_v15, 4  ;;  %v9329_v21 = vld [vmem:[%s9741_s21 + $0x10] ss:$8 sps:$4 sm:$0xff]   ;;  %v10716_v2 = vld [vmem:[%s12226_s9 + $0x28] sm:$0xff]   ;;  %v10723_v44 = vld [vmem:[%s12226_s9 + $0x20] sm:$0xff]  }
 0xb51   :  { %2495 = vmatprep.subr.bf16.mxu0 %v8188_v50  ;;  %2760 = vmatpush1.bf16.msra.mxu1 %v10716_v2  ;;  %v10730_v50 = vld [vmem:[%s12226_s9 + $0x18] sm:$0xff]   ;;  %s12227_s21 = sld [smem:[#allocation21_spill]] }
 0xb52   :  { %v2308_v56 = vld [vmem:[#allocation3 + $0x48] sm:$0xff]  ;;  %2496 = vmatpush1.bf16.msra.mxu0 %v8187_v51  ;;  %v2276_v58 = vsel %vm283_vm9, %v2258_v53, %v2268_v19  ;;  %v2273_v16 = vsel %vm283_vm9, %v2252_v15, %v2265_v55  ;;  %2761 = vmatprep.subr.bf16.mxu1 %v9610_v1  ;;  %v10737_v51 = vld [vmem:[%s12226_s9 + $0x10] sm:$0xff]   ;;  %v10751_v15 = vld [vmem:[%s12226_s9] sm:$0xff]  }
 0xb53   :  { %v8186_v59 = vcombine.high %v2307_v57, %v2308_v56  ;;  %v8185_v60 = vcombine.low %v2307_v57, %v2308_v56  ;;  %2292 = vst.msk [vmem:[#allocation3 + $0xa8] sm:$0xff] %vm10007_vm10, %v2276_v58  ;;  %2289 = vst.msk [vmem:[#allocation3 + $0x90] sm:$0xff] %vm10007_vm10, %v2273_v16  ;;  %v2254_v62 = vpop.permute.xlu1 %2253  ;;  %v2248_v4 = vpop.permute.xlu0 %2247  ;;  %v10744_v53 = vld [vmem:[%s12226_s9 + $0x8] sm:$0xff]   ;;  %v9338_v19 = vld [vmem:[%s12226_s9 + $0x40] ss:$0 sps:$4 sm:$0x33]  }
 0xb54   :  { %v2266_v6 = vrot.slane %v2254_v62, 4  ;;  %v2263_v8 = vrot.slane %v2248_v4, 4  ;;  %v10759_v55 = vsel %vm261_vm6, %v9338_v19, 0  ;;  %s12250_s9 = sld [smem:[#allocation18_spill]] }
 0xb55   :  { %2497 = vmatprep.subr.bf16.mxu0 %v8186_v59  ;;  %2762 = vmatpush1.bf16.msra.mxu1 %v10723_v44 }
 0xb56   :  { %2498 = vmatpush1.bf16.msra.mxu0 %v8185_v60  ;;  %v2274_v11 = vsel %vm283_vm9, %v2254_v62, %v2266_v6  ;;  %v2271_v20 = vsel %vm283_vm9, %v2248_v4, %v2263_v8  ;;  %v9312_v48 = vld [vmem:[#allocation3 + $0xb4] ss:$8 sps:$4 sm:$0xff]   ;;  %v9314_v52 = vld [vmem:[#allocation3 + $0xb0] ss:$8 sps:$4 sm:$0xff]   ;;  %2763 = vmatprep.subr.bf16.mxu1 %v9610_v1 }
 0xb57   :  { %2499 = vmatprep.subr.bf16.mxu0 %v9300_v61  ;;  %2290 = vst.msk [vmem:[#allocation3 + $0x98] sm:$0xff] %vm10007_vm10, %v2274_v11  ;;  %2287 = vst.msk [vmem:[#allocation3 + $0x80] sm:$0xff] %vm10007_vm10, %v2271_v20  ;;  %v2250_v26 = vpop.permute.xlu1 %2249 }
 0xb58   :  { %v2264_v27 = vrot.slane %v2250_v26, 4 }
 0xb59   :  { %2764 = vmatpush1.bf16.msra.mxu1 %v10730_v50 }
 0xb5a   :  { %2500 = vmatpush1.bf16.msra.mxu0 %v9302_v3  ;;  %v2272_v30 = vsel %vm283_vm9, %v2250_v26, %v2264_v27  ;;  %v9315_v46 = vld [vmem:[#allocation3 + $0xa4] ss:$8 sps:$4 sm:$0xff]   ;;  %v9317_v34 = vld [vmem:[#allocation3 + $0xa0] ss:$8 sps:$4 sm:$0xff]   ;;  %2765 = vmatprep.subr.bf16.mxu1 %v9610_v1 }
 0xb5b   :  { %2501 = vmatprep.subr.bf16.mxu0 %v9303_v22  ;;  %2288 = vst.msk [vmem:[#allocation3 + $0x88] sm:$0xff] %vm10007_vm10, %v2272_v30 }
 0xb5d   :  { %2766 = vmatpush1.bf16.msra.mxu1 %v10737_v51 }
 0xb5e   :  { %2502 = vmatpush1.bf16.msra.mxu0 %v9305_v35  ;;  %v9318_v63 = vld [vmem:[#allocation3 + $0x94] ss:$8 sps:$4 sm:$0xff]   ;;  %v9320_v38 = vld [vmem:[#allocation3 + $0x90] ss:$8 sps:$4 sm:$0xff]   ;;  %2767 = vmatprep.subr.bf16.mxu1 %v9610_v1 }
 0xb5f   :  { %2503 = vmatprep.subr.bf16.mxu0 %v9306_v10 }
 0xb60   :  { %v2330_v56 = vpop.permute.xlu0 %2329 }
 0xb61   :  { %2768 = vmatpush1.bf16.msra.mxu1 %v10744_v53 }
 0xb62   :  { %2504 = vmatpush1.bf16.msra.mxu0 %v9308_v0  ;;  %v9321_v5 = vld [vmem:[#allocation3 + $0x84] ss:$8 sps:$4 sm:$0xff]   ;;  %v9323_v24 = vld [vmem:[#allocation3 + $0x80] ss:$8 sps:$4 sm:$0xff]   ;;  %2769 = vmatprep.subr.bf16.mxu1 %v9610_v1 }
 0xb63   :  { %2505 = vmatprep.subr.bf16.mxu0 %v9309_v7 }
 0xb64   :  { %v2335_v61 = vpop.permute.xlu1 %2334  ;;  %v2340_v26 = vpop.permute.xlu0 %2339 }
 0xb65   :  { %2770 = vmatpush1.bf16.msra.mxu1 %v10751_v15 }
 0xb66   :  { %2506 = vmatpush1.bf16.msra.mxu0 %v9311_v45  ;;  %2785 = vmatprep.subr.bf16.mxu1 %v9610_v1 }
 0xb67   :  { %2515 = vmatprep.subr.bf16.mxu0 %v9312_v48 }
 0xb68   :  { %v2345_v45 = vpop.permute.xlu1 %2344 }
 0xb69   :  { %2786 = vmatpush2.bf16.msra.mxu1 %v10759_v55 }
 0xb6a   :  { %2516 = vmatpush2.bf16.msra.mxu0 %v9314_v52  ;;  %2893 = vmatprep.subr.bf16.mxu1 %v9610_v1 }
 0xb6b   :  { %2517 = vmatprep.subr.bf16.mxu0 %v9315_v46 }
 0xb6e   :  { %2518 = vmatpush2.bf16.msra.mxu0 %v9317_v34 }
 0xb6f   :  { %2519 = vmatprep.subr.bf16.mxu0 %v9318_v63 }
 0xb72   :  { %2520 = vmatpush2.bf16.msra.mxu0 %v9320_v38 }
 0xb73   :  { %2521 = vmatprep.subr.bf16.mxu0 %v9321_v5 }
 0xb76   :  { %2522 = vmatpush2.bf16.msra.mxu0 %v9323_v24 }
 0xb77   :  { %2824 = vmatprep.subr.bf16.mxu0 %v9610_v1 }
 0xb79   :  { %2524 = vmatmul.mubr.bf16.vlgmr.msra.gmra.mxu0 %v9324_v14 }
 0xb7a   :  { %8202 = vmatprep.mubr.msk.bf16.mxu0 %vm1574_vm13, %v9327_v12  ;;  %2825 = vmatpush1.bf16.msra.mxu0 %v10649_v13 }
 0xb7b   :  { %2826 = vmatprep.subr.bf16.mxu0 %v9610_v1 }
 0xb7e   :  { %2827 = vmatpush1.bf16.msra.mxu0 %v10653_v54 }
 0xb7f   :  { %2828 = vmatprep.subr.bf16.mxu0 %v9610_v1 }
 0xb81   :  { %2534 = vmatmul.mubr.bf16.gmra.mxu0 %v9329_v21 }
 0xb82   :  { %2829 = vmatpush1.bf16.msra.mxu0 %v10716_v2 }
 0xb83   :  { %2830 = vmatprep.subr.bf16.mxu0 %v9610_v1 }
 0xb86   :  { %2831 = vmatpush1.bf16.msra.mxu0 %v10723_v44 }
 0xb87   :  { %2832 = vmatprep.subr.bf16.mxu0 %v9610_v1 }
 0xb8a   :  { %2833 = vmatpush1.bf16.msra.mxu0 %v10730_v50 }
 0xb8b   :  { %2834 = vmatprep.subr.bf16.mxu0 %v9610_v1 }
 0xb8e   :  { %2835 = vmatpush1.bf16.msra.mxu0 %v10737_v51 }
 0xb8f   :  { %2836 = vmatprep.subr.bf16.mxu0 %v9610_v1 }
 0xb92   :  { %2837 = vmatpush1.bf16.msra.mxu0 %v10744_v53 }
 0xb93   :  { %2838 = vmatprep.subr.bf16.mxu0 %v9610_v1 }
 0xb96   :  { %2839 = vmatpush1.bf16.msra.mxu0 %v10751_v15 }
 0xb97   :  { %2854 = vmatprep.subr.bf16.mxu0 %v9610_v1 }
 0xb9a   :  { %2855 = vmatpush2.bf16.msra.mxu0 %v10759_v55 }
 0xc39   :  { %v2525_v57 = vpop.f32.mrf.mxu0 }
 0xc3a   :  { %v2526_v58 = vadd.f32 %v2525_v57, %v2330_v56 }
 0xc3b   :  { %v2527_v16 = vpop.f32.mrf.mxu0 }
 0xc3c   :  { %v2544_v59 = vmul.f32 %v2526_v58, %v9963_v39  ;;  %v2528_v60 = vadd.f32 %v2527_v16, %v2330_v56  ;;  %v3094_v58 = vld [vmem:[%s12227_s21 + $0x28] sm:$0xff]  ;;  %v3092_v16 = vld [vmem:[%s12227_s21 + $0x18] sm:$0xff] }
 0xc3d   :  { %v2529_v62 = vpop.f32.mrf.mxu0 }
 0xc3e   :  { %v2552_v4 = vadd.f32 %v2544_v59, %v1650_v37  ;;  %v2545_v6 = vmul.f32 %v2528_v60, %v9965_v41  ;;  %v2530_v8 = vadd.f32 %v2529_v62, %v2335_v61  ;;  %v3091_v59 = vld [vmem:[%s12227_s21 + $0x10] sm:$0xff]  ;;  %v3089_v60 = vld [vmem:[%s12227_s21] sm:$0xff] }
 0xc3f   :  { %v2531_v3 = vpop.f32.mrf.mxu0 }
 0xc40   :  { %v10770_v11 = vadd.f32 %v2545_v6, %v1651_v36  ;;  %v2546_v20 = vmul.f32 %v2530_v8, %v9963_v39  ;;  %v2532_v22 = vadd.f32 %v2531_v3, %v2335_v61  ;;  %v10773_v27 = vmax.f32 %v2552_v4, 0.0 }
 0xc41   :  { %v2535_v35 = vpop.f32.mrf.mxu0 }
 0xc42   :  { %v2561_v30 = vmax.f32 %v10770_v11, 0.0  ;;  %v2554_v23 = vadd.f32 %v2546_v20, %v1652_v49  ;;  %v2547_v37 = vmul.f32 %v2532_v22, %v9965_v41  ;;  %v2536_v10 = vadd.f32 %v2535_v35, %v2340_v26 }
 0xc43   :  { %v2537_v0 = vpop.f32.mrf.mxu0 }
 0xc44   :  { %v8598_v18 = vpack.c.bf16 %v2561_v30, %v10773_v27  ;;  %v10784_v36 = vadd.f32 %v2547_v37, %v1653_v43  ;;  %v2548_v7 = vmul.f32 %v2536_v10, %v9963_v39  ;;  %v2538_v48 = vadd.f32 %v2537_v0, %v2340_v26 }
 0xc45   :  { %v2539_v46 = vpop.f32.mrf.mxu0  ;;  %v10789_v47 = vmax.f32 %v2554_v23, 0.0 }
 0xc46   :  { %2663 = vst.msk [vmem:[#allocation2] sm:$0xff] %vm10007_vm10, %v8598_v18  ;;  %v2563_v49 = vmax.f32 %v10784_v36, 0.0  ;;  %v2540_v52 = vadd.f32 %v2539_v46, %v2345_v45  ;;  %v2556_v31 = vadd.f32 %v2548_v7, %v1654_v28  ;;  %v2549_v43 = vmul.f32 %v2538_v48, %v9965_v41 }
 0xc47   :  { %2668 = vst.msk [vmem:[#allocation2 + $0x4] sm:$0xf] %vm2667_vm2, %v9610_v1  ;;  %v2541_v63 = vpop.f32.mrf.mxu0 }
 0xc48   :  { %v8599_v34 = vpack.c.bf16 %v2563_v49, %v10789_v47  ;;  %v2550_v5 = vmul.f32 %v2540_v52, %v9963_v39  ;;  %v2542_v38 = vadd.f32 %v2541_v63, %v2345_v45  ;;  %v10803_v24 = vadd.f32 %v2549_v43, %v1655_v40  ;;  %v9345_v52 = vld [vmem:[%s12228_s25] sm:$0xff]  }
 0xc49   :  { %v10812_v14 = vmax.f32 %v2556_v31, 0.0 }
 0xc4a   :  { %2664 = vst.msk [vmem:[#allocation2 + $0x8] sm:$0xff] %vm10007_vm10, %v8599_v34  ;;  %v2558_v9 = vadd.f32 %v2550_v5, %v1656_v33  ;;  %v2551_v28 = vmul.f32 %v2542_v38, %v9965_v41  ;;  %v2565_v39 = vmax.f32 %v10803_v24, 0.0 }
 0xc4b   :  { %2669 = vst.msk [vmem:[#allocation2 + $0xc] sm:$0xf] %vm2667_vm2, %v9610_v1 }
 0xc4c   :  { %v10817_v17 = vadd.f32 %v2551_v28, %v1657_v42  ;;  %v8600_v40 = vpack.c.bf16 %v2565_v39, %v10812_v14  ;;  %v10822_v12 = vmax.f32 %v2558_v9, 0.0 }
 0xc4e   :  { %v2567_v29 = vmax.f32 %v10817_v17, 0.0  ;;  %2665 = vst.msk [vmem:[#allocation2 + $0x10] sm:$0xff] %vm10007_vm10, %v8600_v40  ;;  %v2672_v32 = vld [vmem:[#allocation2] sm:$0xff] }
 0xc4f   :  { %2670 = vst.msk [vmem:[#allocation2 + $0x14] sm:$0xf] %vm2667_vm2, %v9610_v1 }
 0xc50   :  { %v8601_v41 = vpack.c.bf16 %v2567_v29, %v10822_v12 }
 0xc52   :  { %v2673_v33 = vld [vmem:[#allocation2 + $0x8] sm:$0xff]  ;;  %2666 = vst.msk [vmem:[#allocation2 + $0x18] sm:$0xff] %vm10007_vm10, %v8601_v41  ;;  %vm4405_vm10 = vcmask 297992  }
 0xc53   :  { %2671 = vst.msk [vmem:[#allocation2 + $0x1c] sm:$0xf] %vm2667_vm2, %v9610_v1  ;;  %v8208_v42 = vcombine.high %v2672_v32, %v2673_v33  ;;  %v8207_v21 = vcombine.low %v2672_v32, %v2673_v33  ;;  %vm4422_vm2 = vcmask 306472  }
 0xc55   :  { %2877 = vrot.lane.b32.xlu1 %v8208_v42, %s9611_s0  ;;  %8220 = vmatprep.mubr.msk.bf16.mxu1 %vm2745_vm0, %v8208_v42 }
 0xc56   :  { %2875 = vrot.lane.b32.xlu0 %v8207_v21, %s9611_s0  ;;  %2788 = vmatmul.mubr.bf16.vlgmr.msra.gmra.mxu1 %v8207_v21  ;;  %v2674_v25 = vld [vmem:[#allocation2 + $0x10] sm:$0xff] }
 0xc57   :  { %2894 = vmatpush1.bf16.msra.mxu1 %v10649_v13  ;;  %v3096_v13 = vld [vmem:[%s12227_s21 + $0x38] sm:$0xff] }
 0xc58   :  { %2895 = vmatprep.subr.bf16.mxu1 %v9610_v1 }
 0xc59   :  { %2808 = vrot.lane.b32.xlu1 %v8208_v42, %s9612_s5 }
 0xc5a   :  { %v2675_v19 = vld [vmem:[#allocation2 + $0x18] sm:$0xff]  ;;  %2806 = vrot.lane.b32.xlu0 %v8207_v21, %s9612_s5 }
 0xc5b   :  { %v8210_v56 = vcombine.high %v2674_v25, %v2675_v19  ;;  %v8209_v57 = vcombine.low %v2674_v25, %v2675_v19  ;;  %2896 = vmatpush1.bf16.msra.mxu1 %v10653_v54  ;;  %v3095_v54 = vld [vmem:[%s12227_s21 + $0x30] sm:$0xff] }
 0xc5c   :  { %2897 = vmatprep.subr.bf16.mxu1 %v9610_v1 }
 0xc5d   :  { %2881 = vrot.lane.b32.xlu1 %v8210_v56, %s9611_s0  ;;  %8221 = vmatprep.mubr.msk.bf16.mxu1 %vm2745_vm0, %v8210_v56 }
 0xc5e   :  { %2879 = vrot.lane.b32.xlu0 %v8209_v57, %s9611_s0  ;;  %2796 = vmatmul.mubr.bf16.gmra.mxu1 %v8209_v57 }
 0xc5f   :  { %2898 = vmatpush1.bf16.msra.mxu1 %v10716_v2  ;;  %v3093_v2 = vld [vmem:[%s12227_s21 + $0x20] sm:$0xff] }
 0xc60   :  { %2899 = vmatprep.subr.bf16.mxu1 %v9610_v1 }
 0xc61   :  { %2812 = vrot.lane.b32.xlu1 %v8210_v56, %s9612_s5 }
 0xc62   :  { %2810 = vrot.lane.b32.xlu0 %v8209_v57, %s9612_s5 }
 0xc63   :  { %2900 = vmatpush1.bf16.msra.mxu1 %v10723_v44  ;;  %v3090_v44 = vld [vmem:[%s12227_s21 + $0x8] sm:$0xff]  ;;  %s12251_s21 = sld [smem:[#allocation39_spill]] }
 0xc64   :  { %2901 = vmatprep.subr.bf16.mxu1 %v9610_v1 }
 0xc65   :  { %3134 = vperm.xlu1 %9184, %v3096_v13  }
 0xc66   :  { %3129 = vperm.xlu0 %9185, %v3095_v54  }
 0xc67   :  { %2902 = vmatpush1.bf16.msra.mxu1 %v10730_v50 }
 0xc68   :  { %2903 = vmatprep.subr.bf16.mxu1 %v9610_v1 }
 0xc69   :  { %3124 = vperm.xlu1 %9184, %v3094_v58  }
 0xc6a   :  { %3119 = vperm.xlu0 %9185, %v3093_v2  }
 0xc6b   :  { %2904 = vmatpush1.bf16.msra.mxu1 %v10737_v51 }
 0xc6c   :  { %2905 = vmatprep.subr.bf16.mxu1 %v9610_v1 }
 0xc6d   :  { %3114 = vperm.xlu1 %9184, %v3092_v16  }
 0xc6e   :  { %3109 = vperm.xlu0 %9185, %v3091_v59  }
 0xc6f   :  { %2906 = vmatpush1.bf16.msra.mxu1 %v10744_v53 }
 0xc70   :  { %2907 = vmatprep.subr.bf16.mxu1 %v9610_v1 }
 0xc71   :  { %3104 = vperm.xlu1 %9184, %v3090_v44  }
 0xc72   :  { %3099 = vperm.xlu0 %9185, %v3089_v60  }
 0xc73   :  { %2908 = vmatpush1.bf16.msra.mxu1 %v10751_v15 }
 0xc74   :  { %2923 = vmatprep.subr.bf16.mxu1 %v9610_v1 }
 0xc77   :  { %2924 = vmatpush2.bf16.msra.mxu1 %v10759_v55 }
 0xcc7   :  { %v2878_v50 = vpop.permute.xlu1 %2877 }
 0xcc8   :  { %v2876_v51 = vpop.permute.xlu0 %2875  ;;  %8224 = vmatprep.mubr.msk.bf16.mxu1 %vm2745_vm0, %v2878_v50 }
 0xcc9   :  { %v2883_v61 = vsel %vm283_vm9, %v2876_v51, %v2878_v50 }
 0xcca   :  { %2926 = vmatmul.mubr.bf16.vlgmr.msra.gmra.mxu1 %v2883_v61 }
 0xccb   :  { %v2809_v62 = vpop.permute.xlu1 %2808 }
 0xccc   :  { %v2807_v4 = vpop.permute.xlu0 %2806  ;;  %8222 = vmatprep.mubr.msk.bf16.mxu0 %vm2745_vm0, %v2809_v62 }
 0xccd   :  { %v2814_v53 = vsel %vm271_vm12, %v2807_v4, %v2809_v62 }
 0xcce   :  { %2857 = vmatmul.mubr.bf16.vlgmr.msra.gmra.mxu0 %v2814_v53 }
 0xccf   :  { %v2882_v6 = vpop.permute.xlu1 %2881 }
 0xcd0   :  { %v2880_v15 = vpop.permute.xlu0 %2879  ;;  %8225 = vmatprep.mubr.msk.bf16.mxu1 %vm2745_vm0, %v2882_v6 }
 0xcd1   :  { %v2884_v55 = vsel %vm283_vm9, %v2880_v15, %v2882_v6  ;;  %v9346_v6 = vld [vmem:[%s12228_s25 + $0x8] sm:$0xff]   ;;  %v9347_v15 = vld [vmem:[%s12228_s25 + $0x10] sm:$0xff]   ;;  %vm3340_vm9 = vcmask 560136  }
 0xcd2   :  { %2934 = vmatmul.mubr.bf16.gmra.mxu1 %v2884_v55  ;;  %v9348_v55 = vld [vmem:[%s12228_s25 + $0x18] sm:$0xff]   ;;  %s12252_s25 = sld [smem:[#allocation38_spill]] }
 0xcd3   :  { %v2813_v8 = vpop.permute.xlu1 %2812  ;;  %8865 = vmatprep.mubr.msk.bf16.mxu1 %vm671_vm11, %v9345_v52 }
 0xcd4   :  { %v2811_v3 = vpop.permute.xlu0 %2810  ;;  %8223 = vmatprep.mubr.msk.bf16.mxu0 %vm2745_vm0, %v2813_v8 }
 0xcd5   :  { %v2815_v20 = vsel %vm271_vm12, %v2811_v3, %v2813_v8  ;;  %vm3357_vm12 = vcmask 568872  }
 0xcd6   :  { %2865 = vmatmul.mubr.bf16.gmra.mxu0 %v2815_v20 }
 0xce0   :  { %v3135_v3 = vpop.permute.xlu1 %3134 }
 0xce1   :  { %v3130_v8 = vpop.permute.xlu0 %3129 }
 0xd16   :  { %v2789_v22 = vpop.f32.mrf.mxu1 }
 0xd17   :  { %v8602_v26 = vpack.c.bf16 %v2789_v22, %v2789_v22  ;;  %v3120_v22 = vpop.permute.xlu0 %3119 }
 0xd18   :  { %v2791_v35 = vpop.f32.mrf.mxu1 }
 0xd19   :  { %3029 = vst.msk [vmem:[#allocation3] sm:$0xf] %vm3028_vm1, %v8602_v26 }
 0xd1a   :  { %v2792_v23 = vpop.f32.mrf.mxu1 }
 0xd1b   :  { %v8603_v37 = vpack.c.bf16 %v2792_v23, %v2792_v23  ;;  %v3125_v23 = vpop.permute.xlu1 %3124 }
 0xd1c   :  { %v2794_v10 = vpop.f32.mrf.mxu1 }
 0xd1d   :  { %3030 = vst.msk [vmem:[#allocation3 + $0x8] sm:$0xf] %vm3028_vm1, %v8603_v37  ;;  %v3110_v10 = vpop.permute.xlu0 %3109 }
 0xd1e   :  { %v2797_v0 = vpop.f32.mrf.mxu1 }
 0xd1f   :  { %v8604_v18 = vpack.c.bf16 %v2797_v0, %v2797_v0 }
 0xd20   :  { %v2799_v7 = vpop.f32.mrf.mxu1 }
 0xd21   :  { %3031 = vst.msk [vmem:[#allocation3 + $0x10] sm:$0xf] %vm3028_vm1, %v8604_v18  ;;  %v10901_v7 = vld [vmem:[%s12229_s29] ss:$0 sm:$0xff]  ;;  %s12253_s29 = sld [smem:[#allocation13_spill]] }
 0xd22   :  { %v2800_v45 = vpop.f32.mrf.mxu1 }
 0xd23   :  { %v8605_v48 = vpack.c.bf16 %v2800_v45, %v2800_v45 }
 0xd24   :  { %v2802_v46 = vpop.f32.mrf.mxu1  ;;  %v9344_v53 = vld [vmem:[#allocation3] ss:$8 sps:$4 sm:$0xff]  }
 0xd25   :  { %3032 = vst.msk [vmem:[#allocation3 + $0x18] sm:$0xf] %vm3028_vm1, %v8605_v48 }
 0xd2c   :  { %v9343_v4 = vld [vmem:[#allocation3 + $0x10] ss:$8 sps:$4 sm:$0xff]  }
 0xd8a   :  { %v2927_v31 = vpop.f32.mrf.mxu1 }
 0xd8b   :  { %v8610_v43 = vpack.c.bf16 %v2927_v31, %v2927_v31  ;;  %v3115_v31 = vpop.permute.xlu1 %3114 }
 0xd8c   :  { %v2929_v63 = vpop.f32.mrf.mxu1 }
 0xd8d   :  { %3065 = vst.msk [vmem:[#allocation3 + $0x40] sm:$0xf] %vm3028_vm1, %v8610_v43  ;;  %v3100_v63 = vpop.permute.xlu0 %3099 }
 0xd8e   :  { %v2858_v34 = vpop.f32.mrf.mxu0  ;;  %v2930_v5 = vpop.f32.mrf.mxu1 }
 0xd8f   :  { %v8606_v38 = vpack.c.bf16 %v2858_v34, %v2858_v34  ;;  %v8611_v9 = vpack.c.bf16 %v2930_v5, %v2930_v5 }
 0xd90   :  { %v2860_v28 = vpop.f32.mrf.mxu0  ;;  %v2932_v40 = vpop.f32.mrf.mxu1 }
 0xd91   :  { %3047 = vst.msk [vmem:[#allocation3 + $0x20] sm:$0xf] %vm3028_vm1, %v8606_v38  ;;  %3066 = vst.msk [vmem:[#allocation3 + $0x48] sm:$0xf] %vm3028_vm1, %v8611_v9 }
 0xd92   :  { %v2861_v41 = vpop.f32.mrf.mxu0  ;;  %v2935_v32 = vpop.f32.mrf.mxu1 }
 0xd93   :  { %v8607_v33 = vpack.c.bf16 %v2861_v41, %v2861_v41  ;;  %v8612_v42 = vpack.c.bf16 %v2935_v32, %v2935_v32  ;;  %v2873_v60 = vpack.c.bf16 %v2861_v41, %v2858_v34 }
 0xd94   :  { %v2863_v21 = vpop.f32.mrf.mxu0  ;;  %v2937_v25 = vpop.f32.mrf.mxu1 }
 0xd95   :  { %3048 = vst.msk [vmem:[#allocation3 + $0x28] sm:$0xf] %vm3028_vm1, %v8607_v33  ;;  %3067 = vst.msk [vmem:[#allocation3 + $0x50] sm:$0xf] %vm3028_vm1, %v8612_v42 }
 0xd96   :  { %v2866_v19 = vpop.f32.mrf.mxu0  ;;  %v2938_v56 = vpop.f32.mrf.mxu1 }
 0xd97   :  { %v8608_v57 = vpack.c.bf16 %v2866_v19, %v2866_v19  ;;  %v8613_v13 = vpack.c.bf16 %v2938_v56, %v2938_v56  ;;  %v3105_v56 = vpop.permute.xlu1 %3104 }
 0xd98   :  { %v2868_v54 = vpop.f32.mrf.mxu0  ;;  %v2940_v58 = vpop.f32.mrf.mxu1  ;;  %v9340_v51 = vld [vmem:[#allocation3 + $0x40] ss:$8 sps:$4 sm:$0xff]  }
 0xd99   :  { %3049 = vst.msk [vmem:[#allocation3 + $0x30] sm:$0xf] %vm3028_vm1, %v8608_v57  ;;  %3068 = vst.msk [vmem:[#allocation3 + $0x58] sm:$0xf] %vm3028_vm1, %v8613_v13 }
 0xd9a   :  { %v2869_v2 = vpop.f32.mrf.mxu0 }
 0xd9b   :  { %v2874_v16 = vpack.c.bf16 %v2869_v2, %v2866_v19  ;;  %v8609_v59 = vpack.c.bf16 %v2869_v2, %v2869_v2 }
 0xd9c   :  { %v2871_v44 = vpop.f32.mrf.mxu0  ;;  %v9342_v62 = vld [vmem:[#allocation3 + $0x20] ss:$8 sps:$4 sm:$0xff]  }
 0xd9d   :  { %3050 = vst.msk [vmem:[#allocation3 + $0x38] sm:$0xf] %vm3028_vm1, %v8609_v59  ;;  %8845 = vmatprep.subr.bf16.mxu0 %v2874_v16 }
 0xd9e   :  { %8846 = vmatpush3.bf16.msra.mxu0 %v2874_v16 }
 0xd9f   :  { %8847 = vmatprep.subr.bf16.mxu0 %v2873_v60 }
 0xda0   :  { %v9339_v50 = vld [vmem:[#allocation3 + $0x50] ss:$8 sps:$4 sm:$0xff]  }
 0xda1   :  { %8853 = vmatprep.subr.bf16.mxu1 %v9339_v50 }
 0xda2   :  { %8848 = vmatpush3.bf16.msra.mxu0 %v2873_v60  ;;  %8854 = vmatpush3.bf16.msra.mxu1 %v9339_v50 }
 0xda3   :  { %3602 = vmatprep.subr.bf16.mxu0 %v9610_v1  ;;  %8855 = vmatprep.subr.bf16.mxu1 %v9340_v51 }
 0xda4   :  { %v9341_v61 = vld [vmem:[#allocation3 + $0x30] ss:$8 sps:$4 sm:$0xff]  }
 0xda6   :  { %8856 = vmatpush3.bf16.msra.mxu1 %v9340_v51 }
 0xda7   :  { %8857 = vmatprep.subr.bf16.mxu1 %v9341_v61 }
 0xdaa   :  { %8858 = vmatpush3.bf16.msra.mxu1 %v9341_v61 }
 0xdab   :  { %8859 = vmatprep.subr.bf16.mxu1 %v9342_v62 }
 0xdae   :  { %8860 = vmatpush3.bf16.msra.mxu1 %v9342_v62 }
 0xdaf   :  { %8861 = vmatprep.subr.bf16.mxu1 %v9343_v4 }
 0xdb2   :  { %8862 = vmatpush3.bf16.msra.mxu1 %v9343_v4 }
 0xdb3   :  { %8863 = vmatprep.subr.bf16.mxu1 %v9344_v53 }
 0xdb6   :  { %8864 = vmatpush3.bf16.msra.mxu1 %v9344_v53 }
 0xdb9   :  { %8866 = vmatmul.mubr.msk.bf16.vlgmr.msra.gmra.mxu1 %vm671_vm11, %v9346_v6 }
 0xdba   :  { %8869 = vmatprep.mubr.msk.bf16.mxu1 %vm671_vm11, %v9347_v15 }
 0xdc1   :  { %8870 = vmatmul.mubr.msk.bf16.gmra.mxu1 %vm671_vm11, %v9348_v55  ;;  %v9349_v55 = vld [vmem:[%s12230_s14] sm:$0xff]  }
 0xdc2   :  { %8849 = vmatprep.mubr.msk.bf16.mxu0 %vm2958_vm3, %v9349_v55 }
 0xe79   :  { %v8867_v20 = vpop.f32.mrf.mxu1 }
 0xe7a   :  { %v3248_v45 = vadd.f32 %v8867_v20, %v3110_v10  ;;  %v9350_v20 = vld [vmem:[%s12230_s14 + $0x8] sm:$0xff]   ;;  %s12254_s14 = sld [smem:[#allocation40_spill]] }
 0xe7b   :  { %v3239_v26 = vpop.f32.mrf.mxu1  ;;  %8850 = vmatmul.mubr.msk.bf16.vlgmr.msra.gmra.mxu0 %vm2958_vm3, %v9350_v20 }
 0xe7c   :  { %v3278_v9 = vmul.f32 %v10901_v7, %v3248_v45  ;;  %v3240_v28 = vadd.f32 %v3239_v26, %v3100_v63 }
 0xe7d   :  { %v8868_v35 = vpop.f32.mrf.mxu1 }
 0xe7e   :  { %v3251_v40 = vadd.f32 %v8868_v35, %v3115_v31  ;;  %v3286_v57 = vmax.f32 %v3278_v9, 0.0  ;;  %v3276_v13 = vmul.f32 %v10901_v7, %v3240_v28 }
 0xe7f   :  { %v3242_v37 = vpop.f32.mrf.mxu1 }
 0xe80   :  { %v3279_v54 = vmul.f32 %v10901_v7, %v3251_v40  ;;  %v3243_v58 = vadd.f32 %v3242_v37, %v3105_v56  ;;  %v8616_v44 = vpack.c.bf16 %v3286_v57, %v3286_v57  ;;  %v3284_v60 = vmax.f32 %v3276_v13, 0.0  ;;  %v3651_v57 = vld [vmem:[%s12231_s19] sm:$0xff]  ;;  %v3652_v13 = vld [vmem:[%s12231_s19 + $0x8] sm:$0xff] }
 0xe81   :  { %v8871_v0 = vpop.f32.mrf.mxu1 }
 0xe82   :  { %v3264_v18 = vadd.f32 %v8871_v0, %v3130_v8  ;;  %v3287_v50 = vmax.f32 %v3279_v54, 0.0  ;;  %v3277_v51 = vmul.f32 %v10901_v7, %v3243_v58  ;;  %v8614_v62 = vpack.c.bf16 %v3284_v60, %v3284_v60  ;;  %v3653_v54 = vld [vmem:[%s12231_s19 + $0x10] sm:$0xff]  ;;  %v3654_v58 = vld [vmem:[%s12231_s19 + $0x18] sm:$0xff]  ;;  %s12255_s19 = sld [smem:[#allocation43_spill]] }
 0xe83   :  { %v3255_v48 = vpop.f32.mrf.mxu1  ;;  %v3682_v60 = vld [vmem:[%s12232_s24 + $0x18] sm:$0xff] }
 0xe84   :  { %v3282_v46 = vmul.f32 %v10901_v7, %v3264_v18  ;;  %v3256_v52 = vadd.f32 %v3255_v48, %v3120_v22  ;;  %v8617_v4 = vpack.c.bf16 %v3287_v50, %v3287_v50  ;;  %v3285_v53 = vmax.f32 %v3277_v51, 0.0 }
 0xe85   :  { %v8872_v43 = vpop.f32.mrf.mxu1 }
 0xe86   :  { %v3290_v34 = vmax.f32 %v3282_v46, 0.0  ;;  %v3280_v5 = vmul.f32 %v10901_v7, %v3256_v52  ;;  %v3267_v38 = vadd.f32 %v8872_v43, %v3135_v3  ;;  %v8615_v6 = vpack.c.bf16 %v3285_v53, %v3285_v53 }
 0xe87   :  { %v3258_v41 = vpop.f32.mrf.mxu1 }
 0xe88   :  { %v8620_v32 = vpack.c.bf16 %v3290_v34, %v3290_v34  ;;  %v3288_v33 = vmax.f32 %v3280_v5, 0.0  ;;  %v3283_v42 = vmul.f32 %v10901_v7, %v3267_v38  ;;  %v3259_v21 = vadd.f32 %v3258_v41, %v3125_v23 }
 0xe8a   :  { %v3291_v25 = vmax.f32 %v3283_v42, 0.0  ;;  %v3281_v19 = vmul.f32 %v10901_v7, %v3259_v21  ;;  %3328 = vrot.lane.b32.xlu0 %v8620_v32, %s9609_s22  ;;  %v8618_v2 = vpack.c.bf16 %v3288_v33, %v3288_v33 }
 0xe8c   :  { %v8621_v16 = vpack.c.bf16 %v3291_v25, %v3291_v25  ;;  %v3289_v59 = vmax.f32 %v3281_v19, 0.0 }
 0xe8e   :  { %3330 = vrot.lane.b32.xlu1 %v8621_v16, %s9609_s22  ;;  %3324 = vrot.lane.b32.xlu0 %v8618_v2, %s9609_s22  ;;  %v8619_v61 = vpack.c.bf16 %v3289_v59, %v3289_v59  ;;  %v3679_v2 = vld [vmem:[%s12232_s24] sm:$0xff]  ;;  %v3680_v16 = vld [vmem:[%s12232_s24 + $0x8] sm:$0xff] }
 0xe8f   :  { %v3681_v59 = vld [vmem:[%s12232_s24 + $0x10] sm:$0xff]  ;;  %s12256_s24 = sld [smem:[#allocation41_spill]] }
 0xe92   :  { %3326 = vrot.lane.b32.xlu1 %v8619_v61, %s9609_s22  ;;  %3320 = vrot.lane.b32.xlu0 %v8616_v44, %s9609_s22  ;;  %v9363_v44 = vld [vmem:[%s12233_s30 + $0x4] ss:$8 sps:$4 sm:$0xff]  }
 0xe93   :  { %8281 = vmatprep.mubr.msk.bf16.mxu0 %vm1574_vm13, %v9363_v44 }
 0xe96   :  { %3322 = vrot.lane.b32.xlu1 %v8617_v4, %s9609_s22  ;;  %3316 = vrot.lane.b32.xlu0 %v8614_v62, %s9609_s22 }
 0xe9a   :  { %3318 = vrot.lane.b32.xlu1 %v8615_v6, %s9609_s22 }
 0xefc   :  { %v3329_v15 = vpop.permute.xlu0 %3328 }
 0xefd   :  { %3347 = vst.msk [vmem:[#allocation2 + $0x30] sm:$0xf] %vm3340_vm9, %v3329_v15 }
 0xefe   :  { %3355 = vst.msk [vmem:[#allocation2 + $0x30] sm:$0xf] %vm476_vm4, %v9610_v1 }
 0xeff   :  { %3364 = vst.msk [vmem:[#allocation2 + $0x30] sm:$0xf] %vm3357_vm12, %v9610_v1 }
 0xf00   :  { %v3331_v8 = vpop.permute.xlu1 %3330  ;;  %v3325_v3 = vpop.permute.xlu0 %3324 }
 0xf01   :  { %3348 = vst.msk [vmem:[#allocation2 + $0x38] sm:$0xf] %vm3340_vm9, %v3331_v8  ;;  %3345 = vst.msk [vmem:[#allocation2 + $0x20] sm:$0xf] %vm3340_vm9, %v3325_v3 }
 0xf02   :  { %3356 = vst.msk [vmem:[#allocation2 + $0x38] sm:$0xf] %vm476_vm4, %v9610_v1  ;;  %3353 = vst.msk [vmem:[#allocation2 + $0x20] sm:$0xf] %vm476_vm4, %v9610_v1 }
 0xf03   :  { %3365 = vst.msk [vmem:[#allocation2 + $0x38] sm:$0xf] %vm3357_vm12, %v9610_v1  ;;  %3362 = vst.msk [vmem:[#allocation2 + $0x20] sm:$0xf] %vm3357_vm12, %v9610_v1 }
 0xf04   :  { %v3327_v22 = vpop.permute.xlu1 %3326  ;;  %v3321_v26 = vpop.permute.xlu0 %3320 }
 0xf05   :  { %3346 = vst.msk [vmem:[#allocation2 + $0x28] sm:$0xf] %vm3340_vm9, %v3327_v22  ;;  %3343 = vst.msk [vmem:[#allocation2 + $0x10] sm:$0xf] %vm3340_vm9, %v3321_v26 }
 0xf06   :  { %v3372_v35 = vld [vmem:[#allocation2 + $0x30] sm:$0xf]  ;;  %3354 = vst.msk [vmem:[#allocation2 + $0x28] sm:$0xf] %vm476_vm4, %v9610_v1  ;;  %3351 = vst.msk [vmem:[#allocation2 + $0x10] sm:$0xf] %vm476_vm4, %v9610_v1 }
 0xf07   :  { %v3388_v23 = vld [vmem:[#allocation2 + $0x30] sm:$0xf]  ;;  %3380 = vst.msk [vmem:[#allocation3 + $0x30] sm:$0xf] %vm3028_vm1, %v3372_v35 }
 0xf08   :  { %3363 = vst.msk [vmem:[#allocation2 + $0x28] sm:$0xf] %vm3357_vm12, %v9610_v1  ;;  %3360 = vst.msk [vmem:[#allocation2 + $0x10] sm:$0xf] %vm3357_vm12, %v9610_v1  ;;  %3410 = vrot.lane.b32.xlu0 %v3388_v23, %s9612_s5  ;;  %v3323_v37 = vpop.permute.xlu1 %3322  ;;  %v3317_v10 = vpop.permute.xlu0 %3316  ;;  %v3436_v28 = vld [vmem:[#allocation2 + $0x30] sm:$0xf] }
 0xf09   :  { %3344 = vst.msk [vmem:[#allocation2 + $0x18] sm:$0xf] %vm3340_vm9, %v3323_v37  ;;  %3341 = vst.msk [vmem:[#allocation2] sm:$0xf] %vm3340_vm9, %v3317_v10 }
 0xf0a   :  { %v3373_v0 = vld [vmem:[#allocation2 + $0x38] sm:$0xf]  ;;  %v3370_v18 = vld [vmem:[#allocation2 + $0x20] sm:$0xf]  ;;  %3352 = vst.msk [vmem:[#allocation2 + $0x18] sm:$0xf] %vm476_vm4, %v9610_v1 }
 0xf0b   :  { %3349 = vst.msk [vmem:[#allocation2] sm:$0xf] %vm476_vm4, %v9610_v1  ;;  %v3389_v45 = vld [vmem:[#allocation2 + $0x38] sm:$0xf]  ;;  %v3386_v48 = vld [vmem:[#allocation2 + $0x20] sm:$0xf] }
 0xf0c   :  { %3381 = vst.msk [vmem:[#allocation3 + $0x38] sm:$0xf] %vm3028_vm1, %v3373_v0  ;;  %3378 = vst.msk [vmem:[#allocation3 + $0x20] sm:$0xf] %vm3028_vm1, %v3370_v18  ;;  %3412 = vrot.lane.b32.xlu1 %v3389_v45, %s9612_s5  ;;  %3406 = vrot.lane.b32.xlu0 %v3386_v48, %s9612_s5  ;;  %v3319_v46 = vpop.permute.xlu1 %3318  ;;  %v3437_v32 = vld [vmem:[#allocation2 + $0x38] sm:$0xf] }
 0xf0d   :  { %3361 = vst.msk [vmem:[#allocation2 + $0x18] sm:$0xf] %vm3357_vm12, %v9610_v1  ;;  %3358 = vst.msk [vmem:[#allocation2] sm:$0xf] %vm3357_vm12, %v9610_v1  ;;  %v3434_v33 = vld [vmem:[#allocation2 + $0x20] sm:$0xf] }
 0xf0e   :  { %3342 = vst.msk [vmem:[#allocation2 + $0x8] sm:$0xf] %vm3340_vm9, %v3319_v46  ;;  %vm4877_vm9 = vcmask 293888  }
 0xf0f   :  { %v3371_v52 = vld [vmem:[#allocation2 + $0x28] sm:$0xf]  ;;  %v3368_v31 = vld [vmem:[#allocation2 + $0x10] sm:$0xf]  ;;  %3350 = vst.msk [vmem:[#allocation2 + $0x8] sm:$0xf] %vm476_vm4, %v9610_v1 }
 0xf10   :  { %v3384_v43 = vld [vmem:[#allocation2 + $0x10] sm:$0xf]  ;;  %3379 = vst.msk [vmem:[#allocation3 + $0x28] sm:$0xf] %vm3028_vm1, %v3371_v52  ;;  %3376 = vst.msk [vmem:[#allocation3 + $0x10] sm:$0xf] %vm3028_vm1, %v3368_v31 }
 0xf11   :  { %3359 = vst.msk [vmem:[#allocation2 + $0x8] sm:$0xf] %vm3357_vm12, %v9610_v1  ;;  %v3387_v63 = vld [vmem:[#allocation2 + $0x28] sm:$0xf]  ;;  %3402 = vrot.lane.b32.xlu0 %v3384_v43, %s9612_s5  ;;  %v3432_v42 = vld [vmem:[#allocation2 + $0x10] sm:$0xf] }
 0xf12   :  { %3408 = vrot.lane.b32.xlu1 %v3387_v63, %s9612_s5  ;;  %v3435_v21 = vld [vmem:[#allocation2 + $0x28] sm:$0xf]  ;;  %vm5143_vm12 = vcmask 158720  }
 0xf13   :  { %v9355_v10 = vld [vmem:[#allocation3 + $0x30] ss:$8 sps:$4 sm:$0xff]  }
 0xf14   :  { %v3369_v34 = vld [vmem:[#allocation2 + $0x18] sm:$0xf]  ;;  %v3366_v38 = vld [vmem:[#allocation2] sm:$0xf] }
 0xf15   :  { %v3385_v5 = vld [vmem:[#allocation2 + $0x18] sm:$0xf]  ;;  %3377 = vst.msk [vmem:[#allocation3 + $0x18] sm:$0xf] %vm3028_vm1, %v3369_v34  ;;  %v3382_v9 = vld [vmem:[#allocation2] sm:$0xf] }
 0xf16   :  { %3374 = vst.msk [vmem:[#allocation3] sm:$0xf] %vm3028_vm1, %v3366_v38  ;;  %3404 = vrot.lane.b32.xlu1 %v3385_v5, %s9612_s5  ;;  %3398 = vrot.lane.b32.xlu0 %v3382_v9, %s9612_s5  ;;  %v3433_v25 = vld [vmem:[#allocation2 + $0x18] sm:$0xf]  ;;  %v3430_v19 = vld [vmem:[#allocation2] sm:$0xf] }
 0xf17   :  { %v9356_v45 = vld [vmem:[#allocation3 + $0x20] ss:$8 sps:$4 sm:$0xff]   ;;  %v9366_v38 = vld [vmem:[%s12233_s30 + $0x14] ss:$8 sps:$4 sm:$0xff]   ;;  %v9368_v9 = vld [vmem:[%s12233_s30 + $0x10] ss:$8 sps:$4 sm:$0xff]  }
 0xf18   :  { %v3367_v40 = vld [vmem:[#allocation2 + $0x8] sm:$0xf] }
 0xf19   :  { %v3383_v41 = vld [vmem:[#allocation2 + $0x8] sm:$0xf]  ;;  %3375 = vst.msk [vmem:[#allocation3 + $0x8] sm:$0xf] %vm3028_vm1, %v3367_v40  ;;  %v11030_v40 = vld [vmem:[%s12234_s6 + $0x18] sm:$0xff]  }
 0xf1a   :  { %3400 = vrot.lane.b32.xlu1 %v3383_v41, %s9612_s5  ;;  %3458 = vrot.lane.b32.xlu0 %v3436_v28, %s9611_s0  ;;  %v3431_v56 = vld [vmem:[#allocation2 + $0x8] sm:$0xf]  ;;  %v9369_v28 = vld [vmem:[%s12234_s6 + $0x20] ss:$0 sps:$4 sm:$0x33]  }
 0xf1b   :  { %v9365_v5 = vld [vmem:[%s12233_s30] ss:$8 sps:$4 sm:$0xff]   ;;  %v11034_v41 = vsel %vm261_vm6, %v9369_v28, 0  ;;  %9100 = vmatprep.subr.msk.bf16.mxu1 %vm261_vm6, %v9369_v28  ;;  %s12257_s30 = sld [smem:[#allocation42_spill]] }
 0xf1c   :  { %v9357_v46 = vld [vmem:[#allocation3 + $0x10] ss:$8 sps:$4 sm:$0xff]   ;;  %8888 = vmatpush3.bf16.msra.mxu1 %v11034_v41 }
 0xf1d   :  { %8889 = vmatprep.subr.bf16.mxu1 %v11030_v40 }
 0xf1e   :  { %3460 = vrot.lane.b32.xlu1 %v3437_v32, %s9611_s0  ;;  %3454 = vrot.lane.b32.xlu0 %v3434_v33, %s9611_s0  ;;  %v11041_v32 = vld [vmem:[%s12234_s6 + $0x10] sm:$0xff]   ;;  %v11048_v33 = vld [vmem:[%s12234_s6 + $0x8] sm:$0xff]  }
 0xf20   :  { %v9358_v52 = vld [vmem:[#allocation3] ss:$8 sps:$4 sm:$0xff]   ;;  %8890 = vmatpush3.bf16.msra.mxu1 %v11030_v40 }
 0xf21   :  { %8891 = vmatprep.subr.bf16.mxu1 %v11041_v32 }
 0xf22   :  { %3456 = vrot.lane.b32.xlu1 %v3435_v21, %s9611_s0  ;;  %3450 = vrot.lane.b32.xlu0 %v3432_v42, %s9611_s0  ;;  %v11055_v42 = vld [vmem:[%s12234_s6] sm:$0xff]   ;;  %s12258_s6 = sld [smem:[#allocation19_spill]] }
 0xf24   :  { %8892 = vmatpush3.bf16.msra.mxu1 %v11041_v32 }
 0xf25   :  { %8893 = vmatprep.subr.bf16.mxu1 %v11048_v33 }
 0xf26   :  { %3452 = vrot.lane.b32.xlu1 %v3433_v25, %s9611_s0  ;;  %3446 = vrot.lane.b32.xlu0 %v3430_v19, %s9611_s0 }
 0xf28   :  { %8894 = vmatpush3.bf16.msra.mxu1 %v11048_v33 }
 0xf29   :  { %8895 = vmatprep.subr.bf16.mxu1 %v11055_v42 }
 0xf2a   :  { %3448 = vrot.lane.b32.xlu1 %v3431_v56, %s9611_s0  ;;  %3657 = vperm.xlu0 %9185, %v3651_v57  }
 0xf2c   :  { %8896 = vmatpush3.bf16.msra.mxu1 %v11055_v42 }
 0xf2e   :  { %3662 = vperm.xlu1 %9184, %v3652_v13   ;;  %3667 = vperm.xlu0 %9185, %v3653_v54  }
 0xf32   :  { %3672 = vperm.xlu1 %9184, %v3654_v58   ;;  %3685 = vperm.xlu0 %9185, %v3679_v2  }
 0xf36   :  { %3690 = vperm.xlu1 %9184, %v3680_v16   ;;  %3695 = vperm.xlu0 %9185, %v3681_v59  }
 0xf3a   :  { %3700 = vperm.xlu1 %9184, %v3682_v60  }
 0xf3b   :  { %v8851_v21 = vpop.f32.mrf.mxu0 }
 0xf3d   :  { %v2999_v25 = vpop.f32.mrf.mxu0 }
 0xf3f   :  { %v8852_v56 = vpop.f32.mrf.mxu0 }
 0xf41   :  { %v3002_v54 = vpop.f32.mrf.mxu0 }
 0xf7a   :  { %v3411_v50 = vpop.permute.xlu0 %3410 }
 0xf7b   :  { %3428 = vst.msk [vmem:[#allocation3 + $0x70] sm:$0xf] %vm3028_vm1, %v3411_v50 }
 0xf7e   :  { %v3413_v51 = vpop.permute.xlu1 %3412  ;;  %v3407_v61 = vpop.permute.xlu0 %3406 }
 0xf7f   :  { %3429 = vst.msk [vmem:[#allocation3 + $0x78] sm:$0xf] %vm3028_vm1, %v3413_v51  ;;  %3426 = vst.msk [vmem:[#allocation3 + $0x60] sm:$0xf] %vm3028_vm1, %v3407_v61 }
 0xf83   :  { %v3403_v4 = vpop.permute.xlu0 %3402 }
 0xf84   :  { %v3409_v62 = vpop.permute.xlu1 %3408  ;;  %3424 = vst.msk [vmem:[#allocation3 + $0x50] sm:$0xf] %vm3028_vm1, %v3403_v4 }
 0xf85   :  { %3427 = vst.msk [vmem:[#allocation3 + $0x68] sm:$0xf] %vm3028_vm1, %v3409_v62 }
 0xf86   :  { %v9351_v53 = vld [vmem:[#allocation3 + $0x70] ss:$8 sps:$4 sm:$0xff]  }
 0xf87   :  { %3603 = vmatpush1.bf16.msra.mxu0 %v9351_v53 }
 0xf88   :  { %v3405_v6 = vpop.permute.xlu1 %3404  ;;  %v3399_v15 = vpop.permute.xlu0 %3398  ;;  %3604 = vmatprep.subr.bf16.mxu0 %v9610_v1 }
 0xf89   :  { %3425 = vst.msk [vmem:[#allocation3 + $0x58] sm:$0xf] %vm3028_vm1, %v3405_v6  ;;  %3422 = vst.msk [vmem:[#allocation3 + $0x40] sm:$0xf] %vm3028_vm1, %v3399_v15 }
 0xf8c   :  { %v3401_v55 = vpop.permute.xlu1 %3400  ;;  %v9352_v8 = vld [vmem:[#allocation3 + $0x60] ss:$8 sps:$4 sm:$0xff]   ;;  %v3459_v3 = vpop.permute.xlu0 %3458 }
 0xf8d   :  { %3423 = vst.msk [vmem:[#allocation3 + $0x48] sm:$0xf] %vm3028_vm1, %v3401_v55  ;;  %3476 = vst.msk [vmem:[#allocation3 + $0xb0] sm:$0xf] %vm3028_vm1, %v3459_v3  ;;  %3605 = vmatpush1.bf16.msra.mxu0 %v9352_v8 }
 0xf8e   :  { %3606 = vmatprep.subr.bf16.mxu0 %v9610_v1 }
 0xf90   :  { %v9353_v20 = vld [vmem:[#allocation3 + $0x50] ss:$8 sps:$4 sm:$0xff]   ;;  %v3461_v22 = vpop.permute.xlu1 %3460  ;;  %v3455_v26 = vpop.permute.xlu0 %3454 }
 0xf91   :  { %3477 = vst.msk [vmem:[#allocation3 + $0xb8] sm:$0xf] %vm3028_vm1, %v3461_v22  ;;  %3474 = vst.msk [vmem:[#allocation3 + $0xa0] sm:$0xf] %vm3028_vm1, %v3455_v26  ;;  %3607 = vmatpush1.bf16.msra.mxu0 %v9353_v20 }
 0xf92   :  { %3608 = vmatprep.subr.bf16.mxu0 %v9610_v1 }
 0xf94   :  { %v9354_v35 = vld [vmem:[#allocation3 + $0x40] ss:$8 sps:$4 sm:$0xff]   ;;  %v3457_v23 = vpop.permute.xlu1 %3456  ;;  %v3451_v37 = vpop.permute.xlu0 %3450 }
 0xf95   :  { %3475 = vst.msk [vmem:[#allocation3 + $0xa8] sm:$0xf] %vm3028_vm1, %v3457_v23  ;;  %3472 = vst.msk [vmem:[#allocation3 + $0x90] sm:$0xf] %vm3028_vm1, %v3451_v37  ;;  %3609 = vmatpush1.bf16.msra.mxu0 %v9354_v35 }
 0xf96   :  { %3610 = vmatprep.subr.bf16.mxu0 %v9610_v1 }
 0xf98   :  { %v3453_v0 = vpop.permute.xlu1 %3452  ;;  %v3447_v18 = vpop.permute.xlu0 %3446  ;;  %v9359_v31 = vld [vmem:[#allocation3 + $0xb0] ss:$8 sps:$4 sm:$0xff]  }
 0xf99   :  { %3473 = vst.msk [vmem:[#allocation3 + $0x98] sm:$0xf] %vm3028_vm1, %v3453_v0  ;;  %3470 = vst.msk [vmem:[#allocation3 + $0x80] sm:$0xf] %vm3028_vm1, %v3447_v18  ;;  %3611 = vmatpush1.bf16.msra.mxu0 %v9355_v10 }
 0xf9a   :  { %3612 = vmatprep.subr.bf16.mxu0 %v9610_v1 }
 0xf9c   :  { %v3449_v48 = vpop.permute.xlu1 %3448  ;;  %v9360_v43 = vld [vmem:[#allocation3 + $0xa0] ss:$8 sps:$4 sm:$0xff]  }
 0xf9d   :  { %3471 = vst.msk [vmem:[#allocation3 + $0x88] sm:$0xf] %vm3028_vm1, %v3449_v48  ;;  %3613 = vmatpush1.bf16.msra.mxu0 %v9356_v45 }
 0xf9e   :  { %3614 = vmatprep.subr.bf16.mxu0 %v9610_v1 }
 0xfa0   :  { %v9361_v63 = vld [vmem:[#allocation3 + $0x90] ss:$8 sps:$4 sm:$0xff]  }
 0xfa1   :  { %3615 = vmatpush1.bf16.msra.mxu0 %v9357_v46 }
 0xfa2   :  { %3616 = vmatprep.subr.bf16.mxu0 %v9610_v1 }
 0xfa4   :  { %v9362_v34 = vld [vmem:[#allocation3 + $0x80] ss:$8 sps:$4 sm:$0xff]  }
 0xfa5   :  { %3617 = vmatpush1.bf16.msra.mxu0 %v9358_v52  ;;  %v3658_v19 = vpop.permute.xlu0 %3657 }
 0xfa6   :  { %3626 = vmatprep.subr.bf16.mxu0 %v9610_v1 }
 0xfa9   :  { %3627 = vmatpush2.bf16.msra.mxu0 %v9359_v31  ;;  %v3663_v57 = vpop.permute.xlu1 %3662  ;;  %v3668_v13 = vpop.permute.xlu0 %3667 }
 0xfaa   :  { %3628 = vmatprep.subr.bf16.mxu0 %v9610_v1 }
 0xfad   :  { %3629 = vmatpush2.bf16.msra.mxu0 %v9360_v43  ;;  %v3673_v16 = vpop.permute.xlu1 %3672  ;;  %v3686_v60 = vpop.permute.xlu0 %3685 }
 0xfae   :  { %3630 = vmatprep.subr.bf16.mxu0 %v9610_v1 }
 0xfb1   :  { %3631 = vmatpush2.bf16.msra.mxu0 %v9361_v63  ;;  %v3691_v6 = vpop.permute.xlu1 %3690  ;;  %v3696_v23 = vpop.permute.xlu0 %3695 }
 0xfb2   :  { %3632 = vmatprep.subr.bf16.mxu0 %v9610_v1 }
 0xfb5   :  { %3633 = vmatpush2.bf16.msra.mxu0 %v9362_v34  ;;  %v3701_v31 = vpop.permute.xlu1 %3700 }
 0xfb6   :  { %9099 = vmatprep.subr.msk.bf16.mxu0 %vm261_vm6, %v9369_v28 }
 0xfb8   :  { %3635 = vmatmul.mubr.bf16.vlgmr.msra.gmra.mxu0 %v9365_v5 }
 0xfb9   :  { %8282 = vmatprep.mubr.msk.bf16.mxu0 %vm1574_vm13, %v9366_v38  ;;  %8874 = vmatpush3.bf16.msra.mxu0 %v11034_v41 }
 0xfba   :  { %8875 = vmatprep.subr.bf16.mxu0 %v11030_v40 }
 0xfbd   :  { %8876 = vmatpush3.bf16.msra.mxu0 %v11030_v40 }
 0xfbe   :  { %8877 = vmatprep.subr.bf16.mxu0 %v11041_v32 }
 0xfc0   :  { %3643 = vmatmul.mubr.bf16.gmra.mxu0 %v9368_v9 }
 0xfc1   :  { %8878 = vmatpush3.bf16.msra.mxu0 %v11041_v32 }
 0xfc2   :  { %8879 = vmatprep.subr.bf16.mxu0 %v11048_v33 }
 0xfc5   :  { %8880 = vmatpush3.bf16.msra.mxu0 %v11048_v33 }
 0xfc6   :  { %8881 = vmatprep.subr.bf16.mxu0 %v11055_v42 }
 0xfc9   :  { %8882 = vmatpush3.bf16.msra.mxu0 %v11055_v42 }
 0xfca   :  { %9101 = vmatprep.subr.msk.bf16.mxu0 %vm261_vm6, %v9369_v28 }
0x1078   :  { %v3636_v58 = vpop.f32.mrf.mxu0 }
0x1079   :  { %v3637_v2 = vadd.f32 %v3636_v58, %v2999_v25  ;;  %v4161_v58 = vld [vmem:[%s12235_s12 + $0x38] sm:$0xff] }
0x107a   :  { %v3638_v59 = vpop.f32.mrf.mxu0 }
0x107b   :  { %v3675_v44 = vadd.f32 %v3658_v19, %v3637_v2  ;;  %v4154_v2 = vld [vmem:[%s12235_s12] sm:$0xff]  ;;  %v4155_v59 = vld [vmem:[%s12235_s12 + $0x8] sm:$0xff] }
0x107c   :  { %v3639_v50 = vpop.f32.mrf.mxu0 }
0x107d   :  { %v3703_v51 = vadd.f32 %v3686_v60, %v3675_v44  ;;  %v3640_v61 = vadd.f32 %v3639_v50, %v3002_v54  ;;  %v4156_v54 = vld [vmem:[%s12235_s12 + $0x10] sm:$0xff] }
0x107e   :  { %v3641_v62 = vpop.f32.mrf.mxu0 }
0x107f   :  { %v3707_v4 = vmul.f32 %v10901_v7, %v3703_v51  ;;  %v3676_v53 = vadd.f32 %v3663_v57, %v3640_v61 }
0x1080   :  { %v3644_v15 = vpop.f32.mrf.mxu0 }
0x1081   :  { %v11066_v55 = vmax.f32 %v3707_v4, 0.0  ;;  %v3704_v8 = vadd.f32 %v3691_v6, %v3676_v53  ;;  %v3645_v3 = vadd.f32 %v8851_v21, %v3644_v15 }
0x1082   :  { %v3646_v20 = vpop.f32.mrf.mxu0 }
0x1083   :  { %v8622_v22 = vpack.c.bf16 %v11066_v55, %v11066_v55  ;;  %v3708_v26 = vmul.f32 %v10901_v7, %v3704_v8  ;;  %v3677_v35 = vadd.f32 %v3668_v13, %v3645_v3  ;;  %v4158_v13 = vld [vmem:[%s12235_s12 + $0x20] sm:$0xff] }
0x1084   :  { %v3647_v37 = vpop.f32.mrf.mxu0 }
0x1085   :  { %3777 = vst.msk [vmem:[#allocation2] sm:$0xf] %vm3028_vm1, %v8622_v22  ;;  %v11072_v10 = vmax.f32 %v3708_v26, 0.0  ;;  %v3705_v0 = vadd.f32 %v3696_v23, %v3677_v35  ;;  %v3648_v18 = vadd.f32 %v8852_v56, %v3647_v37  ;;  %v4160_v56 = vld [vmem:[%s12235_s12 + $0x30] sm:$0xff] }
0x1086   :  { %3782 = vst.msk [vmem:[#allocation2] sm:$0xf] %vm3781_vm5, %v9610_v1  ;;  %v3649_v45 = vpop.f32.mrf.mxu0 }
0x1087   :  { %v8623_v48 = vpack.c.bf16 %v11072_v10, %v11072_v10  ;;  %v3709_v46 = vmul.f32 %v10901_v7, %v3705_v0  ;;  %v3678_v52 = vadd.f32 %v3673_v16, %v3648_v18  ;;  %v4159_v16 = vld [vmem:[%s12235_s12 + $0x28] sm:$0xff] }
0x1089   :  { %3778 = vst.msk [vmem:[#allocation2 + $0x8] sm:$0xf] %vm3028_vm1, %v8623_v48  ;;  %v11080_v43 = vmax.f32 %v3709_v46, 0.0  ;;  %v3706_v63 = vadd.f32 %v3701_v31, %v3678_v52 }
0x108a   :  { %3783 = vst.msk [vmem:[#allocation2 + $0x8] sm:$0xf] %vm3781_vm5, %v9610_v1 }
0x108b   :  { %v8624_v34 = vpack.c.bf16 %v11080_v43, %v11080_v43  ;;  %v3710_v5 = vmul.f32 %v10901_v7, %v3706_v63 }
0x108d   :  { %3779 = vst.msk [vmem:[#allocation2 + $0x10] sm:$0xf] %vm3028_vm1, %v8624_v34  ;;  %v11088_v38 = vmax.f32 %v3710_v5, 0.0  ;;  %v3786_v28 = vld [vmem:[#allocation2] sm:$0xf] }
0x108e   :  { %3784 = vst.msk [vmem:[#allocation2 + $0x10] sm:$0xf] %vm3781_vm5, %v9610_v1 }
0x108f   :  { %v8625_v9 = vpack.c.bf16 %v11088_v38, %v11088_v38 }
0x1091   :  { %v3787_v21 = vld [vmem:[#allocation2 + $0x8] sm:$0xf]  ;;  %3780 = vst.msk [vmem:[#allocation2 + $0x18] sm:$0xf] %vm3028_vm1, %v8625_v9  ;;  %vm4843_vm1 = vcmask 306464  }
0x1092   :  { %3785 = vst.msk [vmem:[#allocation2 + $0x18] sm:$0xf] %vm3781_vm5, %v9610_v1  ;;  %v8287_v7 = vcombine.low %v3786_v28, %v3787_v21  ;;  %v9376_v9 = vld [vmem:[%s12236_s20 + $0x8] sm:$0xff]   ;;  %v9382_v28 = vld [vmem:[%s12237_s27] sm:$0xff]   ;;  %vm5455_vm5 = vcmask 166920  }
0x1094   :  { %3949 = vrot.lane.b32.xlu0 %v8287_v7, %s9611_s0  ;;  %8883 = vmatprep.mubr.msk.bf16.mxu0 %vm3827_vm7, %v8287_v7 }
0x1095   :  { %v3788_v25 = vld [vmem:[#allocation2 + $0x10] sm:$0xf] }
0x1098   :  { %3888 = vrot.lane.b32.xlu0 %v8287_v7, %s9612_s5 }
0x1099   :  { %v3789_v19 = vld [vmem:[#allocation2 + $0x18] sm:$0xf] }
0x109a   :  { %v8288_v57 = vcombine.low %v3788_v25, %v3789_v19 }
0x109c   :  { %4194 = vperm.xlu0 %9185, %v4160_v56   ;;  %3951 = vrot.lane.b32.xlu1 %v8288_v57, %s9611_s0 }
0x109d   :  { %8884 = vmatmul.mubr.msk.bf16.vlgmr.msra.gmra.mxu0 %vm3827_vm7, %v8288_v57 }
0x109e   :  { %8902 = vmatpush3.bf16.msra.mxu0 %v11034_v41  ;;  %v4157_v41 = vld [vmem:[%s12235_s12 + $0x18] sm:$0xff]  ;;  %s12259_s12 = sld [smem:[#allocation45_spill]] }
0x109f   :  { %8903 = vmatprep.subr.bf16.mxu0 %v11030_v40 }
0x10a0   :  { %4184 = vperm.xlu0 %9185, %v4158_v13   ;;  %3890 = vrot.lane.b32.xlu1 %v8288_v57, %s9612_s5  ;;  %v9383_v57 = vld [vmem:[%s12237_s27 + $0x8] sm:$0xff]   ;;  %v9384_v13 = vld [vmem:[%s12237_s27 + $0x10] sm:$0xff]  }
0x10a2   :  { %8904 = vmatpush3.bf16.msra.mxu0 %v11030_v40 }
0x10a3   :  { %8905 = vmatprep.subr.bf16.mxu0 %v11041_v32 }
0x10a4   :  { %4174 = vperm.xlu0 %9185, %v4156_v54   ;;  %4199 = vperm.xlu1 %9184, %v4161_v58   ;;  %v9385_v54 = vld [vmem:[%s12237_s27 + $0x18] sm:$0xff]   ;;  %s12261_s27 = sld [smem:[#allocation14_spill]] }
0x10a6   :  { %8906 = vmatpush3.bf16.msra.mxu0 %v11041_v32 }
0x10a7   :  { %8907 = vmatprep.subr.bf16.mxu0 %v11048_v33 }
0x10a8   :  { %4164 = vperm.xlu0 %9185, %v4154_v2   ;;  %4189 = vperm.xlu1 %9184, %v4159_v16  }
0x10aa   :  { %8908 = vmatpush3.bf16.msra.mxu0 %v11048_v33 }
0x10ab   :  { %8909 = vmatprep.subr.bf16.mxu0 %v11055_v42 }
0x10ac   :  { %4179 = vperm.xlu1 %9184, %v4157_v41  }
0x10ae   :  { %8910 = vmatpush3.bf16.msra.mxu0 %v11055_v42  ;;  %v9374_v42 = vld [vmem:[%s12236_s20] sm:$0xff]   ;;  %s12260_s20 = sld [smem:[#allocation44_spill]] }
0x10af   :  { %4667 = vmatprep.subr.bf16.mxu0 %v9610_v1 }
0x10b0   :  { %4169 = vperm.xlu1 %9184, %v4155_v59  }
0x1106   :  { %v3950_v40 = vpop.permute.xlu0 %3949 }
0x1107   :  { %8911 = vmatprep.mubr.msk.bf16.mxu0 %vm3827_vm7, %v3950_v40 }
0x110a   :  { %v3889_v32 = vpop.permute.xlu0 %3888 }
0x110b   :  { %8897 = vmatprep.mubr.msk.bf16.mxu1 %vm3827_vm7, %v3889_v32 }
0x110e   :  { %v3952_v44 = vpop.permute.xlu1 %3951 }
0x110f   :  { %8912 = vmatmul.mubr.msk.bf16.vlgmr.msra.gmra.mxu0 %vm3827_vm7, %v3952_v44 }
0x1112   :  { %v3891_v33 = vpop.permute.xlu1 %3890 }
0x1113   :  { %8898 = vmatmul.mubr.msk.bf16.vlgmr.msra.gmra.mxu1 %vm3827_vm7, %v3891_v33  ;;  %vm5472_vm7 = vcmask 175272  }
0x1114   :  { %8919 = vmatprep.mubr.msk.bf16.mxu1 %vm2958_vm3, %v9374_v42 }
0x1117   :  { %v4195_v41 = vpop.permute.xlu0 %4194 }
0x111b   :  { %v4185_v44 = vpop.permute.xlu0 %4184 }
0x111f   :  { %v4200_v40 = vpop.permute.xlu1 %4199  ;;  %v4175_v42 = vpop.permute.xlu0 %4174 }
0x115d   :  { %v8885_v60 = vpop.f32.mrf.mxu0 }
0x115e   :  { %v8628_v50 = vpack.c.bf16 %v8885_v60, %v8885_v60 }
0x115f   :  { %v3871_v51 = vpop.f32.mrf.mxu0 }
0x1160   :  { %4096 = vst.msk [vmem:[#allocation3 + $0x10] sm:$0xf] %vm4093_vm8, %v8628_v50  ;;  %v8626_v61 = vpack.c.bf16 %v3871_v51, %v3871_v51  ;;  %v4190_v50 = vpop.permute.xlu1 %4189 }
0x1161   :  { %v8886_v62 = vpop.f32.mrf.mxu0 }
0x1162   :  { %4094 = vst.msk [vmem:[#allocation3] sm:$0xf] %vm4093_vm8, %v8626_v61  ;;  %v8629_v4 = vpack.c.bf16 %v8886_v62, %v8886_v62 }
0x1163   :  { %v3874_v53 = vpop.f32.mrf.mxu0 }
0x1164   :  { %4097 = vst.msk [vmem:[#allocation3 + $0x18] sm:$0xf] %vm4093_vm8, %v8629_v4  ;;  %v8627_v6 = vpack.c.bf16 %v3874_v53, %v3874_v53  ;;  %v11158_v4 = vld [vmem:[%s12238_s4] ss:$0 sm:$0xff]  ;;  %s12262_s4 = sld [smem:[#allocation46_spill]] }
0x1166   :  { %4095 = vst.msk [vmem:[#allocation3 + $0x8] sm:$0xf] %vm4093_vm8, %v8627_v6 }
0x116b   :  { %v9380_v19 = vld [vmem:[#allocation3 + $0x10] ss:$8 sps:$4 sm:$0xff]  }
0x116d   :  { %v9381_v56 = vld [vmem:[#allocation3] ss:$8 sps:$4 sm:$0xff]  }
0x11cf   :  { %v8913_v15 = vpop.f32.mrf.mxu0 }
0x11d0   :  { %v8636_v8 = vpack.c.bf16 %v8913_v15, %v8913_v15 }
0x11d1   :  { %v3993_v3 = vpop.f32.mrf.mxu0 }
0x11d2   :  { %4132 = vst.msk [vmem:[#allocation3 + $0x50] sm:$0xf] %vm4093_vm8, %v8636_v8  ;;  %v8634_v20 = vpack.c.bf16 %v3993_v3, %v3993_v3  ;;  %v4180_v3 = vpop.permute.xlu1 %4179 }
0x11d3   :  { %v8899_v22 = vpop.f32.mrf.mxu1  ;;  %v8914_v26 = vpop.f32.mrf.mxu0 }
0x11d4   :  { %v8632_v35 = vpack.c.bf16 %v8899_v22, %v8899_v22  ;;  %4130 = vst.msk [vmem:[#allocation3 + $0x40] sm:$0xf] %vm4093_vm8, %v8634_v20  ;;  %v8637_v23 = vpack.c.bf16 %v8914_v26, %v8914_v26 }
0x11d5   :  { %v3932_v37 = vpop.f32.mrf.mxu1  ;;  %v3996_v0 = vpop.f32.mrf.mxu0 }
0x11d6   :  { %4114 = vst.msk [vmem:[#allocation3 + $0x30] sm:$0xf] %vm4093_vm8, %v8632_v35  ;;  %v8630_v18 = vpack.c.bf16 %v3932_v37, %v3932_v37  ;;  %4133 = vst.msk [vmem:[#allocation3 + $0x58] sm:$0xf] %vm4093_vm8, %v8637_v23  ;;  %v8635_v45 = vpack.c.bf16 %v3996_v0, %v3996_v0 }
0x11d7   :  { %v8900_v48 = vpop.f32.mrf.mxu1 }
0x11d8   :  { %4112 = vst.msk [vmem:[#allocation3 + $0x20] sm:$0xf] %vm4093_vm8, %v8630_v18  ;;  %v3948_v46 = vpack.c.bf16 %v8900_v48, %v8899_v22  ;;  %v8633_v52 = vpack.c.bf16 %v8900_v48, %v8900_v48  ;;  %4131 = vst.msk [vmem:[#allocation3 + $0x48] sm:$0xf] %vm4093_vm8, %v8635_v45  ;;  %v4165_v22 = vpop.permute.xlu0 %4164 }
0x11d9   :  { %v3935_v31 = vpop.f32.mrf.mxu1 }
0x11da   :  { %4115 = vst.msk [vmem:[#allocation3 + $0x38] sm:$0xf] %vm4093_vm8, %v8633_v52  ;;  %8915 = vmatprep.subr.bf16.mxu1 %v3948_v46  ;;  %v3947_v63 = vpack.c.bf16 %v3935_v31, %v3932_v37  ;;  %v8631_v34 = vpack.c.bf16 %v3935_v31, %v3935_v31 }
0x11db   :  { %8916 = vmatpush3.bf16.msra.mxu1 %v3948_v46 }
0x11dc   :  { %4113 = vst.msk [vmem:[#allocation3 + $0x28] sm:$0xf] %vm4093_vm8, %v8631_v34  ;;  %8917 = vmatprep.subr.bf16.mxu1 %v3947_v63 }
0x11dd   :  { %v9375_v5 = vld [vmem:[#allocation3 + $0x50] ss:$8 sps:$4 sm:$0xff]  }
0x11df   :  { %8918 = vmatpush3.bf16.msra.mxu1 %v3947_v63  ;;  %v9377_v21 = vld [vmem:[#allocation3 + $0x40] ss:$8 sps:$4 sm:$0xff]  }
0x11e0   :  { %8923 = vmatprep.subr.bf16.mxu1 %v9375_v5 }
0x11e1   :  { %v9378_v7 = vld [vmem:[#allocation3 + $0x30] ss:$8 sps:$4 sm:$0xff]  }
0x11e2   :  { %8920 = vmatmul.mubr.msk.bf16.vlgmr.msra.gmra.mxu1 %vm2958_vm3, %v9376_v9 }
0x11e3   :  { %8924 = vmatpush3.bf16.msra.mxu1 %v9375_v5  ;;  %8935 = vmatprep.mubr.msk.bf16.mxu1 %vm671_vm11, %v9382_v28  ;;  %v9379_v25 = vld [vmem:[#allocation3 + $0x20] ss:$8 sps:$4 sm:$0xff]   ;;  %v4170_v5 = vpop.permute.xlu1 %4169 }
0x11e4   :  { %8925 = vmatprep.subr.bf16.mxu1 %v9377_v21 }
0x11e7   :  { %8926 = vmatpush3.bf16.msra.mxu1 %v9377_v21 }
0x11e8   :  { %8927 = vmatprep.subr.bf16.mxu1 %v9378_v7 }
0x11eb   :  { %8928 = vmatpush3.bf16.msra.mxu1 %v9378_v7 }
0x11ec   :  { %8929 = vmatprep.subr.bf16.mxu1 %v9379_v25 }
0x11ef   :  { %8930 = vmatpush3.bf16.msra.mxu1 %v9379_v25 }
0x11f0   :  { %8931 = vmatprep.subr.bf16.mxu1 %v9380_v19 }
0x11f3   :  { %8932 = vmatpush3.bf16.msra.mxu1 %v9380_v19 }
0x11f4   :  { %8933 = vmatprep.subr.bf16.mxu1 %v9381_v56 }
0x11f7   :  { %8934 = vmatpush3.bf16.msra.mxu1 %v9381_v56 }
0x11fa   :  { %8936 = vmatmul.mubr.msk.bf16.vlgmr.msra.gmra.mxu1 %vm671_vm11, %v9383_v57 }
0x11fb   :  { %8939 = vmatprep.mubr.msk.bf16.mxu1 %vm671_vm11, %v9384_v13 }
0x1202   :  { %8940 = vmatmul.mubr.msk.bf16.gmra.mxu1 %vm671_vm11, %v9385_v54 }
0x12a2   :  { %v11149_v58 = vpop.f32.mrf.mxu1 }
0x12a4   :  { %v11151_v2 = vpop.f32.mrf.mxu1 }
0x12a6   :  { %v11153_v16 = vpop.f32.mrf.mxu1 }
0x12a8   :  { %v11155_v59 = vpop.f32.mrf.mxu1 }
0x12ba   :  { %v8937_v32 = vpop.f32.mrf.mxu1 }
0x12bb   :  { %v4313_v53 = vadd.f32 %v8937_v32, %v4175_v42 }
0x12bc   :  { %v4304_v33 = vpop.f32.mrf.mxu1 }
0x12bd   :  { %v4343_v37 = vmul.f32 %v11158_v4, %v4313_v53  ;;  %v4305_v0 = vadd.f32 %v4304_v33, %v4165_v22 }
0x12be   :  { %v8938_v60 = vpop.f32.mrf.mxu1 }
0x12bf   :  { %v4316_v18 = vadd.f32 %v8938_v60, %v4180_v3  ;;  %v4351_v9 = vmax.f32 %v4343_v37, 0.0  ;;  %v4341_v28 = vmul.f32 %v11158_v4, %v4305_v0 }
0x12c0   :  { %v4307_v51 = vpop.f32.mrf.mxu1 }
0x12c1   :  { %v4344_v21 = vmul.f32 %v11158_v4, %v4316_v18  ;;  %v4308_v7 = vadd.f32 %v4307_v51, %v4170_v5  ;;  %v8640_v57 = vpack.c.bf16 %v4351_v9, %v4351_v9  ;;  %v4349_v13 = vmax.f32 %v4341_v28, 0.0 }
0x12c2   :  { %v8941_v61 = vpop.f32.mrf.mxu1 }
0x12c3   :  { %v4329_v62 = vadd.f32 %v8941_v61, %v4195_v41  ;;  %v4352_v54 = vmax.f32 %v4344_v21, 0.0  ;;  %v4342_v41 = vmul.f32 %v11158_v4, %v4308_v7  ;;  %v8638_v32 = vpack.c.bf16 %v4349_v13, %v4349_v13  ;;  %v4718_v13 = vld [vmem:[%s12239_s23 + $0x10] sm:$0xff] }
0x12c4   :  { %v4320_v6 = vpop.f32.mrf.mxu1 }
0x12c5   :  { %v4347_v15 = vmul.f32 %v11158_v4, %v4329_v62  ;;  %v4321_v8 = vadd.f32 %v4320_v6, %v4185_v44  ;;  %v8641_v44 = vpack.c.bf16 %v4352_v54, %v4352_v54  ;;  %v4350_v33 = vmax.f32 %v4342_v41, 0.0  ;;  %v4719_v54 = vld [vmem:[%s12239_s23 + $0x18] sm:$0xff]  ;;  %v4744_v41 = vld [vmem:[%s12240_s26] sm:$0xff] }
0x12c6   :  { %v8942_v20 = vpop.f32.mrf.mxu1 }
0x12c7   :  { %v4355_v26 = vmax.f32 %v4347_v15, 0.0  ;;  %v4345_v35 = vmul.f32 %v11158_v4, %v4321_v8  ;;  %v4332_v23 = vadd.f32 %v8942_v20, %v4200_v40  ;;  %v8639_v60 = vpack.c.bf16 %v4350_v33, %v4350_v33  ;;  %v4747_v33 = vld [vmem:[%s12240_s26 + $0x18] sm:$0xff] }
0x12c8   :  { %v4323_v45 = vpop.f32.mrf.mxu1 }
0x12c9   :  { %v8644_v48 = vpack.c.bf16 %v4355_v26, %v4355_v26  ;;  %v4353_v46 = vmax.f32 %v4345_v35, 0.0  ;;  %v4348_v52 = vmul.f32 %v11158_v4, %v4332_v23  ;;  %v4324_v31 = vadd.f32 %v4323_v45, %v4190_v50 }
0x12cb   :  { %v4356_v63 = vmax.f32 %v4348_v52, 0.0  ;;  %v4346_v34 = vmul.f32 %v11158_v4, %v4324_v31  ;;  %4393 = vrot.lane.b32.xlu0 %v8644_v48, %s9609_s22  ;;  %v8642_v25 = vpack.c.bf16 %v4353_v46, %v4353_v46 }
0x12cd   :  { %v8645_v19 = vpack.c.bf16 %v4356_v63, %v4356_v63  ;;  %v4354_v56 = vmax.f32 %v4346_v34, 0.0 }
0x12cf   :  { %4395 = vrot.lane.b32.xlu1 %v8645_v19, %s9609_s22  ;;  %4389 = vrot.lane.b32.xlu0 %v8642_v25, %s9609_s22  ;;  %v8643_v40 = vpack.c.bf16 %v4354_v56, %v4354_v56  ;;  %v4716_v56 = vld [vmem:[%s12239_s23] sm:$0xff] }
0x12d3   :  { %4391 = vrot.lane.b32.xlu1 %v8643_v40, %s9609_s22  ;;  %4385 = vrot.lane.b32.xlu0 %v8640_v57, %s9609_s22  ;;  %v4717_v57 = vld [vmem:[%s12239_s23 + $0x8] sm:$0xff]  ;;  %s12264_s23 = sld [smem:[#allocation47_spill]] }
0x12d4   :  { %v4745_v40 = vld [vmem:[%s12240_s26 + $0x8] sm:$0xff] }
0x12d7   :  { %4387 = vrot.lane.b32.xlu1 %v8641_v44, %s9609_s22  ;;  %4381 = vrot.lane.b32.xlu0 %v8638_v32, %s9609_s22  ;;  %v4746_v32 = vld [vmem:[%s12240_s26 + $0x10] sm:$0xff]  ;;  %v9398_v44 = vld [vmem:[%s12241_s28 + $0x4] ss:$8 sps:$4 sm:$0xff]   ;;  %s12265_s26 = sld [smem:[#allocation48_spill]] }
0x12d8   :  { %8355 = vmatprep.mubr.msk.bf16.mxu0 %vm1574_vm13, %v9398_v44 }
0x12db   :  { %4383 = vrot.lane.b32.xlu1 %v8639_v60, %s9609_s22 }
0x133d   :  { %v4394_v50 = vpop.permute.xlu0 %4393 }
0x133e   :  { %4412 = vst.msk [vmem:[#allocation2 + $0x30] sm:$0xf] %vm4405_vm10, %v4394_v50 }
0x133f   :  { %4420 = vst.msk [vmem:[#allocation2 + $0x30] sm:$0xf] %vm476_vm4, %v9610_v1 }
0x1340   :  { %4429 = vst.msk [vmem:[#allocation2 + $0x30] sm:$0xf] %vm4422_vm2, %v9610_v1 }
0x1341   :  { %v4396_v51 = vpop.permute.xlu1 %4395  ;;  %v4390_v42 = vpop.permute.xlu0 %4389 }
0x1342   :  { %4413 = vst.msk [vmem:[#allocation2 + $0x38] sm:$0xf] %vm4405_vm10, %v4396_v51  ;;  %4410 = vst.msk [vmem:[#allocation2 + $0x20] sm:$0xf] %vm4405_vm10, %v4390_v42 }
0x1343   :  { %4421 = vst.msk [vmem:[#allocation2 + $0x38] sm:$0xf] %vm476_vm4, %v9610_v1  ;;  %4418 = vst.msk [vmem:[#allocation2 + $0x20] sm:$0xf] %vm476_vm4, %v9610_v1 }
0x1344   :  { %4427 = vst.msk [vmem:[#allocation2 + $0x20] sm:$0xf] %vm4422_vm2, %v9610_v1  ;;  %4430 = vst.msk [vmem:[#allocation2 + $0x38] sm:$0xf] %vm4422_vm2, %v9610_v1 }
0x1345   :  { %v4392_v61 = vpop.permute.xlu1 %4391  ;;  %v4386_v62 = vpop.permute.xlu0 %4385 }
0x1346   :  { %4411 = vst.msk [vmem:[#allocation2 + $0x28] sm:$0xf] %vm4405_vm10, %v4392_v61  ;;  %4408 = vst.msk [vmem:[#allocation2 + $0x10] sm:$0xf] %vm4405_vm10, %v4386_v62 }
0x1347   :  { %4419 = vst.msk [vmem:[#allocation2 + $0x28] sm:$0xf] %vm476_vm4, %v9610_v1  ;;  %4416 = vst.msk [vmem:[#allocation2 + $0x10] sm:$0xf] %vm476_vm4, %v9610_v1  ;;  %v4453_v53 = vld [vmem:[#allocation2 + $0x30] sm:$0xf] }
0x1348   :  { %4425 = vst.msk [vmem:[#allocation2 + $0x10] sm:$0xf] %vm4422_vm2, %v9610_v1  ;;  %4428 = vst.msk [vmem:[#allocation2 + $0x28] sm:$0xf] %vm4422_vm2, %v9610_v1  ;;  %4475 = vrot.lane.b32.xlu0 %v4453_v53, %s9612_s5  ;;  %v4437_v22 = vld [vmem:[#allocation2 + $0x30] sm:$0xf] }
0x1349   :  { %v4388_v6 = vpop.permute.xlu1 %4387  ;;  %v4382_v15 = vpop.permute.xlu0 %4381  ;;  %4445 = vst.msk [vmem:[#allocation3 + $0x30] sm:$0xf] %vm4093_vm8, %v4437_v22  ;;  %v4501_v52 = vld [vmem:[#allocation2 + $0x30] sm:$0xf] }
0x134a   :  { %4409 = vst.msk [vmem:[#allocation2 + $0x18] sm:$0xf] %vm4405_vm10, %v4388_v6  ;;  %4406 = vst.msk [vmem:[#allocation2] sm:$0xf] %vm4405_vm10, %v4382_v15 }
0x134b   :  { %4417 = vst.msk [vmem:[#allocation2 + $0x18] sm:$0xf] %vm476_vm4, %v9610_v1  ;;  %4414 = vst.msk [vmem:[#allocation2] sm:$0xf] %vm476_vm4, %v9610_v1  ;;  %v4454_v8 = vld [vmem:[#allocation2 + $0x38] sm:$0xf] }
0x134c   :  { %v4451_v3 = vld [vmem:[#allocation2 + $0x20] sm:$0xf]  ;;  %4426 = vst.msk [vmem:[#allocation2 + $0x18] sm:$0xf] %vm4422_vm2, %v9610_v1  ;;  %4423 = vst.msk [vmem:[#allocation2] sm:$0xf] %vm4422_vm2, %v9610_v1  ;;  %4477 = vrot.lane.b32.xlu1 %v4454_v8, %s9612_s5 }
0x134d   :  { %4471 = vrot.lane.b32.xlu0 %v4451_v3, %s9612_s5  ;;  %v4384_v20 = vpop.permute.xlu1 %4383  ;;  %v4438_v26 = vld [vmem:[#allocation2 + $0x38] sm:$0xf]  ;;  %v4435_v0 = vld [vmem:[#allocation2 + $0x20] sm:$0xf] }
0x134e   :  { %4407 = vst.msk [vmem:[#allocation2 + $0x8] sm:$0xf] %vm4405_vm10, %v4384_v20  ;;  %v4502_v34 = vld [vmem:[#allocation2 + $0x38] sm:$0xf]  ;;  %v4499_v5 = vld [vmem:[#allocation2 + $0x20] sm:$0xf] }
0x134f   :  { %v4433_v35 = vld [vmem:[#allocation2 + $0x10] sm:$0xf]  ;;  %4415 = vst.msk [vmem:[#allocation2 + $0x8] sm:$0xf] %vm476_vm4, %v9610_v1  ;;  %v4452_v23 = vld [vmem:[#allocation2 + $0x28] sm:$0xf] }
0x1350   :  { %v4449_v37 = vld [vmem:[#allocation2 + $0x10] sm:$0xf]  ;;  %4446 = vst.msk [vmem:[#allocation3 + $0x38] sm:$0xf] %vm4093_vm8, %v4438_v26  ;;  %4441 = vst.msk [vmem:[#allocation3 + $0x10] sm:$0xf] %vm4093_vm8, %v4433_v35  ;;  %4473 = vrot.lane.b32.xlu1 %v4452_v23, %s9612_s5 }
0x1351   :  { %4424 = vst.msk [vmem:[#allocation2 + $0x8] sm:$0xf] %vm4422_vm2, %v9610_v1  ;;  %4467 = vrot.lane.b32.xlu0 %v4449_v37, %s9612_s5  ;;  %v4436_v18 = vld [vmem:[#allocation2 + $0x28] sm:$0xf]  ;;  %v4497_v21 = vld [vmem:[#allocation2 + $0x10] sm:$0xf] }
0x1352   :  { %4443 = vst.msk [vmem:[#allocation3 + $0x20] sm:$0xf] %vm4093_vm8, %v4435_v0  ;;  %4444 = vst.msk [vmem:[#allocation3 + $0x28] sm:$0xf] %vm4093_vm8, %v4436_v18  ;;  %v4500_v28 = vld [vmem:[#allocation2 + $0x28] sm:$0xf] }
0x1353   :  { %v4434_v45 = vld [vmem:[#allocation2 + $0x18] sm:$0xf]  ;;  %v4447_v46 = vld [vmem:[#allocation2] sm:$0xf]  ;;  %vm5919_vm10 = vcmask 162816   ;;  %vm6497_vm2 = vcmask 101384  }
0x1354   :  { %v4450_v48 = vld [vmem:[#allocation2 + $0x18] sm:$0xf]  ;;  %4442 = vst.msk [vmem:[#allocation3 + $0x18] sm:$0xf] %vm4093_vm8, %v4434_v45  ;;  %v4431_v9 = vld [vmem:[#allocation2] sm:$0xf] }
0x1355   :  { %4469 = vrot.lane.b32.xlu1 %v4450_v48, %s9612_s5  ;;  %4463 = vrot.lane.b32.xlu0 %v4447_v46, %s9612_s5  ;;  %4439 = vst.msk [vmem:[#allocation3] sm:$0xf] %vm4093_vm8, %v4431_v9  ;;  %v4498_v7 = vld [vmem:[#allocation2 + $0x18] sm:$0xf]  ;;  %v4495_v25 = vld [vmem:[#allocation2] sm:$0xf] }
0x1357   :  { %v9390_v0 = vld [vmem:[#allocation3 + $0x30] ss:$8 sps:$4 sm:$0xff]  }
0x1358   :  { %v4432_v31 = vld [vmem:[#allocation2 + $0x8] sm:$0xf] }
0x1359   :  { %v4448_v63 = vld [vmem:[#allocation2 + $0x8] sm:$0xf]  ;;  %4440 = vst.msk [vmem:[#allocation3 + $0x8] sm:$0xf] %vm4093_vm8, %v4432_v31  ;;  %4523 = vrot.lane.b32.xlu0 %v4501_v52, %s9611_s0 }
0x135a   :  { %4465 = vrot.lane.b32.xlu1 %v4448_v63, %s9612_s5  ;;  %v4496_v19 = vld [vmem:[#allocation2 + $0x8] sm:$0xf] }
0x135b   :  { %v9391_v48 = vld [vmem:[#allocation3 + $0x20] ss:$8 sps:$4 sm:$0xff]   ;;  %v9392_v52 = vld [vmem:[#allocation3 + $0x10] ss:$8 sps:$4 sm:$0xff]  }
0x135d   :  { %4519 = vrot.lane.b32.xlu0 %v4499_v5, %s9611_s0 }
0x135e   :  { %4525 = vrot.lane.b32.xlu1 %v4502_v34, %s9611_s0 }
0x1360   :  { %v9393_v31 = vld [vmem:[#allocation3] ss:$8 sps:$4 sm:$0xff]  }
0x1361   :  { %4515 = vrot.lane.b32.xlu0 %v4497_v21, %s9611_s0  ;;  %v9401_v21 = vld [vmem:[%s12241_s28 + $0x14] ss:$8 sps:$4 sm:$0xff]  }
0x1362   :  { %4521 = vrot.lane.b32.xlu1 %v4500_v28, %s9611_s0  ;;  %v9400_v28 = vld [vmem:[%s12241_s28] ss:$8 sps:$4 sm:$0xff]  }
0x1365   :  { %4511 = vrot.lane.b32.xlu0 %v4495_v25, %s9611_s0  ;;  %v11282_v25 = vld [vmem:[%s12242_s1 + $0x10] ss:$0 sps:$4 sm:$0x33]  }
0x1366   :  { %4517 = vrot.lane.b32.xlu1 %v4498_v7, %s9611_s0  ;;  %v9403_v7 = vld [vmem:[%s12241_s28 + $0x10] ss:$8 sps:$4 sm:$0xff]   ;;  %9102 = vmatprep.subr.msk.bf16.mxu1 %vm261_vm6, %v11282_v25  ;;  %s9614_s28 = smov 93  }
0x1369   :  { %4722 = vperm.xlu0 %9185, %v4716_v56   ;;  %v11291_v56 = vsel %vm261_vm6, %v11282_v25, 0 }
0x136a   :  { %4513 = vrot.lane.b32.xlu1 %v4496_v19, %s9611_s0  ;;  %v11285_v19 = vld [vmem:[%s12242_s1 + $0x8] sm:$0xff]   ;;  %8944 = vmatpush3.bf16.msra.mxu1 %v11291_v56 }
0x136b   :  { %8945 = vmatprep.subr.bf16.mxu1 %v11285_v19 }
0x136d   :  { %4732 = vperm.xlu0 %9185, %v4718_v13  }
0x136e   :  { %4727 = vperm.xlu1 %9184, %v4717_v57   ;;  %v11296_v57 = vld [vmem:[%s12242_s1] sm:$0xff]   ;;  %8946 = vmatpush3.bf16.msra.mxu1 %v11285_v19  ;;  %s9615_s1 = smov 109  }
0x136f   :  { %8947 = vmatprep.subr.bf16.mxu1 %v11296_v57 }
0x1371   :  { %4750 = vperm.xlu0 %9185, %v4744_v41  }
0x1372   :  { %4737 = vperm.xlu1 %9184, %v4719_v54   ;;  %8948 = vmatpush3.bf16.msra.mxu1 %v11296_v57 }
0x1373   :  { %9103 = vmatprep.subr.msk.bf16.mxu1 %vm261_vm6, %v11282_v25 }
0x1375   :  { %4760 = vperm.xlu0 %9185, %v4746_v32  }
0x1376   :  { %4755 = vperm.xlu1 %9184, %v4745_v40  }
0x137a   :  { %4765 = vperm.xlu1 %9184, %v4747_v33  }
0x13ba   :  { %v4476_v60 = vpop.permute.xlu0 %4475 }
0x13bb   :  { %4493 = vst.msk [vmem:[#allocation3 + $0x70] sm:$0xf] %vm4093_vm8, %v4476_v60 }
0x13be   :  { %v4478_v50 = vpop.permute.xlu1 %4477 }
0x13bf   :  { %v4472_v51 = vpop.permute.xlu0 %4471  ;;  %4494 = vst.msk [vmem:[#allocation3 + $0x78] sm:$0xf] %vm4093_vm8, %v4478_v50 }
0x13c0   :  { %4491 = vst.msk [vmem:[#allocation3 + $0x60] sm:$0xf] %vm4093_vm8, %v4472_v51 }
0x13c2   :  { %v4474_v42 = vpop.permute.xlu1 %4473 }
0x13c3   :  { %v4468_v61 = vpop.permute.xlu0 %4467  ;;  %4492 = vst.msk [vmem:[#allocation3 + $0x68] sm:$0xf] %vm4093_vm8, %v4474_v42 }
0x13c4   :  { %4489 = vst.msk [vmem:[#allocation3 + $0x50] sm:$0xf] %vm4093_vm8, %v4468_v61 }
0x13c6   :  { %v9386_v53 = vld [vmem:[#allocation3 + $0x70] ss:$8 sps:$4 sm:$0xff]  }
0x13c7   :  { %v4470_v62 = vpop.permute.xlu1 %4469  ;;  %v4464_v6 = vpop.permute.xlu0 %4463  ;;  %4668 = vmatpush1.bf16.msra.mxu0 %v9386_v53 }
0x13c8   :  { %4490 = vst.msk [vmem:[#allocation3 + $0x58] sm:$0xf] %vm4093_vm8, %v4470_v62  ;;  %4487 = vst.msk [vmem:[#allocation3 + $0x40] sm:$0xf] %vm4093_vm8, %v4464_v6  ;;  %4669 = vmatprep.subr.bf16.mxu0 %v9610_v1 }
0x13ca   :  { %v9387_v8 = vld [vmem:[#allocation3 + $0x60] ss:$8 sps:$4 sm:$0xff]  }
0x13cb   :  { %v4524_v3 = vpop.permute.xlu0 %4523  ;;  %4670 = vmatpush1.bf16.msra.mxu0 %v9387_v8 }
0x13cc   :  { %v4466_v15 = vpop.permute.xlu1 %4465  ;;  %4541 = vst.msk [vmem:[#allocation3 + $0xb0] sm:$0xf] %vm4093_vm8, %v4524_v3  ;;  %4671 = vmatprep.subr.bf16.mxu0 %v9610_v1 }
0x13cd   :  { %4488 = vst.msk [vmem:[#allocation3 + $0x48] sm:$0xf] %vm4093_vm8, %v4466_v15 }
0x13cf   :  { %v9388_v20 = vld [vmem:[#allocation3 + $0x50] ss:$8 sps:$4 sm:$0xff]   ;;  %v4520_v26 = vpop.permute.xlu0 %4519 }
0x13d0   :  { %v4526_v22 = vpop.permute.xlu1 %4525  ;;  %4539 = vst.msk [vmem:[#allocation3 + $0xa0] sm:$0xf] %vm4093_vm8, %v4520_v26  ;;  %4672 = vmatpush1.bf16.msra.mxu0 %v9388_v20 }
0x13d1   :  { %4542 = vst.msk [vmem:[#allocation3 + $0xb8] sm:$0xf] %vm4093_vm8, %v4526_v22  ;;  %4673 = vmatprep.subr.bf16.mxu0 %v9610_v1 }
0x13d3   :  { %v4516_v37 = vpop.permute.xlu0 %4515 }
0x13d4   :  { %v9389_v35 = vld [vmem:[#allocation3 + $0x40] ss:$8 sps:$4 sm:$0xff]   ;;  %v4522_v23 = vpop.permute.xlu1 %4521  ;;  %4537 = vst.msk [vmem:[#allocation3 + $0x90] sm:$0xf] %vm4093_vm8, %v4516_v37 }
0x13d5   :  { %4540 = vst.msk [vmem:[#allocation3 + $0xa8] sm:$0xf] %vm4093_vm8, %v4522_v23  ;;  %4674 = vmatpush1.bf16.msra.mxu0 %v9389_v35 }
0x13d6   :  { %4675 = vmatprep.subr.bf16.mxu0 %v9610_v1 }
0x13d7   :  { %v4512_v45 = vpop.permute.xlu0 %4511 }
0x13d8   :  { %v4518_v18 = vpop.permute.xlu1 %4517  ;;  %4535 = vst.msk [vmem:[#allocation3 + $0x80] sm:$0xf] %vm4093_vm8, %v4512_v45  ;;  %v9394_v63 = vld [vmem:[#allocation3 + $0xb0] ss:$8 sps:$4 sm:$0xff]  }
0x13d9   :  { %4538 = vst.msk [vmem:[#allocation3 + $0x98] sm:$0xf] %vm4093_vm8, %v4518_v18  ;;  %4676 = vmatpush1.bf16.msra.mxu0 %v9390_v0 }
0x13da   :  { %4677 = vmatprep.subr.bf16.mxu0 %v9610_v1 }
0x13dc   :  { %v4514_v46 = vpop.permute.xlu1 %4513  ;;  %v9395_v34 = vld [vmem:[#allocation3 + $0xa0] ss:$8 sps:$4 sm:$0xff]  }
0x13dd   :  { %4536 = vst.msk [vmem:[#allocation3 + $0x88] sm:$0xf] %vm4093_vm8, %v4514_v46  ;;  %4678 = vmatpush1.bf16.msra.mxu0 %v9391_v48 }
0x13de   :  { %4679 = vmatprep.subr.bf16.mxu0 %v9610_v1 }
0x13e0   :  { %v9396_v5 = vld [vmem:[#allocation3 + $0x90] ss:$8 sps:$4 sm:$0xff]  }
0x13e1   :  { %4680 = vmatpush1.bf16.msra.mxu0 %v9392_v52 }
0x13e2   :  { %4681 = vmatprep.subr.bf16.mxu0 %v9610_v1 }
0x13e4   :  { %v9397_v9 = vld [vmem:[#allocation3 + $0x80] ss:$8 sps:$4 sm:$0xff]   ;;  %v4723_v13 = vpop.permute.xlu0 %4722 }
0x13e5   :  { %4682 = vmatpush1.bf16.msra.mxu0 %v9393_v31 }
0x13e6   :  { %4691 = vmatprep.subr.bf16.mxu0 %v9610_v1 }
0x13e8   :  { %v4733_v41 = vpop.permute.xlu0 %4732 }
0x13e9   :  { %4692 = vmatpush2.bf16.msra.mxu0 %v9394_v63  ;;  %v4728_v54 = vpop.permute.xlu1 %4727 }
0x13ea   :  { %4693 = vmatprep.subr.bf16.mxu0 %v9610_v1 }
0x13ec   :  { %v4751_v50 = vpop.permute.xlu0 %4750 }
0x13ed   :  { %4694 = vmatpush2.bf16.msra.mxu0 %v9395_v34  ;;  %v4738_v44 = vpop.permute.xlu1 %4737 }
0x13ee   :  { %4695 = vmatprep.subr.bf16.mxu0 %v9610_v1 }
0x13f1   :  { %4696 = vmatpush2.bf16.msra.mxu0 %v9396_v5  ;;  %v4756_v15 = vpop.permute.xlu1 %4755 }
0x13f2   :  { %4697 = vmatprep.subr.bf16.mxu0 %v9610_v1 }
0x13f5   :  { %4698 = vmatpush2.bf16.msra.mxu0 %v9397_v9  ;;  %v4766_v31 = vpop.permute.xlu1 %4765 }
0x13f8   :  { %4700 = vmatmul.mubr.bf16.vlgmr.msra.gmra.mxu0 %v9400_v28 }
0x13f9   :  { %8356 = vmatprep.mubr.msk.bf16.mxu0 %vm1574_vm13, %v9401_v21 }
0x1400   :  { %4708 = vmatmul.mubr.bf16.gmra.mxu0 %v9403_v7 }
0x14b8   :  { %v4701_v40 = vpop.f32.mrf.mxu0 }
0x14b9   :  { %v4702_v32 = vadd.f32 %v4701_v40, %v11151_v2  ;;  %v5204_v40 = vld [vmem:[%s12243_s2] sm:$0xff] }
0x14ba   :  { %v4703_v33 = vpop.f32.mrf.mxu0 }
0x14bb   :  { %v4740_v60 = vadd.f32 %v4723_v13, %v4702_v32  ;;  %v5208_v13 = vld [vmem:[%s12243_s2 + $0x20] sm:$0xff]  ;;  %v5209_v32 = vld [vmem:[%s12243_s2 + $0x28] sm:$0xff] }
0x14bc   :  { %v4704_v51 = vpop.f32.mrf.mxu0  ;;  %v5205_v33 = vld [vmem:[%s12243_s2 + $0x8] sm:$0xff] }
0x14bd   :  { %v4768_v42 = vadd.f32 %v4751_v50, %v4740_v60  ;;  %v4705_v61 = vadd.f32 %v4704_v51, %v11155_v59  ;;  %v4761_v59 = vpop.permute.xlu0 %4760 }
0x14be   :  { %v4706_v62 = vpop.f32.mrf.mxu0 }
0x14bf   :  { %v4772_v53 = vmul.f32 %v11158_v4, %v4768_v42  ;;  %v4741_v6 = vadd.f32 %v4728_v54, %v4705_v61  ;;  %v5206_v54 = vld [vmem:[%s12243_s2 + $0x10] sm:$0xff] }
0x14c0   :  { %v4709_v8 = vpop.f32.mrf.mxu0 }
0x14c1   :  { %v11306_v3 = vmax.f32 %v4772_v53, 0.0  ;;  %v4769_v20 = vadd.f32 %v4756_v15, %v4741_v6  ;;  %v4710_v22 = vadd.f32 %v11149_v58, %v4709_v8 }
0x14c2   :  { %v4711_v2 = vpop.f32.mrf.mxu0 }
0x14c3   :  { %v8646_v26 = vpack.c.bf16 %v11306_v3, %v11306_v3  ;;  %v4773_v35 = vmul.f32 %v11158_v4, %v4769_v20  ;;  %v4742_v23 = vadd.f32 %v4733_v41, %v4710_v22  ;;  %v5211_v41 = vld [vmem:[%s12243_s2 + $0x38] sm:$0xff] }
0x14c4   :  { %v4712_v37 = vpop.f32.mrf.mxu0 }
0x14c5   :  { %4839 = vst.msk [vmem:[#allocation2] sm:$0xf] %vm4093_vm8, %v8646_v26  ;;  %v11313_v0 = vmax.f32 %v4773_v35, 0.0  ;;  %v4770_v18 = vadd.f32 %v4761_v59, %v4742_v23  ;;  %v4713_v45 = vadd.f32 %v11153_v16, %v4712_v37 }
0x14c6   :  { %v4714_v48 = vpop.f32.mrf.mxu0  ;;  %4844 = vst.msk [vmem:[#allocation2] sm:$0xf] %vm4843_vm1, %v9610_v1 }
0x14c7   :  { %v8647_v58 = vpack.c.bf16 %v11313_v0, %v11313_v0  ;;  %v4774_v46 = vmul.f32 %v11158_v4, %v4770_v18  ;;  %v4743_v52 = vadd.f32 %v4738_v44, %v4713_v45  ;;  %v5207_v44 = vld [vmem:[%s12243_s2 + $0x18] sm:$0xff] }
0x14c9   :  { %4840 = vst.msk [vmem:[#allocation2 + $0x8] sm:$0xf] %vm4093_vm8, %v8647_v58  ;;  %v11322_v63 = vmax.f32 %v4774_v46, 0.0  ;;  %v4771_v34 = vadd.f32 %v4766_v31, %v4743_v52 }
0x14ca   :  { %4845 = vst.msk [vmem:[#allocation2 + $0x8] sm:$0xf] %vm4843_vm1, %v9610_v1 }
0x14cb   :  { %v8648_v16 = vpack.c.bf16 %v11322_v63, %v11322_v63  ;;  %v4775_v5 = vmul.f32 %v11158_v4, %v4771_v34  ;;  %v5210_v4 = vld [vmem:[%s12243_s2 + $0x30] sm:$0xff]  ;;  %s9616_s2 = smov 117  }
0x14cd   :  { %4841 = vst.msk [vmem:[#allocation2 + $0x10] sm:$0xf] %vm4093_vm8, %v8648_v16  ;;  %v11330_v9 = vmax.f32 %v4775_v5, 0.0 }
0x14ce   :  { %4846 = vst.msk [vmem:[#allocation2 + $0x10] sm:$0xf] %vm4843_vm1, %v9610_v1 }
0x14cf   :  { %v8649_v28 = vpack.c.bf16 %v11330_v9, %v11330_v9 }
0x14d1   :  { %4842 = vst.msk [vmem:[#allocation2 + $0x18] sm:$0xf] %vm4093_vm8, %v8649_v28  ;;  %v9404_v21 = vld [vmem:[#allocation2] ss:$8 sps:$4 sm:$0xff]   ;;  %vm5891_vm8 = vcmask 175264  }
0x14d2   :  { %4847 = vst.msk [vmem:[#allocation2 + $0x18] sm:$0xf] %vm4843_vm1, %v9610_v1  ;;  %4938 = vrot.lane.b32.xlu0 %v9404_v21, %s9612_s5  ;;  %8949 = vmatprep.mubr.msk.bf16.mxu1 %vm4877_vm9, %v9404_v21  ;;  %vm6514_vm1 = vcmask 109672  }
0x14d6   :  { %4999 = vrot.lane.b32.xlu0 %v9404_v21, %s9611_s0 }
0x14d9   :  { %v9405_v7 = vld [vmem:[#allocation2 + $0x10] ss:$8 sps:$4 sm:$0xff]  }
0x14da   :  { %5244 = vperm.xlu0 %9185, %v5210_v4   ;;  %4940 = vrot.lane.b32.xlu1 %v9405_v7, %s9612_s5 }
0x14db   :  { %8950 = vmatmul.mubr.msk.bf16.vlgmr.msra.gmra.mxu1 %vm4877_vm9, %v9405_v7 }
0x14dc   :  { %8954 = vmatpush3.bf16.msra.mxu1 %v11291_v56 }
0x14dd   :  { %8955 = vmatprep.subr.bf16.mxu1 %v11285_v19 }
0x14de   :  { %5234 = vperm.xlu0 %9185, %v5208_v13   ;;  %5001 = vrot.lane.b32.xlu1 %v9405_v7, %s9611_s0 }
0x14e0   :  { %8956 = vmatpush3.bf16.msra.mxu1 %v11285_v19 }
0x14e1   :  { %8957 = vmatprep.subr.bf16.mxu1 %v11296_v57 }
0x14e2   :  { %5224 = vperm.xlu0 %9185, %v5206_v54   ;;  %5249 = vperm.xlu1 %9184, %v5211_v41   ;;  %v9416_v54 = vld [vmem:[%s12244_s7 + $0x8] sm:$0xff]   ;;  %v9417_v41 = vld [vmem:[%s12244_s7 + $0x10] sm:$0xff]  }
0x14e4   :  { %8958 = vmatpush3.bf16.msra.mxu1 %v11296_v57 }
0x14e5   :  { %9104 = vmatprep.subr.msk.bf16.mxu1 %vm261_vm6, %v11282_v25 }
0x14e6   :  { %5214 = vperm.xlu0 %9185, %v5204_v40   ;;  %5239 = vperm.xlu1 %9184, %v5209_v32   ;;  %v9418_v40 = vld [vmem:[%s12244_s7 + $0x18] sm:$0xff]  }
0x14ea   :  { %5229 = vperm.xlu1 %9184, %v5207_v44  }
0x14ee   :  { %5219 = vperm.xlu1 %9184, %v5205_v33  }
0x1544   :  { %v4939_v60 = vpop.permute.xlu0 %4938 }
0x1545   :  { %8959 = vmatprep.mubr.msk.bf16.mxu1 %vm4877_vm9, %v4939_v60 }
0x1548   :  { %v5000_v51 = vpop.permute.xlu0 %4999 }
0x154c   :  { %v4941_v50 = vpop.permute.xlu1 %4940 }
0x154d   :  { %8960 = vmatmul.mubr.msk.bf16.vlgmr.msra.gmra.mxu1 %vm4877_vm9, %v4941_v50 }
0x154e   :  { %8964 = vmatpush3.bf16.msra.mxu1 %v11291_v56  ;;  %8969 = vmatprep.mubr.msk.bf16.mxu1 %vm4877_vm9, %v5000_v51 }
0x154f   :  { %8965 = vmatprep.subr.bf16.mxu1 %v11285_v19 }
0x1550   :  { %v5002_v25 = vpop.permute.xlu1 %5001 }
0x1552   :  { %8966 = vmatpush3.bf16.msra.mxu1 %v11285_v19 }
0x1553   :  { %8967 = vmatprep.subr.bf16.mxu1 %v11296_v57 }
0x1555   :  { %v5245_v32 = vpop.permute.xlu0 %5244 }
0x1556   :  { %8968 = vmatpush3.bf16.msra.mxu1 %v11296_v57  ;;  %v9415_v57 = vld [vmem:[%s12244_s7] sm:$0xff]   ;;  %s9617_s7 = smov 121  }
0x1557   :  { %8993 = vmatprep.mubr.msk.bf16.mxu0 %vm671_vm11, %v9415_v57 }
0x1559   :  { %8970 = vmatmul.mubr.msk.bf16.vlgmr.msra.gmra.mxu1 %vm4877_vm9, %v5002_v25  ;;  %v5235_v60 = vpop.permute.xlu0 %5234  ;;  %vm6931_vm9 = vcmask 109664  }
0x155d   :  { %v5250_v44 = vpop.permute.xlu1 %5249 }
0x1561   :  { %v5240_v25 = vpop.permute.xlu1 %5239 }
0x159b   :  { %v8951_v42 = vpop.f32.mrf.mxu1 }
0x159c   :  { %v8652_v61 = vpack.c.bf16 %v8951_v42, %v8951_v42 }
0x159d   :  { %v4921_v62 = vpop.f32.mrf.mxu1 }
0x159e   :  { %5146 = vst.msk [vmem:[#allocation3 + $0x10] sm:$0xf] %vm5143_vm12, %v8652_v61  ;;  %v8650_v56 = vpack.c.bf16 %v4921_v62, %v4921_v62  ;;  %v5225_v61 = vpop.permute.xlu0 %5224 }
0x159f   :  { %v8952_v53 = vpop.f32.mrf.mxu1 }
0x15a0   :  { %5144 = vst.msk [vmem:[#allocation3] sm:$0xf] %vm5143_vm12, %v8650_v56  ;;  %v8653_v6 = vpack.c.bf16 %v8952_v53, %v8952_v53  ;;  %v11391_v53 = vld [vmem:[%s12245_s10] ss:$0 sm:$0xff] }
0x15a1   :  { %v4924_v19 = vpop.f32.mrf.mxu1 }
0x15a2   :  { %5147 = vst.msk [vmem:[#allocation3 + $0x18] sm:$0xf] %vm5143_vm12, %v8653_v6  ;;  %v8651_v15 = vpack.c.bf16 %v4924_v19, %v4924_v19 }
0x15a4   :  { %5145 = vst.msk [vmem:[#allocation3 + $0x8] sm:$0xf] %vm5143_vm12, %v8651_v15 }
0x15a9   :  { %v9413_v7 = vld [vmem:[#allocation3 + $0x10] ss:$8 sps:$4 sm:$0xff]  }
0x15ab   :  { %v9414_v13 = vld [vmem:[#allocation3] ss:$8 sps:$4 sm:$0xff]  }
0x160d   :  { %v8961_v8 = vpop.f32.mrf.mxu1 }
0x160e   :  { %v8656_v20 = vpack.c.bf16 %v8961_v8, %v8961_v8 }
0x160f   :  { %v4982_v22 = vpop.f32.mrf.mxu1 }
0x1610   :  { %5164 = vst.msk [vmem:[#allocation3 + $0x30] sm:$0xf] %vm5143_vm12, %v8656_v20  ;;  %v8654_v2 = vpack.c.bf16 %v4982_v22, %v4982_v22 }
0x1611   :  { %v8962_v26 = vpop.f32.mrf.mxu1 }
0x1612   :  { %5162 = vst.msk [vmem:[#allocation3 + $0x20] sm:$0xf] %vm5143_vm12, %v8654_v2  ;;  %v4998_v35 = vpack.c.bf16 %v8962_v26, %v8961_v8  ;;  %v8657_v23 = vpack.c.bf16 %v8962_v26, %v8962_v26  ;;  %v5230_v8 = vpop.permute.xlu1 %5229 }
0x1613   :  { %v4985_v59 = vpop.f32.mrf.mxu1 }
0x1614   :  { %5165 = vst.msk [vmem:[#allocation3 + $0x38] sm:$0xf] %vm5143_vm12, %v8657_v23  ;;  %8973 = vmatprep.subr.bf16.mxu1 %v4998_v35  ;;  %v4997_v37 = vpack.c.bf16 %v4985_v59, %v4982_v22  ;;  %v8655_v18 = vpack.c.bf16 %v4985_v59, %v4985_v59  ;;  %v5215_v22 = vpop.permute.xlu0 %5214 }
0x1615   :  { %8974 = vmatpush3.bf16.msra.mxu1 %v4998_v35 }
0x1616   :  { %5163 = vst.msk [vmem:[#allocation3 + $0x28] sm:$0xf] %vm5143_vm12, %v8655_v18  ;;  %8975 = vmatprep.subr.bf16.mxu1 %v4997_v37 }
0x1619   :  { %v8971_v45 = vpop.f32.mrf.mxu1  ;;  %8976 = vmatpush3.bf16.msra.mxu1 %v4997_v37 }
0x161a   :  { %v8660_v48 = vpack.c.bf16 %v8971_v45, %v8971_v45  ;;  %5717 = vmatprep.subr.bf16.mxu1 %v9610_v1 }
0x161b   :  { %v5043_v58 = vpop.f32.mrf.mxu1  ;;  %v9411_v21 = vld [vmem:[#allocation3 + $0x30] ss:$8 sps:$4 sm:$0xff]  }
0x161c   :  { %5182 = vst.msk [vmem:[#allocation3 + $0x50] sm:$0xf] %vm5143_vm12, %v8660_v48  ;;  %v8658_v46 = vpack.c.bf16 %v5043_v58, %v5043_v58 }
0x161d   :  { %v8972_v52 = vpop.f32.mrf.mxu1  ;;  %v9412_v4 = vld [vmem:[#allocation3 + $0x20] ss:$8 sps:$4 sm:$0xff]  }
0x161e   :  { %5180 = vst.msk [vmem:[#allocation3 + $0x40] sm:$0xf] %vm5143_vm12, %v8658_v46  ;;  %v8661_v31 = vpack.c.bf16 %v8972_v52, %v8972_v52 }
0x161f   :  { %v5046_v34 = vpop.f32.mrf.mxu1 }
0x1620   :  { %5183 = vst.msk [vmem:[#allocation3 + $0x58] sm:$0xf] %vm5143_vm12, %v8661_v31  ;;  %v8659_v16 = vpack.c.bf16 %v5046_v34, %v5046_v34  ;;  %v5220_v34 = vpop.permute.xlu1 %5219 }
0x1622   :  { %5181 = vst.msk [vmem:[#allocation3 + $0x48] sm:$0xf] %vm5143_vm12, %v8659_v16 }
0x1627   :  { %v9409_v5 = vld [vmem:[#allocation3 + $0x50] ss:$8 sps:$4 sm:$0xff]  }
0x1628   :  { %8981 = vmatprep.subr.bf16.mxu0 %v9409_v5 }
0x1629   :  { %v9410_v28 = vld [vmem:[#allocation3 + $0x40] ss:$8 sps:$4 sm:$0xff]   ;;  %8982 = vmatpush3.bf16.msra.mxu0 %v9409_v5 }
0x162a   :  { %8983 = vmatprep.subr.bf16.mxu0 %v9410_v28 }
0x162d   :  { %8984 = vmatpush3.bf16.msra.mxu0 %v9410_v28 }
0x162e   :  { %8985 = vmatprep.subr.bf16.mxu0 %v9411_v21 }
0x1631   :  { %8986 = vmatpush3.bf16.msra.mxu0 %v9411_v21 }
0x1632   :  { %8987 = vmatprep.subr.bf16.mxu0 %v9412_v4 }
0x1635   :  { %8988 = vmatpush3.bf16.msra.mxu0 %v9412_v4 }
0x1636   :  { %8989 = vmatprep.subr.bf16.mxu0 %v9413_v7 }
0x1639   :  { %8990 = vmatpush3.bf16.msra.mxu0 %v9413_v7 }
0x163a   :  { %8991 = vmatprep.subr.bf16.mxu0 %v9414_v13 }
0x163d   :  { %8992 = vmatpush3.bf16.msra.mxu0 %v9414_v13 }
0x1640   :  { %8994 = vmatmul.mubr.msk.bf16.vlgmr.msra.gmra.mxu0 %vm671_vm11, %v9416_v54 }
0x1641   :  { %8997 = vmatprep.mubr.msk.bf16.mxu0 %vm671_vm11, %v9417_v41 }
0x1648   :  { %8998 = vmatmul.mubr.msk.bf16.gmra.mxu0 %vm671_vm11, %v9418_v40 }
0x1700   :  { %v8995_v33 = vpop.f32.mrf.mxu0 }
0x1701   :  { %v5363_v6 = vadd.f32 %v8995_v33, %v5225_v61  ;;  %v9420_v61 = vld [vmem:[%s12246_s11 + $0x8] sm:$0xff]  }
0x1702   :  { %v5354_v50 = vpop.f32.mrf.mxu0 }
0x1703   :  { %v5393_v23 = vmul.f32 %v11391_v53, %v5363_v6  ;;  %v5355_v59 = vadd.f32 %v5354_v50, %v5215_v22 }
0x1704   :  { %v8996_v51 = vpop.f32.mrf.mxu0 }
0x1705   :  { %v5366_v37 = vadd.f32 %v8996_v51, %v5230_v8  ;;  %v5401_v16 = vmax.f32 %v5393_v23, 0.0  ;;  %v5391_v5 = vmul.f32 %v11391_v53, %v5355_v59 }
0x1706   :  { %v5357_v42 = vpop.f32.mrf.mxu0 }
0x1707   :  { %v5394_v28 = vmul.f32 %v11391_v53, %v5366_v37  ;;  %v5358_v21 = vadd.f32 %v5357_v42, %v5220_v34  ;;  %v8664_v54 = vpack.c.bf16 %v5401_v16, %v5401_v16  ;;  %v5399_v41 = vmax.f32 %v5391_v5, 0.0  ;;  %v9419_v42 = vld [vmem:[%s12246_s11] sm:$0xff]   ;;  %s9620_s11 = smov 123  }
0x1708   :  { %v8999_v62 = vpop.f32.mrf.mxu0  ;;  %8977 = vmatprep.mubr.msk.bf16.mxu1 %vm2958_vm3, %v9419_v42 }
0x1709   :  { %v5379_v56 = vadd.f32 %v8999_v62, %v5245_v32  ;;  %v5402_v40 = vmax.f32 %v5394_v28, 0.0  ;;  %v5392_v32 = vmul.f32 %v11391_v53, %v5358_v21  ;;  %v8662_v33 = vpack.c.bf16 %v5399_v41, %v5399_v41  ;;  %8978 = vmatmul.mubr.msk.bf16.vlgmr.msra.gmra.mxu1 %vm2958_vm3, %v9420_v61  ;;  %v5766_v41 = vld [vmem:[%s12247_s15] sm:$0xff] }
0x170a   :  { %v5370_v19 = vpop.f32.mrf.mxu0 }
0x170b   :  { %v5397_v15 = vmul.f32 %v11391_v53, %v5379_v56  ;;  %v5371_v57 = vadd.f32 %v5370_v19, %v5235_v60  ;;  %v8665_v60 = vpack.c.bf16 %v5402_v40, %v5402_v40  ;;  %v5400_v50 = vmax.f32 %v5392_v32, 0.0  ;;  %v5767_v40 = vld [vmem:[%s12247_s15 + $0x8] sm:$0xff]  ;;  %v5768_v32 = vld [vmem:[%s12247_s15 + $0x10] sm:$0xff] }
0x170c   :  { %v9000_v20 = vpop.f32.mrf.mxu0 }
0x170d   :  { %v5405_v2 = vmax.f32 %v5397_v15, 0.0  ;;  %v5395_v26 = vmul.f32 %v11391_v53, %v5371_v57  ;;  %v5382_v35 = vadd.f32 %v9000_v20, %v5250_v44  ;;  %v8663_v51 = vpack.c.bf16 %v5400_v50, %v5400_v50  ;;  %v5796_v50 = vld [vmem:[%s12248_s16 + $0x10] sm:$0xff] }
0x170e   :  { %v5373_v18 = vpop.f32.mrf.mxu0 }
0x170f   :  { %v8668_v45 = vpack.c.bf16 %v5405_v2, %v5405_v2  ;;  %v5403_v48 = vmax.f32 %v5395_v26, 0.0  ;;  %v5398_v58 = vmul.f32 %v11391_v53, %v5382_v35  ;;  %v5374_v46 = vadd.f32 %v5373_v18, %v5240_v25 }
0x1711   :  { %v5406_v52 = vmax.f32 %v5398_v58, 0.0  ;;  %v5396_v31 = vmul.f32 %v11391_v53, %v5374_v46  ;;  %5443 = vrot.lane.b32.xlu0 %v8668_v45, %s9609_s22  ;;  %v8666_v4 = vpack.c.bf16 %v5403_v48, %v5403_v48 }
0x1713   :  { %v8669_v7 = vpack.c.bf16 %v5406_v52, %v5406_v52  ;;  %v5404_v13 = vmax.f32 %v5396_v31, 0.0 }
0x1715   :  { %5445 = vrot.lane.b32.xlu1 %v8669_v7, %s9609_s22  ;;  %5439 = vrot.lane.b32.xlu0 %v8666_v4, %s9609_s22  ;;  %v8667_v44 = vpack.c.bf16 %v5404_v13, %v5404_v13 }
0x1719   :  { %5441 = vrot.lane.b32.xlu1 %v8667_v44, %s9609_s22  ;;  %5435 = vrot.lane.b32.xlu0 %v8664_v54, %s9609_s22  ;;  %v5769_v44 = vld [vmem:[%s12247_s15 + $0x18] sm:$0xff] }
0x171d   :  { %5437 = vrot.lane.b32.xlu1 %v8665_v60, %s9609_s22  ;;  %5431 = vrot.lane.b32.xlu0 %v8662_v33, %s9609_s22  ;;  %v5794_v33 = vld [vmem:[%s12248_s16] sm:$0xff]  ;;  %v5795_v60 = vld [vmem:[%s12248_s16 + $0x8] sm:$0xff] }
0x1721   :  { %5433 = vrot.lane.b32.xlu1 %v8663_v51, %s9609_s22  ;;  %v9433_v51 = vld [vmem:[%s12249_s18 + $0x4] ss:$8 sps:$4 sm:$0xff]  }
0x1722   :  { %8427 = vmatprep.mubr.msk.bf16.mxu1 %vm1574_vm13, %v9433_v51 }
0x1783   :  { %v5444_v25 = vpop.permute.xlu0 %5443 }
0x1784   :  { %5462 = vst.msk [vmem:[#allocation2 + $0x30] sm:$0xf] %vm5455_vm5, %v5444_v25  ;;  %v5797_v25 = vld [vmem:[%s12248_s16 + $0x18] sm:$0xff] }
0x1785   :  { %5470 = vst.msk [vmem:[#allocation2 + $0x30] sm:$0xf] %vm476_vm4, %v9610_v1 }
0x1786   :  { %5479 = vst.msk [vmem:[#allocation2 + $0x30] sm:$0xf] %vm5472_vm7, %v9610_v1 }
0x1787   :  { %v5446_v62 = vpop.permute.xlu1 %5445  ;;  %v5440_v56 = vpop.permute.xlu0 %5439 }
0x1788   :  { %5463 = vst.msk [vmem:[#allocation2 + $0x38] sm:$0xf] %vm5455_vm5, %v5446_v62  ;;  %5460 = vst.msk [vmem:[#allocation2 + $0x20] sm:$0xf] %vm5455_vm5, %v5440_v56 }
0x1789   :  { %5471 = vst.msk [vmem:[#allocation2 + $0x38] sm:$0xf] %vm476_vm4, %v9610_v1  ;;  %5468 = vst.msk [vmem:[#allocation2 + $0x20] sm:$0xf] %vm476_vm4, %v9610_v1 }
0x178a   :  { %5477 = vst.msk [vmem:[#allocation2 + $0x20] sm:$0xf] %vm5472_vm7, %v9610_v1  ;;  %5480 = vst.msk [vmem:[#allocation2 + $0x38] sm:$0xf] %vm5472_vm7, %v9610_v1 }
0x178b   :  { %v5442_v6 = vpop.permute.xlu1 %5441  ;;  %v5436_v19 = vpop.permute.xlu0 %5435 }
0x178c   :  { %5461 = vst.msk [vmem:[#allocation2 + $0x28] sm:$0xf] %vm5455_vm5, %v5442_v6  ;;  %5458 = vst.msk [vmem:[#allocation2 + $0x10] sm:$0xf] %vm5455_vm5, %v5436_v19 }
0x178d   :  { %5469 = vst.msk [vmem:[#allocation2 + $0x28] sm:$0xf] %vm476_vm4, %v9610_v1  ;;  %5466 = vst.msk [vmem:[#allocation2 + $0x10] sm:$0xf] %vm476_vm4, %v9610_v1  ;;  %v5503_v15 = vld [vmem:[#allocation2 + $0x30] sm:$0xf] }
0x178e   :  { %5525 = vrot.lane.b32.xlu0 %v5503_v15, %s9612_s5  ;;  %5475 = vst.msk [vmem:[#allocation2 + $0x10] sm:$0xf] %vm5472_vm7, %v9610_v1  ;;  %5478 = vst.msk [vmem:[#allocation2 + $0x28] sm:$0xf] %vm5472_vm7, %v9610_v1  ;;  %v5487_v26 = vld [vmem:[#allocation2 + $0x30] sm:$0xf] }
0x178f   :  { %v5438_v57 = vpop.permute.xlu1 %5437  ;;  %v5432_v8 = vpop.permute.xlu0 %5431  ;;  %5495 = vst.msk [vmem:[#allocation3 + $0x30] sm:$0xf] %vm5143_vm12, %v5487_v26  ;;  %v5551_v58 = vld [vmem:[#allocation2 + $0x30] sm:$0xf] }
0x1790   :  { %5459 = vst.msk [vmem:[#allocation2 + $0x18] sm:$0xf] %vm5455_vm5, %v5438_v57  ;;  %5456 = vst.msk [vmem:[#allocation2] sm:$0xf] %vm5455_vm5, %v5432_v8 }
0x1791   :  { %5467 = vst.msk [vmem:[#allocation2 + $0x18] sm:$0xf] %vm476_vm4, %v9610_v1  ;;  %5464 = vst.msk [vmem:[#allocation2] sm:$0xf] %vm476_vm4, %v9610_v1  ;;  %v5504_v20 = vld [vmem:[#allocation2 + $0x38] sm:$0xf] }
0x1792   :  { %v5501_v22 = vld [vmem:[#allocation2 + $0x20] sm:$0xf]  ;;  %5476 = vst.msk [vmem:[#allocation2 + $0x18] sm:$0xf] %vm5472_vm7, %v9610_v1  ;;  %5473 = vst.msk [vmem:[#allocation2] sm:$0xf] %vm5472_vm7, %v9610_v1  ;;  %5527 = vrot.lane.b32.xlu1 %v5504_v20, %s9612_s5 }
0x1793   :  { %5521 = vrot.lane.b32.xlu0 %v5501_v22, %s9612_s5  ;;  %v5434_v2 = vpop.permute.xlu1 %5433  ;;  %v5488_v35 = vld [vmem:[#allocation2 + $0x38] sm:$0xf]  ;;  %v5485_v37 = vld [vmem:[#allocation2 + $0x20] sm:$0xf] }
0x1794   :  { %5457 = vst.msk [vmem:[#allocation2 + $0x8] sm:$0xf] %vm5455_vm5, %v5434_v2  ;;  %v5552_v34 = vld [vmem:[#allocation2 + $0x38] sm:$0xf]  ;;  %v5549_v16 = vld [vmem:[#allocation2 + $0x20] sm:$0xf] }
0x1795   :  { %5465 = vst.msk [vmem:[#allocation2 + $0x8] sm:$0xf] %vm476_vm4, %v9610_v1  ;;  %v5502_v23 = vld [vmem:[#allocation2 + $0x28] sm:$0xf]  ;;  %v5499_v59 = vld [vmem:[#allocation2 + $0x10] sm:$0xf] }
0x1796   :  { %5496 = vst.msk [vmem:[#allocation3 + $0x38] sm:$0xf] %vm5143_vm12, %v5488_v35  ;;  %5523 = vrot.lane.b32.xlu1 %v5502_v23, %s9612_s5  ;;  %v5486_v18 = vld [vmem:[#allocation2 + $0x28] sm:$0xf]  ;;  %5493 = vst.msk [vmem:[#allocation3 + $0x20] sm:$0xf] %vm5143_vm12, %v5485_v37 }
0x1797   :  { %5474 = vst.msk [vmem:[#allocation2 + $0x8] sm:$0xf] %vm5472_vm7, %v9610_v1  ;;  %5517 = vrot.lane.b32.xlu0 %v5499_v59, %s9612_s5  ;;  %v5483_v52 = vld [vmem:[#allocation2 + $0x10] sm:$0xf]  ;;  %v5550_v21 = vld [vmem:[#allocation2 + $0x28] sm:$0xf] }
0x1798   :  { %5494 = vst.msk [vmem:[#allocation3 + $0x28] sm:$0xf] %vm5143_vm12, %v5486_v18  ;;  %5491 = vst.msk [vmem:[#allocation3 + $0x10] sm:$0xf] %vm5143_vm12, %v5483_v52  ;;  %v5547_v4 = vld [vmem:[#allocation2 + $0x10] sm:$0xf] }
0x1799   :  { %v5500_v45 = vld [vmem:[#allocation2 + $0x18] sm:$0xf]  ;;  %v5497_v48 = vld [vmem:[#allocation2] sm:$0xf] }
0x179a   :  { %5519 = vrot.lane.b32.xlu1 %v5500_v45, %s9612_s5  ;;  %v5484_v31 = vld [vmem:[#allocation2 + $0x18] sm:$0xf]  ;;  %v5481_v5 = vld [vmem:[#allocation2] sm:$0xf] }
0x179b   :  { %5513 = vrot.lane.b32.xlu0 %v5497_v48, %s9612_s5  ;;  %5492 = vst.msk [vmem:[#allocation3 + $0x18] sm:$0xf] %vm5143_vm12, %v5484_v31  ;;  %5489 = vst.msk [vmem:[#allocation3] sm:$0xf] %vm5143_vm12, %v5481_v5  ;;  %v5548_v7 = vld [vmem:[#allocation2 + $0x18] sm:$0xf] }
0x179c   :  { %v5545_v13 = vld [vmem:[#allocation2] sm:$0xf] }
0x179d   :  { %v9425_v18 = vld [vmem:[#allocation3 + $0x30] ss:$8 sps:$4 sm:$0xff]  }
0x179e   :  { %v5498_v46 = vld [vmem:[#allocation2 + $0x8] sm:$0xf] }
0x179f   :  { %5515 = vrot.lane.b32.xlu1 %v5498_v46, %s9612_s5  ;;  %5573 = vrot.lane.b32.xlu0 %v5551_v58, %s9611_s0  ;;  %v5482_v28 = vld [vmem:[#allocation2 + $0x8] sm:$0xf] }
0x17a0   :  { %5490 = vst.msk [vmem:[#allocation3 + $0x8] sm:$0xf] %vm5143_vm12, %v5482_v28  ;;  %v5546_v54 = vld [vmem:[#allocation2 + $0x8] sm:$0xf] }
0x17a1   :  { %v9426_v58 = vld [vmem:[#allocation3 + $0x20] ss:$8 sps:$4 sm:$0xff]  }
0x17a2   :  { %v9427_v52 = vld [vmem:[#allocation3 + $0x10] ss:$8 sps:$4 sm:$0xff]  }
0x17a3   :  { %5575 = vrot.lane.b32.xlu1 %v5552_v34, %s9611_s0  ;;  %5569 = vrot.lane.b32.xlu0 %v5549_v16, %s9611_s0 }
0x17a7   :  { %5571 = vrot.lane.b32.xlu1 %v5550_v21, %s9611_s0  ;;  %5565 = vrot.lane.b32.xlu0 %v5547_v4, %s9611_s0  ;;  %v9428_v31 = vld [vmem:[#allocation3] ss:$8 sps:$4 sm:$0xff]   ;;  %v9436_v4 = vld [vmem:[%s12249_s18 + $0x14] ss:$8 sps:$4 sm:$0xff]  }
0x17a8   :  { %v9435_v21 = vld [vmem:[%s12249_s18] ss:$8 sps:$4 sm:$0xff]  }
0x17ab   :  { %5567 = vrot.lane.b32.xlu1 %v5548_v7, %s9611_s0  ;;  %5561 = vrot.lane.b32.xlu0 %v5545_v13, %s9611_s0  ;;  %v9438_v7 = vld [vmem:[%s12249_s18 + $0x10] ss:$8 sps:$4 sm:$0xff]   ;;  %v11519_v13 = vld [vmem:[%s12250_s9 + $0x8] ss:$0 sps:$4 sm:$0x33]  }
0x17ac   :  { %9105 = vmatprep.subr.msk.bf16.mxu0 %vm261_vm6, %v11519_v13 }
0x17af   :  { %5563 = vrot.lane.b32.xlu1 %v5546_v54, %s9611_s0  ;;  %5772 = vperm.xlu0 %9185, %v5766_v41   ;;  %v11522_v54 = vld [vmem:[%s12250_s9] sm:$0xff]   ;;  %v11528_v41 = vsel %vm261_vm6, %v11519_v13, 0 }
0x17b0   :  { %9002 = vmatpush3.bf16.msra.mxu0 %v11528_v41 }
0x17b1   :  { %9003 = vmatprep.subr.bf16.mxu0 %v11522_v54 }
0x17b3   :  { %5777 = vperm.xlu1 %9184, %v5767_v40   ;;  %5782 = vperm.xlu0 %9185, %v5768_v32  }
0x17b4   :  { %9004 = vmatpush3.bf16.msra.mxu0 %v11522_v54 }
0x17b5   :  { %9106 = vmatprep.subr.msk.bf16.mxu0 %vm261_vm6, %v11519_v13 }
0x17b7   :  { %5787 = vperm.xlu1 %9184, %v5769_v44   ;;  %5800 = vperm.xlu0 %9185, %v5794_v33  }
0x17bb   :  { %5805 = vperm.xlu1 %9184, %v5795_v60   ;;  %5810 = vperm.xlu0 %9185, %v5796_v50  }
0x17bf   :  { %5815 = vperm.xlu1 %9184, %v5797_v25  }
0x17c9   :  { %v8979_v40 = vpop.f32.mrf.mxu1 }
0x17cb   :  { %v5114_v32 = vpop.f32.mrf.mxu1 }
0x17cd   :  { %v8980_v33 = vpop.f32.mrf.mxu1 }
0x17cf   :  { %v5117_v51 = vpop.f32.mrf.mxu1 }
0x1800   :  { %v5526_v42 = vpop.permute.xlu0 %5525 }
0x1801   :  { %5543 = vst.msk [vmem:[#allocation3 + $0x70] sm:$0xf] %vm5143_vm12, %v5526_v42 }
0x1804   :  { %v5528_v61 = vpop.permute.xlu1 %5527 }
0x1805   :  { %v5522_v62 = vpop.permute.xlu0 %5521  ;;  %5544 = vst.msk [vmem:[#allocation3 + $0x78] sm:$0xf] %vm5143_vm12, %v5528_v61 }
0x1806   :  { %5541 = vst.msk [vmem:[#allocation3 + $0x60] sm:$0xf] %vm5143_vm12, %v5522_v62 }
0x1808   :  { %v5524_v56 = vpop.permute.xlu1 %5523 }
0x1809   :  { %v5518_v6 = vpop.permute.xlu0 %5517  ;;  %5542 = vst.msk [vmem:[#allocation3 + $0x68] sm:$0xf] %vm5143_vm12, %v5524_v56 }
0x180a   :  { %5539 = vst.msk [vmem:[#allocation3 + $0x50] sm:$0xf] %vm5143_vm12, %v5518_v6 }
0x180c   :  { %v5520_v19 = vpop.permute.xlu1 %5519  ;;  %v9421_v15 = vld [vmem:[#allocation3 + $0x70] ss:$8 sps:$4 sm:$0xff]  }
0x180d   :  { %v5514_v57 = vpop.permute.xlu0 %5513  ;;  %5540 = vst.msk [vmem:[#allocation3 + $0x58] sm:$0xf] %vm5143_vm12, %v5520_v19  ;;  %5718 = vmatpush1.bf16.msra.mxu1 %v9421_v15 }
0x180e   :  { %5537 = vst.msk [vmem:[#allocation3 + $0x40] sm:$0xf] %vm5143_vm12, %v5514_v57  ;;  %5719 = vmatprep.subr.bf16.mxu1 %v9610_v1 }
0x1810   :  { %v9422_v20 = vld [vmem:[#allocation3 + $0x60] ss:$8 sps:$4 sm:$0xff]  }
0x1811   :  { %v5516_v8 = vpop.permute.xlu1 %5515  ;;  %v5574_v22 = vpop.permute.xlu0 %5573  ;;  %5720 = vmatpush1.bf16.msra.mxu1 %v9422_v20 }
0x1812   :  { %5538 = vst.msk [vmem:[#allocation3 + $0x48] sm:$0xf] %vm5143_vm12, %v5516_v8  ;;  %5591 = vst.msk [vmem:[#allocation3 + $0xb0] sm:$0xf] %vm5143_vm12, %v5574_v22  ;;  %5721 = vmatprep.subr.bf16.mxu1 %v9610_v1 }
0x1814   :  { %v9423_v2 = vld [vmem:[#allocation3 + $0x50] ss:$8 sps:$4 sm:$0xff]  }
0x1815   :  { %v5576_v26 = vpop.permute.xlu1 %5575  ;;  %v5570_v35 = vpop.permute.xlu0 %5569  ;;  %5722 = vmatpush1.bf16.msra.mxu1 %v9423_v2 }
0x1816   :  { %5592 = vst.msk [vmem:[#allocation3 + $0xb8] sm:$0xf] %vm5143_vm12, %v5576_v26  ;;  %5589 = vst.msk [vmem:[#allocation3 + $0xa0] sm:$0xf] %vm5143_vm12, %v5570_v35  ;;  %5723 = vmatprep.subr.bf16.mxu1 %v9610_v1 }
0x1819   :  { %v9424_v23 = vld [vmem:[#allocation3 + $0x40] ss:$8 sps:$4 sm:$0xff]   ;;  %v5572_v59 = vpop.permute.xlu1 %5571  ;;  %v5566_v37 = vpop.permute.xlu0 %5565 }
0x181a   :  { %5590 = vst.msk [vmem:[#allocation3 + $0xa8] sm:$0xf] %vm5143_vm12, %v5572_v59  ;;  %5587 = vst.msk [vmem:[#allocation3 + $0x90] sm:$0xf] %vm5143_vm12, %v5566_v37  ;;  %5724 = vmatpush1.bf16.msra.mxu1 %v9424_v23 }
0x181b   :  { %5725 = vmatprep.subr.bf16.mxu1 %v9610_v1 }
0x181d   :  { %v5568_v45 = vpop.permute.xlu1 %5567  ;;  %v5562_v48 = vpop.permute.xlu0 %5561  ;;  %v9429_v34 = vld [vmem:[#allocation3 + $0xb0] ss:$8 sps:$4 sm:$0xff]  }
0x181e   :  { %5588 = vst.msk [vmem:[#allocation3 + $0x98] sm:$0xf] %vm5143_vm12, %v5568_v45  ;;  %5585 = vst.msk [vmem:[#allocation3 + $0x80] sm:$0xf] %vm5143_vm12, %v5562_v48  ;;  %5726 = vmatpush1.bf16.msra.mxu1 %v9425_v18 }
0x181f   :  { %5727 = vmatprep.subr.bf16.mxu1 %v9610_v1 }
0x1821   :  { %v5564_v46 = vpop.permute.xlu1 %5563  ;;  %v9430_v16 = vld [vmem:[#allocation3 + $0xa0] ss:$8 sps:$4 sm:$0xff]  }
0x1822   :  { %5586 = vst.msk [vmem:[#allocation3 + $0x88] sm:$0xf] %vm5143_vm12, %v5564_v46  ;;  %5728 = vmatpush1.bf16.msra.mxu1 %v9426_v58 }
0x1823   :  { %5729 = vmatprep.subr.bf16.mxu1 %v9610_v1 }
0x1825   :  { %v9431_v5 = vld [vmem:[#allocation3 + $0x90] ss:$8 sps:$4 sm:$0xff]  }
0x1826   :  { %5730 = vmatpush1.bf16.msra.mxu1 %v9427_v52 }
0x1827   :  { %5731 = vmatprep.subr.bf16.mxu1 %v9610_v1 }
0x1829   :  { %v9432_v28 = vld [vmem:[#allocation3 + $0x80] ss:$8 sps:$4 sm:$0xff]  }
0x182a   :  { %5732 = vmatpush1.bf16.msra.mxu1 %v9428_v31  ;;  %v5773_v44 = vpop.permute.xlu0 %5772 }
0x182b   :  { %5741 = vmatprep.subr.bf16.mxu1 %v9610_v1 }
0x182e   :  { %5742 = vmatpush2.bf16.msra.mxu1 %v9429_v34  ;;  %v5778_v60 = vpop.permute.xlu1 %5777  ;;  %v5783_v50 = vpop.permute.xlu0 %5782 }
0x182f   :  { %5743 = vmatprep.subr.bf16.mxu1 %v9610_v1 }
0x1832   :  { %5744 = vmatpush2.bf16.msra.mxu1 %v9430_v16  ;;  %v5788_v61 = vpop.permute.xlu1 %5787  ;;  %v5801_v6 = vpop.permute.xlu0 %5800 }
0x1833   :  { %5745 = vmatprep.subr.bf16.mxu1 %v9610_v1 }
0x1836   :  { %5746 = vmatpush2.bf16.msra.mxu1 %v9431_v5  ;;  %v5806_v2 = vpop.permute.xlu1 %5805  ;;  %v5811_v58 = vpop.permute.xlu0 %5810 }
0x1837   :  { %5747 = vmatprep.subr.bf16.mxu1 %v9610_v1 }
0x183a   :  { %5748 = vmatpush2.bf16.msra.mxu1 %v9432_v28 }
0x183d   :  { %5750 = vmatmul.mubr.bf16.vlgmr.msra.gmra.mxu1 %v9435_v21 }
0x183e   :  { %8428 = vmatprep.mubr.msk.bf16.mxu1 %vm1574_vm13, %v9436_v4  ;;  %v5816_v4 = vpop.permute.xlu1 %5815 }
0x1845   :  { %5758 = vmatmul.mubr.bf16.gmra.mxu1 %v9438_v7 }
0x18fd   :  { %v5751_v25 = vpop.f32.mrf.mxu1 }
0x18fe   :  { %v5752_v42 = vadd.f32 %v5751_v25, %v5114_v32  ;;  %v6250_v25 = vld [vmem:[%s12251_s21 + $0x20] sm:$0xff] }
0x18ff   :  { %v5753_v62 = vpop.f32.mrf.mxu1 }
0x1900   :  { %v5790_v56 = vadd.f32 %v5773_v44, %v5752_v42  ;;  %v6248_v42 = vld [vmem:[%s12251_s21 + $0x10] sm:$0xff]  ;;  %v6246_v62 = vld [vmem:[%s12251_s21] sm:$0xff] }
0x1901   :  { %v5754_v19 = vpop.f32.mrf.mxu1 }
0x1902   :  { %v5818_v15 = vadd.f32 %v5801_v6, %v5790_v56  ;;  %v5755_v57 = vadd.f32 %v5754_v19, %v5117_v51  ;;  %v6251_v56 = vld [vmem:[%s12251_s21 + $0x28] sm:$0xff]  ;;  %v6249_v6 = vld [vmem:[%s12251_s21 + $0x18] sm:$0xff] }
0x1903   :  { %v5756_v8 = vpop.f32.mrf.mxu1  ;;  %v6247_v19 = vld [vmem:[%s12251_s21 + $0x8] sm:$0xff] }
0x1904   :  { %v5822_v20 = vmul.f32 %v11391_v53, %v5818_v15  ;;  %v5791_v22 = vadd.f32 %v5778_v60, %v5755_v57 }
0x1905   :  { %v5759_v26 = vpop.f32.mrf.mxu1 }
0x1906   :  { %v11536_v35 = vmax.f32 %v5822_v20, 0.0  ;;  %v5819_v23 = vadd.f32 %v5806_v2, %v5791_v22  ;;  %v5760_v59 = vadd.f32 %v8979_v40, %v5759_v26 }
0x1907   :  { %v5761_v37 = vpop.f32.mrf.mxu1 }
0x1908   :  { %v8670_v18 = vpack.c.bf16 %v11536_v35, %v11536_v35  ;;  %v5823_v45 = vmul.f32 %v11391_v53, %v5819_v23  ;;  %v5792_v48 = vadd.f32 %v5783_v50, %v5760_v59 }
0x1909   :  { %v5762_v46 = vpop.f32.mrf.mxu1 }
0x190a   :  { %5887 = vst.msk [vmem:[#allocation2] sm:$0xf] %vm5143_vm12, %v8670_v18  ;;  %v11542_v52 = vmax.f32 %v5823_v45, 0.0  ;;  %v5820_v31 = vadd.f32 %v5811_v58, %v5792_v48  ;;  %v5763_v34 = vadd.f32 %v8980_v33, %v5762_v46 }
0x190b   :  { %v5764_v16 = vpop.f32.mrf.mxu1  ;;  %5892 = vst.msk [vmem:[#allocation2] sm:$0xf] %vm5891_vm8, %v9610_v1 }
0x190c   :  { %v8671_v5 = vpack.c.bf16 %v11542_v52, %v11542_v52  ;;  %v5824_v28 = vmul.f32 %v11391_v53, %v5820_v31  ;;  %v5793_v21 = vadd.f32 %v5788_v61, %v5763_v34  ;;  %v6253_v61 = vld [vmem:[%s12251_s21 + $0x38] sm:$0xff] }
0x190e   :  { %5888 = vst.msk [vmem:[#allocation2 + $0x8] sm:$0xf] %vm5143_vm12, %v8671_v5  ;;  %v11550_v7 = vmax.f32 %v5824_v28, 0.0  ;;  %v5821_v40 = vadd.f32 %v5816_v4, %v5793_v21 }
0x190f   :  { %5893 = vst.msk [vmem:[#allocation2 + $0x8] sm:$0xf] %vm5891_vm8, %v9610_v1 }
0x1910   :  { %v8672_v32 = vpack.c.bf16 %v11550_v7, %v11550_v7  ;;  %v5825_v44 = vmul.f32 %v11391_v53, %v5821_v40  ;;  %v6252_v53 = vld [vmem:[%s12251_s21 + $0x30] sm:$0xff] }
0x1912   :  { %5889 = vst.msk [vmem:[#allocation2 + $0x10] sm:$0xf] %vm5143_vm12, %v8672_v32  ;;  %v11558_v33 = vmax.f32 %v5825_v44, 0.0 }
0x1913   :  { %5894 = vst.msk [vmem:[#allocation2 + $0x10] sm:$0xf] %vm5891_vm8, %v9610_v1 }
0x1914   :  { %v8673_v60 = vpack.c.bf16 %v11558_v33, %v11558_v33 }
0x1916   :  { %5890 = vst.msk [vmem:[#allocation2 + $0x18] sm:$0xf] %vm5143_vm12, %v8673_v60  ;;  %v9439_v50 = vld [vmem:[#allocation2] ss:$8 sps:$4 sm:$0xff]  }
0x1917   :  { %5895 = vst.msk [vmem:[#allocation2 + $0x18] sm:$0xf] %vm5891_vm8, %v9610_v1  ;;  %5980 = vrot.lane.b32.xlu0 %v9439_v50, %s9612_s5  ;;  %9005 = vmatprep.mubr.msk.bf16.mxu0 %vm5919_vm10, %v9439_v50 }
0x191b   :  { %6041 = vrot.lane.b32.xlu0 %v9439_v50, %s9611_s0 }
0x191e   :  { %v9440_v51 = vld [vmem:[#allocation2 + $0x10] ss:$8 sps:$4 sm:$0xff]  }
0x191f   :  { %6286 = vperm.xlu0 %9185, %v6252_v53   ;;  %5982 = vrot.lane.b32.xlu1 %v9440_v51, %s9612_s5 }
0x1920   :  { %9006 = vmatmul.mubr.msk.bf16.vlgmr.msra.gmra.mxu0 %vm5919_vm10, %v9440_v51 }
0x1921   :  { %9010 = vmatpush3.bf16.msra.mxu0 %v11528_v41 }
0x1922   :  { %9011 = vmatprep.subr.bf16.mxu0 %v11522_v54 }
0x1923   :  { %6276 = vperm.xlu0 %9185, %v6250_v25   ;;  %6043 = vrot.lane.b32.xlu1 %v9440_v51, %s9611_s0 }
0x1925   :  { %9012 = vmatpush3.bf16.msra.mxu0 %v11522_v54 }
0x1926   :  { %9107 = vmatprep.subr.msk.bf16.mxu0 %vm261_vm6, %v11519_v13  ;;  %vm6185_vm6 = vcmask 93184  }
0x1927   :  { %6266 = vperm.xlu0 %9185, %v6248_v42   ;;  %6291 = vperm.xlu1 %9184, %v6253_v61  }
0x192b   :  { %6256 = vperm.xlu0 %9185, %v6246_v62   ;;  %6281 = vperm.xlu1 %9184, %v6251_v56  }
0x192f   :  { %6271 = vperm.xlu1 %9184, %v6249_v6   ;;  %v9450_v6 = vld [vmem:[%s12252_s25 + $0x8] sm:$0xff]  }
0x1933   :  { %6261 = vperm.xlu1 %9184, %v6247_v19   ;;  %v9451_v19 = vld [vmem:[%s12252_s25 + $0x10] sm:$0xff]  }
0x1989   :  { %v5981_v15 = vpop.permute.xlu0 %5980 }
0x198a   :  { %9013 = vmatprep.mubr.msk.bf16.mxu0 %vm5919_vm10, %v5981_v15  ;;  %v9452_v15 = vld [vmem:[%s12252_s25 + $0x18] sm:$0xff]  }
0x198d   :  { %v6042_v8 = vpop.permute.xlu0 %6041 }
0x1991   :  { %v5983_v57 = vpop.permute.xlu1 %5982 }
0x1992   :  { %9014 = vmatmul.mubr.msk.bf16.vlgmr.msra.gmra.mxu0 %vm5919_vm10, %v5983_v57 }
0x1993   :  { %9018 = vmatpush3.bf16.msra.mxu0 %v11528_v41  ;;  %9021 = vmatprep.mubr.msk.bf16.mxu0 %vm5919_vm10, %v6042_v8 }
0x1994   :  { %9019 = vmatprep.subr.bf16.mxu0 %v11522_v54 }
0x1995   :  { %v6044_v13 = vpop.permute.xlu1 %6043 }
0x1997   :  { %9020 = vmatpush3.bf16.msra.mxu0 %v11522_v54  ;;  %v9449_v54 = vld [vmem:[%s12252_s25] sm:$0xff]  }
0x1998   :  { %9045 = vmatprep.mubr.msk.bf16.mxu1 %vm671_vm11, %v9449_v54  ;;  %v11615_v54 = vld [vmem:[%s12253_s29] ss:$0 sm:$0xff] }
0x199a   :  { %9022 = vmatmul.mubr.msk.bf16.vlgmr.msra.gmra.mxu0 %vm5919_vm10, %v6044_v13  ;;  %v6287_v57 = vpop.permute.xlu0 %6286 }
0x19a2   :  { %v6292_v8 = vpop.permute.xlu1 %6291 }
0x19e0   :  { %v9007_v20 = vpop.f32.mrf.mxu0 }
0x19e1   :  { %v8676_v22 = vpack.c.bf16 %v9007_v20, %v9007_v20  ;;  %v6277_v20 = vpop.permute.xlu0 %6276 }
0x19e2   :  { %v5963_v2 = vpop.f32.mrf.mxu0 }
0x19e3   :  { %v8674_v26 = vpack.c.bf16 %v5963_v2, %v5963_v2  ;;  %6188 = vst.msk [vmem:[#allocation3 + $0x10] sm:$0xf] %vm6185_vm6, %v8676_v22 }
0x19e4   :  { %v9008_v23 = vpop.f32.mrf.mxu0 }
0x19e5   :  { %v8677_v59 = vpack.c.bf16 %v9008_v23, %v9008_v23  ;;  %6186 = vst.msk [vmem:[#allocation3] sm:$0xf] %vm6185_vm6, %v8674_v26  ;;  %v6282_v26 = vpop.permute.xlu1 %6281 }
0x19e6   :  { %v5966_v41 = vpop.f32.mrf.mxu0 }
0x19e7   :  { %v8675_v37 = vpack.c.bf16 %v5966_v41, %v5966_v41  ;;  %6189 = vst.msk [vmem:[#allocation3 + $0x18] sm:$0xf] %vm6185_vm6, %v8677_v59  ;;  %v6267_v59 = vpop.permute.xlu0 %6266 }
0x19e9   :  { %6187 = vst.msk [vmem:[#allocation3 + $0x8] sm:$0xf] %vm6185_vm6, %v8675_v37 }
0x19ee   :  { %v9447_v62 = vld [vmem:[#allocation3 + $0x10] ss:$8 sps:$4 sm:$0xff]  }
0x19f0   :  { %v9448_v56 = vld [vmem:[#allocation3] ss:$8 sps:$4 sm:$0xff]  }
0x1a52   :  { %v9015_v18 = vpop.f32.mrf.mxu0 }
0x1a53   :  { %v8680_v45 = vpack.c.bf16 %v9015_v18, %v9015_v18 }
0x1a54   :  { %v6024_v48 = vpop.f32.mrf.mxu0 }
0x1a55   :  { %v8678_v58 = vpack.c.bf16 %v6024_v48, %v6024_v48  ;;  %6206 = vst.msk [vmem:[#allocation3 + $0x30] sm:$0xf] %vm6185_vm6, %v8680_v45 }
0x1a56   :  { %v9016_v46 = vpop.f32.mrf.mxu0 }
0x1a57   :  { %v6040_v31 = vpack.c.bf16 %v9016_v46, %v9015_v18  ;;  %v8681_v34 = vpack.c.bf16 %v9016_v46, %v9016_v46  ;;  %6204 = vst.msk [vmem:[#allocation3 + $0x20] sm:$0xf] %vm6185_vm6, %v8678_v58  ;;  %v6272_v46 = vpop.permute.xlu1 %6271 }
0x1a58   :  { %v6027_v16 = vpop.f32.mrf.mxu0 }
0x1a59   :  { %v6039_v5 = vpack.c.bf16 %v6027_v16, %v6024_v48  ;;  %v8679_v28 = vpack.c.bf16 %v6027_v16, %v6027_v16  ;;  %9025 = vmatprep.subr.bf16.mxu0 %v6040_v31  ;;  %6207 = vst.msk [vmem:[#allocation3 + $0x38] sm:$0xf] %vm6185_vm6, %v8681_v34  ;;  %v6257_v34 = vpop.permute.xlu0 %6256 }
0x1a5a   :  { %v9023_v21 = vpop.f32.mrf.mxu0  ;;  %9026 = vmatpush3.bf16.msra.mxu0 %v6040_v31 }
0x1a5b   :  { %v8684_v4 = vpack.c.bf16 %v9023_v21, %v9023_v21  ;;  %9027 = vmatprep.subr.bf16.mxu0 %v6039_v5  ;;  %6205 = vst.msk [vmem:[#allocation3 + $0x28] sm:$0xf] %vm6185_vm6, %v8679_v28 }
0x1a5c   :  { %v6085_v40 = vpop.f32.mrf.mxu0 }
0x1a5d   :  { %v8682_v32 = vpack.c.bf16 %v6085_v40, %v6085_v40  ;;  %6224 = vst.msk [vmem:[#allocation3 + $0x50] sm:$0xf] %vm6185_vm6, %v8684_v4 }
0x1a5e   :  { %v9024_v44 = vpop.f32.mrf.mxu0  ;;  %9028 = vmatpush3.bf16.msra.mxu0 %v6039_v5 }
0x1a5f   :  { %v8685_v60 = vpack.c.bf16 %v9024_v44, %v9024_v44  ;;  %6222 = vst.msk [vmem:[#allocation3 + $0x40] sm:$0xf] %vm6185_vm6, %v8682_v32  ;;  %6759 = vmatprep.subr.bf16.mxu0 %v9610_v1 }
0x1a60   :  { %v6088_v50 = vpop.f32.mrf.mxu0  ;;  %v9445_v42 = vld [vmem:[#allocation3 + $0x30] ss:$8 sps:$4 sm:$0xff]  }
0x1a61   :  { %v8683_v53 = vpack.c.bf16 %v6088_v50, %v6088_v50  ;;  %6225 = vst.msk [vmem:[#allocation3 + $0x58] sm:$0xf] %vm6185_vm6, %v8685_v60 }
0x1a62   :  { %v9446_v61 = vld [vmem:[#allocation3 + $0x20] ss:$8 sps:$4 sm:$0xff]  }
0x1a63   :  { %6223 = vst.msk [vmem:[#allocation3 + $0x48] sm:$0xf] %vm6185_vm6, %v8683_v53 }
0x1a68   :  { %v9443_v51 = vld [vmem:[#allocation3 + $0x50] ss:$8 sps:$4 sm:$0xff]  }
0x1a69   :  { %9033 = vmatprep.subr.bf16.mxu1 %v9443_v51 }
0x1a6a   :  { %v9444_v25 = vld [vmem:[#allocation3 + $0x40] ss:$8 sps:$4 sm:$0xff]   ;;  %9034 = vmatpush3.bf16.msra.mxu1 %v9443_v51 }
0x1a6b   :  { %9035 = vmatprep.subr.bf16.mxu1 %v9444_v25 }
0x1a6e   :  { %9036 = vmatpush3.bf16.msra.mxu1 %v9444_v25 }
0x1a6f   :  { %9037 = vmatprep.subr.bf16.mxu1 %v9445_v42 }
0x1a72   :  { %9038 = vmatpush3.bf16.msra.mxu1 %v9445_v42  ;;  %v6262_v42 = vpop.permute.xlu1 %6261 }
0x1a73   :  { %9039 = vmatprep.subr.bf16.mxu1 %v9446_v61 }
0x1a76   :  { %9040 = vmatpush3.bf16.msra.mxu1 %v9446_v61 }
0x1a77   :  { %9041 = vmatprep.subr.bf16.mxu1 %v9447_v62 }
0x1a7a   :  { %9042 = vmatpush3.bf16.msra.mxu1 %v9447_v62 }
0x1a7b   :  { %9043 = vmatprep.subr.bf16.mxu1 %v9448_v56 }
0x1a7e   :  { %9044 = vmatpush3.bf16.msra.mxu1 %v9448_v56 }
0x1a81   :  { %9046 = vmatmul.mubr.msk.bf16.vlgmr.msra.gmra.mxu1 %vm671_vm11, %v9450_v6 }
0x1a82   :  { %9049 = vmatprep.mubr.msk.bf16.mxu1 %vm671_vm11, %v9451_v19 }
0x1a89   :  { %9050 = vmatmul.mubr.msk.bf16.gmra.mxu1 %vm671_vm11, %v9452_v15 }
0x1b41   :  { %v9047_v13 = vpop.f32.mrf.mxu1 }
0x1b42   :  { %v6405_v18 = vadd.f32 %v9047_v13, %v6267_v59 }
0x1b43   :  { %v6396_v22 = vpop.f32.mrf.mxu1 }
0x1b44   :  { %v6435_v21 = vmul.f32 %v11615_v54, %v6405_v18  ;;  %v6397_v4 = vadd.f32 %v6396_v22, %v6257_v34  ;;  %v9453_v18 = vld [vmem:[%s12254_s14] sm:$0xff]  }
0x1b45   :  { %v9048_v2 = vpop.f32.mrf.mxu1  ;;  %9029 = vmatprep.mubr.msk.bf16.mxu0 %vm2958_vm3, %v9453_v18  ;;  %v6837_v18 = vld [vmem:[%s12256_s24 + $0x8] sm:$0xff] }
0x1b46   :  { %v6408_v40 = vadd.f32 %v9048_v2, %v6272_v46  ;;  %v6443_v61 = vmax.f32 %v6435_v21, 0.0  ;;  %v6433_v62 = vmul.f32 %v11615_v54, %v6397_v4 }
0x1b47   :  { %v6399_v23 = vpop.f32.mrf.mxu1 }
0x1b48   :  { %v6436_v56 = vmul.f32 %v11615_v54, %v6408_v40  ;;  %v6400_v6 = vadd.f32 %v6399_v23, %v6262_v42  ;;  %v6441_v13 = vmax.f32 %v6433_v62, 0.0 }
0x1b49   :  { %v9051_v41 = vpop.f32.mrf.mxu1 }
0x1b4a   :  { %v6421_v37 = vadd.f32 %v9051_v41, %v6287_v57  ;;  %v6434_v22 = vmul.f32 %v11615_v54, %v6400_v6 }
0x1b4b   :  { %v6412_v45 = vpop.f32.mrf.mxu1 }
0x1b4c   :  { %v6439_v48 = vmul.f32 %v11615_v54, %v6421_v37  ;;  %v6413_v58 = vadd.f32 %v6412_v45, %v6277_v20  ;;  %v6444_v20 = vmax.f32 %v6436_v56, 0.0  ;;  %v6442_v59 = vmax.f32 %v6434_v22, 0.0  ;;  %v9454_v45 = vld [vmem:[%s12254_s14 + $0x8] sm:$0xff]  }
0x1b4d   :  { %v9052_v31 = vpop.f32.mrf.mxu1  ;;  %9030 = vmatmul.mubr.msk.bf16.vlgmr.msra.gmra.mxu0 %vm2958_vm3, %v9454_v45  ;;  %v6838_v45 = vld [vmem:[%s12256_s24 + $0x10] sm:$0xff] }
0x1b4e   :  { %v6447_v16 = vmax.f32 %v6439_v48, 0.0  ;;  %v6437_v5 = vmul.f32 %v11615_v54, %v6413_v58  ;;  %v6424_v28 = vadd.f32 %v9052_v31, %v6292_v8  ;;  %v8688_v8 = vpack.c.bf16 %v6443_v61, %v6443_v61 }
0x1b4f   :  { %v6415_v32 = vpop.f32.mrf.mxu1  ;;  %v8689_v23 = vpack.c.bf16 %v6444_v20, %v6444_v20  ;;  %v8687_v41 = vpack.c.bf16 %v6442_v59, %v6442_v59  ;;  %v6810_v59 = vld [vmem:[%s12255_s19 + $0x10] sm:$0xff] }
0x1b50   :  { %v8692_v44 = vpack.c.bf16 %v6447_v16, %v6447_v16  ;;  %v6445_v60 = vmax.f32 %v6437_v5, 0.0  ;;  %v6440_v50 = vmul.f32 %v11615_v54, %v6424_v28  ;;  %v6416_v53 = vadd.f32 %v6415_v32, %v6282_v26 }
0x1b51   :  { %v8686_v26 = vpack.c.bf16 %v6441_v13, %v6441_v13 }
0x1b52   :  { %v6448_v51 = vmax.f32 %v6440_v50, 0.0  ;;  %v6438_v25 = vmul.f32 %v11615_v54, %v6416_v53  ;;  %6485 = vrot.lane.b32.xlu0 %v8692_v44, %s9609_s22  ;;  %v8690_v19 = vpack.c.bf16 %v6445_v60, %v6445_v60 }
0x1b54   :  { %v8693_v15 = vpack.c.bf16 %v6448_v51, %v6448_v51  ;;  %v6446_v57 = vmax.f32 %v6438_v25, 0.0 }
0x1b56   :  { %6487 = vrot.lane.b32.xlu1 %v8693_v15, %s9609_s22  ;;  %6481 = vrot.lane.b32.xlu0 %v8690_v19, %s9609_s22  ;;  %v8691_v2 = vpack.c.bf16 %v6446_v57, %v6446_v57 }
0x1b5a   :  { %6483 = vrot.lane.b32.xlu1 %v8691_v2, %s9609_s22  ;;  %6477 = vrot.lane.b32.xlu0 %v8688_v8, %s9609_s22 }
0x1b5e   :  { %6479 = vrot.lane.b32.xlu1 %v8689_v23, %s9609_s22  ;;  %6473 = vrot.lane.b32.xlu0 %v8686_v26, %s9609_s22  ;;  %v6808_v26 = vld [vmem:[%s12255_s19] sm:$0xff]  ;;  %v6809_v23 = vld [vmem:[%s12255_s19 + $0x8] sm:$0xff] }
0x1b62   :  { %6475 = vrot.lane.b32.xlu1 %v8687_v41, %s9609_s22  ;;  %v6811_v41 = vld [vmem:[%s12255_s19 + $0x18] sm:$0xff] }
0x1bc4   :  { %v6486_v37 = vpop.permute.xlu0 %6485 }
0x1bc5   :  { %6504 = vst.msk [vmem:[#allocation2 + $0x30] sm:$0xf] %vm6497_vm2, %v6486_v37  ;;  %v6836_v37 = vld [vmem:[%s12256_s24] sm:$0xff] }
0x1bc6   :  { %6512 = vst.msk [vmem:[#allocation2 + $0x30] sm:$0xf] %vm476_vm4, %v9610_v1 }
0x1bc7   :  { %6521 = vst.msk [vmem:[#allocation2 + $0x30] sm:$0xf] %vm6514_vm1, %v9610_v1 }
0x1bc8   :  { %v6488_v48 = vpop.permute.xlu1 %6487  ;;  %v6482_v58 = vpop.permute.xlu0 %6481 }
0x1bc9   :  { %6505 = vst.msk [vmem:[#allocation2 + $0x38] sm:$0xf] %vm6497_vm2, %v6488_v48  ;;  %6502 = vst.msk [vmem:[#allocation2 + $0x20] sm:$0xf] %vm6497_vm2, %v6482_v58  ;;  %v9467_v48 = vld [vmem:[%s12257_s30 + $0x4] ss:$8 sps:$4 sm:$0xff]  }
0x1bca   :  { %6513 = vst.msk [vmem:[#allocation2 + $0x38] sm:$0xf] %vm476_vm4, %v9610_v1  ;;  %6510 = vst.msk [vmem:[#allocation2 + $0x20] sm:$0xf] %vm476_vm4, %v9610_v1  ;;  %v6839_v58 = vld [vmem:[%s12256_s24 + $0x18] sm:$0xff]  ;;  %8498 = vmatprep.mubr.msk.bf16.mxu0 %vm1574_vm13, %v9467_v48 }
0x1bcb   :  { %6519 = vst.msk [vmem:[#allocation2 + $0x20] sm:$0xf] %vm6514_vm1, %v9610_v1  ;;  %6522 = vst.msk [vmem:[#allocation2 + $0x38] sm:$0xf] %vm6514_vm1, %v9610_v1 }
0x1bcc   :  { %v6484_v46 = vpop.permute.xlu1 %6483  ;;  %v6478_v31 = vpop.permute.xlu0 %6477 }
0x1bcd   :  { %6503 = vst.msk [vmem:[#allocation2 + $0x28] sm:$0xf] %vm6497_vm2, %v6484_v46  ;;  %6500 = vst.msk [vmem:[#allocation2 + $0x10] sm:$0xf] %vm6497_vm2, %v6478_v31 }
0x1bce   :  { %6511 = vst.msk [vmem:[#allocation2 + $0x28] sm:$0xf] %vm476_vm4, %v9610_v1  ;;  %6508 = vst.msk [vmem:[#allocation2 + $0x10] sm:$0xf] %vm476_vm4, %v9610_v1  ;;  %v6545_v34 = vld [vmem:[#allocation2 + $0x30] sm:$0xf] }
0x1bcf   :  { %v6529_v16 = vld [vmem:[#allocation2 + $0x30] sm:$0xf]  ;;  %6567 = vrot.lane.b32.xlu0 %v6545_v34, %s9612_s5  ;;  %6517 = vst.msk [vmem:[#allocation2 + $0x10] sm:$0xf] %vm6514_vm1, %v9610_v1  ;;  %6520 = vst.msk [vmem:[#allocation2 + $0x28] sm:$0xf] %vm6514_vm1, %v9610_v1 }
0x1bd0   :  { %6537 = vst.msk [vmem:[#allocation3 + $0x30] sm:$0xf] %vm6185_vm6, %v6529_v16  ;;  %v6480_v5 = vpop.permute.xlu1 %6479  ;;  %v6474_v28 = vpop.permute.xlu0 %6473  ;;  %v6593_v42 = vld [vmem:[#allocation2 + $0x30] sm:$0xf] }
0x1bd1   :  { %6501 = vst.msk [vmem:[#allocation2 + $0x18] sm:$0xf] %vm6497_vm2, %v6480_v5  ;;  %6498 = vst.msk [vmem:[#allocation2] sm:$0xf] %vm6497_vm2, %v6474_v28 }
0x1bd2   :  { %6509 = vst.msk [vmem:[#allocation2 + $0x18] sm:$0xf] %vm476_vm4, %v9610_v1  ;;  %6506 = vst.msk [vmem:[#allocation2] sm:$0xf] %vm476_vm4, %v9610_v1  ;;  %v6530_v21 = vld [vmem:[#allocation2 + $0x38] sm:$0xf] }
0x1bd3   :  { %v6546_v4 = vld [vmem:[#allocation2 + $0x38] sm:$0xf]  ;;  %v6543_v40 = vld [vmem:[#allocation2 + $0x20] sm:$0xf]  ;;  %6518 = vst.msk [vmem:[#allocation2 + $0x18] sm:$0xf] %vm6514_vm1, %v9610_v1 }
0x1bd4   :  { %6569 = vrot.lane.b32.xlu1 %v6546_v4, %s9612_s5  ;;  %6515 = vst.msk [vmem:[#allocation2] sm:$0xf] %vm6514_vm1, %v9610_v1  ;;  %6563 = vrot.lane.b32.xlu0 %v6543_v40, %s9612_s5  ;;  %v6527_v32 = vld [vmem:[#allocation2 + $0x20] sm:$0xf]  ;;  %v6476_v44 = vpop.permute.xlu1 %6475  ;;  %v6594_v19 = vld [vmem:[#allocation2 + $0x38] sm:$0xf] }
0x1bd5   :  { %6538 = vst.msk [vmem:[#allocation3 + $0x38] sm:$0xf] %vm6185_vm6, %v6530_v21  ;;  %6535 = vst.msk [vmem:[#allocation3 + $0x20] sm:$0xf] %vm6185_vm6, %v6527_v32  ;;  %v6591_v15 = vld [vmem:[#allocation2 + $0x20] sm:$0xf] }
0x1bd6   :  { %6499 = vst.msk [vmem:[#allocation2 + $0x8] sm:$0xf] %vm6497_vm2, %v6476_v44  ;;  %v6528_v60 = vld [vmem:[#allocation2 + $0x28] sm:$0xf]  ;;  %v6541_v53 = vld [vmem:[#allocation2 + $0x10] sm:$0xf] }
0x1bd7   :  { %6507 = vst.msk [vmem:[#allocation2 + $0x8] sm:$0xf] %vm476_vm4, %v9610_v1  ;;  %v6544_v50 = vld [vmem:[#allocation2 + $0x28] sm:$0xf]  ;;  %v6525_v61 = vld [vmem:[#allocation2 + $0x10] sm:$0xf] }
0x1bd8   :  { %6565 = vrot.lane.b32.xlu1 %v6544_v50, %s9612_s5  ;;  %6516 = vst.msk [vmem:[#allocation2 + $0x8] sm:$0xf] %vm6514_vm1, %v9610_v1  ;;  %6559 = vrot.lane.b32.xlu0 %v6541_v53, %s9612_s5  ;;  %v6592_v8 = vld [vmem:[#allocation2 + $0x28] sm:$0xf]  ;;  %v6589_v13 = vld [vmem:[#allocation2 + $0x10] sm:$0xf] }
0x1bd9   :  { %6536 = vst.msk [vmem:[#allocation3 + $0x28] sm:$0xf] %vm6185_vm6, %v6528_v60  ;;  %6533 = vst.msk [vmem:[#allocation3 + $0x10] sm:$0xf] %vm6185_vm6, %v6525_v61 }
0x1bda   :  { %v6542_v51 = vld [vmem:[#allocation2 + $0x18] sm:$0xf] }
0x1bdb   :  { %v6539_v25 = vld [vmem:[#allocation2] sm:$0xf]  ;;  %v6526_v62 = vld [vmem:[#allocation2 + $0x18] sm:$0xf] }
0x1bdc   :  { %6561 = vrot.lane.b32.xlu1 %v6542_v51, %s9612_s5  ;;  %6555 = vrot.lane.b32.xlu0 %v6539_v25, %s9612_s5  ;;  %6534 = vst.msk [vmem:[#allocation3 + $0x18] sm:$0xf] %vm6185_vm6, %v6526_v62  ;;  %v6523_v57 = vld [vmem:[#allocation2] sm:$0xf]  ;;  %v6590_v20 = vld [vmem:[#allocation2 + $0x18] sm:$0xf] }
0x1bdd   :  { %6531 = vst.msk [vmem:[#allocation3] sm:$0xf] %vm6185_vm6, %v6523_v57  ;;  %v6587_v22 = vld [vmem:[#allocation2] sm:$0xf]  ;;  %v9459_v61 = vld [vmem:[#allocation3 + $0x30] ss:$8 sps:$4 sm:$0xff]  }
0x1bdf   :  { %v6540_v56 = vld [vmem:[#allocation2 + $0x8] sm:$0xf] }
0x1be0   :  { %v6524_v6 = vld [vmem:[#allocation2 + $0x8] sm:$0xf]  ;;  %6557 = vrot.lane.b32.xlu1 %v6540_v56, %s9612_s5  ;;  %6615 = vrot.lane.b32.xlu0 %v6593_v42, %s9611_s0 }
0x1be1   :  { %6532 = vst.msk [vmem:[#allocation3 + $0x8] sm:$0xf] %vm6185_vm6, %v6524_v6  ;;  %v6588_v2 = vld [vmem:[#allocation2 + $0x8] sm:$0xf] }
0x1be2   :  { %v9460_v6 = vld [vmem:[#allocation3 + $0x20] ss:$8 sps:$4 sm:$0xff]  }
0x1be4   :  { %6617 = vrot.lane.b32.xlu1 %v6594_v19, %s9611_s0  ;;  %6611 = vrot.lane.b32.xlu0 %v6591_v15, %s9611_s0  ;;  %v9461_v15 = vld [vmem:[#allocation3 + $0x10] ss:$8 sps:$4 sm:$0xff]  }
0x1be8   :  { %6613 = vrot.lane.b32.xlu1 %v6592_v8, %s9611_s0  ;;  %6607 = vrot.lane.b32.xlu0 %v6589_v13, %s9611_s0  ;;  %v9462_v57 = vld [vmem:[#allocation3] ss:$8 sps:$4 sm:$0xff]  }
0x1bec   :  { %6609 = vrot.lane.b32.xlu1 %v6590_v20, %s9611_s0  ;;  %6603 = vrot.lane.b32.xlu0 %v6587_v22, %s9611_s0 }
0x1bf0   :  { %6605 = vrot.lane.b32.xlu1 %v6588_v2, %s9611_s0  ;;  %6814 = vperm.xlu0 %9185, %v6808_v26   ;;  %v9469_v2 = vld [vmem:[%s12257_s30] ss:$8 sps:$4 sm:$0xff]   ;;  %v9470_v26 = vld [vmem:[%s12257_s30 + $0x14] ss:$8 sps:$4 sm:$0xff]  }
0x1bf4   :  { %6819 = vperm.xlu1 %9184, %v6809_v23   ;;  %6824 = vperm.xlu0 %9185, %v6810_v59   ;;  %v9472_v23 = vld [vmem:[%s12257_s30 + $0x10] ss:$8 sps:$4 sm:$0xff]   ;;  %v11743_v59 = vld [vmem:[%s12258_s6] sm:$0x3f]  }
0x1bf5   :  { %9108 = vmatprep.subr.msk.bf16.mxu1 %vm342_vm14, %v11743_v59 }
0x1bf8   :  { %6829 = vperm.xlu1 %9184, %v6811_v41   ;;  %6842 = vperm.xlu0 %9185, %v6836_v37   ;;  %v11749_v41 = vsel %vm342_vm14, %v11743_v59, 0 }
0x1bf9   :  { %9054 = vmatpush3.bf16.msra.mxu1 %v11749_v41 }
0x1bfa   :  { %9109 = vmatprep.subr.msk.bf16.mxu1 %vm342_vm14, %v11743_v59 }
0x1bfc   :  { %6847 = vperm.xlu1 %9184, %v6837_v18   ;;  %6852 = vperm.xlu0 %9185, %v6838_v45  }
0x1c00   :  { %6857 = vperm.xlu1 %9184, %v6839_v58  }
0x1c0d   :  { %v9031_v37 = vpop.f32.mrf.mxu0 }
0x1c0f   :  { %v6156_v18 = vpop.f32.mrf.mxu0 }
0x1c11   :  { %v9032_v48 = vpop.f32.mrf.mxu0 }
0x1c41   :  { %v6568_v46 = vpop.permute.xlu0 %6567 }
0x1c42   :  { %6585 = vst.msk [vmem:[#allocation3 + $0x70] sm:$0xf] %vm6185_vm6, %v6568_v46 }
0x1c46   :  { %v6570_v31 = vpop.permute.xlu1 %6569  ;;  %v6564_v34 = vpop.permute.xlu0 %6563 }
0x1c47   :  { %6586 = vst.msk [vmem:[#allocation3 + $0x78] sm:$0xf] %vm6185_vm6, %v6570_v31  ;;  %6583 = vst.msk [vmem:[#allocation3 + $0x60] sm:$0xf] %vm6185_vm6, %v6564_v34  ;;  %v6159_v31 = vpop.f32.mrf.mxu0 }
0x1c4a   :  { %v6566_v16 = vpop.permute.xlu1 %6565  ;;  %v6560_v5 = vpop.permute.xlu0 %6559 }
0x1c4b   :  { %6584 = vst.msk [vmem:[#allocation3 + $0x68] sm:$0xf] %vm6185_vm6, %v6566_v16  ;;  %6581 = vst.msk [vmem:[#allocation3 + $0x50] sm:$0xf] %vm6185_vm6, %v6560_v5 }
0x1c4e   :  { %v6562_v28 = vpop.permute.xlu1 %6561  ;;  %v9455_v21 = vld [vmem:[#allocation3 + $0x70] ss:$8 sps:$4 sm:$0xff]   ;;  %v6556_v4 = vpop.permute.xlu0 %6555 }
0x1c4f   :  { %6582 = vst.msk [vmem:[#allocation3 + $0x58] sm:$0xf] %vm6185_vm6, %v6562_v28  ;;  %6579 = vst.msk [vmem:[#allocation3 + $0x40] sm:$0xf] %vm6185_vm6, %v6556_v4  ;;  %6760 = vmatpush1.bf16.msra.mxu0 %v9455_v21 }
0x1c50   :  { %6761 = vmatprep.subr.bf16.mxu0 %v9610_v1 }
0x1c52   :  { %v6558_v40 = vpop.permute.xlu1 %6557  ;;  %v9456_v32 = vld [vmem:[#allocation3 + $0x60] ss:$8 sps:$4 sm:$0xff]   ;;  %v6616_v44 = vpop.permute.xlu0 %6615 }
0x1c53   :  { %6580 = vst.msk [vmem:[#allocation3 + $0x48] sm:$0xf] %vm6185_vm6, %v6558_v40  ;;  %6633 = vst.msk [vmem:[#allocation3 + $0xb0] sm:$0xf] %vm6185_vm6, %v6616_v44  ;;  %6762 = vmatpush1.bf16.msra.mxu0 %v9456_v32 }
0x1c54   :  { %6763 = vmatprep.subr.bf16.mxu0 %v9610_v1 }
0x1c56   :  { %v9457_v60 = vld [vmem:[#allocation3 + $0x50] ss:$8 sps:$4 sm:$0xff]   ;;  %v6618_v50 = vpop.permute.xlu1 %6617  ;;  %v6612_v53 = vpop.permute.xlu0 %6611 }
0x1c57   :  { %6634 = vst.msk [vmem:[#allocation3 + $0xb8] sm:$0xf] %vm6185_vm6, %v6618_v50  ;;  %6631 = vst.msk [vmem:[#allocation3 + $0xa0] sm:$0xf] %vm6185_vm6, %v6612_v53  ;;  %6764 = vmatpush1.bf16.msra.mxu0 %v9457_v60 }
0x1c58   :  { %6765 = vmatprep.subr.bf16.mxu0 %v9610_v1 }
0x1c5a   :  { %v9458_v51 = vld [vmem:[#allocation3 + $0x40] ss:$8 sps:$4 sm:$0xff]   ;;  %v6614_v25 = vpop.permute.xlu1 %6613  ;;  %v6608_v42 = vpop.permute.xlu0 %6607 }
0x1c5b   :  { %6632 = vst.msk [vmem:[#allocation3 + $0xa8] sm:$0xf] %vm6185_vm6, %v6614_v25  ;;  %6629 = vst.msk [vmem:[#allocation3 + $0x90] sm:$0xf] %vm6185_vm6, %v6608_v42  ;;  %6766 = vmatpush1.bf16.msra.mxu0 %v9458_v51 }
0x1c5c   :  { %6767 = vmatprep.subr.bf16.mxu0 %v9610_v1 }
0x1c5e   :  { %v6610_v62 = vpop.permute.xlu1 %6609  ;;  %v6604_v56 = vpop.permute.xlu0 %6603  ;;  %v9463_v8 = vld [vmem:[#allocation3 + $0xb0] ss:$8 sps:$4 sm:$0xff]  }
0x1c5f   :  { %6630 = vst.msk [vmem:[#allocation3 + $0x98] sm:$0xf] %vm6185_vm6, %v6610_v62  ;;  %6627 = vst.msk [vmem:[#allocation3 + $0x80] sm:$0xf] %vm6185_vm6, %v6604_v56  ;;  %6768 = vmatpush1.bf16.msra.mxu0 %v9459_v61 }
0x1c60   :  { %6769 = vmatprep.subr.bf16.mxu0 %v9610_v1 }
0x1c62   :  { %v6606_v19 = vpop.permute.xlu1 %6605  ;;  %v9464_v13 = vld [vmem:[#allocation3 + $0xa0] ss:$8 sps:$4 sm:$0xff]  }
0x1c63   :  { %6628 = vst.msk [vmem:[#allocation3 + $0x88] sm:$0xf] %vm6185_vm6, %v6606_v19  ;;  %6770 = vmatpush1.bf16.msra.mxu0 %v9460_v6 }
0x1c64   :  { %6771 = vmatprep.subr.bf16.mxu0 %v9610_v1 }
0x1c66   :  { %v9465_v20 = vld [vmem:[#allocation3 + $0x90] ss:$8 sps:$4 sm:$0xff]  }
0x1c67   :  { %6772 = vmatpush1.bf16.msra.mxu0 %v9461_v15 }
0x1c68   :  { %6773 = vmatprep.subr.bf16.mxu0 %v9610_v1 }
0x1c6a   :  { %v9466_v22 = vld [vmem:[#allocation3 + $0x80] ss:$8 sps:$4 sm:$0xff]  }
0x1c6b   :  { %6774 = vmatpush1.bf16.msra.mxu0 %v9462_v57  ;;  %v6815_v45 = vpop.permute.xlu0 %6814 }
0x1c6c   :  { %6783 = vmatprep.subr.bf16.mxu0 %v9610_v1 }
0x1c6f   :  { %6784 = vmatpush2.bf16.msra.mxu0 %v9463_v8  ;;  %v6820_v58 = vpop.permute.xlu1 %6819  ;;  %v6825_v46 = vpop.permute.xlu0 %6824 }
0x1c70   :  { %6785 = vmatprep.subr.bf16.mxu0 %v9610_v1 }
0x1c73   :  { %6786 = vmatpush2.bf16.msra.mxu0 %v9464_v13  ;;  %v6830_v5 = vpop.permute.xlu1 %6829  ;;  %v6843_v4 = vpop.permute.xlu0 %6842 }
0x1c74   :  { %6787 = vmatprep.subr.bf16.mxu0 %v9610_v1 }
0x1c77   :  { %6788 = vmatpush2.bf16.msra.mxu0 %v9465_v20  ;;  %v6848_v51 = vpop.permute.xlu1 %6847  ;;  %v6853_v57 = vpop.permute.xlu0 %6852 }
0x1c78   :  { %6789 = vmatprep.subr.bf16.mxu0 %v9610_v1 }
0x1c7b   :  { %6790 = vmatpush2.bf16.msra.mxu0 %v9466_v22 }
0x1c7e   :  { %6792 = vmatmul.mubr.bf16.vlgmr.msra.gmra.mxu0 %v9469_v2 }
0x1c7f   :  { %8499 = vmatprep.mubr.msk.bf16.mxu0 %vm1574_vm13, %v9470_v26 }
0x1c86   :  { %6800 = vmatmul.mubr.bf16.gmra.mxu0 %v9472_v23 }
0x1d3e   :  { %v6793_v34 = vpop.f32.mrf.mxu0 }
0x1d3f   :  { %v6794_v16 = vadd.f32 %v6793_v34, %v6156_v18  ;;  %v6858_v18 = vpop.permute.xlu1 %6857 }
0x1d40   :  { %v6795_v28 = vpop.f32.mrf.mxu0 }
0x1d41   :  { %v6832_v21 = vadd.f32 %v6815_v45, %v6794_v16  ;;  %v7285_v28 = vld [vmem:[%s12259_s12 + $0x20] sm:$0xff] }
0x1d42   :  { %v6796_v40 = vpop.f32.mrf.mxu0 }
0x1d43   :  { %v6860_v32 = vadd.f32 %v6843_v4, %v6832_v21  ;;  %v6797_v44 = vadd.f32 %v6796_v40, %v6159_v31  ;;  %v7283_v21 = vld [vmem:[%s12259_s12 + $0x10] sm:$0xff]  ;;  %v7288_v4 = vld [vmem:[%s12259_s12 + $0x38] sm:$0xff]  ;;  %v7281_v40 = vld [vmem:[%s12259_s12] sm:$0xff] }
0x1d44   :  { %v6798_v60 = vpop.f32.mrf.mxu0 }
0x1d45   :  { %v6864_v50 = vmul.f32 %v11615_v54, %v6860_v32  ;;  %v6833_v53 = vadd.f32 %v6820_v58, %v6797_v44  ;;  %v7286_v32 = vld [vmem:[%s12259_s12 + $0x28] sm:$0xff]  ;;  %v7284_v44 = vld [vmem:[%s12259_s12 + $0x18] sm:$0xff] }
0x1d46   :  { %v6801_v25 = vpop.f32.mrf.mxu0  ;;  %v7282_v60 = vld [vmem:[%s12259_s12 + $0x8] sm:$0xff] }
0x1d47   :  { %v11755_v42 = vmax.f32 %v6864_v50, 0.0  ;;  %v6861_v61 = vadd.f32 %v6848_v51, %v6833_v53  ;;  %v6802_v62 = vadd.f32 %v9031_v37, %v6801_v25 }
0x1d48   :  { %v6803_v56 = vpop.f32.mrf.mxu0 }
0x1d49   :  { %v8694_v6 = vpack.c.bf16 %v11755_v42, %v11755_v42  ;;  %v6865_v19 = vmul.f32 %v11615_v54, %v6861_v61  ;;  %v6834_v15 = vadd.f32 %v6825_v46, %v6802_v62 }
0x1d4a   :  { %v6804_v8 = vpop.f32.mrf.mxu0 }
0x1d4b   :  { %6927 = vst.msk [vmem:[#allocation2] sm:$0xf] %vm6185_vm6, %v8694_v6  ;;  %v11761_v13 = vmax.f32 %v6865_v19, 0.0  ;;  %v6862_v20 = vadd.f32 %v6853_v57, %v6834_v15  ;;  %v6805_v22 = vadd.f32 %v9032_v48, %v6804_v8 }
0x1d4c   :  { %v6806_v2 = vpop.f32.mrf.mxu0  ;;  %6932 = vst.msk [vmem:[#allocation2] sm:$0xf] %vm6931_vm9, %v9610_v1 }
0x1d4d   :  { %v8695_v26 = vpack.c.bf16 %v11761_v13, %v11761_v13  ;;  %v6866_v23 = vmul.f32 %v11615_v54, %v6862_v20  ;;  %v6835_v37 = vadd.f32 %v6830_v5, %v6805_v22 }
0x1d4f   :  { %6928 = vst.msk [vmem:[#allocation2 + $0x8] sm:$0xf] %vm6185_vm6, %v8695_v26  ;;  %v11769_v45 = vmax.f32 %v6866_v23, 0.0  ;;  %v6863_v58 = vadd.f32 %v6858_v18, %v6835_v37 }
0x1d50   :  { %6933 = vst.msk [vmem:[#allocation2 + $0x8] sm:$0xf] %vm6931_vm9, %v9610_v1 }
0x1d51   :  { %v8696_v48 = vpack.c.bf16 %v11769_v45, %v11769_v45  ;;  %v6867_v46 = vmul.f32 %v11615_v54, %v6863_v58  ;;  %v7287_v54 = vld [vmem:[%s12259_s12 + $0x30] sm:$0xff] }
0x1d53   :  { %6929 = vst.msk [vmem:[#allocation2 + $0x10] sm:$0xf] %vm6185_vm6, %v8696_v48  ;;  %v11777_v31 = vmax.f32 %v6867_v46, 0.0 }
0x1d54   :  { %6934 = vst.msk [vmem:[#allocation2 + $0x10] sm:$0xf] %vm6931_vm9, %v9610_v1 }
0x1d55   :  { %v8697_v34 = vpack.c.bf16 %v11777_v31, %v11777_v31 }
0x1d57   :  { %6930 = vst.msk [vmem:[#allocation2 + $0x18] sm:$0xf] %vm6185_vm6, %v8697_v34  ;;  %v9473_v16 = vld [vmem:[#allocation2] ss:$8 sps:$4 sm:$0xff]  }
0x1d58   :  { %6935 = vst.msk [vmem:[#allocation2 + $0x18] sm:$0xf] %vm6931_vm9, %v9610_v1  ;;  %7015 = vrot.lane.b32.xlu0 %v9473_v16, %s9612_s5  ;;  %9055 = vmatprep.mubr.msk.bf16.mxu1 %vm335_vm15, %v9473_v16 }
0x1d5c   :  { %7076 = vrot.lane.b32.xlu0 %v9473_v16, %s9611_s0 }
0x1d5f   :  { %v9474_v5 = vld [vmem:[#allocation2 + $0x10] ss:$8 sps:$4 sm:$0xff]  }
0x1d60   :  { %7321 = vperm.xlu0 %9185, %v7287_v54   ;;  %7017 = vrot.lane.b32.xlu1 %v9474_v5, %s9612_s5 }
0x1d61   :  { %9056 = vmatmul.mubr.msk.bf16.vlgmr.msra.gmra.mxu1 %vm335_vm15, %v9474_v5 }
0x1d62   :  { %9060 = vmatpush3.bf16.msra.mxu1 %v11749_v41 }
0x1d63   :  { %9110 = vmatprep.subr.msk.bf16.mxu1 %vm342_vm14, %v11743_v59  ;;  %vm7220_vm14 = vcmask 60416  }
0x1d64   :  { %7311 = vperm.xlu0 %9185, %v7285_v28   ;;  %7078 = vrot.lane.b32.xlu1 %v9474_v5, %s9611_s0 }
0x1d68   :  { %7301 = vperm.xlu0 %9185, %v7283_v21   ;;  %7326 = vperm.xlu1 %9184, %v7288_v4  }
0x1d6c   :  { %7291 = vperm.xlu0 %9185, %v7281_v40   ;;  %7316 = vperm.xlu1 %9184, %v7286_v32  }
0x1d70   :  { %7306 = vperm.xlu1 %9184, %v7284_v44  }
0x1d74   :  { %7296 = vperm.xlu1 %9184, %v7282_v60  }
0x1dca   :  { %v7016_v50 = vpop.permute.xlu0 %7015 }
0x1dcb   :  { %9061 = vmatprep.mubr.msk.bf16.mxu1 %vm335_vm15, %v7016_v50 }
0x1dce   :  { %v7077_v59 = vpop.permute.xlu0 %7076 }
0x1dd2   :  { %v7018_v53 = vpop.permute.xlu1 %7017 }
0x1dd3   :  { %9062 = vmatmul.mubr.msk.bf16.vlgmr.msra.gmra.mxu1 %vm335_vm15, %v7018_v53 }
0x1dd4   :  { %9066 = vmatpush3.bf16.msra.mxu1 %v11749_v41  ;;  %9067 = vmatprep.mubr.msk.bf16.mxu1 %vm335_vm15, %v7077_v59  ;;  %v9482_v41 = vld [vmem:[%s12260_s20] sm:$0xff]   ;;  %v9483_v59 = vld [vmem:[%s12260_s20 + $0x8] sm:$0xff]  }
0x1dd5   :  { %9091 = vmatprep.mubr.msk.bf16.mxu0 %vm671_vm11, %v9482_v41 }
0x1dd6   :  { %v7079_v51 = vpop.permute.xlu1 %7078 }
0x1ddb   :  { %9068 = vmatmul.mubr.msk.bf16.vlgmr.msra.gmra.mxu1 %vm335_vm15, %v7079_v51  ;;  %v9484_v51 = vld [vmem:[%s12260_s20 + $0x10] sm:$0xff]   ;;  %vm7532_vm15 = vcmask 68616  }
0x1e21   :  { %v9057_v25 = vpop.f32.mrf.mxu1 }
0x1e22   :  { %v8700_v61 = vpack.c.bf16 %v9057_v25, %v9057_v25  ;;  %v9485_v25 = vld [vmem:[%s12260_s20 + $0x18] sm:$0xff]  }
0x1e23   :  { %v6998_v62 = vpop.f32.mrf.mxu1 }
0x1e24   :  { %v8698_v56 = vpack.c.bf16 %v6998_v62, %v6998_v62  ;;  %7223 = vst.msk [vmem:[#allocation3 + $0x10] sm:$0xf] %vm7220_vm14, %v8700_v61  ;;  %v7322_v61 = vpop.permute.xlu0 %7321  ;;  %v7327_v62 = vpop.permute.xlu1 %7326 }
0x1e25   :  { %v9058_v6 = vpop.f32.mrf.mxu1 }
0x1e26   :  { %v8701_v19 = vpack.c.bf16 %v9058_v6, %v9058_v6  ;;  %7221 = vst.msk [vmem:[#allocation3] sm:$0xf] %vm7220_vm14, %v8698_v56 }
0x1e27   :  { %v7001_v15 = vpop.f32.mrf.mxu1 }
0x1e28   :  { %v8699_v57 = vpack.c.bf16 %v7001_v15, %v7001_v15  ;;  %7224 = vst.msk [vmem:[#allocation3 + $0x18] sm:$0xf] %vm7220_vm14, %v8701_v19  ;;  %v7312_v6 = vpop.permute.xlu0 %7311 }
0x1e2a   :  { %7222 = vst.msk [vmem:[#allocation3 + $0x8] sm:$0xf] %vm7220_vm14, %v8699_v57  ;;  %v7317_v57 = vpop.permute.xlu1 %7316 }
0x1e2f   :  { %v9480_v50 = vld [vmem:[#allocation3 + $0x10] ss:$8 sps:$4 sm:$0xff]  }
0x1e31   :  { %v9481_v53 = vld [vmem:[#allocation3] ss:$8 sps:$4 sm:$0xff]  }
0x1e93   :  { %v9063_v8 = vpop.f32.mrf.mxu1 }
0x1e94   :  { %v8704_v20 = vpack.c.bf16 %v9063_v8, %v9063_v8 }
0x1e95   :  { %v7059_v22 = vpop.f32.mrf.mxu1 }
0x1e96   :  { %v8702_v2 = vpack.c.bf16 %v7059_v22, %v7059_v22  ;;  %7241 = vst.msk [vmem:[#allocation3 + $0x30] sm:$0xf] %vm7220_vm14, %v8704_v20 }
0x1e97   :  { %v9064_v26 = vpop.f32.mrf.mxu1 }
0x1e98   :  { %v7075_v23 = vpack.c.bf16 %v9064_v26, %v9063_v8  ;;  %v8705_v37 = vpack.c.bf16 %v9064_v26, %v9064_v26  ;;  %7239 = vst.msk [vmem:[#allocation3 + $0x20] sm:$0xf] %vm7220_vm14, %v8702_v2  ;;  %v7302_v8 = vpop.permute.xlu0 %7301  ;;  %v11830_v2 = vld [vmem:[%s12261_s27] ss:$0 sm:$0xff] }
0x1e99   :  { %v7062_v18 = vpop.f32.mrf.mxu1 }
0x1e9a   :  { %v7074_v58 = vpack.c.bf16 %v7062_v18, %v7059_v22  ;;  %v8703_v48 = vpack.c.bf16 %v7062_v18, %v7062_v18  ;;  %9071 = vmatprep.subr.bf16.mxu1 %v7075_v23  ;;  %7242 = vst.msk [vmem:[#allocation3 + $0x38] sm:$0xf] %vm7220_vm14, %v8705_v37 }
0x1e9b   :  { %v9069_v46 = vpop.f32.mrf.mxu1  ;;  %9072 = vmatpush3.bf16.msra.mxu1 %v7075_v23 }
0x1e9c   :  { %v8708_v34 = vpack.c.bf16 %v9069_v46, %v9069_v46  ;;  %9073 = vmatprep.subr.bf16.mxu1 %v7074_v58  ;;  %7240 = vst.msk [vmem:[#allocation3 + $0x28] sm:$0xf] %vm7220_vm14, %v8703_v48  ;;  %v7292_v46 = vpop.permute.xlu0 %7291 }
0x1e9d   :  { %v7120_v16 = vpop.f32.mrf.mxu1 }
0x1e9e   :  { %v8706_v54 = vpack.c.bf16 %v7120_v16, %v7120_v16  ;;  %7259 = vst.msk [vmem:[#allocation3 + $0x50] sm:$0xf] %vm7220_vm14, %v8708_v34 }
0x1e9f   :  { %v9070_v5 = vpop.f32.mrf.mxu1  ;;  %9074 = vmatpush3.bf16.msra.mxu1 %v7074_v58  ;;  %v7307_v58 = vpop.permute.xlu1 %7306 }
0x1ea0   :  { %v8709_v28 = vpack.c.bf16 %v9070_v5, %v9070_v5  ;;  %7257 = vst.msk [vmem:[#allocation3 + $0x40] sm:$0xf] %vm7220_vm14, %v8706_v54  ;;  %7794 = vmatprep.subr.bf16.mxu1 %v9610_v1 }
0x1ea1   :  { %v7123_v21 = vpop.f32.mrf.mxu1  ;;  %v9478_v44 = vld [vmem:[#allocation3 + $0x30] ss:$8 sps:$4 sm:$0xff]  }
0x1ea2   :  { %v8707_v4 = vpack.c.bf16 %v7123_v21, %v7123_v21  ;;  %7260 = vst.msk [vmem:[#allocation3 + $0x58] sm:$0xf] %vm7220_vm14, %v8709_v28 }
0x1ea3   :  { %v9479_v60 = vld [vmem:[#allocation3 + $0x20] ss:$8 sps:$4 sm:$0xff]  }
0x1ea4   :  { %7258 = vst.msk [vmem:[#allocation3 + $0x48] sm:$0xf] %vm7220_vm14, %v8707_v4 }
0x1ea9   :  { %v9476_v40 = vld [vmem:[#allocation3 + $0x50] ss:$8 sps:$4 sm:$0xff]  }
0x1eaa   :  { %9079 = vmatprep.subr.bf16.mxu0 %v9476_v40 }
0x1eab   :  { %v9477_v32 = vld [vmem:[#allocation3 + $0x40] ss:$8 sps:$4 sm:$0xff]   ;;  %9080 = vmatpush3.bf16.msra.mxu0 %v9476_v40 }
0x1eac   :  { %9081 = vmatprep.subr.bf16.mxu0 %v9477_v32 }
0x1eaf   :  { %9082 = vmatpush3.bf16.msra.mxu0 %v9477_v32 }
0x1eb0   :  { %9083 = vmatprep.subr.bf16.mxu0 %v9478_v44 }
0x1eb3   :  { %9084 = vmatpush3.bf16.msra.mxu0 %v9478_v44 }
0x1eb4   :  { %9085 = vmatprep.subr.bf16.mxu0 %v9479_v60 }
0x1eb7   :  { %9086 = vmatpush3.bf16.msra.mxu0 %v9479_v60 }
0x1eb8   :  { %9087 = vmatprep.subr.bf16.mxu0 %v9480_v50 }
0x1ebb   :  { %9088 = vmatpush3.bf16.msra.mxu0 %v9480_v50 }
0x1ebc   :  { %9089 = vmatprep.subr.bf16.mxu0 %v9481_v53 }
0x1ebf   :  { %9090 = vmatpush3.bf16.msra.mxu0 %v9481_v53 }
0x1ec2   :  { %9092 = vmatmul.mubr.msk.bf16.vlgmr.msra.gmra.mxu0 %vm671_vm11, %v9483_v59  ;;  %v7297_v59 = vpop.permute.xlu1 %7296 }
0x1ec3   :  { %9095 = vmatprep.mubr.msk.bf16.mxu0 %vm671_vm11, %v9484_v51 }
0x1eca   :  { %9096 = vmatmul.mubr.msk.bf16.gmra.mxu0 %vm671_vm11, %v9485_v25  ;;  %vm7549_vm11 = vcmask 76872  }
0x1f82   :  { %v9093_v56 = vpop.f32.mrf.mxu0 }
0x1f83   :  { %v7440_v26 = vadd.f32 %v9093_v56, %v7302_v8 }
0x1f84   :  { %v7431_v19 = vpop.f32.mrf.mxu0 }
0x1f85   :  { %v7470_v5 = vmul.f32 %v11830_v2, %v7440_v26  ;;  %v7432_v28 = vadd.f32 %v7431_v19, %v7292_v46 }
0x1f86   :  { %v9094_v15 = vpop.f32.mrf.mxu0 }
0x1f87   :  { %v7443_v21 = vadd.f32 %v9094_v15, %v7307_v58  ;;  %v7478_v51 = vmax.f32 %v7470_v5, 0.0  ;;  %v7468_v25 = vmul.f32 %v11830_v2, %v7432_v28  ;;  %v9486_v58 = vld [vmem:[%s12262_s4] sm:$0xff]  }
0x1f88   :  { %v7434_v41 = vpop.f32.mrf.mxu0  ;;  %9075 = vmatprep.mubr.msk.bf16.mxu1 %vm2958_vm3, %v9486_v58 }
0x1f89   :  { %v8712_v15 = vpack.c.bf16 %v7478_v51, %v7478_v51 }
0x1f8a   :  { %v9097_v20 = vpop.f32.mrf.mxu0 }
0x1f8b   :  { %v7456_v22 = vadd.f32 %v9097_v20, %v7322_v61  ;;  %v7471_v61 = vmul.f32 %v11830_v2, %v7443_v21 }
0x1f8c   :  { %v7447_v23 = vpop.f32.mrf.mxu0 }
0x1f8d   :  { %v7474_v37 = vmul.f32 %v11830_v2, %v7456_v22  ;;  %v7448_v18 = vadd.f32 %v7447_v23, %v7312_v6  ;;  %v7479_v8 = vmax.f32 %v7471_v61, 0.0 }
0x1f8e   :  { %v9098_v48 = vpop.f32.mrf.mxu0 }
0x1f8f   :  { %v7482_v34 = vmax.f32 %v7474_v37, 0.0  ;;  %v7472_v16 = vmul.f32 %v11830_v2, %v7448_v18  ;;  %v7459_v54 = vadd.f32 %v9098_v48, %v7327_v62  ;;  %v7435_v62 = vadd.f32 %v7434_v41, %v7297_v59  ;;  %v9487_v48 = vld [vmem:[%s12262_s4 + $0x8] sm:$0xff]  }
0x1f90   :  { %v7450_v4 = vpop.f32.mrf.mxu0  ;;  %v8713_v26 = vpack.c.bf16 %v7479_v8, %v7479_v8  ;;  %9076 = vmatmul.mubr.msk.bf16.vlgmr.msra.gmra.mxu1 %vm2958_vm3, %v9487_v48 }
0x1f91   :  { %v8716_v40 = vpack.c.bf16 %v7482_v34, %v7482_v34  ;;  %v7480_v32 = vmax.f32 %v7472_v16, 0.0  ;;  %v7475_v44 = vmul.f32 %v11830_v2, %v7459_v54  ;;  %v7451_v60 = vadd.f32 %v7450_v4, %v7317_v57 }
0x1f92   :  { %v7476_v57 = vmax.f32 %v7468_v25, 0.0  ;;  %v7469_v20 = vmul.f32 %v11830_v2, %v7435_v62 }
0x1f93   :  { %v7483_v50 = vmax.f32 %v7475_v44, 0.0  ;;  %v7473_v53 = vmul.f32 %v11830_v2, %v7451_v60  ;;  %7520 = vrot.lane.b32.xlu0 %v8716_v40, %s9609_s22  ;;  %v8714_v56 = vpack.c.bf16 %v7480_v32, %v7480_v32 }
0x1f94   :  { %v8710_v41 = vpack.c.bf16 %v7476_v57, %v7476_v57  ;;  %v7477_v23 = vmax.f32 %v7469_v20, 0.0 }
0x1f95   :  { %v8717_v6 = vpack.c.bf16 %v7483_v50, %v7483_v50  ;;  %v7481_v19 = vmax.f32 %v7473_v53, 0.0 }
0x1f96   :  { %v8711_v37 = vpack.c.bf16 %v7477_v23, %v7477_v23 }
0x1f97   :  { %7522 = vrot.lane.b32.xlu1 %v8717_v6, %s9609_s22  ;;  %7516 = vrot.lane.b32.xlu0 %v8714_v56, %s9609_s22  ;;  %v8715_v22 = vpack.c.bf16 %v7481_v19, %v7481_v19 }
0x1f9b   :  { %7518 = vrot.lane.b32.xlu1 %v8715_v22, %s9609_s22  ;;  %7512 = vrot.lane.b32.xlu0 %v8712_v15, %s9609_s22 }
0x1f9f   :  { %7514 = vrot.lane.b32.xlu1 %v8713_v26, %s9609_s22  ;;  %7508 = vrot.lane.b32.xlu0 %v8710_v41, %s9609_s22 }
0x1fa3   :  { %7510 = vrot.lane.b32.xlu1 %v8711_v37, %s9609_s22  ;;  %s12263_s22 = sld [smem:[#allocation49_spill]] }
0x1fa9   :  { %v7844_v58 = vld [vmem:[%s12263_s22 + $0x8] sm:$0xff]  ;;  %v7845_v48 = vld [vmem:[%s12263_s22 + $0x10] sm:$0xff] }
0x2005   :  { %v7521_v18 = vpop.permute.xlu0 %7520 }
0x2006   :  { %7539 = vst.msk [vmem:[#allocation2 + $0x30] sm:$0xf] %vm7532_vm15, %v7521_v18  ;;  %v7843_v18 = vld [vmem:[%s12263_s22] sm:$0xff] }
0x2007   :  { %7547 = vst.msk [vmem:[#allocation2 + $0x30] sm:$0xf] %vm476_vm4, %v9610_v1 }
0x2008   :  { %7556 = vst.msk [vmem:[#allocation2 + $0x30] sm:$0xf] %vm7549_vm11, %v9610_v1 }
0x2009   :  { %v7523_v46 = vpop.permute.xlu1 %7522  ;;  %v7517_v34 = vpop.permute.xlu0 %7516 }
0x200a   :  { %7540 = vst.msk [vmem:[#allocation2 + $0x38] sm:$0xf] %vm7532_vm15, %v7523_v46  ;;  %7537 = vst.msk [vmem:[#allocation2 + $0x20] sm:$0xf] %vm7532_vm15, %v7517_v34  ;;  %v7846_v46 = vld [vmem:[%s12263_s22 + $0x18] sm:$0xff]  ;;  %v7871_v34 = vld [vmem:[%s12264_s23] sm:$0xff] }
0x200b   :  { %7548 = vst.msk [vmem:[#allocation2 + $0x38] sm:$0xf] %vm476_vm4, %v9610_v1  ;;  %7545 = vst.msk [vmem:[#allocation2 + $0x20] sm:$0xf] %vm476_vm4, %v9610_v1 }
0x200c   :  { %7554 = vst.msk [vmem:[#allocation2 + $0x20] sm:$0xf] %vm7549_vm11, %v9610_v1  ;;  %7557 = vst.msk [vmem:[#allocation2 + $0x38] sm:$0xf] %vm7549_vm11, %v9610_v1 }
0x200d   :  { %v7519_v16 = vpop.permute.xlu1 %7518  ;;  %v7513_v54 = vpop.permute.xlu0 %7512 }
0x200e   :  { %7538 = vst.msk [vmem:[#allocation2 + $0x28] sm:$0xf] %vm7532_vm15, %v7519_v16  ;;  %7535 = vst.msk [vmem:[#allocation2 + $0x10] sm:$0xf] %vm7532_vm15, %v7513_v54  ;;  %v9500_v16 = vld [vmem:[%s12265_s26 + $0x4] ss:$8 sps:$4 sm:$0xff]  }
0x200f   :  { %7546 = vst.msk [vmem:[#allocation2 + $0x28] sm:$0xf] %vm476_vm4, %v9610_v1  ;;  %7543 = vst.msk [vmem:[#allocation2 + $0x10] sm:$0xf] %vm476_vm4, %v9610_v1  ;;  %v7580_v5 = vld [vmem:[#allocation2 + $0x30] sm:$0xf]  ;;  %8568 = vmatprep.mubr.msk.bf16.mxu1 %vm1574_vm13, %v9500_v16 }
0x2010   :  { %v7564_v28 = vld [vmem:[#allocation2 + $0x30] sm:$0xf]  ;;  %7602 = vrot.lane.b32.xlu0 %v7580_v5, %s9612_s5  ;;  %7552 = vst.msk [vmem:[#allocation2 + $0x10] sm:$0xf] %vm7549_vm11, %v9610_v1  ;;  %7555 = vst.msk [vmem:[#allocation2 + $0x28] sm:$0xf] %vm7549_vm11, %v9610_v1 }
0x2011   :  { %7572 = vst.msk [vmem:[#allocation3 + $0x30] sm:$0xf] %vm7220_vm14, %v7564_v28  ;;  %v7515_v21 = vpop.permute.xlu1 %7514  ;;  %v7509_v4 = vpop.permute.xlu0 %7508  ;;  %v7628_v19 = vld [vmem:[#allocation2 + $0x30] sm:$0xf]  ;;  %v7872_v54 = vld [vmem:[%s12264_s23 + $0x8] sm:$0xff]  ;;  %v7874_v28 = vld [vmem:[%s12264_s23 + $0x18] sm:$0xff] }
0x2012   :  { %7536 = vst.msk [vmem:[#allocation2 + $0x18] sm:$0xf] %vm7532_vm15, %v7515_v21  ;;  %7533 = vst.msk [vmem:[#allocation2] sm:$0xf] %vm7532_vm15, %v7509_v4  ;;  %v7873_v5 = vld [vmem:[%s12264_s23 + $0x10] sm:$0xff] }
0x2013   :  { %7544 = vst.msk [vmem:[#allocation2 + $0x18] sm:$0xf] %vm476_vm4, %v9610_v1  ;;  %7541 = vst.msk [vmem:[#allocation2] sm:$0xf] %vm476_vm4, %v9610_v1  ;;  %v7565_v40 = vld [vmem:[#allocation2 + $0x38] sm:$0xf] }
0x2014   :  { %v7581_v32 = vld [vmem:[#allocation2 + $0x38] sm:$0xf]  ;;  %v7578_v44 = vld [vmem:[#allocation2 + $0x20] sm:$0xf]  ;;  %7553 = vst.msk [vmem:[#allocation2 + $0x18] sm:$0xf] %vm7549_vm11, %v9610_v1 }
0x2015   :  { %7604 = vrot.lane.b32.xlu1 %v7581_v32, %s9612_s5  ;;  %7550 = vst.msk [vmem:[#allocation2] sm:$0xf] %vm7549_vm11, %v9610_v1  ;;  %7598 = vrot.lane.b32.xlu0 %v7578_v44, %s9612_s5  ;;  %v7562_v60 = vld [vmem:[#allocation2 + $0x20] sm:$0xf]  ;;  %v7511_v50 = vpop.permute.xlu1 %7510  ;;  %v7629_v8 = vld [vmem:[#allocation2 + $0x38] sm:$0xf] }
0x2016   :  { %7573 = vst.msk [vmem:[#allocation3 + $0x38] sm:$0xf] %vm7220_vm14, %v7565_v40  ;;  %7570 = vst.msk [vmem:[#allocation3 + $0x20] sm:$0xf] %vm7220_vm14, %v7562_v60  ;;  %v7626_v20 = vld [vmem:[#allocation2 + $0x20] sm:$0xf] }
0x2017   :  { %7534 = vst.msk [vmem:[#allocation2 + $0x8] sm:$0xf] %vm7532_vm15, %v7511_v50  ;;  %v7563_v53 = vld [vmem:[#allocation2 + $0x28] sm:$0xf]  ;;  %v7576_v51 = vld [vmem:[#allocation2 + $0x10] sm:$0xf] }
0x2018   :  { %7542 = vst.msk [vmem:[#allocation2 + $0x8] sm:$0xf] %vm476_vm4, %v9610_v1  ;;  %v7579_v59 = vld [vmem:[#allocation2 + $0x28] sm:$0xf]  ;;  %v7560_v25 = vld [vmem:[#allocation2 + $0x10] sm:$0xf] }
0x2019   :  { %7600 = vrot.lane.b32.xlu1 %v7579_v59, %s9612_s5  ;;  %7551 = vst.msk [vmem:[#allocation2 + $0x8] sm:$0xf] %vm7549_vm11, %v9610_v1  ;;  %7594 = vrot.lane.b32.xlu0 %v7576_v51, %s9612_s5  ;;  %v7627_v22 = vld [vmem:[#allocation2 + $0x28] sm:$0xf]  ;;  %v7624_v41 = vld [vmem:[#allocation2 + $0x10] sm:$0xf] }
0x201a   :  { %7571 = vst.msk [vmem:[#allocation3 + $0x28] sm:$0xf] %vm7220_vm14, %v7563_v53  ;;  %7568 = vst.msk [vmem:[#allocation3 + $0x10] sm:$0xf] %vm7220_vm14, %v7560_v25  ;;  %v9502_v51 = vld [vmem:[%s12265_s26] ss:$8 sps:$4 sm:$0xff]  }
0x201b   :  { %v7561_v61 = vld [vmem:[#allocation2 + $0x18] sm:$0xf]  ;;  %v9503_v25 = vld [vmem:[%s12265_s26 + $0x14] ss:$8 sps:$4 sm:$0xff]   ;;  %vm2608_vm4 = vcmask 498688  }
0x201c   :  { %v7577_v62 = vld [vmem:[#allocation2 + $0x18] sm:$0xf]  ;;  %v7574_v56 = vld [vmem:[#allocation2] sm:$0xf]  ;;  %7569 = vst.msk [vmem:[#allocation3 + $0x18] sm:$0xf] %vm7220_vm14, %v7561_v61 }
0x201d   :  { %7596 = vrot.lane.b32.xlu1 %v7577_v62, %s9612_s5  ;;  %7590 = vrot.lane.b32.xlu0 %v7574_v56, %s9612_s5  ;;  %v7558_v6 = vld [vmem:[#allocation2] sm:$0xf]  ;;  %v7625_v26 = vld [vmem:[#allocation2 + $0x18] sm:$0xf] }
0x201e   :  { %7566 = vst.msk [vmem:[#allocation3] sm:$0xf] %vm7220_vm14, %v7558_v6  ;;  %v7622_v23 = vld [vmem:[#allocation2] sm:$0xf] }
0x2020   :  { %v7575_v15 = vld [vmem:[#allocation2 + $0x8] sm:$0xf] }
0x2021   :  { %v7559_v57 = vld [vmem:[#allocation2 + $0x8] sm:$0xf]  ;;  %7592 = vrot.lane.b32.xlu1 %v7575_v15, %s9612_s5  ;;  %7650 = vrot.lane.b32.xlu0 %v7628_v19, %s9611_s0  ;;  %v9505_v19 = vld [vmem:[%s12265_s26 + $0x10] ss:$8 sps:$4 sm:$0xff]  }
0x2022   :  { %7567 = vst.msk [vmem:[#allocation3 + $0x8] sm:$0xf] %vm7220_vm14, %v7559_v57  ;;  %v7623_v37 = vld [vmem:[#allocation2 + $0x8] sm:$0xf] }
0x2025   :  { %7652 = vrot.lane.b32.xlu1 %v7629_v8, %s9611_s0  ;;  %7646 = vrot.lane.b32.xlu0 %v7626_v20, %s9611_s0 }
0x2029   :  { %7648 = vrot.lane.b32.xlu1 %v7627_v22, %s9611_s0  ;;  %7642 = vrot.lane.b32.xlu0 %v7624_v41, %s9611_s0 }
0x202d   :  { %7644 = vrot.lane.b32.xlu1 %v7625_v26, %s9611_s0  ;;  %7638 = vrot.lane.b32.xlu0 %v7622_v23, %s9611_s0 }
0x2031   :  { %7640 = vrot.lane.b32.xlu1 %v7623_v37, %s9611_s0  ;;  %2572 = vrot.lane.b32.xlu0 %v10773_v27, %s9612_s5  ;;  %s9613_s0 = smov 61  }
0x2035   :  { %2574 = vrot.lane.b32.xlu1 %v10789_v47, %s9612_s5  ;;  %2576 = vrot.lane.b32.xlu0 %v10812_v14, %s9612_s5 }
0x2039   :  { %2578 = vrot.lane.b32.xlu1 %v10822_v12, %s9612_s5  ;;  %7849 = vperm.xlu0 %9185, %v7843_v18  }
0x203d   :  { %7854 = vperm.xlu1 %9184, %v7844_v58   ;;  %7859 = vperm.xlu0 %9185, %v7845_v48  }
0x2041   :  { %7864 = vperm.xlu1 %9184, %v7846_v46   ;;  %7877 = vperm.xlu0 %9185, %v7871_v34  }
0x2045   :  { %7882 = vperm.xlu1 %9184, %v7872_v54   ;;  %7887 = vperm.xlu0 %9185, %v7873_v5  }
0x2049   :  { %7892 = vperm.xlu1 %9184, %v7874_v28   ;;  %2592 = vrot.lane.b32.xlu0 %v10773_v27, %s9613_s0 }
0x204d   :  { %2594 = vrot.lane.b32.xlu1 %v2561_v30, %s9613_s0  ;;  %2596 = vrot.lane.b32.xlu0 %v10789_v47, %s9613_s0 }
0x2051   :  { %2598 = vrot.lane.b32.xlu1 %v2563_v49, %s9613_s0  ;;  %2600 = vrot.lane.b32.xlu0 %v10812_v14, %s9613_s0 }
0x2055   :  { %2602 = vrot.lane.b32.xlu1 %v2565_v39, %s9613_s0  ;;  %2604 = vrot.lane.b32.xlu0 %v10822_v12, %s9613_s0 }
0x2059   :  { %2606 = vrot.lane.b32.xlu1 %v2567_v29, %s9613_s0  ;;  %3719 = vrot.lane.b32.xlu0 %v11066_v55, %s9612_s5 }
0x205d   :  { %3721 = vrot.lane.b32.xlu1 %v11072_v10, %s9612_s5  ;;  %3723 = vrot.lane.b32.xlu0 %v11080_v43, %s9612_s5 }
0x2061   :  { %3725 = vrot.lane.b32.xlu1 %v11088_v38, %s9612_s5  ;;  %3735 = vrot.lane.b32.xlu0 %v11066_v55, %s9614_s28 }
0x2065   :  { %3737 = vrot.lane.b32.xlu1 %v11072_v10, %s9614_s28  ;;  %3739 = vrot.lane.b32.xlu0 %v11080_v43, %s9614_s28 }
0x2069   :  { %3741 = vrot.lane.b32.xlu1 %v11088_v38, %s9614_s28  ;;  %4784 = vrot.lane.b32.xlu0 %v11306_v3, %s9612_s5 }
0x206d   :  { %4786 = vrot.lane.b32.xlu1 %v11313_v0, %s9612_s5  ;;  %4788 = vrot.lane.b32.xlu0 %v11322_v63, %s9612_s5 }
0x2071   :  { %4790 = vrot.lane.b32.xlu1 %v11330_v9, %s9612_s5  ;;  %4801 = vrot.lane.b32.xlu0 %v11306_v3, %s9615_s1 }
0x2075   :  { %4803 = vrot.lane.b32.xlu1 %v11313_v0, %s9615_s1  ;;  %4805 = vrot.lane.b32.xlu0 %v11322_v63, %s9615_s1  ;;  %v9492_v0 = vld [vmem:[#allocation3 + $0x30] ss:$8 sps:$4 sm:$0xff]  }
0x2079   :  { %4807 = vrot.lane.b32.xlu1 %v11330_v9, %s9615_s1  ;;  %5834 = vrot.lane.b32.xlu0 %v11536_v35, %s9612_s5 }
0x207d   :  { %5836 = vrot.lane.b32.xlu1 %v11542_v52, %s9612_s5  ;;  %5838 = vrot.lane.b32.xlu0 %v11550_v7, %s9612_s5 }
0x2081   :  { %5840 = vrot.lane.b32.xlu1 %v11558_v33, %s9612_s5  ;;  %5851 = vrot.lane.b32.xlu0 %v11536_v35, %s9616_s2  ;;  %v9493_v35 = vld [vmem:[#allocation3 + $0x20] ss:$8 sps:$4 sm:$0xff]  }
0x2082   :  { %v7603_v11 = vpop.permute.xlu0 %7602 }
0x2083   :  { %7620 = vst.msk [vmem:[#allocation3 + $0x70] sm:$0xf] %vm7220_vm14, %v7603_v11 }
0x2085   :  { %5853 = vrot.lane.b32.xlu1 %v11542_v52, %s9616_s2  ;;  %5855 = vrot.lane.b32.xlu0 %v11550_v7, %s9616_s2 }
0x2087   :  { %v7605_v27 = vpop.permute.xlu1 %7604  ;;  %v7599_v30 = vpop.permute.xlu0 %7598 }
0x2088   :  { %7621 = vst.msk [vmem:[#allocation3 + $0x78] sm:$0xf] %vm7220_vm14, %v7605_v27  ;;  %7618 = vst.msk [vmem:[#allocation3 + $0x60] sm:$0xf] %vm7220_vm14, %v7599_v30 }
0x2089   :  { %5857 = vrot.lane.b32.xlu1 %v11558_v33, %s9616_s2  ;;  %6876 = vrot.lane.b32.xlu0 %v11755_v42, %s9612_s5  ;;  %v9494_v33 = vld [vmem:[#allocation3 + $0x10] ss:$8 sps:$4 sm:$0xff]  }
0x208b   :  { %v7601_v36 = vpop.permute.xlu1 %7600  ;;  %v7595_v47 = vpop.permute.xlu0 %7594 }
0x208c   :  { %7619 = vst.msk [vmem:[#allocation3 + $0x68] sm:$0xf] %vm7220_vm14, %v7601_v36  ;;  %7616 = vst.msk [vmem:[#allocation3 + $0x50] sm:$0xf] %vm7220_vm14, %v7595_v47 }
0x208d   :  { %6878 = vrot.lane.b32.xlu1 %v11761_v13, %s9612_s5  ;;  %6880 = vrot.lane.b32.xlu0 %v11769_v45, %s9612_s5 }
0x208f   :  { %v7597_v49 = vpop.permute.xlu1 %7596  ;;  %v7591_v24 = vpop.permute.xlu0 %7590  ;;  %v9488_v14 = vld [vmem:[#allocation3 + $0x70] ss:$8 sps:$4 sm:$0xff]  }
0x2090   :  { %7617 = vst.msk [vmem:[#allocation3 + $0x58] sm:$0xf] %vm7220_vm14, %v7597_v49  ;;  %7614 = vst.msk [vmem:[#allocation3 + $0x40] sm:$0xf] %vm7220_vm14, %v7591_v24  ;;  %7795 = vmatpush1.bf16.msra.mxu1 %v9488_v14 }
0x2091   :  { %6882 = vrot.lane.b32.xlu1 %v11777_v31, %s9612_s5  ;;  %6892 = vrot.lane.b32.xlu0 %v11755_v42, %s9617_s7 }
0x2092   :  { %7796 = vmatprep.subr.bf16.mxu1 %v9610_v1 }
0x2093   :  { %v7593_v39 = vpop.permute.xlu1 %7592  ;;  %v7651_v17 = vpop.permute.xlu0 %7650  ;;  %v9489_v12 = vld [vmem:[#allocation3 + $0x60] ss:$8 sps:$4 sm:$0xff]  }
0x2094   :  { %7615 = vst.msk [vmem:[#allocation3 + $0x48] sm:$0xf] %vm7220_vm14, %v7593_v39  ;;  %7668 = vst.msk [vmem:[#allocation3 + $0xb0] sm:$0xf] %vm7220_vm14, %v7651_v17  ;;  %7797 = vmatpush1.bf16.msra.mxu1 %v9489_v12 }
0x2095   :  { %6894 = vrot.lane.b32.xlu1 %v11761_v13, %s9617_s7  ;;  %6896 = vrot.lane.b32.xlu0 %v11769_v45, %s9617_s7  ;;  %v9495_v45 = vld [vmem:[#allocation3] ss:$8 sps:$4 sm:$0xff]  }
0x2096   :  { %7798 = vmatprep.subr.bf16.mxu1 %v9610_v1 }
0x2097   :  { %v7653_v29 = vpop.permute.xlu1 %7652  ;;  %v7647_v55 = vpop.permute.xlu0 %7646  ;;  %v9490_v10 = vld [vmem:[#allocation3 + $0x50] ss:$8 sps:$4 sm:$0xff]  }
0x2098   :  { %7669 = vst.msk [vmem:[#allocation3 + $0xb8] sm:$0xf] %vm7220_vm14, %v7653_v29  ;;  %7666 = vst.msk [vmem:[#allocation3 + $0xa0] sm:$0xf] %vm7220_vm14, %v7647_v55  ;;  %7799 = vmatpush1.bf16.msra.mxu1 %v9490_v10 }
0x2099   :  { %6898 = vrot.lane.b32.xlu1 %v11777_v31, %s9617_s7  ;;  %7800 = vmatprep.subr.bf16.mxu1 %v9610_v1 }
0x209b   :  { %v7649_v43 = vpop.permute.xlu1 %7648  ;;  %v7643_v38 = vpop.permute.xlu0 %7642  ;;  %v9491_v3 = vld [vmem:[#allocation3 + $0x40] ss:$8 sps:$4 sm:$0xff]  }
0x209c   :  { %7667 = vst.msk [vmem:[#allocation3 + $0xa8] sm:$0xf] %vm7220_vm14, %v7649_v43  ;;  %7664 = vst.msk [vmem:[#allocation3 + $0x90] sm:$0xf] %vm7220_vm14, %v7643_v38  ;;  %7801 = vmatpush1.bf16.msra.mxu1 %v9491_v3 }
0x209d   :  { %7802 = vmatprep.subr.bf16.mxu1 %v9610_v1 }
0x209f   :  { %v7645_v63 = vpop.permute.xlu1 %7644  ;;  %v7639_v9 = vpop.permute.xlu0 %7638  ;;  %v9496_v21 = vld [vmem:[#allocation3 + $0xb0] ss:$8 sps:$4 sm:$0xff]  }
0x20a0   :  { %7665 = vst.msk [vmem:[#allocation3 + $0x98] sm:$0xf] %vm7220_vm14, %v7645_v63  ;;  %7662 = vst.msk [vmem:[#allocation3 + $0x80] sm:$0xf] %vm7220_vm14, %v7639_v9  ;;  %7803 = vmatpush1.bf16.msra.mxu1 %v9492_v0 }
0x20a1   :  { %7804 = vmatprep.subr.bf16.mxu1 %v9610_v1 }
0x20a3   :  { %v7641_v52 = vpop.permute.xlu1 %7640  ;;  %v2573_v7 = vpop.permute.xlu0 %2572  ;;  %v9497_v4 = vld [vmem:[#allocation3 + $0xa0] ss:$8 sps:$4 sm:$0xff]  }
0x20a4   :  { %7663 = vst.msk [vmem:[#allocation3 + $0x88] sm:$0xf] %vm7220_vm14, %v7641_v52  ;;  %7805 = vmatpush1.bf16.msra.mxu1 %v9493_v35 }
0x20a5   :  { %2584 = vst.msk [vmem:[#allocation4] sm:$0xff] %vm1574_vm13, %v2573_v7  ;;  %7806 = vmatprep.subr.bf16.mxu1 %v9610_v1 }
0x20a7   :  { %v2575_v42 = vpop.permute.xlu1 %2574  ;;  %v2577_v13 = vpop.permute.xlu0 %2576  ;;  %v9498_v32 = vld [vmem:[#allocation3 + $0x90] ss:$8 sps:$4 sm:$0xff]  }
0x20a8   :  { %2585 = vst.msk [vmem:[#allocation4 + $0x8] sm:$0xff] %vm1574_vm13, %v2575_v42  ;;  %2586 = vst.msk [vmem:[#allocation4 + $0x10] sm:$0xff] %vm1574_vm13, %v2577_v13  ;;  %7807 = vmatpush1.bf16.msra.mxu1 %v9494_v33  ;;  %v9077_v42 = vpop.f32.mrf.mxu1 }
0x20a9   :  { %7808 = vmatprep.subr.bf16.mxu1 %v9610_v1 }
0x20aa   :  { %v7191_v13 = vpop.f32.mrf.mxu1 }
0x20ab   :  { %v2579_v31 = vpop.permute.xlu1 %2578  ;;  %v9499_v50 = vld [vmem:[#allocation3 + $0x80] ss:$8 sps:$4 sm:$0xff]  }
0x20ac   :  { %2587 = vst.msk [vmem:[#allocation4 + $0x18] sm:$0xff] %vm1574_vm13, %v2579_v31  ;;  %7809 = vmatpush1.bf16.msra.mxu1 %v9495_v45  ;;  %v9078_v45 = vpop.f32.mrf.mxu1 }
0x20ad   :  { %7818 = vmatprep.subr.bf16.mxu1 %v9610_v1 }
0x20ae   :  { %v7194_v31 = vpop.f32.mrf.mxu1 }
0x20b0   :  { %7819 = vmatpush2.bf16.msra.mxu1 %v9496_v21 }
0x20b1   :  { %7820 = vmatprep.subr.bf16.mxu1 %v9610_v1 }
0x20b4   :  { %v12023_v40 = vpop.permute.xlu0 %7849  ;;  %7821 = vmatpush2.bf16.msra.mxu1 %v9497_v4 }
0x20b5   :  { %7822 = vmatprep.subr.bf16.mxu1 %v9610_v1 }
0x20b8   :  { %v12026_v44 = vpop.permute.xlu1 %7854  ;;  %v12028_v60 = vpop.permute.xlu0 %7859  ;;  %7823 = vmatpush2.bf16.msra.mxu1 %v9498_v32 }
0x20b9   :  { %7824 = vmatprep.subr.bf16.mxu1 %v9610_v1 }
0x20bc   :  { %v12031_v53 = vpop.permute.xlu1 %7864  ;;  %v12033_v59 = vpop.permute.xlu0 %7877  ;;  %7825 = vmatpush2.bf16.msra.mxu1 %v9499_v50 }
0x20bf   :  { %7827 = vmatmul.mubr.bf16.vlgmr.msra.gmra.mxu1 %v9502_v51 }
0x20c0   :  { %v12037_v61 = vpop.permute.xlu1 %7882  ;;  %v12039_v62 = vpop.permute.xlu0 %7887  ;;  %8569 = vmatprep.mubr.msk.bf16.mxu1 %vm1574_vm13, %v9503_v25 }
0x20c4   :  { %v12042_v56 = vpop.permute.xlu1 %7892  ;;  %v2593_v6 = vpop.permute.xlu0 %2592 }
0x20c7   :  { %7835 = vmatmul.mubr.bf16.gmra.mxu1 %v9505_v19 }
0x20c8   :  { %v2595_v1 = vpop.permute.xlu1 %2594  ;;  %v2597_v15 = vpop.permute.xlu0 %2596 }
0x20c9   :  { %v2609_v57 = vsel %vm2608_vm4, %v2593_v6, %v2595_v1 }
0x20ca   :  { %2617 = vst.msk [vmem:[#allocation4 + $0x20] sm:$0xff] %vm1574_vm13, %v2609_v57 }
0x20cc   :  { %v2599_v8 = vpop.permute.xlu1 %2598  ;;  %v2601_v20 = vpop.permute.xlu0 %2600 }
0x20cd   :  { %v2610_v22 = vsel %vm2608_vm4, %v2597_v15, %v2599_v8 }
0x20ce   :  { %2618 = vst.msk [vmem:[#allocation4 + $0x28] sm:$0xff] %vm1574_vm13, %v2610_v22 }
0x20d0   :  { %v2603_v41 = vpop.permute.xlu1 %2602  ;;  %v2605_v26 = vpop.permute.xlu0 %2604 }
0x20d1   :  { %v2611_v23 = vsel %vm2608_vm4, %v2601_v20, %v2603_v41 }
0x20d2   :  { %2619 = vst.msk [vmem:[#allocation4 + $0x30] sm:$0xff] %vm1574_vm13, %v2611_v23 }
0x20d4   :  { %v2607_v37 = vpop.permute.xlu1 %2606  ;;  %v3720_v18 = vpop.permute.xlu0 %3719 }
0x20d5   :  { %v2612_v58 = vsel %vm2608_vm4, %v2605_v26, %v2607_v37  ;;  %3731 = vst.msk [vmem:[#allocation6] sm:$0xff] %vm2958_vm3, %v3720_v18 }
0x20d6   :  { %2620 = vst.msk [vmem:[#allocation4 + $0x38] sm:$0xff] %vm1574_vm13, %v2612_v58  ;;  %vm4796_vm13 = vcmask 130048  }
0x20d8   :  { %v3722_v48 = vpop.permute.xlu1 %3721  ;;  %v3724_v46 = vpop.permute.xlu0 %3723 }
0x20d9   :  { %3732 = vst.msk [vmem:[#allocation6 + $0x8] sm:$0xff] %vm2958_vm3, %v3722_v48  ;;  %3733 = vst.msk [vmem:[#allocation6 + $0x10] sm:$0xff] %vm2958_vm3, %v3724_v46 }
0x20dc   :  { %v3726_v34 = vpop.permute.xlu1 %3725  ;;  %v3736_v16 = vpop.permute.xlu0 %3735 }
0x20dd   :  { %3734 = vst.msk [vmem:[#allocation6 + $0x18] sm:$0xff] %vm2958_vm3, %v3726_v34  ;;  %3747 = vst.msk [vmem:[#allocation6 + $0x20] sm:$0xff] %vm2958_vm3, %v3736_v16 }
0x20e0   :  { %v3738_v54 = vpop.permute.xlu1 %3737  ;;  %v3740_v5 = vpop.permute.xlu0 %3739 }
0x20e1   :  { %3748 = vst.msk [vmem:[#allocation6 + $0x28] sm:$0xff] %vm2958_vm3, %v3738_v54  ;;  %3749 = vst.msk [vmem:[#allocation6 + $0x30] sm:$0xff] %vm2958_vm3, %v3740_v5 }
0x20e4   :  { %v3742_v28 = vpop.permute.xlu1 %3741  ;;  %v4785_v11 = vpop.permute.xlu0 %4784 }
0x20e5   :  { %3750 = vst.msk [vmem:[#allocation6 + $0x38] sm:$0xff] %vm2958_vm3, %v3742_v28  ;;  %vm5846_vm3 = vcmask 64512  }
0x20e6   :  { %4797 = vst.msk [vmem:[%s9911_s17] sm:$0xff] %vm4796_vm13, %v4785_v11 }
0x20e8   :  { %v4787_v27 = vpop.permute.xlu1 %4786  ;;  %v4789_v30 = vpop.permute.xlu0 %4788 }
0x20e9   :  { %4798 = vst.msk [vmem:[%s9911_s17 + $0x8] sm:$0xff] %vm4796_vm13, %v4787_v27  ;;  %4799 = vst.msk [vmem:[%s9911_s17 + $0x10] sm:$0xff] %vm4796_vm13, %v4789_v30 }
0x20ec   :  { %v4791_v36 = vpop.permute.xlu1 %4790  ;;  %v4802_v47 = vpop.permute.xlu0 %4801 }
0x20ed   :  { %4800 = vst.msk [vmem:[%s9911_s17 + $0x18] sm:$0xff] %vm4796_vm13, %v4791_v36  ;;  %4813 = vst.msk [vmem:[%s9911_s17 + $0x20] sm:$0xff] %vm4796_vm13, %v4802_v47 }
0x20f0   :  { %v4804_v49 = vpop.permute.xlu1 %4803  ;;  %v4806_v24 = vpop.permute.xlu0 %4805 }
0x20f1   :  { %4814 = vst.msk [vmem:[%s9911_s17 + $0x28] sm:$0xff] %vm4796_vm13, %v4804_v49  ;;  %4815 = vst.msk [vmem:[%s9911_s17 + $0x30] sm:$0xff] %vm4796_vm13, %v4806_v24 }
0x20f4   :  { %v4808_v14 = vpop.permute.xlu1 %4807  ;;  %v5835_v39 = vpop.permute.xlu0 %5834 }
0x20f5   :  { %4816 = vst.msk [vmem:[%s9911_s17 + $0x38] sm:$0xff] %vm4796_vm13, %v4808_v14 }
0x20f6   :  { %5847 = vst.msk [vmem:[%s9916_s8] sm:$0xff] %vm5846_vm3, %v5835_v39 }
0x20f8   :  { %v5837_v17 = vpop.permute.xlu1 %5836  ;;  %v5839_v12 = vpop.permute.xlu0 %5838 }
0x20f9   :  { %5848 = vst.msk [vmem:[%s9916_s8 + $0x8] sm:$0xff] %vm5846_vm3, %v5837_v17  ;;  %5849 = vst.msk [vmem:[%s9916_s8 + $0x10] sm:$0xff] %vm5846_vm3, %v5839_v12 }
0x20fc   :  { %v5841_v29 = vpop.permute.xlu1 %5840  ;;  %v5852_v55 = vpop.permute.xlu0 %5851 }
0x20fd   :  { %5850 = vst.msk [vmem:[%s9916_s8 + $0x18] sm:$0xff] %vm5846_vm3, %v5841_v29  ;;  %5863 = vst.msk [vmem:[%s9916_s8 + $0x20] sm:$0xff] %vm5846_vm3, %v5852_v55 }
0x2100   :  { %v5854_v10 = vpop.permute.xlu1 %5853  ;;  %v5856_v43 = vpop.permute.xlu0 %5855 }
0x2101   :  { %5864 = vst.msk [vmem:[%s9916_s8 + $0x28] sm:$0xff] %vm5846_vm3, %v5854_v10  ;;  %5865 = vst.msk [vmem:[%s9916_s8 + $0x30] sm:$0xff] %vm5846_vm3, %v5856_v43 }
0x2104   :  { %v5858_v38 = vpop.permute.xlu1 %5857  ;;  %v6877_v3 = vpop.permute.xlu0 %6876 }
0x2105   :  { %5866 = vst.msk [vmem:[%s9916_s8 + $0x38] sm:$0xff] %vm5846_vm3, %v5858_v38  ;;  %s9619_s8 = smov [#allocation6]  }
0x2106   :  { %6888 = vst.msk [vmem:[%s9921_s13] sm:$0xff] %vm2745_vm0, %v6877_v3  ;;  %s7961_s10 = sshll.u32 %s9619_s8, 4  ;;  %s7962_s10 = int_to_ptr.vmem [resolvable:$true] %s7961_s10 }
0x2108   :  { %v6879_v0 = vpop.permute.xlu1 %6878  ;;  %v6881_v63 = vpop.permute.xlu0 %6880 }
0x2109   :  { %6889 = vst.msk [vmem:[%s9921_s13 + $0x8] sm:$0xff] %vm2745_vm0, %v6879_v0  ;;  %6890 = vst.msk [vmem:[%s9921_s13 + $0x10] sm:$0xff] %vm2745_vm0, %v6881_v63 }
0x210c   :  { %v6883_v9 = vpop.permute.xlu1 %6882  ;;  %v6893_v35 = vpop.permute.xlu0 %6892 }
0x210d   :  { %6891 = vst.msk [vmem:[%s9921_s13 + $0x18] sm:$0xff] %vm2745_vm0, %v6883_v9  ;;  %6904 = vst.msk [vmem:[%s9921_s13 + $0x20] sm:$0xff] %vm2745_vm0, %v6893_v35 }
0x2110   :  { %v6895_v52 = vpop.permute.xlu1 %6894  ;;  %v6897_v7 = vpop.permute.xlu0 %6896 }
0x2111   :  { %6905 = vst.msk [vmem:[%s9921_s13 + $0x28] sm:$0xff] %vm2745_vm0, %v6895_v52  ;;  %6906 = vst.msk [vmem:[%s9921_s13 + $0x30] sm:$0xff] %vm2745_vm0, %v6897_v7 }
0x2114   :  { %v6899_v33 = vpop.permute.xlu1 %6898 }
0x2115   :  { %6907 = vst.msk [vmem:[%s9921_s13 + $0x38] sm:$0xff] %vm2745_vm0, %v6899_v33  ;;  %s9618_s13 = smov [#allocation4]  }
0x2116   :  { %s7949_s17 = sshll.u32 %s9618_s13, 4  ;;  %s7950_s17 = int_to_ptr.vmem [resolvable:$true] %s7949_s17 }
0x2117   :  { %s9506_s15 = scalar_lea.vmem %s7950_s17, 1024  ;;  %p9511_p1 = scmp.lt.s32.totalorder %s7950_s17, %s7950_s17 }
0x2118   :  { %p9507_p0 = scmp.ne.s32.totalorder %s7950_s17, %s9506_s15  ;;  %p9512_p2 = scmp.lt.s32.totalorder %s9506_s15, %s9506_s15 }
0x211a   :  { %p9513_p3 = por %p9512_p2, %p9511_p1 }
0x211c   :  { %p9514_p4 = pnand %p9513_p3, %p9507_p0 }
0x217f   :  { %v7828_v21 = vpop.f32.mrf.mxu1 }
0x2180   :  { %v7829_v4 = vadd.f32 %v7828_v21, %v7191_v13 }
0x2181   :  { %v7830_v32 = vpop.f32.mrf.mxu1 }
0x2182   :  { %v7867_v50 = vadd.f32 %v12023_v40, %v7829_v4 }
0x2183   :  { %v7831_v51 = vpop.f32.mrf.mxu1 }
0x2184   :  { %v7895_v25 = vadd.f32 %v12033_v59, %v7867_v50  ;;  %v7832_v6 = vadd.f32 %v7831_v51, %v7194_v31 }
0x2185   :  { %v7833_v19 = vpop.f32.mrf.mxu1 }
0x2186   :  { %v7899_v1 = vmul.f32 %v11830_v2, %v7895_v25  ;;  %v7868_v15 = vadd.f32 %v12026_v44, %v7832_v6 }
0x2187   :  { %v7836_v57 = vpop.f32.mrf.mxu1 }
0x2188   :  { %v7903_v8 = vmax.f32 %v7899_v1, 0.0  ;;  %v7896_v20 = vadd.f32 %v12037_v61, %v7868_v15  ;;  %v7837_v22 = vadd.f32 %v9077_v42, %v7836_v57 }
0x2189   :  { %v7838_v41 = vpop.f32.mrf.mxu1 }
0x218a   :  { %v7900_v26 = vmul.f32 %v11830_v2, %v7896_v20  ;;  %v7869_v23 = vadd.f32 %v12028_v60, %v7837_v22  ;;  %7911 = vrot.lane.b32.xlu0 %v7903_v8, %s9612_s5 }
0x218b   :  { %v7839_v40 = vpop.f32.mrf.mxu1 }
0x218c   :  { %v7904_v59 = vmax.f32 %v7900_v26, 0.0  ;;  %v7897_v44 = vadd.f32 %v12039_v62, %v7869_v23  ;;  %v7840_v37 = vadd.f32 %v9078_v45, %v7839_v40 }
0x218d   :  { %v7841_v18 = vpop.f32.mrf.mxu1 }
0x218e   :  { %v7901_v61 = vmul.f32 %v11830_v2, %v7897_v44  ;;  %v7870_v58 = vadd.f32 %v12031_v53, %v7840_v37  ;;  %7913 = vrot.lane.b32.xlu1 %v7904_v59, %s9612_s5  ;;  %7928 = vrot.lane.b32.xlu0 %v7903_v8, %s9620_s11 }
0x218f   :  { %9517 = shalt.err (!%p9514_p4)
}
0x2190   :  { %s9621_s16 = smov 128   ;;  %s12266_s18 = sld [smem:[#allocation50_spill]]  ;;  %v7905_v60 = vmax.f32 %v7901_v61, 0.0  ;;  %v7898_v62 = vadd.f32 %v12042_v56, %v7870_v58 }
0x2191   :  { %s9622_s9 = smov 8   ;;  %s9526_s21 = scalar_lea.vmem %s7962_s10, 1024 }
0x2192   :  { %p9527_p5 = scmp.ne.s32.totalorder %s7962_s10, %s9526_s21  ;;  %p9531_p6 = scmp.lt.s32.totalorder %s7962_s10, %s7962_s10 }
0x2193   :  { %p9532_p7 = scmp.lt.s32.totalorder %s9526_s21, %s9526_s21 }
0x2195   :  { %p9533_p8 = por %p9532_p7, %p9531_p6 }
0x2196   :  { %7955 = dma.vmem_to_hbm [thread:$0]  %s7950_s17, 1024, %s12266_s18, [#allocation5], %s9621_s16, %s9621_s16, %s9622_s9  }
0x2197   :  { %p9534_p9 = pnand %p9533_p8, %p9527_p5 }
0x2199   :  { %9537 = shalt.err (!%p9534_p9)
}
0x219a   :  { %s12267_s25 = sld [smem:[#allocation51_spill]]  ;;  %v7902_v53 = vmul.f32 %v11830_v2, %v7898_v62  ;;  %7930 = vrot.lane.b32.xlu1 %v7904_v59, %s9620_s11  ;;  %7915 = vrot.lane.b32.xlu0 %v7905_v60, %s9612_s5  ;;  %vm7923_vm0 = vcmask 15360  }
0x219c   :  { %v7906_v56 = vmax.f32 %v7902_v53, 0.0 }
0x219e   :  { %7917 = vrot.lane.b32.xlu1 %v7906_v56, %s9612_s5  ;;  %7932 = vrot.lane.b32.xlu0 %v7905_v60, %s9620_s11 }
0x21a0   :  { %7967 = dma.vmem_to_hbm [thread:$0]  %s7962_s10, 1024, %s12267_s25, [#allocation7], %s9621_s16, %s9621_s16, %s9622_s9  }
0x21a2   :  { %7934 = vrot.lane.b32.xlu1 %v7906_v56, %s9620_s11 }
0x21fc   :  { %v7912_v48 = vpop.permute.xlu0 %7911 }
0x21fd   :  { %7924 = vst.msk [vmem:[%s9926_s3] sm:$0xff] %vm7923_vm0, %v7912_v48 }
0x2200   :  { %v7914_v46 = vpop.permute.xlu1 %7913  ;;  %v7929_v34 = vpop.permute.xlu0 %7928 }
0x2201   :  { %7925 = vst.msk [vmem:[%s9926_s3 + $0x8] sm:$0xff] %vm7923_vm0, %v7914_v46  ;;  %7940 = vst.msk [vmem:[%s9926_s3 + $0x20] sm:$0xff] %vm7923_vm0, %v7929_v34 }
0x220c   :  { %v7931_v2 = vpop.permute.xlu1 %7930  ;;  %v7916_v16 = vpop.permute.xlu0 %7915 }
0x220d   :  { %7941 = vst.msk [vmem:[%s9926_s3 + $0x28] sm:$0xff] %vm7923_vm0, %v7931_v2  ;;  %7926 = vst.msk [vmem:[%s9926_s3 + $0x10] sm:$0xff] %vm7923_vm0, %v7916_v16 }
0x2210   :  { %v7918_v54 = vpop.permute.xlu1 %7917  ;;  %v7933_v5 = vpop.permute.xlu0 %7932 }
0x2211   :  { %7927 = vst.msk [vmem:[%s9926_s3 + $0x18] sm:$0xff] %vm7923_vm0, %v7918_v54  ;;  %7942 = vst.msk [vmem:[%s9926_s3 + $0x30] sm:$0xff] %vm7923_vm0, %v7933_v5 }
0x2214   :  { %v7935_v28 = vpop.permute.xlu1 %7934 }
0x2215   :  { %7943 = vst.msk [vmem:[%s9926_s3 + $0x38] sm:$0xff] %vm7923_vm0, %v7935_v28 }
0x2216   :  { %9546 = dma.done.wait [#allocation5], 1024  }
0x2217   :  { %9547 = vsyncadd [#allocation5], 4294966272 }
0x2218   :  { %9548 = dma.done.wait [#allocation7], 1024  }
0x2219   :  { %9549 = vsyncadd [#allocation7], 4294966272 }
0x221a   :  { %7990 = vsyncpa [#allocation5], 1 }
0x221b   :  { %7991 = vsyncpa [#allocation7], 1 }

</bundles_post_ra>
